<compile_context>
chip_gen: v7x
topology: tpu7x:2x2x1
jax: 0.10.0
libtpu: 0.0.40
codegen_flags: <defaults>
</compile_context>

<pallas_src>
import functools

import numpy as np
import jax
import jax.numpy as jnp
from jax.experimental import pallas as pl
from jax.experimental.pallas import tpu as pltpu

KSIZE = 7
PAD = KSIZE // 2
KK = KSIZE * KSIZE
LEAKY_SLOPE = 0.01       # nn.LeakyReLU() default negative_slope
ATAN_COEF = 0.636        # literal constant used by the PyTorch module
SUBLANE_BF16 = 16        # bf16 sublane tile -> channel padding granularity
VMEM_BUDGET = 12 * 1024 * 1024   # conservative; fits default scoped VMEM on v5e/v6e/v7x


def _round_up(v, m):
    return (v + m - 1) // m * m


def _atan_f32(x):
    """float32 arctan (Cephes atanf) from ops with guaranteed Mosaic lowering.

    Exact divides (not approx reciprocal) so dlogdet / exp(dlogdet) keep full
    f32 accuracy (review correctness concern).
    """
    sgn = jnp.where(x < 0, jnp.float32(-1.0), jnp.float32(1.0))
    a = jnp.abs(x)
    t3p8 = jnp.float32(2.414213562373095)     # tan(3*pi/8)
    tp8 = jnp.float32(0.4142135623730951)     # tan(pi/8)
    big = a > t3p8
    mid = a > tp8
    safe = jnp.maximum(a, jnp.float32(1e-30))
    xr = jnp.where(big, -1.0 / safe, jnp.where(mid, (a - 1.0) / (a + 1.0), a))
    yoff = jnp.where(big, jnp.float32(np.pi / 2),
                     jnp.where(mid, jnp.float32(np.pi / 4), jnp.float32(0.0)))
    z = xr * xr
    p = ((jnp.float32(8.05374449538e-2) * z - jnp.float32(1.38776856032e-1)) * z
         + jnp.float32(1.99777106478e-1)) * z - jnp.float32(3.33329491539e-1)
    return sgn * (yoff + p * z * xr + xr)


def _write_patches(inp, mask_rows, patch_ref, cp, width, lane_len):
    """Write the 49 im2col taps of `inp` (cp, lane_len) f32 into the shared bf16 scratch.

    Tap math stays f32 (v5e has no bf16 VPU path); only the store is bf16, which
    halves the patch buffer and the vst traffic versus an f32 concat + cast.
    The centre tap's all-ones mask multiply is skipped.
    """
    for kh in range(KSIZE):
        for kw in range(KSIZE):
            t = kh * KSIZE + kw
            delta = (kh - PAD) * width + (kw - PAD)
            if delta == 0:
                tap = inp                                    # centre tap: mask is all ones
            else:
                # Lane rotation on the XLU; out-of-image (and cross-sample) wraps are
                # zeroed by the mask, so stacking samples along lanes stays exact.
                shifted = pltpu.roll(inp, shift=(-delta) % lane_len, axis=1)
                tap = shifted * mask_rows[t]
            patch_ref[t * cp:(t + 1) * cp, :] = tap.astype(jnp.bfloat16)


def _conv_stack(x_ref, w1_ref, w2_ref, mask_ref, patch_ref, *, clamp, width, n_out_ch):
    """conv7x7 -> LeakyReLU -> conv7x7 -> chunk -> clamp*0.636*atan(./clamp)."""
    cin_p = x_ref.shape[0]
    chid_p = w1_ref.shape[0]
    lane_len = x_ref.shape[-1]
    C = n_out_ch

    mask_rows = [mask_ref[t:t + 1, :] for t in range(KK)]    # load once, reuse for both convs

    _write_patches(x_ref[...], mask_rows, patch_ref, cin_p, width, lane_len)
    pre1 = jnp.dot(w1_ref[...], patch_ref[0:KK * cin_p, :],
                   preferred_element_type=jnp.float32)       # (chid_p, L) f32
    hidden = jnp.where(pre1 > 0, pre1, LEAKY_SLOPE * pre1)   # LeakyReLU(0.01)

    _write_patches(hidden, mask_rows, patch_ref, chid_p, width, lane_len)
    out = jnp.dot(w2_ref[...], patch_ref[0:KK * chid_p, :],
                  preferred_element_type=jnp.float32)        # (cout, L) f32

    _dl = out[:C, :]                                         # chunk(2, dim=channel)
    bias = out[C:2 * C, :]
    dl = (clamp * ATAN_COEF) * _atan_f32(_dl * (1.0 / clamp))
    return dl, bias


def _finish_and_store(dl, bias, mean_full, scale_ref, bias_ref, dlogdet_ref):
    dln = dl - mean_full
    dlogdet_ref[...] = dln
    bias_ref[...] = bias
    scale_ref[...] = jnp.exp(dln)


def _fused_train_kernel(x_ref, w1_ref, w2_ref, mask_ref,
                        scale_ref, bias_ref, dlogdet_ref, patch_ref,
                        *, clamp, width, hw, b_tile, n_out_ch):
    """Whole-batch tile: convs + atan + in-kernel VolumeNorm((0,1)) mean + exp."""
    dl, bias = _conv_stack(x_ref, w1_ref, w2_ref, mask_ref, patch_ref,
                           clamp=clamp, width=width, n_out_ch=n_out_ch)
    s = jnp.sum(dl, axis=0, keepdims=True)                   # sum over channels, (1, L)
    tot = s[:, 0:hw]
    for k in range(1, b_tile):                               # sum over batch segments
        tot = tot + s[:, k * hw:(k + 1) * hw]
    mean = tot * jnp.float32(1.0 / (b_tile * n_out_ch))      # per spatial position
    if b_tile > 1:
        mean = jnp.concatenate([mean] * b_tile, axis=1)      # back to (1, L)
    _finish_and_store(dl, bias, mean, scale_ref, bias_ref, dlogdet_ref)


def _fused_eval_kernel(x_ref, w1_ref, w2_ref, mask_ref, mean_ref,
                       scale_ref, bias_ref, dlogdet_ref, patch_ref,
                       *, clamp, width, b_tile, n_out_ch):
    """Eval: convs + atan + subtract running-mean map + exp, all fused."""
    dl, bias = _conv_stack(x_ref, w1_ref, w2_ref, mask_ref, patch_ref,
                           clamp=clamp, width=width, n_out_ch=n_out_ch)
    mean = mean_ref[...]
    if b_tile > 1:
        mean = jnp.concatenate([mean] * b_tile, axis=1)
    _finish_and_store(dl, bias, mean, scale_ref, bias_ref, dlogdet_ref)


def _raw_kernel(x_ref, w1_ref, w2_ref, mask_ref,
                dlraw_ref, bias_ref, csum_ref, patch_ref,
                *, clamp, width, n_out_ch):
    """Training fallback when the batch needs multiple tiles: emit pre-norm dlogdet,
    bias and per-position channel sums (mean is combined by a tiny jnp epilogue)."""
    dl, bias = _conv_stack(x_ref, w1_ref, w2_ref, mask_ref, patch_ref,
                           clamp=clamp, width=width, n_out_ch=n_out_ch)
    dlraw_ref[...] = dl
    bias_ref[...] = bias
    csum_ref[...] = jnp.sum(dl, axis=0, keepdims=True)


def prepare_affine_weights(w1_oihw, w2_oihw):
    """OIHW -> bf16 im2col matrices (rows ordered (kh, kw, cin), cin padded to 16).

    Static per module: cache the result or keep under jit so XLA constant-folds it.
    """
    chid, cin = w1_oihw.shape[:2]
    cout = w2_oihw.shape[0]
    cin_p = _round_up(cin, SUBLANE_BF16)
    chid_p = _round_up(chid, SUBLANE_BF16)
    w1p = jnp.zeros((chid_p, cin_p, KSIZE, KSIZE), jnp.float32)
    w1p = w1p.at[:chid, :cin].set(w1_oihw.astype(jnp.float32))
    w1mat = jnp.transpose(w1p, (0, 2, 3, 1)).reshape(chid_p, KK * cin_p).astype(jnp.bfloat16)
    w2p = jnp.zeros((cout, chid_p, KSIZE, KSIZE), jnp.float32)
    w2p = w2p.at[:, :chid].set(w2_oihw.astype(jnp.float32))
    w2mat = jnp.transpose(w2p, (0, 2, 3, 1)).reshape(cout, KK * chid_p).astype(jnp.bfloat16)
    return w1mat, w2mat, (cin_p, chid_p, cout)


def _boundary_masks(h, w, b_tile):
    """{0,1} masks for the 49 taps of a 'same' 7x7 conv, tiled across b_tile samples."""
    hw = h * w
    hh, ww = np.meshgrid(np.arange(h), np.arange(w), indexing="ij")
    hh = hh.reshape(-1)
    ww = ww.reshape(-1)
    m = np.zeros((KK, hw), np.float32)
    for kh in range(KSIZE):
        for kw in range(KSIZE):
            valid = ((hh + kh - PAD >= 0) & (hh + kh - PAD < h) &
                     (ww + kw - PAD >= 0) & (ww + kw - PAD < w))
            m[kh * KSIZE + kw] = valid.astype(np.float32)
    return np.tile(m, (1, b_tile))


def _pick_b_tile(n, hw, cin_p, chid_p, cout, c):
    """Largest batch tile (divisor of n) whose working set fits a conservative VMEM budget."""
    cp_max = max(cin_p, chid_p)
    for b in range(n, 0, -1):
        if n % b:
            continue
        lanes = b * hw
        need = (KK * cp_max * lanes * 2            # shared bf16 patch scratch (single)
                + cin_p * lanes * 4 * 2            # x block, double-buffered
                + KK * lanes * 4 * 2               # mask tile
                + 3 * c * lanes * 4 * 2            # three f32 output blocks
                + (2 * chid_p + cout + 3 * c) * lanes * 4)   # pre1/hidden/out/dl temporaries
        if need <= VMEM_BUDGET:
            return b
    return 1


def affine_param_block(x_nchw, w1_oihw, w2_oihw, forward_mode=True, *,
                       clamp=2.0, training=True, running_mean=0.0):
    """Pallas-TPU forward of AffineParamBlock.

    Returns ((scale, bias), dlogdet), all NCHW like the PyTorch module.
    `forward_mode` is accepted for signature parity but (as in the reference
    forward) unused.
    """
    del forward_mode
    N, Cin, H, W = x_nchw.shape
    HW = H * W

    w1mat, w2mat, (cin_p, chid_p, cout) = prepare_affine_weights(w1_oihw, w2_oihw)
    C = cout // 2
    cp_max = max(cin_p, chid_p)

    # Lane-dense layout: channels on sublanes, batch-major flat spatial on lanes.
    # (Tiny wrapper transpose = layout plumbing so the matmul lane dim is N*H*W.)
    x = jnp.transpose(x_nchw.astype(jnp.float32), (1, 0, 2, 3)).reshape(Cin, N * HW)
    x = jnp.pad(x, ((0, cin_p - Cin), (0, 0)))

    b_tile = _pick_b_tile(N, HW, cin_p, chid_p, cout, C)
    num_tiles = N // b_tile
    L = b_tile * HW
    masks = jnp.asarray(_boundary_masks(H, W, b_tile))       # (KK, L) f32

    common_in_specs = [
        pl.BlockSpec((cin_p, L), lambda b: (0, b)),
        pl.BlockSpec((chid_p, KK * cin_p), lambda b: (0, 0)),   # resident weights
        pl.BlockSpec((cout, KK * chid_p), lambda b: (0, 0)),
        pl.BlockSpec((KK, L), lambda b: (0, 0)),                # resident masks
    ]
    out_spec = pl.BlockSpec((C, L), lambda b: (0, b))
    csum_spec = pl.BlockSpec((1, L), lambda b: (0, b))
    scratch = [pltpu.VMEM((KK * cp_max, L), jnp.bfloat16)]      # shared by both convs
    cparams = pltpu.CompilerParams(dimension_semantics=("parallel",))
    out_cl = jax.ShapeDtypeStruct((C, N * HW), jnp.float32)

    if training and num_tiles == 1:
        # Fully fused: convs + atan + VolumeNorm batch mean + exp in one kernel.
        kern = functools.partial(_fused_train_kernel, clamp=float(clamp), width=W,
                                 hw=HW, b_tile=b_tile, n_out_ch=C)
        scale_f, bias_f, dl_f = pl.pallas_call(
            kern,
            out_shape=(out_cl, out_cl, out_cl),
            grid=(num_tiles,),
            in_specs=common_in_specs,
            out_specs=(out_spec, out_spec, out_spec),
            scratch_shapes=scratch,
            compiler_params=cparams,
        )(x, w1mat, w2mat, masks)
    elif not training:
        # Eval: running-mean map (scalar zeros buffer at init, per-position after training).
        rm = jnp.asarray(running_mean, jnp.float32).reshape(-1)
        if rm.shape[0] == 1:
            rm_map = jnp.broadcast_to(rm.reshape(1, 1), (1, HW))
        elif rm.shape[0] == HW:
            rm_map = rm.reshape(1, HW)
        else:
            raise ValueError("running_mean must be a scalar or have H*W elements")
        kern = functools.partial(_fused_eval_kernel, clamp=float(clamp), width=W,
                                 b_tile=b_tile, n_out_ch=C)
        scale_f, bias_f, dl_f = pl.pallas_call(
            kern,
            out_shape=(out_cl, out_cl, out_cl),
            grid=(num_tiles,),
            in_specs=common_in_specs + [pl.BlockSpec((1, HW), lambda b: (0, 0))],
            out_specs=(out_spec, out_spec, out_spec),
            scratch_shapes=scratch,
            compiler_params=cparams,
        )(x, w1mat, w2mat, masks, rm_map)
    else:
        # Training with a batch too large for one tile: per-tile channel sums, then a
        # trivially-fused jnp epilogue for the cross-tile mean + subtract + exp.
        kern = functools.partial(_raw_kernel, clamp=float(clamp), width=W, n_out_ch=C)
        dl_raw, bias_f, csum = pl.pallas_call(
            kern,
            out_shape=(out_cl, out_cl, jax.ShapeDtypeStruct((1, N * HW), jnp.float32)),
            grid=(num_tiles,),
            in_specs=common_in_specs,
            out_specs=(out_spec, out_spec, csum_spec),
            scratch_shapes=scratch,
            compiler_params=cparams,
        )(x, w1mat, w2mat, masks)
        mean = jnp.sum(csum.reshape(N, HW), axis=0, keepdims=True) * (1.0 / (N * C))
        dl_f = dl_raw - jnp.tile(mean, (1, N))
        scale_f = jnp.exp(dl_f)

    # TODO(synk): VolumeNorm's running_mean momentum update is a stateful buffer side
    # effect of the PyTorch module (not a forward output); not modeled here.

    def to_nchw(a):
        return jnp.transpose(a.reshape(C, N, H, W), (1, 0, 2, 3))

    return (to_nchw(scale_f), to_nchw(bias_f)), to_nchw(dl_f)


def _reference(x_nchw, w1_oihw, w2_oihw, clamp=2.0, training=True):
    """Pure-JAX f32 reference (same math as the PyTorch module)."""
    dn = ("NCHW", "OIHW", "NCHW")
    h = jax.lax.conv_general_dilated(
        x_nchw, w1_oihw, (1, 1), [(PAD, PAD), (PAD, PAD)],
        dimension_numbers=dn, precision=jax.lax.Precision.HIGHEST)
    h = jnp.where(h > 0, h, LEAKY_SLOPE * h)
    out = jax.lax.conv_general_dilated(
        h, w2_oihw, (1, 1), [(PAD, PAD), (PAD, PAD)],
        dimension_numbers=dn, precision=jax.lax.Precision.HIGHEST)
    C = out.shape[1] // 2
    _dl, b = out[:, :C], out[:, C:]
    dl = clamp * ATAN_COEF * jnp.arctan(_dl / clamp)
    if training:
        dl = dl - jnp.mean(dl, axis=(0, 1), keepdims=True)
    return (jnp.exp(dl), b), dl


if __name__ == "__main__":
    # Small shapes consistent with the module: in_ch=4 -> hidden_ch=out_ch=8.
    N, Cin, H, W = 2, 4, 16, 16
    Chid = 2 * Cin
    Cout = 2 * Cin

    key = jax.random.PRNGKey(0)
    kx, k1, k2 = jax.random.split(key, 3)
    x = jax.random.normal(kx, (N, Cin, H, W), jnp.float32)
    # Deterministic parameter init.  Note: the reference __init__ zero-inits the
    # last conv weight; we use small nonzero values so the kernel does real work.
    w1 = 0.05 * jax.random.normal(k1, (Chid, Cin, KSIZE, KSIZE), jnp.float32)
    w2 = 0.05 * jax.random.normal(k2, (Cout, Chid, KSIZE, KSIZE), jnp.float32)

    (scale, bias), dlogdet = affine_param_block(x, w1, w2, forward_mode=True)
    jax.block_until_ready((scale, bias, dlogdet))

    # Sanity check against a pure-f32 JAX reference.  Tolerance covers the bf16
    # MXU operands (f32 accumulation) through both convs.
    (scale_r, bias_r), dlogdet_r = _reference(x, w1, w2)
    np.testing.assert_allclose(np.asarray(bias), np.asarray(bias_r), atol=3e-2, rtol=3e-2)
    np.testing.assert_allclose(np.asarray(dlogdet), np.asarray(dlogdet_r), atol=3e-2, rtol=3e-2)
    np.testing.assert_allclose(np.asarray(scale), np.asarray(scale_r), atol=3e-2, rtol=3e-2)

    print("KERNEL_OK")
</pallas_src>

<mosaic_0001>
module attributes {stable_mosaic.version = 11 : i64} {
  func.func @_fused_train_kernel(%arg0: i32, %arg1: memref<16x512xf32, #tpu.memory_space<vmem>>, %arg2: memref<16x784xbf16, #tpu.memory_space<vmem>>, %arg3: memref<8x784xbf16, #tpu.memory_space<vmem>>, %arg4: memref<49x512xf32, #tpu.memory_space<vmem>>, %arg5: memref<4x512xf32, #tpu.memory_space<vmem>>, %arg6: memref<4x512xf32, #tpu.memory_space<vmem>>, %arg7: memref<4x512xf32, #tpu.memory_space<vmem>>, %arg8: memref<784x512xbf16, #tpu.memory_space<vmem>>) attributes {dimension_semantics = [#tpu.dimension_semantics<parallel>], iteration_bounds = array<i64: 1>, scalar_prefetch = 0 : i64, scratch_operands = 1 : i64, tpu.core_type = #tpu.core_type<tc>, window_params = [{transform_indices = @transform_0, window_bounds = array<i64: 16, 512>}, {pipeline_mode = #tpu.pipeline_mode<synchronous>, transform_indices = @transform_1, window_bounds = array<i64: 16, 784>}, {pipeline_mode = #tpu.pipeline_mode<synchronous>, transform_indices = @transform_2, window_bounds = array<i64: 8, 784>}, {pipeline_mode = #tpu.pipeline_mode<synchronous>, transform_indices = @transform_3, window_bounds = array<i64: 49, 512>}, {transform_indices = @transform_4, window_bounds = array<i64: 4, 512>}, {transform_indices = @transform_5, window_bounds = array<i64: 4, 512>}, {transform_indices = @transform_6, window_bounds = array<i64: 4, 512>}]} {
    %c0 = arith.constant 0 : index
    %c0_0 = arith.constant 0 : index
    %0 = vector.load %arg4[%c0, %c0_0] : memref<49x512xf32, #tpu.memory_space<vmem>>, vector<1x512xf32>
    %c1 = arith.constant 1 : index
    %c0_1 = arith.constant 0 : index
    %1 = vector.load %arg4[%c1, %c0_1] : memref<49x512xf32, #tpu.memory_space<vmem>>, vector<1x512xf32>
    %c2 = arith.constant 2 : index
    %c0_2 = arith.constant 0 : index
    %2 = vector.load %arg4[%c2, %c0_2] : memref<49x512xf32, #tpu.memory_space<vmem>>, vector<1x512xf32>
    %c3 = arith.constant 3 : index
    %c0_3 = arith.constant 0 : index
    %3 = vector.load %arg4[%c3, %c0_3] : memref<49x512xf32, #tpu.memory_space<vmem>>, vector<1x512xf32>
    %c4 = arith.constant 4 : index
    %c0_4 = arith.constant 0 : index
    %4 = vector.load %arg4[%c4, %c0_4] : memref<49x512xf32, #tpu.memory_space<vmem>>, vector<1x512xf32>
    %c5 = arith.constant 5 : index
    %c0_5 = arith.constant 0 : index
    %5 = vector.load %arg4[%c5, %c0_5] : memref<49x512xf32, #tpu.memory_space<vmem>>, vector<1x512xf32>
    %c6 = arith.constant 6 : index
    %c0_6 = arith.constant 0 : index
    %6 = vector.load %arg4[%c6, %c0_6] : memref<49x512xf32, #tpu.memory_space<vmem>>, vector<1x512xf32>
    %c7 = arith.constant 7 : index
    %c0_7 = arith.constant 0 : index
    %7 = vector.load %arg4[%c7, %c0_7] : memref<49x512xf32, #tpu.memory_space<vmem>>, vector<1x512xf32>
    %c8 = arith.constant 8 : index
    %c0_8 = arith.constant 0 : index
    %8 = vector.load %arg4[%c8, %c0_8] : memref<49x512xf32, #tpu.memory_space<vmem>>, vector<1x512xf32>
    %c9 = arith.constant 9 : index
    %c0_9 = arith.constant 0 : index
    %9 = vector.load %arg4[%c9, %c0_9] : memref<49x512xf32, #tpu.memory_space<vmem>>, vector<1x512xf32>
    %c10 = arith.constant 10 : index
    %c0_10 = arith.constant 0 : index
    %10 = vector.load %arg4[%c10, %c0_10] : memref<49x512xf32, #tpu.memory_space<vmem>>, vector<1x512xf32>
    %c11 = arith.constant 11 : index
    %c0_11 = arith.constant 0 : index
    %11 = vector.load %arg4[%c11, %c0_11] : memref<49x512xf32, #tpu.memory_space<vmem>>, vector<1x512xf32>
    %c12 = arith.constant 12 : index
    %c0_12 = arith.constant 0 : index
    %12 = vector.load %arg4[%c12, %c0_12] : memref<49x512xf32, #tpu.memory_space<vmem>>, vector<1x512xf32>
    %c13 = arith.constant 13 : index
    %c0_13 = arith.constant 0 : index
    %13 = vector.load %arg4[%c13, %c0_13] : memref<49x512xf32, #tpu.memory_space<vmem>>, vector<1x512xf32>
    %c14 = arith.constant 14 : index
    %c0_14 = arith.constant 0 : index
    %14 = vector.load %arg4[%c14, %c0_14] : memref<49x512xf32, #tpu.memory_space<vmem>>, vector<1x512xf32>
    %c15 = arith.constant 15 : index
    %c0_15 = arith.constant 0 : index
    %15 = vector.load %arg4[%c15, %c0_15] : memref<49x512xf32, #tpu.memory_space<vmem>>, vector<1x512xf32>
    %c16 = arith.constant 16 : index
    %c0_16 = arith.constant 0 : index
    %16 = vector.load %arg4[%c16, %c0_16] : memref<49x512xf32, #tpu.memory_space<vmem>>, vector<1x512xf32>
    %c17 = arith.constant 17 : index
    %c0_17 = arith.constant 0 : index
    %17 = vector.load %arg4[%c17, %c0_17] : memref<49x512xf32, #tpu.memory_space<vmem>>, vector<1x512xf32>
    %c18 = arith.constant 18 : index
    %c0_18 = arith.constant 0 : index
    %18 = vector.load %arg4[%c18, %c0_18] : memref<49x512xf32, #tpu.memory_space<vmem>>, vector<1x512xf32>
    %c19 = arith.constant 19 : index
    %c0_19 = arith.constant 0 : index
    %19 = vector.load %arg4[%c19, %c0_19] : memref<49x512xf32, #tpu.memory_space<vmem>>, vector<1x512xf32>
    %c20 = arith.constant 20 : index
    %c0_20 = arith.constant 0 : index
    %20 = vector.load %arg4[%c20, %c0_20] : memref<49x512xf32, #tpu.memory_space<vmem>>, vector<1x512xf32>
    %c21 = arith.constant 21 : index
    %c0_21 = arith.constant 0 : index
    %21 = vector.load %arg4[%c21, %c0_21] : memref<49x512xf32, #tpu.memory_space<vmem>>, vector<1x512xf32>
    %c22 = arith.constant 22 : index
    %c0_22 = arith.constant 0 : index
    %22 = vector.load %arg4[%c22, %c0_22] : memref<49x512xf32, #tpu.memory_space<vmem>>, vector<1x512xf32>
    %c23 = arith.constant 23 : index
    %c0_23 = arith.constant 0 : index
    %23 = vector.load %arg4[%c23, %c0_23] : memref<49x512xf32, #tpu.memory_space<vmem>>, vector<1x512xf32>
    %c25 = arith.constant 25 : index
    %c0_24 = arith.constant 0 : index
    %24 = vector.load %arg4[%c25, %c0_24] : memref<49x512xf32, #tpu.memory_space<vmem>>, vector<1x512xf32>
    %c26 = arith.constant 26 : index
    %c0_25 = arith.constant 0 : index
    %25 = vector.load %arg4[%c26, %c0_25] : memref<49x512xf32, #tpu.memory_space<vmem>>, vector<1x512xf32>
    %c27 = arith.constant 27 : index
    %c0_26 = arith.constant 0 : index
    %26 = vector.load %arg4[%c27, %c0_26] : memref<49x512xf32, #tpu.memory_space<vmem>>, vector<1x512xf32>
    %c28 = arith.constant 28 : index
    %c0_27 = arith.constant 0 : index
    %27 = vector.load %arg4[%c28, %c0_27] : memref<49x512xf32, #tpu.memory_space<vmem>>, vector<1x512xf32>
    %c29 = arith.constant 29 : index
    %c0_28 = arith.constant 0 : index
    %28 = vector.load %arg4[%c29, %c0_28] : memref<49x512xf32, #tpu.memory_space<vmem>>, vector<1x512xf32>
    %c30 = arith.constant 30 : index
    %c0_29 = arith.constant 0 : index
    %29 = vector.load %arg4[%c30, %c0_29] : memref<49x512xf32, #tpu.memory_space<vmem>>, vector<1x512xf32>
    %c31 = arith.constant 31 : index
    %c0_30 = arith.constant 0 : index
    %30 = vector.load %arg4[%c31, %c0_30] : memref<49x512xf32, #tpu.memory_space<vmem>>, vector<1x512xf32>
    %c32 = arith.constant 32 : index
    %c0_31 = arith.constant 0 : index
    %31 = vector.load %arg4[%c32, %c0_31] : memref<49x512xf32, #tpu.memory_space<vmem>>, vector<1x512xf32>
    %c33 = arith.constant 33 : index
    %c0_32 = arith.constant 0 : index
    %32 = vector.load %arg4[%c33, %c0_32] : memref<49x512xf32, #tpu.memory_space<vmem>>, vector<1x512xf32>
    %c34 = arith.constant 34 : index
    %c0_33 = arith.constant 0 : index
    %33 = vector.load %arg4[%c34, %c0_33] : memref<49x512xf32, #tpu.memory_space<vmem>>, vector<1x512xf32>
    %c35 = arith.constant 35 : index
    %c0_34 = arith.constant 0 : index
    %34 = vector.load %arg4[%c35, %c0_34] : memref<49x512xf32, #tpu.memory_space<vmem>>, vector<1x512xf32>
    %c36 = arith.constant 36 : index
    %c0_35 = arith.constant 0 : index
    %35 = vector.load %arg4[%c36, %c0_35] : memref<49x512xf32, #tpu.memory_space<vmem>>, vector<1x512xf32>
    %c37 = arith.constant 37 : index
    %c0_36 = arith.constant 0 : index
    %36 = vector.load %arg4[%c37, %c0_36] : memref<49x512xf32, #tpu.memory_space<vmem>>, vector<1x512xf32>
    %c38 = arith.constant 38 : index
    %c0_37 = arith.constant 0 : index
    %37 = vector.load %arg4[%c38, %c0_37] : memref<49x512xf32, #tpu.memory_space<vmem>>, vector<1x512xf32>
    %c39 = arith.constant 39 : index
    %c0_38 = arith.constant 0 : index
    %38 = vector.load %arg4[%c39, %c0_38] : memref<49x512xf32, #tpu.memory_space<vmem>>, vector<1x512xf32>
    %c40 = arith.constant 40 : index
    %c0_39 = arith.constant 0 : index
    %39 = vector.load %arg4[%c40, %c0_39] : memref<49x512xf32, #tpu.memory_space<vmem>>, vector<1x512xf32>
    %c41 = arith.constant 41 : index
    %c0_40 = arith.constant 0 : index
    %40 = vector.load %arg4[%c41, %c0_40] : memref<49x512xf32, #tpu.memory_space<vmem>>, vector<1x512xf32>
    %c42 = arith.constant 42 : index
    %c0_41 = arith.constant 0 : index
    %41 = vector.load %arg4[%c42, %c0_41] : memref<49x512xf32, #tpu.memory_space<vmem>>, vector<1x512xf32>
    %c43 = arith.constant 43 : index
    %c0_42 = arith.constant 0 : index
    %42 = vector.load %arg4[%c43, %c0_42] : memref<49x512xf32, #tpu.memory_space<vmem>>, vector<1x512xf32>
    %c44 = arith.constant 44 : index
    %c0_43 = arith.constant 0 : index
    %43 = vector.load %arg4[%c44, %c0_43] : memref<49x512xf32, #tpu.memory_space<vmem>>, vector<1x512xf32>
    %c45 = arith.constant 45 : index
    %c0_44 = arith.constant 0 : index
    %44 = vector.load %arg4[%c45, %c0_44] : memref<49x512xf32, #tpu.memory_space<vmem>>, vector<1x512xf32>
    %c46 = arith.constant 46 : index
    %c0_45 = arith.constant 0 : index
    %45 = vector.load %arg4[%c46, %c0_45] : memref<49x512xf32, #tpu.memory_space<vmem>>, vector<1x512xf32>
    %c47 = arith.constant 47 : index
    %c0_46 = arith.constant 0 : index
    %46 = vector.load %arg4[%c47, %c0_46] : memref<49x512xf32, #tpu.memory_space<vmem>>, vector<1x512xf32>
    %c48 = arith.constant 48 : index
    %c0_47 = arith.constant 0 : index
    %47 = vector.load %arg4[%c48, %c0_47] : memref<49x512xf32, #tpu.memory_space<vmem>>, vector<1x512xf32>
    %c0_48 = arith.constant 0 : index
    %c0_49 = arith.constant 0 : index
    %48 = vector.load %arg1[%c0_48, %c0_49] : memref<16x512xf32, #tpu.memory_space<vmem>>, vector<16x512xf32>
    %c51_i32 = arith.constant 51 : i32
    %49 = tpu.dynamic_rotate %48 by %c51_i32 dim 1 : vector<16x512xf32>, i32 -> vector<16x512xf32>
    %50 = vector.broadcast %0 : vector<1x512xf32> to vector<16x512xf32>
    %51 = arith.mulf %49, %50 : vector<16x512xf32>
    %52 = arith.truncf %51 : vector<16x512xf32> to vector<16x512xbf16>
    %c0_50 = arith.constant 0 : index
    %c0_51 = arith.constant 0 : index
    %53 = vector.load %arg8[%c0_50, %c0_51] : memref<784x512xbf16, #tpu.memory_space<vmem>>, vector<16x512xbf16>
    tpu.vector_store %arg8[%c0_50, %c0_51], %52 {strides = array<i32>} : memref<784x512xbf16, #tpu.memory_space<vmem>>, vector<16x512xbf16>,
    %c50_i32 = arith.constant 50 : i32
    %54 = tpu.dynamic_rotate %48 by %c50_i32 dim 1 : vector<16x512xf32>, i32 -> vector<16x512xf32>
    %55 = vector.broadcast %1 : vector<1x512xf32> to vector<16x512xf32>
    %56 = arith.mulf %54, %55 : vector<16x512xf32>
    %57 = arith.truncf %56 : vector<16x512xf32> to vector<16x512xbf16>
    %c16_52 = arith.constant 16 : index
    %c0_53 = arith.constant 0 : index
    %58 = vector.load %arg8[%c16_52, %c0_53] : memref<784x512xbf16, #tpu.memory_space<vmem>>, vector<16x512xbf16>
    tpu.vector_store %arg8[%c16_52, %c0_53], %57 {strides = array<i32>} : memref<784x512xbf16, #tpu.memory_space<vmem>>, vector<16x512xbf16>,
    %c49_i32 = arith.constant 49 : i32
    %59 = tpu.dynamic_rotate %48 by %c49_i32 dim 1 : vector<16x512xf32>, i32 -> vector<16x512xf32>
    %60 = vector.broadcast %2 : vector<1x512xf32> to vector<16x512xf32>
    %61 = arith.mulf %59, %60 : vector<16x512xf32>
    %62 = arith.truncf %61 : vector<16x512xf32> to vector<16x512xbf16>
    %c32_54 = arith.constant 32 : index
    %c0_55 = arith.constant 0 : index
    %63 = vector.load %arg8[%c32_54, %c0_55] : memref<784x512xbf16, #tpu.memory_space<vmem>>, vector<16x512xbf16>
    tpu.vector_store %arg8[%c32_54, %c0_55], %62 {strides = array<i32>} : memref<784x512xbf16, #tpu.memory_space<vmem>>, vector<16x512xbf16>,
    %c48_i32 = arith.constant 48 : i32
    %64 = tpu.dynamic_rotate %48 by %c48_i32 dim 1 : vector<16x512xf32>, i32 -> vector<16x512xf32>
    %65 = vector.broadcast %3 : vector<1x512xf32> to vector<16x512xf32>
    %66 = arith.mulf %64, %65 : vector<16x512xf32>
    %67 = arith.truncf %66 : vector<16x512xf32> to vector<16x512xbf16>
    %c48_56 = arith.constant 48 : index
    %c0_57 = arith.constant 0 : index
    %68 = vector.load %arg8[%c48_56, %c0_57] : memref<784x512xbf16, #tpu.memory_space<vmem>>, vector<16x512xbf16>
    tpu.vector_store %arg8[%c48_56, %c0_57], %67 {strides = array<i32>} : memref<784x512xbf16, #tpu.memory_space<vmem>>, vector<16x512xbf16>,
    %c47_i32 = arith.constant 47 : i32
    %69 = tpu.dynamic_rotate %48 by %c47_i32 dim 1 : vector<16x512xf32>, i32 -> vector<16x512xf32>
    %70 = vector.broadcast %4 : vector<1x512xf32> to vector<16x512xf32>
    %71 = arith.mulf %69, %70 : vector<16x512xf32>
    %72 = arith.truncf %71 : vector<16x512xf32> to vector<16x512xbf16>
    %c64 = arith.constant 64 : index
    %c0_58 = arith.constant 0 : index
    %73 = vector.load %arg8[%c64, %c0_58] : memref<784x512xbf16, #tpu.memory_space<vmem>>, vector<16x512xbf16>
    tpu.vector_store %arg8[%c64, %c0_58], %72 {strides = array<i32>} : memref<784x512xbf16, #tpu.memory_space<vmem>>, vector<16x512xbf16>,
    %c46_i32 = arith.constant 46 : i32
    %74 = tpu.dynamic_rotate %48 by %c46_i32 dim 1 : vector<16x512xf32>, i32 -> vector<16x512xf32>
    %75 = vector.broadcast %5 : vector<1x512xf32> to vector<16x512xf32>
    %76 = arith.mulf %74, %75 : vector<16x512xf32>
    %77 = arith.truncf %76 : vector<16x512xf32> to vector<16x512xbf16>
    %c80 = arith.constant 80 : index
    %c0_59 = arith.constant 0 : index
    %78 = vector.load %arg8[%c80, %c0_59] : memref<784x512xbf16, #tpu.memory_space<vmem>>, vector<16x512xbf16>
    tpu.vector_store %arg8[%c80, %c0_59], %77 {strides = array<i32>} : memref<784x512xbf16, #tpu.memory_space<vmem>>, vector<16x512xbf16>,
    %c45_i32 = arith.constant 45 : i32
    %79 = tpu.dynamic_rotate %48 by %c45_i32 dim 1 : vector<16x512xf32>, i32 -> vector<16x512xf32>
    %80 = vector.broadcast %6 : vector<1x512xf32> to vector<16x512xf32>
    %81 = arith.mulf %79, %80 : vector<16x512xf32>
    %82 = arith.truncf %81 : vector<16x512xf32> to vector<16x512xbf16>
    %c96 = arith.constant 96 : index
    %c0_60 = arith.constant 0 : index
    %83 = vector.load %arg8[%c96, %c0_60] : memref<784x512xbf16, #tpu.memory_space<vmem>>, vector<16x512xbf16>
    tpu.vector_store %arg8[%c96, %c0_60], %82 {strides = array<i32>} : memref<784x512xbf16, #tpu.memory_space<vmem>>, vector<16x512xbf16>,
    %c35_i32 = arith.constant 35 : i32
    %84 = tpu.dynamic_rotate %48 by %c35_i32 dim 1 : vector<16x512xf32>, i32 -> vector<16x512xf32>
    %85 = vector.broadcast %7 : vector<1x512xf32> to vector<16x512xf32>
    %86 = arith.mulf %84, %85 : vector<16x512xf32>
    %87 = arith.truncf %86 : vector<16x512xf32> to vector<16x512xbf16>
    %c112 = arith.constant 112 : index
    %c0_61 = arith.constant 0 : index
    %88 = vector.load %arg8[%c112, %c0_61] : memref<784x512xbf16, #tpu.memory_space<vmem>>, vector<16x512xbf16>
    tpu.vector_store %arg8[%c112, %c0_61], %87 {strides = array<i32>} : memref<784x512xbf16, #tpu.memory_space<vmem>>, vector<16x512xbf16>,
    %c34_i32 = arith.constant 34 : i32
    %89 = tpu.dynamic_rotate %48 by %c34_i32 dim 1 : vector<16x512xf32>, i32 -> vector<16x512xf32>
    %90 = vector.broadcast %8 : vector<1x512xf32> to vector<16x512xf32>
    %91 = arith.mulf %89, %90 : vector<16x512xf32>
    %92 = arith.truncf %91 : vector<16x512xf32> to vector<16x512xbf16>
    %c128 = arith.constant 128 : index
    %c0_62 = arith.constant 0 : index
    %93 = vector.load %arg8[%c128, %c0_62] : memref<784x512xbf16, #tpu.memory_space<vmem>>, vector<16x512xbf16>
    tpu.vector_store %arg8[%c128, %c0_62], %92 {strides = array<i32>} : memref<784x512xbf16, #tpu.memory_space<vmem>>, vector<16x512xbf16>,
    %c33_i32 = arith.constant 33 : i32
    %94 = tpu.dynamic_rotate %48 by %c33_i32 dim 1 : vector<16x512xf32>, i32 -> vector<16x512xf32>
    %95 = vector.broadcast %9 : vector<1x512xf32> to vector<16x512xf32>
    %96 = arith.mulf %94, %95 : vector<16x512xf32>
    %97 = arith.truncf %96 : vector<16x512xf32> to vector<16x512xbf16>
    %c144 = arith.constant 144 : index
    %c0_63 = arith.constant 0 : index
    %98 = vector.load %arg8[%c144, %c0_63] : memref<784x512xbf16, #tpu.memory_space<vmem>>, vector<16x512xbf16>
    tpu.vector_store %arg8[%c144, %c0_63], %97 {strides = array<i32>} : memref<784x512xbf16, #tpu.memory_space<vmem>>, vector<16x512xbf16>,
    %c32_i32 = arith.constant 32 : i32
    %99 = tpu.dynamic_rotate %48 by %c32_i32 dim 1 : vector<16x512xf32>, i32 -> vector<16x512xf32>
    %100 = vector.broadcast %10 : vector<1x512xf32> to vector<16x512xf32>
    %101 = arith.mulf %99, %100 : vector<16x512xf32>
    %102 = arith.truncf %101 : vector<16x512xf32> to vector<16x512xbf16>
    %c160 = arith.constant 160 : index
    %c0_64 = arith.constant 0 : index
    %103 = vector.load %arg8[%c160, %c0_64] : memref<784x512xbf16, #tpu.memory_space<vmem>>, vector<16x512xbf16>
    tpu.vector_store %arg8[%c160, %c0_64], %102 {strides = array<i32>} : memref<784x512xbf16, #tpu.memory_space<vmem>>, vector<16x512xbf16>,
    %c31_i32 = arith.constant 31 : i32
    %104 = tpu.dynamic_rotate %48 by %c31_i32 dim 1 : vector<16x512xf32>, i32 -> vector<16x512xf32>
    %105 = vector.broadcast %11 : vector<1x512xf32> to vector<16x512xf32>
    %106 = arith.mulf %104, %105 : vector<16x512xf32>
    %107 = arith.truncf %106 : vector<16x512xf32> to vector<16x512xbf16>
    %c176 = arith.constant 176 : index
    %c0_65 = arith.constant 0 : index
    %108 = vector.load %arg8[%c176, %c0_65] : memref<784x512xbf16, #tpu.memory_space<vmem>>, vector<16x512xbf16>
    tpu.vector_store %arg8[%c176, %c0_65], %107 {strides = array<i32>} : memref<784x512xbf16, #tpu.memory_space<vmem>>, vector<16x512xbf16>,
    %c30_i32 = arith.constant 30 : i32
    %109 = tpu.dynamic_rotate %48 by %c30_i32 dim 1 : vector<16x512xf32>, i32 -> vector<16x512xf32>
    %110 = vector.broadcast %12 : vector<1x512xf32> to vector<16x512xf32>
    %111 = arith.mulf %109, %110 : vector<16x512xf32>
    %112 = arith.truncf %111 : vector<16x512xf32> to vector<16x512xbf16>
    %c192 = arith.constant 192 : index
    %c0_66 = arith.constant 0 : index
    %113 = vector.load %arg8[%c192, %c0_66] : memref<784x512xbf16, #tpu.memory_space<vmem>>, vector<16x512xbf16>
    tpu.vector_store %arg8[%c192, %c0_66], %112 {strides = array<i32>} : memref<784x512xbf16, #tpu.memory_space<vmem>>, vector<16x512xbf16>,
    %c29_i32 = arith.constant 29 : i32
    %114 = tpu.dynamic_rotate %48 by %c29_i32 dim 1 : vector<16x512xf32>, i32 -> vector<16x512xf32>
    %115 = vector.broadcast %13 : vector<1x512xf32> to vector<16x512xf32>
    %116 = arith.mulf %114, %115 : vector<16x512xf32>
    %117 = arith.truncf %116 : vector<16x512xf32> to vector<16x512xbf16>
    %c208 = arith.constant 208 : index
    %c0_67 = arith.constant 0 : index
    %118 = vector.load %arg8[%c208, %c0_67] : memref<784x512xbf16, #tpu.memory_space<vmem>>, vector<16x512xbf16>
    tpu.vector_store %arg8[%c208, %c0_67], %117 {strides = array<i32>} : memref<784x512xbf16, #tpu.memory_space<vmem>>, vector<16x512xbf16>,
    %c19_i32 = arith.constant 19 : i32
    %119 = tpu.dynamic_rotate %48 by %c19_i32 dim 1 : vector<16x512xf32>, i32 -> vector<16x512xf32>
    %120 = vector.broadcast %14 : vector<1x512xf32> to vector<16x512xf32>
    %121 = arith.mulf %119, %120 : vector<16x512xf32>
    %122 = arith.truncf %121 : vector<16x512xf32> to vector<16x512xbf16>
    %c224 = arith.constant 224 : index
    %c0_68 = arith.constant 0 : index
    %123 = vector.load %arg8[%c224, %c0_68] : memref<784x512xbf16, #tpu.memory_space<vmem>>, vector<16x512xbf16>
    tpu.vector_store %arg8[%c224, %c0_68], %122 {strides = array<i32>} : memref<784x512xbf16, #tpu.memory_space<vmem>>, vector<16x512xbf16>,
    %c18_i32 = arith.constant 18 : i32
    %124 = tpu.dynamic_rotate %48 by %c18_i32 dim 1 : vector<16x512xf32>, i32 -> vector<16x512xf32>
    %125 = vector.broadcast %15 : vector<1x512xf32> to vector<16x512xf32>
    %126 = arith.mulf %124, %125 : vector<16x512xf32>
    %127 = arith.truncf %126 : vector<16x512xf32> to vector<16x512xbf16>
    %c240 = arith.constant 240 : index
    %c0_69 = arith.constant 0 : index
    %128 = vector.load %arg8[%c240, %c0_69] : memref<784x512xbf16, #tpu.memory_space<vmem>>, vector<16x512xbf16>
    tpu.vector_store %arg8[%c240, %c0_69], %127 {strides = array<i32>} : memref<784x512xbf16, #tpu.memory_space<vmem>>, vector<16x512xbf16>,
    %c17_i32 = arith.constant 17 : i32
    %129 = tpu.dynamic_rotate %48 by %c17_i32 dim 1 : vector<16x512xf32>, i32 -> vector<16x512xf32>
    %130 = vector.broadcast %16 : vector<1x512xf32> to vector<16x512xf32>
    %131 = arith.mulf %129, %130 : vector<16x512xf32>
    %132 = arith.truncf %131 : vector<16x512xf32> to vector<16x512xbf16>
    %c256 = arith.constant 256 : index
    %c0_70 = arith.constant 0 : index
    %133 = vector.load %arg8[%c256, %c0_70] : memref<784x512xbf16, #tpu.memory_space<vmem>>, vector<16x512xbf16>
    tpu.vector_store %arg8[%c256, %c0_70], %132 {strides = array<i32>} : memref<784x512xbf16, #tpu.memory_space<vmem>>, vector<16x512xbf16>,
    %c16_i32 = arith.constant 16 : i32
    %134 = tpu.dynamic_rotate %48 by %c16_i32 dim 1 : vector<16x512xf32>, i32 -> vector<16x512xf32>
    %135 = vector.broadcast %17 : vector<1x512xf32> to vector<16x512xf32>
    %136 = arith.mulf %134, %135 : vector<16x512xf32>
    %137 = arith.truncf %136 : vector<16x512xf32> to vector<16x512xbf16>
    %c272 = arith.constant 272 : index
    %c0_71 = arith.constant 0 : index
    %138 = vector.load %arg8[%c272, %c0_71] : memref<784x512xbf16, #tpu.memory_space<vmem>>, vector<16x512xbf16>
    tpu.vector_store %arg8[%c272, %c0_71], %137 {strides = array<i32>} : memref<784x512xbf16, #tpu.memory_space<vmem>>, vector<16x512xbf16>,
    %c15_i32 = arith.constant 15 : i32
    %139 = tpu.dynamic_rotate %48 by %c15_i32 dim 1 : vector<16x512xf32>, i32 -> vector<16x512xf32>
    %140 = vector.broadcast %18 : vector<1x512xf32> to vector<16x512xf32>
    %141 = arith.mulf %139, %140 : vector<16x512xf32>
    %142 = arith.truncf %141 : vector<16x512xf32> to vector<16x512xbf16>
    %c288 = arith.constant 288 : index
    %c0_72 = arith.constant 0 : index
    %143 = vector.load %arg8[%c288, %c0_72] : memref<784x512xbf16, #tpu.memory_space<vmem>>, vector<16x512xbf16>
    tpu.vector_store %arg8[%c288, %c0_72], %142 {strides = array<i32>} : memref<784x512xbf16, #tpu.memory_space<vmem>>, vector<16x512xbf16>,
    %c14_i32 = arith.constant 14 : i32
    %144 = tpu.dynamic_rotate %48 by %c14_i32 dim 1 : vector<16x512xf32>, i32 -> vector<16x512xf32>
    %145 = vector.broadcast %19 : vector<1x512xf32> to vector<16x512xf32>
    %146 = arith.mulf %144, %145 : vector<16x512xf32>
    %147 = arith.truncf %146 : vector<16x512xf32> to vector<16x512xbf16>
    %c304 = arith.constant 304 : index
    %c0_73 = arith.constant 0 : index
    %148 = vector.load %arg8[%c304, %c0_73] : memref<784x512xbf16, #tpu.memory_space<vmem>>, vector<16x512xbf16>
    tpu.vector_store %arg8[%c304, %c0_73], %147 {strides = array<i32>} : memref<784x512xbf16, #tpu.memory_space<vmem>>, vector<16x512xbf16>,
    %c13_i32 = arith.constant 13 : i32
    %149 = tpu.dynamic_rotate %48 by %c13_i32 dim 1 : vector<16x512xf32>, i32 -> vector<16x512xf32>
    %150 = vector.broadcast %20 : vector<1x512xf32> to vector<16x512xf32>
    %151 = arith.mulf %149, %150 : vector<16x512xf32>
    %152 = arith.truncf %151 : vector<16x512xf32> to vector<16x512xbf16>
    %c320 = arith.constant 320 : index
    %c0_74 = arith.constant 0 : index
    %153 = vector.load %arg8[%c320, %c0_74] : memref<784x512xbf16, #tpu.memory_space<vmem>>, vector<16x512xbf16>
    tpu.vector_store %arg8[%c320, %c0_74], %152 {strides = array<i32>} : memref<784x512xbf16, #tpu.memory_space<vmem>>, vector<16x512xbf16>,
    %c3_i32 = arith.constant 3 : i32
    %154 = tpu.dynamic_rotate %48 by %c3_i32 dim 1 : vector<16x512xf32>, i32 -> vector<16x512xf32>
    %155 = vector.broadcast %21 : vector<1x512xf32> to vector<16x512xf32>
    %156 = arith.mulf %154, %155 : vector<16x512xf32>
    %157 = arith.truncf %156 : vector<16x512xf32> to vector<16x512xbf16>
    %c336 = arith.constant 336 : index
    %c0_75 = arith.constant 0 : index
    %158 = vector.load %arg8[%c336, %c0_75] : memref<784x512xbf16, #tpu.memory_space<vmem>>, vector<16x512xbf16>
    tpu.vector_store %arg8[%c336, %c0_75], %157 {strides = array<i32>} : memref<784x512xbf16, #tpu.memory_space<vmem>>, vector<16x512xbf16>,
    %c2_i32 = arith.constant 2 : i32
    %159 = tpu.dynamic_rotate %48 by %c2_i32 dim 1 : vector<16x512xf32>, i32 -> vector<16x512xf32>
    %160 = vector.broadcast %22 : vector<1x512xf32> to vector<16x512xf32>
    %161 = arith.mulf %159, %160 : vector<16x512xf32>
    %162 = arith.truncf %161 : vector<16x512xf32> to vector<16x512xbf16>
    %c352 = arith.constant 352 : index
    %c0_76 = arith.constant 0 : index
    %163 = vector.load %arg8[%c352, %c0_76] : memref<784x512xbf16, #tpu.memory_space<vmem>>, vector<16x512xbf16>
    tpu.vector_store %arg8[%c352, %c0_76], %162 {strides = array<i32>} : memref<784x512xbf16, #tpu.memory_space<vmem>>, vector<16x512xbf16>,
    %c1_i32 = arith.constant 1 : i32
    %164 = tpu.dynamic_rotate %48 by %c1_i32 dim 1 : vector<16x512xf32>, i32 -> vector<16x512xf32>
    %165 = vector.broadcast %23 : vector<1x512xf32> to vector<16x512xf32>
    %166 = arith.mulf %164, %165 : vector<16x512xf32>
    %167 = arith.truncf %166 : vector<16x512xf32> to vector<16x512xbf16>
    %c368 = arith.constant 368 : index
    %c0_77 = arith.constant 0 : index
    %168 = vector.load %arg8[%c368, %c0_77] : memref<784x512xbf16, #tpu.memory_space<vmem>>, vector<16x512xbf16>
    tpu.vector_store %arg8[%c368, %c0_77], %167 {strides = array<i32>} : memref<784x512xbf16, #tpu.memory_space<vmem>>, vector<16x512xbf16>,
    %169 = arith.truncf %48 : vector<16x512xf32> to vector<16x512xbf16>
    %c384 = arith.constant 384 : index
    %c0_78 = arith.constant 0 : index
    %170 = vector.load %arg8[%c384, %c0_78] : memref<784x512xbf16, #tpu.memory_space<vmem>>, vector<16x512xbf16>
    tpu.vector_store %arg8[%c384, %c0_78], %169 {strides = array<i32>} : memref<784x512xbf16, #tpu.memory_space<vmem>>, vector<16x512xbf16>,
    %c511_i32 = arith.constant 511 : i32
    %171 = tpu.dynamic_rotate %48 by %c511_i32 dim 1 : vector<16x512xf32>, i32 -> vector<16x512xf32>
    %172 = vector.broadcast %24 : vector<1x512xf32> to vector<16x512xf32>
    %173 = arith.mulf %171, %172 : vector<16x512xf32>
    %174 = arith.truncf %173 : vector<16x512xf32> to vector<16x512xbf16>
    %c400 = arith.constant 400 : index
    %c0_79 = arith.constant 0 : index
    %175 = vector.load %arg8[%c400, %c0_79] : memref<784x512xbf16, #tpu.memory_space<vmem>>, vector<16x512xbf16>
    tpu.vector_store %arg8[%c400, %c0_79], %174 {strides = array<i32>} : memref<784x512xbf16, #tpu.memory_space<vmem>>, vector<16x512xbf16>,
    %c510_i32 = arith.constant 510 : i32
    %176 = tpu.dynamic_rotate %48 by %c510_i32 dim 1 : vector<16x512xf32>, i32 -> vector<16x512xf32>
    %177 = vector.broadcast %25 : vector<1x512xf32> to vector<16x512xf32>
    %178 = arith.mulf %176, %177 : vector<16x512xf32>
    %179 = arith.truncf %178 : vector<16x512xf32> to vector<16x512xbf16>
    %c416 = arith.constant 416 : index
    %c0_80 = arith.constant 0 : index
    %180 = vector.load %arg8[%c416, %c0_80] : memref<784x512xbf16, #tpu.memory_space<vmem>>, vector<16x512xbf16>
    tpu.vector_store %arg8[%c416, %c0_80], %179 {strides = array<i32>} : memref<784x512xbf16, #tpu.memory_space<vmem>>, vector<16x512xbf16>,
    %c509_i32 = arith.constant 509 : i32
    %181 = tpu.dynamic_rotate %48 by %c509_i32 dim 1 : vector<16x512xf32>, i32 -> vector<16x512xf32>
    %182 = vector.broadcast %26 : vector<1x512xf32> to vector<16x512xf32>
    %183 = arith.mulf %181, %182 : vector<16x512xf32>
    %184 = arith.truncf %183 : vector<16x512xf32> to vector<16x512xbf16>
    %c432 = arith.constant 432 : index
    %c0_81 = arith.constant 0 : index
    %185 = vector.load %arg8[%c432, %c0_81] : memref<784x512xbf16, #tpu.memory_space<vmem>>, vector<16x512xbf16>
    tpu.vector_store %arg8[%c432, %c0_81], %184 {strides = array<i32>} : memref<784x512xbf16, #tpu.memory_space<vmem>>, vector<16x512xbf16>,
    %c499_i32 = arith.constant 499 : i32
    %186 = tpu.dynamic_rotate %48 by %c499_i32 dim 1 : vector<16x512xf32>, i32 -> vector<16x512xf32>
    %187 = vector.broadcast %27 : vector<1x512xf32> to vector<16x512xf32>
    %188 = arith.mulf %186, %187 : vector<16x512xf32>
    %189 = arith.truncf %188 : vector<16x512xf32> to vector<16x512xbf16>
    %c448 = arith.constant 448 : index
    %c0_82 = arith.constant 0 : index
    %190 = vector.load %arg8[%c448, %c0_82] : memref<784x512xbf16, #tpu.memory_space<vmem>>, vector<16x512xbf16>
    tpu.vector_store %arg8[%c448, %c0_82], %189 {strides = array<i32>} : memref<784x512xbf16, #tpu.memory_space<vmem>>, vector<16x512xbf16>,
    %c498_i32 = arith.constant 498 : i32
    %191 = tpu.dynamic_rotate %48 by %c498_i32 dim 1 : vector<16x512xf32>, i32 -> vector<16x512xf32>
    %192 = vector.broadcast %28 : vector<1x512xf32> to vector<16x512xf32>
    %193 = arith.mulf %191, %192 : vector<16x512xf32>
    %194 = arith.truncf %193 : vector<16x512xf32> to vector<16x512xbf16>
    %c464 = arith.constant 464 : index
    %c0_83 = arith.constant 0 : index
    %195 = vector.load %arg8[%c464, %c0_83] : memref<784x512xbf16, #tpu.memory_space<vmem>>, vector<16x512xbf16>
    tpu.vector_store %arg8[%c464, %c0_83], %194 {strides = array<i32>} : memref<784x512xbf16, #tpu.memory_space<vmem>>, vector<16x512xbf16>,
    %c497_i32 = arith.constant 497 : i32
    %196 = tpu.dynamic_rotate %48 by %c497_i32 dim 1 : vector<16x512xf32>, i32 -> vector<16x512xf32>
    %197 = vector.broadcast %29 : vector<1x512xf32> to vector<16x512xf32>
    %198 = arith.mulf %196, %197 : vector<16x512xf32>
    %199 = arith.truncf %198 : vector<16x512xf32> to vector<16x512xbf16>
    %c480 = arith.constant 480 : index
    %c0_84 = arith.constant 0 : index
    %200 = vector.load %arg8[%c480, %c0_84] : memref<784x512xbf16, #tpu.memory_space<vmem>>, vector<16x512xbf16>
    tpu.vector_store %arg8[%c480, %c0_84], %199 {strides = array<i32>} : memref<784x512xbf16, #tpu.memory_space<vmem>>, vector<16x512xbf16>,
    %c496_i32 = arith.constant 496 : i32
    %201 = tpu.dynamic_rotate %48 by %c496_i32 dim 1 : vector<16x512xf32>, i32 -> vector<16x512xf32>
    %202 = vector.broadcast %30 : vector<1x512xf32> to vector<16x512xf32>
    %203 = arith.mulf %201, %202 : vector<16x512xf32>
    %204 = arith.truncf %203 : vector<16x512xf32> to vector<16x512xbf16>
    %c496 = arith.constant 496 : index
    %c0_85 = arith.constant 0 : index
    %205 = vector.load %arg8[%c496, %c0_85] : memref<784x512xbf16, #tpu.memory_space<vmem>>, vector<16x512xbf16>
    tpu.vector_store %arg8[%c496, %c0_85], %204 {strides = array<i32>} : memref<784x512xbf16, #tpu.memory_space<vmem>>, vector<16x512xbf16>,
    %c495_i32 = arith.constant 495 : i32
    %206 = tpu.dynamic_rotate %48 by %c495_i32 dim 1 : vector<16x512xf32>, i32 -> vector<16x512xf32>
    %207 = vector.broadcast %31 : vector<1x512xf32> to vector<16x512xf32>
    %208 = arith.mulf %206, %207 : vector<16x512xf32>
    %209 = arith.truncf %208 : vector<16x512xf32> to vector<16x512xbf16>
    %c512 = arith.constant 512 : index
    %c0_86 = arith.constant 0 : index
    %210 = vector.load %arg8[%c512, %c0_86] : memref<784x512xbf16, #tpu.memory_space<vmem>>, vector<16x512xbf16>
    tpu.vector_store %arg8[%c512, %c0_86], %209 {strides = array<i32>} : memref<784x512xbf16, #tpu.memory_space<vmem>>, vector<16x512xbf16>,
    %c494_i32 = arith.constant 494 : i32
    %211 = tpu.dynamic_rotate %48 by %c494_i32 dim 1 : vector<16x512xf32>, i32 -> vector<16x512xf32>
    %212 = vector.broadcast %32 : vector<1x512xf32> to vector<16x512xf32>
    %213 = arith.mulf %211, %212 : vector<16x512xf32>
    %214 = arith.truncf %213 : vector<16x512xf32> to vector<16x512xbf16>
    %c528 = arith.constant 528 : index
    %c0_87 = arith.constant 0 : index
    %215 = vector.load %arg8[%c528, %c0_87] : memref<784x512xbf16, #tpu.memory_space<vmem>>, vector<16x512xbf16>
    tpu.vector_store %arg8[%c528, %c0_87], %214 {strides = array<i32>} : memref<784x512xbf16, #tpu.memory_space<vmem>>, vector<16x512xbf16>,
    %c493_i32 = arith.constant 493 : i32
    %216 = tpu.dynamic_rotate %48 by %c493_i32 dim 1 : vector<16x512xf32>, i32 -> vector<16x512xf32>
    %217 = vector.broadcast %33 : vector<1x512xf32> to vector<16x512xf32>
    %218 = arith.mulf %216, %217 : vector<16x512xf32>
    %219 = arith.truncf %218 : vector<16x512xf32> to vector<16x512xbf16>
    %c544 = arith.constant 544 : index
    %c0_88 = arith.constant 0 : index
    %220 = vector.load %arg8[%c544, %c0_88] : memref<784x512xbf16, #tpu.memory_space<vmem>>, vector<16x512xbf16>
    tpu.vector_store %arg8[%c544, %c0_88], %219 {strides = array<i32>} : memref<784x512xbf16, #tpu.memory_space<vmem>>, vector<16x512xbf16>,
    %c483_i32 = arith.constant 483 : i32
    %221 = tpu.dynamic_rotate %48 by %c483_i32 dim 1 : vector<16x512xf32>, i32 -> vector<16x512xf32>
    %222 = vector.broadcast %34 : vector<1x512xf32> to vector<16x512xf32>
    %223 = arith.mulf %221, %222 : vector<16x512xf32>
    %224 = arith.truncf %223 : vector<16x512xf32> to vector<16x512xbf16>
    %c560 = arith.constant 560 : index
    %c0_89 = arith.constant 0 : index
    %225 = vector.load %arg8[%c560, %c0_89] : memref<784x512xbf16, #tpu.memory_space<vmem>>, vector<16x512xbf16>
    tpu.vector_store %arg8[%c560, %c0_89], %224 {strides = array<i32>} : memref<784x512xbf16, #tpu.memory_space<vmem>>, vector<16x512xbf16>,
    %c482_i32 = arith.constant 482 : i32
    %226 = tpu.dynamic_rotate %48 by %c482_i32 dim 1 : vector<16x512xf32>, i32 -> vector<16x512xf32>
    %227 = vector.broadcast %35 : vector<1x512xf32> to vector<16x512xf32>
    %228 = arith.mulf %226, %227 : vector<16x512xf32>
    %229 = arith.truncf %228 : vector<16x512xf32> to vector<16x512xbf16>
    %c576 = arith.constant 576 : index
    %c0_90 = arith.constant 0 : index
    %230 = vector.load %arg8[%c576, %c0_90] : memref<784x512xbf16, #tpu.memory_space<vmem>>, vector<16x512xbf16>
    tpu.vector_store %arg8[%c576, %c0_90], %229 {strides = array<i32>} : memref<784x512xbf16, #tpu.memory_space<vmem>>, vector<16x512xbf16>,
    %c481_i32 = arith.constant 481 : i32
    %231 = tpu.dynamic_rotate %48 by %c481_i32 dim 1 : vector<16x512xf32>, i32 -> vector<16x512xf32>
    %232 = vector.broadcast %36 : vector<1x512xf32> to vector<16x512xf32>
    %233 = arith.mulf %231, %232 : vector<16x512xf32>
    %234 = arith.truncf %233 : vector<16x512xf32> to vector<16x512xbf16>
    %c592 = arith.constant 592 : index
    %c0_91 = arith.constant 0 : index
    %235 = vector.load %arg8[%c592, %c0_91] : memref<784x512xbf16, #tpu.memory_space<vmem>>, vector<16x512xbf16>
    tpu.vector_store %arg8[%c592, %c0_91], %234 {strides = array<i32>} : memref<784x512xbf16, #tpu.memory_space<vmem>>, vector<16x512xbf16>,
    %c480_i32 = arith.constant 480 : i32
    %236 = tpu.dynamic_rotate %48 by %c480_i32 dim 1 : vector<16x512xf32>, i32 -> vector<16x512xf32>
    %237 = vector.broadcast %37 : vector<1x512xf32> to vector<16x512xf32>
    %238 = arith.mulf %236, %237 : vector<16x512xf32>
    %239 = arith.truncf %238 : vector<16x512xf32> to vector<16x512xbf16>
    %c608 = arith.constant 608 : index
    %c0_92 = arith.constant 0 : index
    %240 = vector.load %arg8[%c608, %c0_92] : memref<784x512xbf16, #tpu.memory_space<vmem>>, vector<16x512xbf16>
    tpu.vector_store %arg8[%c608, %c0_92], %239 {strides = array<i32>} : memref<784x512xbf16, #tpu.memory_space<vmem>>, vector<16x512xbf16>,
    %c479_i32 = arith.constant 479 : i32
    %241 = tpu.dynamic_rotate %48 by %c479_i32 dim 1 : vector<16x512xf32>, i32 -> vector<16x512xf32>
    %242 = vector.broadcast %38 : vector<1x512xf32> to vector<16x512xf32>
    %243 = arith.mulf %241, %242 : vector<16x512xf32>
    %244 = arith.truncf %243 : vector<16x512xf32> to vector<16x512xbf16>
    %c624 = arith.constant 624 : index
    %c0_93 = arith.constant 0 : index
    %245 = vector.load %arg8[%c624, %c0_93] : memref<784x512xbf16, #tpu.memory_space<vmem>>, vector<16x512xbf16>
    tpu.vector_store %arg8[%c624, %c0_93], %244 {strides = array<i32>} : memref<784x512xbf16, #tpu.memory_space<vmem>>, vector<16x512xbf16>,
    %c478_i32 = arith.constant 478 : i32
    %246 = tpu.dynamic_rotate %48 by %c478_i32 dim 1 : vector<16x512xf32>, i32 -> vector<16x512xf32>
    %247 = vector.broadcast %39 : vector<1x512xf32> to vector<16x512xf32>
    %248 = arith.mulf %246, %247 : vector<16x512xf32>
    %249 = arith.truncf %248 : vector<16x512xf32> to vector<16x512xbf16>
    %c640 = arith.constant 640 : index
    %c0_94 = arith.constant 0 : index
    %250 = vector.load %arg8[%c640, %c0_94] : memref<784x512xbf16, #tpu.memory_space<vmem>>, vector<16x512xbf16>
    tpu.vector_store %arg8[%c640, %c0_94], %249 {strides = array<i32>} : memref<784x512xbf16, #tpu.memory_space<vmem>>, vector<16x512xbf16>,
    %c477_i32 = arith.constant 477 : i32
    %251 = tpu.dynamic_rotate %48 by %c477_i32 dim 1 : vector<16x512xf32>, i32 -> vector<16x512xf32>
    %252 = vector.broadcast %40 : vector<1x512xf32> to vector<16x512xf32>
    %253 = arith.mulf %251, %252 : vector<16x512xf32>
    %254 = arith.truncf %253 : vector<16x512xf32> to vector<16x512xbf16>
    %c656 = arith.constant 656 : index
    %c0_95 = arith.constant 0 : index
    %255 = vector.load %arg8[%c656, %c0_95] : memref<784x512xbf16, #tpu.memory_space<vmem>>, vector<16x512xbf16>
    tpu.vector_store %arg8[%c656, %c0_95], %254 {strides = array<i32>} : memref<784x512xbf16, #tpu.memory_space<vmem>>, vector<16x512xbf16>,
    %c467_i32 = arith.constant 467 : i32
    %256 = tpu.dynamic_rotate %48 by %c467_i32 dim 1 : vector<16x512xf32>, i32 -> vector<16x512xf32>
    %257 = vector.broadcast %41 : vector<1x512xf32> to vector<16x512xf32>
    %258 = arith.mulf %256, %257 : vector<16x512xf32>
    %259 = arith.truncf %258 : vector<16x512xf32> to vector<16x512xbf16>
    %c672 = arith.constant 672 : index
    %c0_96 = arith.constant 0 : index
    %260 = vector.load %arg8[%c672, %c0_96] : memref<784x512xbf16, #tpu.memory_space<vmem>>, vector<16x512xbf16>
    tpu.vector_store %arg8[%c672, %c0_96], %259 {strides = array<i32>} : memref<784x512xbf16, #tpu.memory_space<vmem>>, vector<16x512xbf16>,
    %c466_i32 = arith.constant 466 : i32
    %261 = tpu.dynamic_rotate %48 by %c466_i32 dim 1 : vector<16x512xf32>, i32 -> vector<16x512xf32>
    %262 = vector.broadcast %42 : vector<1x512xf32> to vector<16x512xf32>
    %263 = arith.mulf %261, %262 : vector<16x512xf32>
    %264 = arith.truncf %263 : vector<16x512xf32> to vector<16x512xbf16>
    %c688 = arith.constant 688 : index
    %c0_97 = arith.constant 0 : index
    %265 = vector.load %arg8[%c688, %c0_97] : memref<784x512xbf16, #tpu.memory_space<vmem>>, vector<16x512xbf16>
    tpu.vector_store %arg8[%c688, %c0_97], %264 {strides = array<i32>} : memref<784x512xbf16, #tpu.memory_space<vmem>>, vector<16x512xbf16>,
    %c465_i32 = arith.constant 465 : i32
    %266 = tpu.dynamic_rotate %48 by %c465_i32 dim 1 : vector<16x512xf32>, i32 -> vector<16x512xf32>
    %267 = vector.broadcast %43 : vector<1x512xf32> to vector<16x512xf32>
    %268 = arith.mulf %266, %267 : vector<16x512xf32>
    %269 = arith.truncf %268 : vector<16x512xf32> to vector<16x512xbf16>
    %c704 = arith.constant 704 : index
    %c0_98 = arith.constant 0 : index
    %270 = vector.load %arg8[%c704, %c0_98] : memref<784x512xbf16, #tpu.memory_space<vmem>>, vector<16x512xbf16>
    tpu.vector_store %arg8[%c704, %c0_98], %269 {strides = array<i32>} : memref<784x512xbf16, #tpu.memory_space<vmem>>, vector<16x512xbf16>,
    %c464_i32 = arith.constant 464 : i32
    %271 = tpu.dynamic_rotate %48 by %c464_i32 dim 1 : vector<16x512xf32>, i32 -> vector<16x512xf32>
    %272 = vector.broadcast %44 : vector<1x512xf32> to vector<16x512xf32>
    %273 = arith.mulf %271, %272 : vector<16x512xf32>
    %274 = arith.truncf %273 : vector<16x512xf32> to vector<16x512xbf16>
    %c720 = arith.constant 720 : index
    %c0_99 = arith.constant 0 : index
    %275 = vector.load %arg8[%c720, %c0_99] : memref<784x512xbf16, #tpu.memory_space<vmem>>, vector<16x512xbf16>
    tpu.vector_store %arg8[%c720, %c0_99], %274 {strides = array<i32>} : memref<784x512xbf16, #tpu.memory_space<vmem>>, vector<16x512xbf16>,
    %c463_i32 = arith.constant 463 : i32
    %276 = tpu.dynamic_rotate %48 by %c463_i32 dim 1 : vector<16x512xf32>, i32 -> vector<16x512xf32>
    %277 = vector.broadcast %45 : vector<1x512xf32> to vector<16x512xf32>
    %278 = arith.mulf %276, %277 : vector<16x512xf32>
    %279 = arith.truncf %278 : vector<16x512xf32> to vector<16x512xbf16>
    %c736 = arith.constant 736 : index
    %c0_100 = arith.constant 0 : index
    %280 = vector.load %arg8[%c736, %c0_100] : memref<784x512xbf16, #tpu.memory_space<vmem>>, vector<16x512xbf16>
    tpu.vector_store %arg8[%c736, %c0_100], %279 {strides = array<i32>} : memref<784x512xbf16, #tpu.memory_space<vmem>>, vector<16x512xbf16>,
    %c462_i32 = arith.constant 462 : i32
    %281 = tpu.dynamic_rotate %48 by %c462_i32 dim 1 : vector<16x512xf32>, i32 -> vector<16x512xf32>
    %282 = vector.broadcast %46 : vector<1x512xf32> to vector<16x512xf32>
    %283 = arith.mulf %281, %282 : vector<16x512xf32>
    %284 = arith.truncf %283 : vector<16x512xf32> to vector<16x512xbf16>
    %c752 = arith.constant 752 : index
    %c0_101 = arith.constant 0 : index
    %285 = vector.load %arg8[%c752, %c0_101] : memref<784x512xbf16, #tpu.memory_space<vmem>>, vector<16x512xbf16>
    tpu.vector_store %arg8[%c752, %c0_101], %284 {strides = array<i32>} : memref<784x512xbf16, #tpu.memory_space<vmem>>, vector<16x512xbf16>,
    %c461_i32 = arith.constant 461 : i32
    %286 = tpu.dynamic_rotate %48 by %c461_i32 dim 1 : vector<16x512xf32>, i32 -> vector<16x512xf32>
    %287 = vector.broadcast %47 : vector<1x512xf32> to vector<16x512xf32>
    %288 = arith.mulf %286, %287 : vector<16x512xf32>
    %289 = arith.truncf %288 : vector<16x512xf32> to vector<16x512xbf16>
    %c768 = arith.constant 768 : index
    %c0_102 = arith.constant 0 : index
    %290 = vector.load %arg8[%c768, %c0_102] : memref<784x512xbf16, #tpu.memory_space<vmem>>, vector<16x512xbf16>
    tpu.vector_store %arg8[%c768, %c0_102], %289 {strides = array<i32>} : memref<784x512xbf16, #tpu.memory_space<vmem>>, vector<16x512xbf16>,
    %c0_103 = arith.constant 0 : index
    %c0_104 = arith.constant 0 : index
    %291 = vector.load %arg2[%c0_103, %c0_104] : memref<16x784xbf16, #tpu.memory_space<vmem>>, vector<16x784xbf16>
    %c0_105 = arith.constant 0 : index
    %c0_106 = arith.constant 0 : index
    %292 = vector.load %arg8[%c0_105, %c0_106] : memref<784x512xbf16, #tpu.memory_space<vmem>>, vector<784x512xbf16>
    %cst = arith.constant dense<0.000000e+00> : vector<16x512xf32>
    %293 = tpu.matmul %291, %292, %cst {dimension_numbers = #tpu.dot_dimension_numbers<[1], [0], [0], [1], [0, 0, 1, 1], [], []>} : vector<16x784xbf16>, vector<784x512xbf16>, vector<16x512xf32> -> vector<16x512xf32>
    %cst_107 = arith.constant 0.000000e+00 : f32
    %294 = vector.broadcast %cst_107 : f32 to vector<16x512xf32>
    %295 = arith.cmpf ogt, %293, %294 : vector<16x512xf32>
    %cst_108 = arith.constant 0.00999999977 : f32
    %296 = vector.broadcast %cst_108 : f32 to vector<16x512xf32>
    %297 = arith.mulf %296, %293 : vector<16x512xf32>
    %298 = arith.select %295, %293, %297 : vector<16x512xi1>, vector<16x512xf32>
    %c51_i32_109 = arith.constant 51 : i32
    %299 = tpu.dynamic_rotate %298 by %c51_i32_109 dim 1 : vector<16x512xf32>, i32 -> vector<16x512xf32>
    %300 = vector.broadcast %0 : vector<1x512xf32> to vector<16x512xf32>
    %301 = arith.mulf %299, %300 : vector<16x512xf32>
    %302 = arith.truncf %301 : vector<16x512xf32> to vector<16x512xbf16>
    %c0_110 = arith.constant 0 : index
    %c0_111 = arith.constant 0 : index
    %303 = vector.load %arg8[%c0_110, %c0_111] : memref<784x512xbf16, #tpu.memory_space<vmem>>, vector<16x512xbf16>
    tpu.vector_store %arg8[%c0_110, %c0_111], %302 {strides = array<i32>} : memref<784x512xbf16, #tpu.memory_space<vmem>>, vector<16x512xbf16>,
    %c50_i32_112 = arith.constant 50 : i32
    %304 = tpu.dynamic_rotate %298 by %c50_i32_112 dim 1 : vector<16x512xf32>, i32 -> vector<16x512xf32>
    %305 = vector.broadcast %1 : vector<1x512xf32> to vector<16x512xf32>
    %306 = arith.mulf %304, %305 : vector<16x512xf32>
    %307 = arith.truncf %306 : vector<16x512xf32> to vector<16x512xbf16>
    %c16_113 = arith.constant 16 : index
    %c0_114 = arith.constant 0 : index
    %308 = vector.load %arg8[%c16_113, %c0_114] : memref<784x512xbf16, #tpu.memory_space<vmem>>, vector<16x512xbf16>
    tpu.vector_store %arg8[%c16_113, %c0_114], %307 {strides = array<i32>} : memref<784x512xbf16, #tpu.memory_space<vmem>>, vector<16x512xbf16>,
    %c49_i32_115 = arith.constant 49 : i32
    %309 = tpu.dynamic_rotate %298 by %c49_i32_115 dim 1 : vector<16x512xf32>, i32 -> vector<16x512xf32>
    %310 = vector.broadcast %2 : vector<1x512xf32> to vector<16x512xf32>
    %311 = arith.mulf %309, %310 : vector<16x512xf32>
    %312 = arith.truncf %311 : vector<16x512xf32> to vector<16x512xbf16>
    %c32_116 = arith.constant 32 : index
    %c0_117 = arith.constant 0 : index
    %313 = vector.load %arg8[%c32_116, %c0_117] : memref<784x512xbf16, #tpu.memory_space<vmem>>, vector<16x512xbf16>
    tpu.vector_store %arg8[%c32_116, %c0_117], %312 {strides = array<i32>} : memref<784x512xbf16, #tpu.memory_space<vmem>>, vector<16x512xbf16>,
    %c48_i32_118 = arith.constant 48 : i32
    %314 = tpu.dynamic_rotate %298 by %c48_i32_118 dim 1 : vector<16x512xf32>, i32 -> vector<16x512xf32>
    %315 = vector.broadcast %3 : vector<1x512xf32> to vector<16x512xf32>
    %316 = arith.mulf %314, %315 : vector<16x512xf32>
    %317 = arith.truncf %316 : vector<16x512xf32> to vector<16x512xbf16>
    %c48_119 = arith.constant 48 : index
    %c0_120 = arith.constant 0 : index
    %318 = vector.load %arg8[%c48_119, %c0_120] : memref<784x512xbf16, #tpu.memory_space<vmem>>, vector<16x512xbf16>
    tpu.vector_store %arg8[%c48_119, %c0_120], %317 {strides = array<i32>} : memref<784x512xbf16, #tpu.memory_space<vmem>>, vector<16x512xbf16>,
    %c47_i32_121 = arith.constant 47 : i32
    %319 = tpu.dynamic_rotate %298 by %c47_i32_121 dim 1 : vector<16x512xf32>, i32 -> vector<16x512xf32>
    %320 = vector.broadcast %4 : vector<1x512xf32> to vector<16x512xf32>
    %321 = arith.mulf %319, %320 : vector<16x512xf32>
    %322 = arith.truncf %321 : vector<16x512xf32> to vector<16x512xbf16>
    %c64_122 = arith.constant 64 : index
    %c0_123 = arith.constant 0 : index
    %323 = vector.load %arg8[%c64_122, %c0_123] : memref<784x512xbf16, #tpu.memory_space<vmem>>, vector<16x512xbf16>
    tpu.vector_store %arg8[%c64_122, %c0_123], %322 {strides = array<i32>} : memref<784x512xbf16, #tpu.memory_space<vmem>>, vector<16x512xbf16>,
    %c46_i32_124 = arith.constant 46 : i32
    %324 = tpu.dynamic_rotate %298 by %c46_i32_124 dim 1 : vector<16x512xf32>, i32 -> vector<16x512xf32>
    %325 = vector.broadcast %5 : vector<1x512xf32> to vector<16x512xf32>
    %326 = arith.mulf %324, %325 : vector<16x512xf32>
    %327 = arith.truncf %326 : vector<16x512xf32> to vector<16x512xbf16>
    %c80_125 = arith.constant 80 : index
    %c0_126 = arith.constant 0 : index
    %328 = vector.load %arg8[%c80_125, %c0_126] : memref<784x512xbf16, #tpu.memory_space<vmem>>, vector<16x512xbf16>
    tpu.vector_store %arg8[%c80_125, %c0_126], %327 {strides = array<i32>} : memref<784x512xbf16, #tpu.memory_space<vmem>>, vector<16x512xbf16>,
    %c45_i32_127 = arith.constant 45 : i32
    %329 = tpu.dynamic_rotate %298 by %c45_i32_127 dim 1 : vector<16x512xf32>, i32 -> vector<16x512xf32>
    %330 = vector.broadcast %6 : vector<1x512xf32> to vector<16x512xf32>
    %331 = arith.mulf %329, %330 : vector<16x512xf32>
    %332 = arith.truncf %331 : vector<16x512xf32> to vector<16x512xbf16>
    %c96_128 = arith.constant 96 : index
    %c0_129 = arith.constant 0 : index
    %333 = vector.load %arg8[%c96_128, %c0_129] : memref<784x512xbf16, #tpu.memory_space<vmem>>, vector<16x512xbf16>
    tpu.vector_store %arg8[%c96_128, %c0_129], %332 {strides = array<i32>} : memref<784x512xbf16, #tpu.memory_space<vmem>>, vector<16x512xbf16>,
    %c35_i32_130 = arith.constant 35 : i32
    %334 = tpu.dynamic_rotate %298 by %c35_i32_130 dim 1 : vector<16x512xf32>, i32 -> vector<16x512xf32>
    %335 = vector.broadcast %7 : vector<1x512xf32> to vector<16x512xf32>
    %336 = arith.mulf %334, %335 : vector<16x512xf32>
    %337 = arith.truncf %336 : vector<16x512xf32> to vector<16x512xbf16>
    %c112_131 = arith.constant 112 : index
    %c0_132 = arith.constant 0 : index
    %338 = vector.load %arg8[%c112_131, %c0_132] : memref<784x512xbf16, #tpu.memory_space<vmem>>, vector<16x512xbf16>
    tpu.vector_store %arg8[%c112_131, %c0_132], %337 {strides = array<i32>} : memref<784x512xbf16, #tpu.memory_space<vmem>>, vector<16x512xbf16>,
    %c34_i32_133 = arith.constant 34 : i32
    %339 = tpu.dynamic_rotate %298 by %c34_i32_133 dim 1 : vector<16x512xf32>, i32 -> vector<16x512xf32>
    %340 = vector.broadcast %8 : vector<1x512xf32> to vector<16x512xf32>
    %341 = arith.mulf %339, %340 : vector<16x512xf32>
    %342 = arith.truncf %341 : vector<16x512xf32> to vector<16x512xbf16>
    %c128_134 = arith.constant 128 : index
    %c0_135 = arith.constant 0 : index
    %343 = vector.load %arg8[%c128_134, %c0_135] : memref<784x512xbf16, #tpu.memory_space<vmem>>, vector<16x512xbf16>
    tpu.vector_store %arg8[%c128_134, %c0_135], %342 {strides = array<i32>} : memref<784x512xbf16, #tpu.memory_space<vmem>>, vector<16x512xbf16>,
    %c33_i32_136 = arith.constant 33 : i32
    %344 = tpu.dynamic_rotate %298 by %c33_i32_136 dim 1 : vector<16x512xf32>, i32 -> vector<16x512xf32>
    %345 = vector.broadcast %9 : vector<1x512xf32> to vector<16x512xf32>
    %346 = arith.mulf %344, %345 : vector<16x512xf32>
    %347 = arith.truncf %346 : vector<16x512xf32> to vector<16x512xbf16>
    %c144_137 = arith.constant 144 : index
    %c0_138 = arith.constant 0 : index
    %348 = vector.load %arg8[%c144_137, %c0_138] : memref<784x512xbf16, #tpu.memory_space<vmem>>, vector<16x512xbf16>
    tpu.vector_store %arg8[%c144_137, %c0_138], %347 {strides = array<i32>} : memref<784x512xbf16, #tpu.memory_space<vmem>>, vector<16x512xbf16>,
    %c32_i32_139 = arith.constant 32 : i32
    %349 = tpu.dynamic_rotate %298 by %c32_i32_139 dim 1 : vector<16x512xf32>, i32 -> vector<16x512xf32>
    %350 = vector.broadcast %10 : vector<1x512xf32> to vector<16x512xf32>
    %351 = arith.mulf %349, %350 : vector<16x512xf32>
    %352 = arith.truncf %351 : vector<16x512xf32> to vector<16x512xbf16>
    %c160_140 = arith.constant 160 : index
    %c0_141 = arith.constant 0 : index
    %353 = vector.load %arg8[%c160_140, %c0_141] : memref<784x512xbf16, #tpu.memory_space<vmem>>, vector<16x512xbf16>
    tpu.vector_store %arg8[%c160_140, %c0_141], %352 {strides = array<i32>} : memref<784x512xbf16, #tpu.memory_space<vmem>>, vector<16x512xbf16>,
    %c31_i32_142 = arith.constant 31 : i32
    %354 = tpu.dynamic_rotate %298 by %c31_i32_142 dim 1 : vector<16x512xf32>, i32 -> vector<16x512xf32>
    %355 = vector.broadcast %11 : vector<1x512xf32> to vector<16x512xf32>
    %356 = arith.mulf %354, %355 : vector<16x512xf32>
    %357 = arith.truncf %356 : vector<16x512xf32> to vector<16x512xbf16>
    %c176_143 = arith.constant 176 : index
    %c0_144 = arith.constant 0 : index
    %358 = vector.load %arg8[%c176_143, %c0_144] : memref<784x512xbf16, #tpu.memory_space<vmem>>, vector<16x512xbf16>
    tpu.vector_store %arg8[%c176_143, %c0_144], %357 {strides = array<i32>} : memref<784x512xbf16, #tpu.memory_space<vmem>>, vector<16x512xbf16>,
    %c30_i32_145 = arith.constant 30 : i32
    %359 = tpu.dynamic_rotate %298 by %c30_i32_145 dim 1 : vector<16x512xf32>, i32 -> vector<16x512xf32>
    %360 = vector.broadcast %12 : vector<1x512xf32> to vector<16x512xf32>
    %361 = arith.mulf %359, %360 : vector<16x512xf32>
    %362 = arith.truncf %361 : vector<16x512xf32> to vector<16x512xbf16>
    %c192_146 = arith.constant 192 : index
    %c0_147 = arith.constant 0 : index
    %363 = vector.load %arg8[%c192_146, %c0_147] : memref<784x512xbf16, #tpu.memory_space<vmem>>, vector<16x512xbf16>
    tpu.vector_store %arg8[%c192_146, %c0_147], %362 {strides = array<i32>} : memref<784x512xbf16, #tpu.memory_space<vmem>>, vector<16x512xbf16>,
    %c29_i32_148 = arith.constant 29 : i32
    %364 = tpu.dynamic_rotate %298 by %c29_i32_148 dim 1 : vector<16x512xf32>, i32 -> vector<16x512xf32>
    %365 = vector.broadcast %13 : vector<1x512xf32> to vector<16x512xf32>
    %366 = arith.mulf %364, %365 : vector<16x512xf32>
    %367 = arith.truncf %366 : vector<16x512xf32> to vector<16x512xbf16>
    %c208_149 = arith.constant 208 : index
    %c0_150 = arith.constant 0 : index
    %368 = vector.load %arg8[%c208_149, %c0_150] : memref<784x512xbf16, #tpu.memory_space<vmem>>, vector<16x512xbf16>
    tpu.vector_store %arg8[%c208_149, %c0_150], %367 {strides = array<i32>} : memref<784x512xbf16, #tpu.memory_space<vmem>>, vector<16x512xbf16>,
    %c19_i32_151 = arith.constant 19 : i32
    %369 = tpu.dynamic_rotate %298 by %c19_i32_151 dim 1 : vector<16x512xf32>, i32 -> vector<16x512xf32>
    %370 = vector.broadcast %14 : vector<1x512xf32> to vector<16x512xf32>
    %371 = arith.mulf %369, %370 : vector<16x512xf32>
    %372 = arith.truncf %371 : vector<16x512xf32> to vector<16x512xbf16>
    %c224_152 = arith.constant 224 : index
    %c0_153 = arith.constant 0 : index
    %373 = vector.load %arg8[%c224_152, %c0_153] : memref<784x512xbf16, #tpu.memory_space<vmem>>, vector<16x512xbf16>
    tpu.vector_store %arg8[%c224_152, %c0_153], %372 {strides = array<i32>} : memref<784x512xbf16, #tpu.memory_space<vmem>>, vector<16x512xbf16>,
    %c18_i32_154 = arith.constant 18 : i32
    %374 = tpu.dynamic_rotate %298 by %c18_i32_154 dim 1 : vector<16x512xf32>, i32 -> vector<16x512xf32>
    %375 = vector.broadcast %15 : vector<1x512xf32> to vector<16x512xf32>
    %376 = arith.mulf %374, %375 : vector<16x512xf32>
    %377 = arith.truncf %376 : vector<16x512xf32> to vector<16x512xbf16>
    %c240_155 = arith.constant 240 : index
    %c0_156 = arith.constant 0 : index
    %378 = vector.load %arg8[%c240_155, %c0_156] : memref<784x512xbf16, #tpu.memory_space<vmem>>, vector<16x512xbf16>
    tpu.vector_store %arg8[%c240_155, %c0_156], %377 {strides = array<i32>} : memref<784x512xbf16, #tpu.memory_space<vmem>>, vector<16x512xbf16>,
    %c17_i32_157 = arith.constant 17 : i32
    %379 = tpu.dynamic_rotate %298 by %c17_i32_157 dim 1 : vector<16x512xf32>, i32 -> vector<16x512xf32>
    %380 = vector.broadcast %16 : vector<1x512xf32> to vector<16x512xf32>
    %381 = arith.mulf %379, %380 : vector<16x512xf32>
    %382 = arith.truncf %381 : vector<16x512xf32> to vector<16x512xbf16>
    %c256_158 = arith.constant 256 : index
    %c0_159 = arith.constant 0 : index
    %383 = vector.load %arg8[%c256_158, %c0_159] : memref<784x512xbf16, #tpu.memory_space<vmem>>, vector<16x512xbf16>
    tpu.vector_store %arg8[%c256_158, %c0_159], %382 {strides = array<i32>} : memref<784x512xbf16, #tpu.memory_space<vmem>>, vector<16x512xbf16>,
    %c16_i32_160 = arith.constant 16 : i32
    %384 = tpu.dynamic_rotate %298 by %c16_i32_160 dim 1 : vector<16x512xf32>, i32 -> vector<16x512xf32>
    %385 = vector.broadcast %17 : vector<1x512xf32> to vector<16x512xf32>
    %386 = arith.mulf %384, %385 : vector<16x512xf32>
    %387 = arith.truncf %386 : vector<16x512xf32> to vector<16x512xbf16>
    %c272_161 = arith.constant 272 : index
    %c0_162 = arith.constant 0 : index
    %388 = vector.load %arg8[%c272_161, %c0_162] : memref<784x512xbf16, #tpu.memory_space<vmem>>, vector<16x512xbf16>
    tpu.vector_store %arg8[%c272_161, %c0_162], %387 {strides = array<i32>} : memref<784x512xbf16, #tpu.memory_space<vmem>>, vector<16x512xbf16>,
    %c15_i32_163 = arith.constant 15 : i32
    %389 = tpu.dynamic_rotate %298 by %c15_i32_163 dim 1 : vector<16x512xf32>, i32 -> vector<16x512xf32>
    %390 = vector.broadcast %18 : vector<1x512xf32> to vector<16x512xf32>
    %391 = arith.mulf %389, %390 : vector<16x512xf32>
    %392 = arith.truncf %391 : vector<16x512xf32> to vector<16x512xbf16>
    %c288_164 = arith.constant 288 : index
    %c0_165 = arith.constant 0 : index
    %393 = vector.load %arg8[%c288_164, %c0_165] : memref<784x512xbf16, #tpu.memory_space<vmem>>, vector<16x512xbf16>
    tpu.vector_store %arg8[%c288_164, %c0_165], %392 {strides = array<i32>} : memref<784x512xbf16, #tpu.memory_space<vmem>>, vector<16x512xbf16>,
    %c14_i32_166 = arith.constant 14 : i32
    %394 = tpu.dynamic_rotate %298 by %c14_i32_166 dim 1 : vector<16x512xf32>, i32 -> vector<16x512xf32>
    %395 = vector.broadcast %19 : vector<1x512xf32> to vector<16x512xf32>
    %396 = arith.mulf %394, %395 : vector<16x512xf32>
    %397 = arith.truncf %396 : vector<16x512xf32> to vector<16x512xbf16>
    %c304_167 = arith.constant 304 : index
    %c0_168 = arith.constant 0 : index
    %398 = vector.load %arg8[%c304_167, %c0_168] : memref<784x512xbf16, #tpu.memory_space<vmem>>, vector<16x512xbf16>
    tpu.vector_store %arg8[%c304_167, %c0_168], %397 {strides = array<i32>} : memref<784x512xbf16, #tpu.memory_space<vmem>>, vector<16x512xbf16>,
    %c13_i32_169 = arith.constant 13 : i32
    %399 = tpu.dynamic_rotate %298 by %c13_i32_169 dim 1 : vector<16x512xf32>, i32 -> vector<16x512xf32>
    %400 = vector.broadcast %20 : vector<1x512xf32> to vector<16x512xf32>
    %401 = arith.mulf %399, %400 : vector<16x512xf32>
    %402 = arith.truncf %401 : vector<16x512xf32> to vector<16x512xbf16>
    %c320_170 = arith.constant 320 : index
    %c0_171 = arith.constant 0 : index
    %403 = vector.load %arg8[%c320_170, %c0_171] : memref<784x512xbf16, #tpu.memory_space<vmem>>, vector<16x512xbf16>
    tpu.vector_store %arg8[%c320_170, %c0_171], %402 {strides = array<i32>} : memref<784x512xbf16, #tpu.memory_space<vmem>>, vector<16x512xbf16>,
    %c3_i32_172 = arith.constant 3 : i32
    %404 = tpu.dynamic_rotate %298 by %c3_i32_172 dim 1 : vector<16x512xf32>, i32 -> vector<16x512xf32>
    %405 = vector.broadcast %21 : vector<1x512xf32> to vector<16x512xf32>
    %406 = arith.mulf %404, %405 : vector<16x512xf32>
    %407 = arith.truncf %406 : vector<16x512xf32> to vector<16x512xbf16>
    %c336_173 = arith.constant 336 : index
    %c0_174 = arith.constant 0 : index
    %408 = vector.load %arg8[%c336_173, %c0_174] : memref<784x512xbf16, #tpu.memory_space<vmem>>, vector<16x512xbf16>
    tpu.vector_store %arg8[%c336_173, %c0_174], %407 {strides = array<i32>} : memref<784x512xbf16, #tpu.memory_space<vmem>>, vector<16x512xbf16>,
    %c2_i32_175 = arith.constant 2 : i32
    %409 = tpu.dynamic_rotate %298 by %c2_i32_175 dim 1 : vector<16x512xf32>, i32 -> vector<16x512xf32>
    %410 = vector.broadcast %22 : vector<1x512xf32> to vector<16x512xf32>
    %411 = arith.mulf %409, %410 : vector<16x512xf32>
    %412 = arith.truncf %411 : vector<16x512xf32> to vector<16x512xbf16>
    %c352_176 = arith.constant 352 : index
    %c0_177 = arith.constant 0 : index
    %413 = vector.load %arg8[%c352_176, %c0_177] : memref<784x512xbf16, #tpu.memory_space<vmem>>, vector<16x512xbf16>
    tpu.vector_store %arg8[%c352_176, %c0_177], %412 {strides = array<i32>} : memref<784x512xbf16, #tpu.memory_space<vmem>>, vector<16x512xbf16>,
    %c1_i32_178 = arith.constant 1 : i32
    %414 = tpu.dynamic_rotate %298 by %c1_i32_178 dim 1 : vector<16x512xf32>, i32 -> vector<16x512xf32>
    %415 = vector.broadcast %23 : vector<1x512xf32> to vector<16x512xf32>
    %416 = arith.mulf %414, %415 : vector<16x512xf32>
    %417 = arith.truncf %416 : vector<16x512xf32> to vector<16x512xbf16>
    %c368_179 = arith.constant 368 : index
    %c0_180 = arith.constant 0 : index
    %418 = vector.load %arg8[%c368_179, %c0_180] : memref<784x512xbf16, #tpu.memory_space<vmem>>, vector<16x512xbf16>
    tpu.vector_store %arg8[%c368_179, %c0_180], %417 {strides = array<i32>} : memref<784x512xbf16, #tpu.memory_space<vmem>>, vector<16x512xbf16>,
    %419 = arith.truncf %298 : vector<16x512xf32> to vector<16x512xbf16>
    %c384_181 = arith.constant 384 : index
    %c0_182 = arith.constant 0 : index
    %420 = vector.load %arg8[%c384_181, %c0_182] : memref<784x512xbf16, #tpu.memory_space<vmem>>, vector<16x512xbf16>
    tpu.vector_store %arg8[%c384_181, %c0_182], %419 {strides = array<i32>} : memref<784x512xbf16, #tpu.memory_space<vmem>>, vector<16x512xbf16>,
    %c511_i32_183 = arith.constant 511 : i32
    %421 = tpu.dynamic_rotate %298 by %c511_i32_183 dim 1 : vector<16x512xf32>, i32 -> vector<16x512xf32>
    %422 = vector.broadcast %24 : vector<1x512xf32> to vector<16x512xf32>
    %423 = arith.mulf %421, %422 : vector<16x512xf32>
    %424 = arith.truncf %423 : vector<16x512xf32> to vector<16x512xbf16>
    %c400_184 = arith.constant 400 : index
    %c0_185 = arith.constant 0 : index
    %425 = vector.load %arg8[%c400_184, %c0_185] : memref<784x512xbf16, #tpu.memory_space<vmem>>, vector<16x512xbf16>
    tpu.vector_store %arg8[%c400_184, %c0_185], %424 {strides = array<i32>} : memref<784x512xbf16, #tpu.memory_space<vmem>>, vector<16x512xbf16>,
    %c510_i32_186 = arith.constant 510 : i32
    %426 = tpu.dynamic_rotate %298 by %c510_i32_186 dim 1 : vector<16x512xf32>, i32 -> vector<16x512xf32>
    %427 = vector.broadcast %25 : vector<1x512xf32> to vector<16x512xf32>
    %428 = arith.mulf %426, %427 : vector<16x512xf32>
    %429 = arith.truncf %428 : vector<16x512xf32> to vector<16x512xbf16>
    %c416_187 = arith.constant 416 : index
    %c0_188 = arith.constant 0 : index
    %430 = vector.load %arg8[%c416_187, %c0_188] : memref<784x512xbf16, #tpu.memory_space<vmem>>, vector<16x512xbf16>
    tpu.vector_store %arg8[%c416_187, %c0_188], %429 {strides = array<i32>} : memref<784x512xbf16, #tpu.memory_space<vmem>>, vector<16x512xbf16>,
    %c509_i32_189 = arith.constant 509 : i32
    %431 = tpu.dynamic_rotate %298 by %c509_i32_189 dim 1 : vector<16x512xf32>, i32 -> vector<16x512xf32>
    %432 = vector.broadcast %26 : vector<1x512xf32> to vector<16x512xf32>
    %433 = arith.mulf %431, %432 : vector<16x512xf32>
    %434 = arith.truncf %433 : vector<16x512xf32> to vector<16x512xbf16>
    %c432_190 = arith.constant 432 : index
    %c0_191 = arith.constant 0 : index
    %435 = vector.load %arg8[%c432_190, %c0_191] : memref<784x512xbf16, #tpu.memory_space<vmem>>, vector<16x512xbf16>
    tpu.vector_store %arg8[%c432_190, %c0_191], %434 {strides = array<i32>} : memref<784x512xbf16, #tpu.memory_space<vmem>>, vector<16x512xbf16>,
    %c499_i32_192 = arith.constant 499 : i32
    %436 = tpu.dynamic_rotate %298 by %c499_i32_192 dim 1 : vector<16x512xf32>, i32 -> vector<16x512xf32>
    %437 = vector.broadcast %27 : vector<1x512xf32> to vector<16x512xf32>
    %438 = arith.mulf %436, %437 : vector<16x512xf32>
    %439 = arith.truncf %438 : vector<16x512xf32> to vector<16x512xbf16>
    %c448_193 = arith.constant 448 : index
    %c0_194 = arith.constant 0 : index
    %440 = vector.load %arg8[%c448_193, %c0_194] : memref<784x512xbf16, #tpu.memory_space<vmem>>, vector<16x512xbf16>
    tpu.vector_store %arg8[%c448_193, %c0_194], %439 {strides = array<i32>} : memref<784x512xbf16, #tpu.memory_space<vmem>>, vector<16x512xbf16>,
    %c498_i32_195 = arith.constant 498 : i32
    %441 = tpu.dynamic_rotate %298 by %c498_i32_195 dim 1 : vector<16x512xf32>, i32 -> vector<16x512xf32>
    %442 = vector.broadcast %28 : vector<1x512xf32> to vector<16x512xf32>
    %443 = arith.mulf %441, %442 : vector<16x512xf32>
    %444 = arith.truncf %443 : vector<16x512xf32> to vector<16x512xbf16>
    %c464_196 = arith.constant 464 : index
    %c0_197 = arith.constant 0 : index
    %445 = vector.load %arg8[%c464_196, %c0_197] : memref<784x512xbf16, #tpu.memory_space<vmem>>, vector<16x512xbf16>
    tpu.vector_store %arg8[%c464_196, %c0_197], %444 {strides = array<i32>} : memref<784x512xbf16, #tpu.memory_space<vmem>>, vector<16x512xbf16>,
    %c497_i32_198 = arith.constant 497 : i32
    %446 = tpu.dynamic_rotate %298 by %c497_i32_198 dim 1 : vector<16x512xf32>, i32 -> vector<16x512xf32>
    %447 = vector.broadcast %29 : vector<1x512xf32> to vector<16x512xf32>
    %448 = arith.mulf %446, %447 : vector<16x512xf32>
    %449 = arith.truncf %448 : vector<16x512xf32> to vector<16x512xbf16>
    %c480_199 = arith.constant 480 : index
    %c0_200 = arith.constant 0 : index
    %450 = vector.load %arg8[%c480_199, %c0_200] : memref<784x512xbf16, #tpu.memory_space<vmem>>, vector<16x512xbf16>
    tpu.vector_store %arg8[%c480_199, %c0_200], %449 {strides = array<i32>} : memref<784x512xbf16, #tpu.memory_space<vmem>>, vector<16x512xbf16>,
    %c496_i32_201 = arith.constant 496 : i32
    %451 = tpu.dynamic_rotate %298 by %c496_i32_201 dim 1 : vector<16x512xf32>, i32 -> vector<16x512xf32>
    %452 = vector.broadcast %30 : vector<1x512xf32> to vector<16x512xf32>
    %453 = arith.mulf %451, %452 : vector<16x512xf32>
    %454 = arith.truncf %453 : vector<16x512xf32> to vector<16x512xbf16>
    %c496_202 = arith.constant 496 : index
    %c0_203 = arith.constant 0 : index
    %455 = vector.load %arg8[%c496_202, %c0_203] : memref<784x512xbf16, #tpu.memory_space<vmem>>, vector<16x512xbf16>
    tpu.vector_store %arg8[%c496_202, %c0_203], %454 {strides = array<i32>} : memref<784x512xbf16, #tpu.memory_space<vmem>>, vector<16x512xbf16>,
    %c495_i32_204 = arith.constant 495 : i32
    %456 = tpu.dynamic_rotate %298 by %c495_i32_204 dim 1 : vector<16x512xf32>, i32 -> vector<16x512xf32>
    %457 = vector.broadcast %31 : vector<1x512xf32> to vector<16x512xf32>
    %458 = arith.mulf %456, %457 : vector<16x512xf32>
    %459 = arith.truncf %458 : vector<16x512xf32> to vector<16x512xbf16>
    %c512_205 = arith.constant 512 : index
    %c0_206 = arith.constant 0 : index
    %460 = vector.load %arg8[%c512_205, %c0_206] : memref<784x512xbf16, #tpu.memory_space<vmem>>, vector<16x512xbf16>
    tpu.vector_store %arg8[%c512_205, %c0_206], %459 {strides = array<i32>} : memref<784x512xbf16, #tpu.memory_space<vmem>>, vector<16x512xbf16>,
    %c494_i32_207 = arith.constant 494 : i32
    %461 = tpu.dynamic_rotate %298 by %c494_i32_207 dim 1 : vector<16x512xf32>, i32 -> vector<16x512xf32>
    %462 = vector.broadcast %32 : vector<1x512xf32> to vector<16x512xf32>
    %463 = arith.mulf %461, %462 : vector<16x512xf32>
    %464 = arith.truncf %463 : vector<16x512xf32> to vector<16x512xbf16>
    %c528_208 = arith.constant 528 : index
    %c0_209 = arith.constant 0 : index
    %465 = vector.load %arg8[%c528_208, %c0_209] : memref<784x512xbf16, #tpu.memory_space<vmem>>, vector<16x512xbf16>
    tpu.vector_store %arg8[%c528_208, %c0_209], %464 {strides = array<i32>} : memref<784x512xbf16, #tpu.memory_space<vmem>>, vector<16x512xbf16>,
    %c493_i32_210 = arith.constant 493 : i32
    %466 = tpu.dynamic_rotate %298 by %c493_i32_210 dim 1 : vector<16x512xf32>, i32 -> vector<16x512xf32>
    %467 = vector.broadcast %33 : vector<1x512xf32> to vector<16x512xf32>
    %468 = arith.mulf %466, %467 : vector<16x512xf32>
    %469 = arith.truncf %468 : vector<16x512xf32> to vector<16x512xbf16>
    %c544_211 = arith.constant 544 : index
    %c0_212 = arith.constant 0 : index
    %470 = vector.load %arg8[%c544_211, %c0_212] : memref<784x512xbf16, #tpu.memory_space<vmem>>, vector<16x512xbf16>
    tpu.vector_store %arg8[%c544_211, %c0_212], %469 {strides = array<i32>} : memref<784x512xbf16, #tpu.memory_space<vmem>>, vector<16x512xbf16>,
    %c483_i32_213 = arith.constant 483 : i32
    %471 = tpu.dynamic_rotate %298 by %c483_i32_213 dim 1 : vector<16x512xf32>, i32 -> vector<16x512xf32>
    %472 = vector.broadcast %34 : vector<1x512xf32> to vector<16x512xf32>
    %473 = arith.mulf %471, %472 : vector<16x512xf32>
    %474 = arith.truncf %473 : vector<16x512xf32> to vector<16x512xbf16>
    %c560_214 = arith.constant 560 : index
    %c0_215 = arith.constant 0 : index
    %475 = vector.load %arg8[%c560_214, %c0_215] : memref<784x512xbf16, #tpu.memory_space<vmem>>, vector<16x512xbf16>
    tpu.vector_store %arg8[%c560_214, %c0_215], %474 {strides = array<i32>} : memref<784x512xbf16, #tpu.memory_space<vmem>>, vector<16x512xbf16>,
    %c482_i32_216 = arith.constant 482 : i32
    %476 = tpu.dynamic_rotate %298 by %c482_i32_216 dim 1 : vector<16x512xf32>, i32 -> vector<16x512xf32>
    %477 = vector.broadcast %35 : vector<1x512xf32> to vector<16x512xf32>
    %478 = arith.mulf %476, %477 : vector<16x512xf32>
    %479 = arith.truncf %478 : vector<16x512xf32> to vector<16x512xbf16>
    %c576_217 = arith.constant 576 : index
    %c0_218 = arith.constant 0 : index
    %480 = vector.load %arg8[%c576_217, %c0_218] : memref<784x512xbf16, #tpu.memory_space<vmem>>, vector<16x512xbf16>
    tpu.vector_store %arg8[%c576_217, %c0_218], %479 {strides = array<i32>} : memref<784x512xbf16, #tpu.memory_space<vmem>>, vector<16x512xbf16>,
    %c481_i32_219 = arith.constant 481 : i32
    %481 = tpu.dynamic_rotate %298 by %c481_i32_219 dim 1 : vector<16x512xf32>, i32 -> vector<16x512xf32>
    %482 = vector.broadcast %36 : vector<1x512xf32> to vector<16x512xf32>
    %483 = arith.mulf %481, %482 : vector<16x512xf32>
    %484 = arith.truncf %483 : vector<16x512xf32> to vector<16x512xbf16>
    %c592_220 = arith.constant 592 : index
    %c0_221 = arith.constant 0 : index
    %485 = vector.load %arg8[%c592_220, %c0_221] : memref<784x512xbf16, #tpu.memory_space<vmem>>, vector<16x512xbf16>
    tpu.vector_store %arg8[%c592_220, %c0_221], %484 {strides = array<i32>} : memref<784x512xbf16, #tpu.memory_space<vmem>>, vector<16x512xbf16>,
    %c480_i32_222 = arith.constant 480 : i32
    %486 = tpu.dynamic_rotate %298 by %c480_i32_222 dim 1 : vector<16x512xf32>, i32 -> vector<16x512xf32>
    %487 = vector.broadcast %37 : vector<1x512xf32> to vector<16x512xf32>
    %488 = arith.mulf %486, %487 : vector<16x512xf32>
    %489 = arith.truncf %488 : vector<16x512xf32> to vector<16x512xbf16>
    %c608_223 = arith.constant 608 : index
    %c0_224 = arith.constant 0 : index
    %490 = vector.load %arg8[%c608_223, %c0_224] : memref<784x512xbf16, #tpu.memory_space<vmem>>, vector<16x512xbf16>
    tpu.vector_store %arg8[%c608_223, %c0_224], %489 {strides = array<i32>} : memref<784x512xbf16, #tpu.memory_space<vmem>>, vector<16x512xbf16>,
    %c479_i32_225 = arith.constant 479 : i32
    %491 = tpu.dynamic_rotate %298 by %c479_i32_225 dim 1 : vector<16x512xf32>, i32 -> vector<16x512xf32>
    %492 = vector.broadcast %38 : vector<1x512xf32> to vector<16x512xf32>
    %493 = arith.mulf %491, %492 : vector<16x512xf32>
    %494 = arith.truncf %493 : vector<16x512xf32> to vector<16x512xbf16>
    %c624_226 = arith.constant 624 : index
    %c0_227 = arith.constant 0 : index
    %495 = vector.load %arg8[%c624_226, %c0_227] : memref<784x512xbf16, #tpu.memory_space<vmem>>, vector<16x512xbf16>
    tpu.vector_store %arg8[%c624_226, %c0_227], %494 {strides = array<i32>} : memref<784x512xbf16, #tpu.memory_space<vmem>>, vector<16x512xbf16>,
    %c478_i32_228 = arith.constant 478 : i32
    %496 = tpu.dynamic_rotate %298 by %c478_i32_228 dim 1 : vector<16x512xf32>, i32 -> vector<16x512xf32>
    %497 = vector.broadcast %39 : vector<1x512xf32> to vector<16x512xf32>
    %498 = arith.mulf %496, %497 : vector<16x512xf32>
    %499 = arith.truncf %498 : vector<16x512xf32> to vector<16x512xbf16>
    %c640_229 = arith.constant 640 : index
    %c0_230 = arith.constant 0 : index
    %500 = vector.load %arg8[%c640_229, %c0_230] : memref<784x512xbf16, #tpu.memory_space<vmem>>, vector<16x512xbf16>
    tpu.vector_store %arg8[%c640_229, %c0_230], %499 {strides = array<i32>} : memref<784x512xbf16, #tpu.memory_space<vmem>>, vector<16x512xbf16>,
    %c477_i32_231 = arith.constant 477 : i32
    %501 = tpu.dynamic_rotate %298 by %c477_i32_231 dim 1 : vector<16x512xf32>, i32 -> vector<16x512xf32>
    %502 = vector.broadcast %40 : vector<1x512xf32> to vector<16x512xf32>
    %503 = arith.mulf %501, %502 : vector<16x512xf32>
    %504 = arith.truncf %503 : vector<16x512xf32> to vector<16x512xbf16>
    %c656_232 = arith.constant 656 : index
    %c0_233 = arith.constant 0 : index
    %505 = vector.load %arg8[%c656_232, %c0_233] : memref<784x512xbf16, #tpu.memory_space<vmem>>, vector<16x512xbf16>
    tpu.vector_store %arg8[%c656_232, %c0_233], %504 {strides = array<i32>} : memref<784x512xbf16, #tpu.memory_space<vmem>>, vector<16x512xbf16>,
    %c467_i32_234 = arith.constant 467 : i32
    %506 = tpu.dynamic_rotate %298 by %c467_i32_234 dim 1 : vector<16x512xf32>, i32 -> vector<16x512xf32>
    %507 = vector.broadcast %41 : vector<1x512xf32> to vector<16x512xf32>
    %508 = arith.mulf %506, %507 : vector<16x512xf32>
    %509 = arith.truncf %508 : vector<16x512xf32> to vector<16x512xbf16>
    %c672_235 = arith.constant 672 : index
    %c0_236 = arith.constant 0 : index
    %510 = vector.load %arg8[%c672_235, %c0_236] : memref<784x512xbf16, #tpu.memory_space<vmem>>, vector<16x512xbf16>
    tpu.vector_store %arg8[%c672_235, %c0_236], %509 {strides = array<i32>} : memref<784x512xbf16, #tpu.memory_space<vmem>>, vector<16x512xbf16>,
    %c466_i32_237 = arith.constant 466 : i32
    %511 = tpu.dynamic_rotate %298 by %c466_i32_237 dim 1 : vector<16x512xf32>, i32 -> vector<16x512xf32>
    %512 = vector.broadcast %42 : vector<1x512xf32> to vector<16x512xf32>
    %513 = arith.mulf %511, %512 : vector<16x512xf32>
    %514 = arith.truncf %513 : vector<16x512xf32> to vector<16x512xbf16>
    %c688_238 = arith.constant 688 : index
    %c0_239 = arith.constant 0 : index
    %515 = vector.load %arg8[%c688_238, %c0_239] : memref<784x512xbf16, #tpu.memory_space<vmem>>, vector<16x512xbf16>
    tpu.vector_store %arg8[%c688_238, %c0_239], %514 {strides = array<i32>} : memref<784x512xbf16, #tpu.memory_space<vmem>>, vector<16x512xbf16>,
    %c465_i32_240 = arith.constant 465 : i32
    %516 = tpu.dynamic_rotate %298 by %c465_i32_240 dim 1 : vector<16x512xf32>, i32 -> vector<16x512xf32>
    %517 = vector.broadcast %43 : vector<1x512xf32> to vector<16x512xf32>
    %518 = arith.mulf %516, %517 : vector<16x512xf32>
    %519 = arith.truncf %518 : vector<16x512xf32> to vector<16x512xbf16>
    %c704_241 = arith.constant 704 : index
    %c0_242 = arith.constant 0 : index
    %520 = vector.load %arg8[%c704_241, %c0_242] : memref<784x512xbf16, #tpu.memory_space<vmem>>, vector<16x512xbf16>
    tpu.vector_store %arg8[%c704_241, %c0_242], %519 {strides = array<i32>} : memref<784x512xbf16, #tpu.memory_space<vmem>>, vector<16x512xbf16>,
    %c464_i32_243 = arith.constant 464 : i32
    %521 = tpu.dynamic_rotate %298 by %c464_i32_243 dim 1 : vector<16x512xf32>, i32 -> vector<16x512xf32>
    %522 = vector.broadcast %44 : vector<1x512xf32> to vector<16x512xf32>
    %523 = arith.mulf %521, %522 : vector<16x512xf32>
    %524 = arith.truncf %523 : vector<16x512xf32> to vector<16x512xbf16>
    %c720_244 = arith.constant 720 : index
    %c0_245 = arith.constant 0 : index
    %525 = vector.load %arg8[%c720_244, %c0_245] : memref<784x512xbf16, #tpu.memory_space<vmem>>, vector<16x512xbf16>
    tpu.vector_store %arg8[%c720_244, %c0_245], %524 {strides = array<i32>} : memref<784x512xbf16, #tpu.memory_space<vmem>>, vector<16x512xbf16>,
    %c463_i32_246 = arith.constant 463 : i32
    %526 = tpu.dynamic_rotate %298 by %c463_i32_246 dim 1 : vector<16x512xf32>, i32 -> vector<16x512xf32>
    %527 = vector.broadcast %45 : vector<1x512xf32> to vector<16x512xf32>
    %528 = arith.mulf %526, %527 : vector<16x512xf32>
    %529 = arith.truncf %528 : vector<16x512xf32> to vector<16x512xbf16>
    %c736_247 = arith.constant 736 : index
    %c0_248 = arith.constant 0 : index
    %530 = vector.load %arg8[%c736_247, %c0_248] : memref<784x512xbf16, #tpu.memory_space<vmem>>, vector<16x512xbf16>
    tpu.vector_store %arg8[%c736_247, %c0_248], %529 {strides = array<i32>} : memref<784x512xbf16, #tpu.memory_space<vmem>>, vector<16x512xbf16>,
    %c462_i32_249 = arith.constant 462 : i32
    %531 = tpu.dynamic_rotate %298 by %c462_i32_249 dim 1 : vector<16x512xf32>, i32 -> vector<16x512xf32>
    %532 = vector.broadcast %46 : vector<1x512xf32> to vector<16x512xf32>
    %533 = arith.mulf %531, %532 : vector<16x512xf32>
    %534 = arith.truncf %533 : vector<16x512xf32> to vector<16x512xbf16>
    %c752_250 = arith.constant 752 : index
    %c0_251 = arith.constant 0 : index
    %535 = vector.load %arg8[%c752_250, %c0_251] : memref<784x512xbf16, #tpu.memory_space<vmem>>, vector<16x512xbf16>
    tpu.vector_store %arg8[%c752_250, %c0_251], %534 {strides = array<i32>} : memref<784x512xbf16, #tpu.memory_space<vmem>>, vector<16x512xbf16>,
    %c461_i32_252 = arith.constant 461 : i32
    %536 = tpu.dynamic_rotate %298 by %c461_i32_252 dim 1 : vector<16x512xf32>, i32 -> vector<16x512xf32>
    %537 = vector.broadcast %47 : vector<1x512xf32> to vector<16x512xf32>
    %538 = arith.mulf %536, %537 : vector<16x512xf32>
    %539 = arith.truncf %538 : vector<16x512xf32> to vector<16x512xbf16>
    %c768_253 = arith.constant 768 : index
    %c0_254 = arith.constant 0 : index
    %540 = vector.load %arg8[%c768_253, %c0_254] : memref<784x512xbf16, #tpu.memory_space<vmem>>, vector<16x512xbf16>
    tpu.vector_store %arg8[%c768_253, %c0_254], %539 {strides = array<i32>} : memref<784x512xbf16, #tpu.memory_space<vmem>>, vector<16x512xbf16>,
    %c0_255 = arith.constant 0 : index
    %c0_256 = arith.constant 0 : index
    %541 = vector.load %arg3[%c0_255, %c0_256] : memref<8x784xbf16, #tpu.memory_space<vmem>>, vector<8x784xbf16>
    %c0_257 = arith.constant 0 : index
    %c0_258 = arith.constant 0 : index
    %542 = vector.load %arg8[%c0_257, %c0_258] : memref<784x512xbf16, #tpu.memory_space<vmem>>, vector<784x512xbf16>
    %cst_259 = arith.constant dense<0.000000e+00> : vector<8x512xf32>
    %543 = tpu.matmul %541, %542, %cst_259 {dimension_numbers = #tpu.dot_dimension_numbers<[1], [0], [0], [1], [0, 0, 1, 1], [], []>} : vector<8x784xbf16>, vector<784x512xbf16>, vector<8x512xf32> -> vector<8x512xf32>
    %544 = vector.extract_strided_slice %543 {offsets = [0, 0], sizes = [4, 512], strides = [1, 1]} : vector<8x512xf32> to vector<4x512xf32>
    %545 = vector.extract_strided_slice %543 {offsets = [4, 0], sizes = [4, 512], strides = [1, 1]} : vector<8x512xf32> to vector<4x512xf32>
    %cst_260 = arith.constant 5.000000e-01 : f32
    %546 = vector.broadcast %cst_260 : f32 to vector<4x512xf32>
    %547 = arith.mulf %544, %546 : vector<4x512xf32>
    %cst_261 = arith.constant 0.000000e+00 : f32
    %548 = vector.broadcast %cst_261 : f32 to vector<4x512xf32>
    %549 = arith.cmpf olt, %547, %548 : vector<4x512xf32>
    %cst_262 = arith.constant -1.000000e+00 : f32
    %cst_263 = arith.constant 1.000000e+00 : f32
    %550 = vector.broadcast %cst_262 : f32 to vector<4x512xf32>
    %551 = vector.broadcast %cst_263 : f32 to vector<4x512xf32>
    %552 = arith.select %549, %550, %551 : vector<4x512xi1>, vector<4x512xf32>
    %553 = math.absf %547 : vector<4x512xf32>
    %cst_264 = arith.constant 2.41421366 : f32
    %554 = vector.broadcast %cst_264 : f32 to vector<4x512xf32>
    %555 = arith.cmpf ogt, %553, %554 : vector<4x512xf32>
    %cst_265 = arith.constant 0.414213568 : f32
    %556 = vector.broadcast %cst_265 : f32 to vector<4x512xf32>
    %557 = arith.cmpf ogt, %553, %556 : vector<4x512xf32>
    %cst_266 = arith.constant 1.000000e-30 : f32
    %558 = vector.broadcast %cst_266 : f32 to vector<4x512xf32>
    %559 = arith.maximumf %553, %558 : vector<4x512xf32>
    %cst_267 = arith.constant -1.000000e+00 : f32
    %560 = vector.broadcast %cst_267 : f32 to vector<4x512xf32>
    %561 = arith.divf %560, %559 : vector<4x512xf32>
    %cst_268 = arith.constant 1.000000e+00 : f32
    %562 = vector.broadcast %cst_268 : f32 to vector<4x512xf32>
    %563 = arith.subf %553, %562 : vector<4x512xf32>
    %cst_269 = arith.constant 1.000000e+00 : f32
    %564 = vector.broadcast %cst_269 : f32 to vector<4x512xf32>
    %565 = arith.addf %553, %564 : vector<4x512xf32>
    %566 = arith.divf %563, %565 : vector<4x512xf32>
    %567 = arith.select %557, %566, %553 : vector<4x512xi1>, vector<4x512xf32>
    %568 = arith.select %555, %561, %567 : vector<4x512xi1>, vector<4x512xf32>
    %cst_270 = arith.constant 0.785398185 : f32
    %cst_271 = arith.constant 0.000000e+00 : f32
    %569 = vector.broadcast %cst_270 : f32 to vector<4x512xf32>
    %570 = vector.broadcast %cst_271 : f32 to vector<4x512xf32>
    %571 = arith.select %557, %569, %570 : vector<4x512xi1>, vector<4x512xf32>
    %cst_272 = arith.constant 1.57079637 : f32
    %572 = vector.broadcast %cst_272 : f32 to vector<4x512xf32>
    %573 = arith.select %555, %572, %571 : vector<4x512xi1>, vector<4x512xf32>
    %574 = arith.mulf %568, %568 : vector<4x512xf32>
    %cst_273 = arith.constant 0.0805374458 : f32
    %575 = vector.broadcast %cst_273 : f32 to vector<4x512xf32>
    %576 = arith.mulf %575, %574 : vector<4x512xf32>
    %cst_274 = arith.constant 0.138776854 : f32
    %577 = vector.broadcast %cst_274 : f32 to vector<4x512xf32>
    %578 = arith.subf %576, %577 : vector<4x512xf32>
    %579 = arith.mulf %578, %574 : vector<4x512xf32>
    %cst_275 = arith.constant 0.199777111 : f32
    %580 = vector.broadcast %cst_275 : f32 to vector<4x512xf32>
    %581 = arith.addf %579, %580 : vector<4x512xf32>
    %582 = arith.mulf %581, %574 : vector<4x512xf32>
    %cst_276 = arith.constant 0.333329499 : f32
    %583 = vector.broadcast %cst_276 : f32 to vector<4x512xf32>
    %584 = arith.subf %582, %583 : vector<4x512xf32>
    %585 = arith.mulf %584, %574 : vector<4x512xf32>
    %586 = arith.mulf %585, %568 : vector<4x512xf32>
    %587 = arith.addf %573, %586 : vector<4x512xf32>
    %588 = arith.addf %587, %568 : vector<4x512xf32>
    %589 = arith.mulf %552, %588 : vector<4x512xf32>
    %cst_277 = arith.constant 1.272000e+00 : f32
    %590 = vector.broadcast %cst_277 : f32 to vector<4x512xf32>
    %591 = arith.mulf %590, %589 : vector<4x512xf32>
    %cst_278 = arith.constant dense<0.000000e+00> : vector<512xf32>
    %592 = vector.multi_reduction <add>, %591, %cst_278 [0] : vector<4x512xf32> to vector<512xf32>
    %593 = vector.shape_cast %592 : vector<512xf32> to vector<1x512xf32>
    %594 = vector.extract_strided_slice %593 {offsets = [0, 0], sizes = [1, 256], strides = [1, 1]} : vector<1x512xf32> to vector<1x256xf32>
    %595 = vector.extract_strided_slice %593 {offsets = [0, 256], sizes = [1, 256], strides = [1, 1]} : vector<1x512xf32> to vector<1x256xf32>
    %596 = arith.addf %594, %595 : vector<1x256xf32>
    %cst_279 = arith.constant 1.250000e-01 : f32
    %597 = vector.broadcast %cst_279 : f32 to vector<1x256xf32>
    %598 = arith.mulf %596, %597 : vector<1x256xf32>
    %599 = tpu.concatenate %598, %598 in 1 : vector<1x256xf32>, vector<1x256xf32> -> vector<1x512xf32>
    %600 = vector.broadcast %599 : vector<1x512xf32> to vector<4x512xf32>
    %601 = arith.subf %591, %600 : vector<4x512xf32>
    %c0_280 = arith.constant 0 : index
    %c0_281 = arith.constant 0 : index
    %602 = vector.load %arg7[%c0_280, %c0_281] : memref<4x512xf32, #tpu.memory_space<vmem>>, vector<4x512xf32>
    tpu.vector_store %arg7[%c0_280, %c0_281], %601 {strides = array<i32>} : memref<4x512xf32, #tpu.memory_space<vmem>>, vector<4x512xf32>,
    %c0_282 = arith.constant 0 : index
    %c0_283 = arith.constant 0 : index
    %603 = vector.load %arg6[%c0_282, %c0_283] : memref<4x512xf32, #tpu.memory_space<vmem>>, vector<4x512xf32>
    tpu.vector_store %arg6[%c0_282, %c0_283], %545 {strides = array<i32>} : memref<4x512xf32, #tpu.memory_space<vmem>>, vector<4x512xf32>,
    %604 = math.exp %601 : vector<4x512xf32>
    %c0_284 = arith.constant 0 : index
    %c0_285 = arith.constant 0 : index
    %605 = vector.load %arg5[%c0_284, %c0_285] : memref<4x512xf32, #tpu.memory_space<vmem>>, vector<4x512xf32>
    tpu.vector_store %arg5[%c0_284, %c0_285], %604 {strides = array<i32>} : memref<4x512xf32, #tpu.memory_space<vmem>>, vector<4x512xf32>,
    return
  }
  func.func @transform_0(%arg0: i32) -> (i32, i32) {
    %c0_i32 = arith.constant 0 : i32
    %c0_i32_0 = arith.constant 0 : i32
    return %c0_i32, %arg0 : i32, i32
  }
  func.func @transform_1(%arg0: i32) -> (i32, i32) {
    %c0_i32 = arith.constant 0 : i32
    %c0_i32_0 = arith.constant 0 : i32
    %c0_i32_1 = arith.constant 0 : i32
    return %c0_i32, %c0_i32_0 : i32, i32
  }
  func.func @transform_2(%arg0: i32) -> (i32, i32) {
    %c0_i32 = arith.constant 0 : i32
    %c0_i32_0 = arith.constant 0 : i32
    %c0_i32_1 = arith.constant 0 : i32
    return %c0_i32, %c0_i32_0 : i32, i32
  }
  func.func @transform_3(%arg0: i32) -> (i32, i32) {
    %c0_i32 = arith.constant 0 : i32
    %c0_i32_0 = arith.constant 0 : i32
    %c0_i32_1 = arith.constant 0 : i32
    return %c0_i32, %c0_i32_0 : i32, i32
  }
  func.func @transform_4(%arg0: i32) -> (i32, i32) {
    %c0_i32 = arith.constant 0 : i32
    %c0_i32_0 = arith.constant 0 : i32
    return %c0_i32, %arg0 : i32, i32
  }
  func.func @transform_5(%arg0: i32) -> (i32, i32) {
    %c0_i32 = arith.constant 0 : i32
    %c0_i32_0 = arith.constant 0 : i32
    return %c0_i32, %arg0 : i32, i32
  }
  func.func @transform_6(%arg0: i32) -> (i32, i32) {
    %c0_i32 = arith.constant 0 : i32
    %c0_i32_0 = arith.constant 0 : i32
    return %c0_i32, %arg0 : i32, i32
  }
}

</mosaic_0001>

<bundles_post_ra>
// kernel: tpu_custom_call.1
= control target key start
LH: loop header
LB: loop body
LE: loop exit
PB: predicated region body
PF: predicated region fallthrough
CT: control target
= control target key end

     0   :  { %12 = vsyncpa [#allocation4], 0  ;;  %s11755_s0 = inlined_call_operand.hbm [shape: f32[16,512], index: 0, kind: input, shape index: {}]   ;;  %s11756_s1 = inlined_call_operand.hbm [shape: bf16[16,784], index: 1, kind: input, shape index: {}]   ;;  %s11757_s2 = inlined_call_operand.hbm [shape: bf16[8,784], index: 2, kind: input, shape index: {}]   ;;  %s11758_s3 = inlined_call_operand.hbm [shape: f32[49,512], index: 3, kind: input, shape index: {}]   ;;  %s11759_s4 = inlined_call_operand.hbm [shape: f32[4,512], index: 4, kind: output, shape index: {0}]   ;;  %s11760_s5 = inlined_call_operand.hbm [shape: f32[4,512], index: 5, kind: output, shape index: {1}]   ;;  %s11761_s6 = inlined_call_operand.hbm [shape: f32[4,512], index: 6, kind: output, shape index: {2}]  }
   0x1   :  { %13 = vsyncpa [#allocation7], 0 }
   0x2   :  { %14 = vsyncpa [#allocation10], 0 }
   0x3   :  { %15 = vsyncpa [#allocation5], 0 }
   0x4   :  { %16 = vsyncpa [#allocation13], 0  ;;  %s6874_s21 = smov [#allocation6]   ;;  %s6710_s25 = scalar_lea.hbm %s11756_s1, 896 }
   0x5   :  { %s34_s22 = sshll.u32 %s6874_s21, 4  ;;  %p6711_p0 = scmp.ne.s32.totalorder %s11756_s1, %s6710_s25  ;;  %s35_s22 = int_to_ptr.vmem [resolvable:$true] %s34_s22 }
   0x6   :  { %p6714_p1 = scmp.lt.u32.totalorder %s6710_s25, %s11756_s1 }
   0x8   :  { %p6716_p2 = pnand %p6714_p1, %p6711_p0 }
   0xa   :  { %6719 = shalt.err (!%p6716_p2)
}
   0xb   :  { %s6720_s30 = scalar_lea.vmem %s35_s22, 896  ;;  %p6725_p4 = scmp.lt.s32.totalorder %s35_s22, %s35_s22 }
   0xc   :  { %p6721_p3 = scmp.ne.s32.totalorder %s35_s22, %s6720_s30  ;;  %p6726_p5 = scmp.lt.s32.totalorder %s6720_s30, %s6720_s30 }
   0xe   :  { %p6727_p6 = por %p6726_p5, %p6725_p4 }
  0x10   :  { %p6728_p7 = pnand %p6727_p6, %p6721_p3 }
  0x12   :  { %6731 = shalt.err (!%p6728_p7)
}
  0x13   :  { %s6875_s7 = smov 448   ;;  %s6876_s8 = smov 28  }
  0x14   :  { %40 = dma.hbm_to_vmem [thread:$0]  %s11756_s1, 896, %s35_s22, [#allocation7], %s6875_s7, %s6875_s7, %s6876_s8  }
  0x15   :  { %s6877_s11 = smov [#allocation3]   ;;  %s6732_s15 = scalar_lea.hbm %s11755_s0, 1024 }
  0x16   :  { %s22_s12 = sshll.u32 %s6877_s11, 4  ;;  %p6733_p8 = scmp.ne.s32.totalorder %s11755_s0, %s6732_s15  ;;  %s23_s12 = int_to_ptr.vmem [resolvable:$true] %s22_s12 }
  0x17   :  { %p6736_p9 = scmp.lt.u32.totalorder %s6732_s15, %s11755_s0 }
  0x19   :  { %p6738_p10 = pnand %p6736_p9, %p6733_p8 }
  0x1b   :  { %6741 = shalt.err (!%p6738_p10)
}
  0x1c   :  { %s6742_s20 = scalar_lea.vmem %s23_s12, 1024  ;;  %p6747_p12 = scmp.lt.s32.totalorder %s23_s12, %s23_s12 }
  0x1d   :  { %p6743_p11 = scmp.ne.s32.totalorder %s23_s12, %s6742_s20  ;;  %p6748_p13 = scmp.lt.s32.totalorder %s6742_s20, %s6742_s20 }
  0x1f   :  { %p6749_p0 = por %p6748_p13, %p6747_p12 }
  0x21   :  { %p6750_p1 = pnand %p6749_p0, %p6743_p11 }
  0x23   :  { %6753 = shalt.err (!%p6750_p1)
}
  0x24   :  { %s6878_s1 = smov 512   ;;  %s6879_s21 = smov 32  }
  0x25   :  { %28 = dma.hbm_to_vmem [thread:$0]  %s11755_s0, 1024, %s23_s12, [#allocation4], %s6878_s1, %s6878_s1, %s6879_s21  }
  0x26   :  { %s6880_s24 = smov [#allocation8]   ;;  %s6881_s26 = smov [#allocation9]  }
  0x27   :  { %s47_s25 = sshll.u32 %s6880_s24, 4  ;;  %s56_s27 = sshll.u32 %s6881_s26, 4  ;;  %s48_s25 = int_to_ptr.vmem [resolvable:$true] %s47_s25  ;;  %s6997_s27 = int_to_ptr.vmem [resolvable:$true] %s56_s27 }
  0x28   :  { %s6754_s30 = scalar_lea.hbm %s11757_s2, 448 }
  0x29   :  { %p6755_p2 = scmp.ne.s32.totalorder %s11757_s2, %s6754_s30  ;;  %p6758_p3 = scmp.lt.u32.totalorder %s6754_s30, %s11757_s2 }
  0x2b   :  { %p6760_p4 = pnand %p6758_p3, %p6755_p2 }
  0x2d   :  { %6763 = shalt.err (!%p6760_p4)
}
  0x2e   :  { %s6764_s0 = scalar_lea.vmem %s48_s25, 448  ;;  %p6769_p6 = scmp.lt.s32.totalorder %s48_s25, %s48_s25 }
  0x2f   :  { %p6765_p5 = scmp.ne.s32.totalorder %s48_s25, %s6764_s0  ;;  %p6770_p7 = scmp.lt.s32.totalorder %s6764_s0, %s6764_s0 }
  0x31   :  { %p6771_p8 = por %p6770_p7, %p6769_p6 }
  0x33   :  { %p6772_p9 = pnand %p6771_p8, %p6765_p5 }
  0x35   :  { %6775 = shalt.err (!%p6772_p9)
}
  0x36   :  { %50 = dma.hbm_to_vmem [thread:$0]  %s11757_s2, 448, %s48_s25, [#allocation7]  }
  0x37   :  { %s6776_s15 = scalar_lea.hbm %s11758_s3, 3584 }
  0x38   :  { %p6777_p10 = scmp.ne.s32.totalorder %s11758_s3, %s6776_s15  ;;  %p6780_p11 = scmp.lt.u32.totalorder %s6776_s15, %s11758_s3 }
  0x3a   :  { %p6782_p12 = pnand %p6780_p11, %p6777_p10 }
  0x3c   :  { %6785 = shalt.err (!%p6782_p12)
}
  0x3d   :  { %s6786_s20 = scalar_lea.vmem %s6997_s27, 3584  ;;  %p6791_p0 = scmp.lt.s32.totalorder %s6997_s27, %s6997_s27 }
  0x3e   :  { %p6787_p13 = scmp.ne.s32.totalorder %s6997_s27, %s6786_s20  ;;  %p6792_p1 = scmp.lt.s32.totalorder %s6786_s20, %s6786_s20 }
  0x40   :  { %p6793_p2 = por %p6792_p1, %p6791_p0 }
  0x42   :  { %p6794_p3 = pnand %p6793_p2, %p6787_p13 }
  0x44   :  { %6797 = shalt.err (!%p6794_p3)
}
  0x45   :  { %62 = dma.hbm_to_vmem [thread:$0]  %s11758_s3, 3584, %s6997_s27, [#allocation10], %s6878_s1, %s6878_s1, %s6879_s21  }
  0x46   :  { %6864 = dma.done.wait [#allocation4], 1024  }
  0x47   :  { %6865 = vsyncadd [#allocation4], 4294966272 }
  0x48   :  { %6866 = dma.done.wait [#allocation7], 1344  }
  0x49   :  { %6867 = vsyncadd [#allocation7], 4294965952 }
  0x4a   :  { %6868 = dma.done.wait [#allocation10], 3584  }
  0x4b   :  { %6869 = vsyncadd [#allocation10], 4294963712  ;;  %v7031_v0 = vld [vmem:[#allocation3 + $0x8] sm:$0xff]  ;;  %v7033_v1 = vld [vmem:[#allocation3] sm:$0xff]  ;;  %s6882_s23 = smov 51   ;;  %s6883_s3 = smov 50   ;;  %v195_v8 = vlaneseq }
  0x4c   :  { %183 = vrot.lane.b32.xlu1 %v7031_v0, %s6882_s23  ;;  %179 = vrot.lane.b32.xlu0 %v7033_v1, %s6882_s23  ;;  %v7039_v2 = vld [vmem:[#allocation3 + $0x28] sm:$0xff]  ;;  %v7041_v3 = vld [vmem:[#allocation3 + $0x20] sm:$0xff]  ;;  %v7047_v4 = vld [vmem:[#allocation3 + $0x30] sm:$0xff]  ;;  %s6884_s1 = smov 49   ;;  %s6885_s24 = smov 48  }
  0x4d   :  { %v7049_v5 = vld [vmem:[#allocation3 + $0x10] sm:$0xff]  ;;  %v7055_v6 = vld [vmem:[#allocation3 + $0x38] sm:$0xff]  ;;  %s6886_s25 = smov 47   ;;  %s6887_s26 = smov 46   ;;  %v208_v9 = vshrl.u32 %v195_v8, 7  ;;  %v7159_v10 = vand.u32 127, %v195_v8 }
  0x4e   :  { %v7057_v7 = vld [vmem:[#allocation3 + $0x18] sm:$0xff]  ;;  %s6888_s27 = smov 45   ;;  %s6889_s28 = smov 35  }
  0x4f   :  { %v7165_v11 = vsub.s32 1, %v208_v9  ;;  %v76_v12 = vld [vmem:[#allocation9] ss:$8 sm:$0xf]  ;;  %vm197_vm0 = vcmp.lt.s32.totalorder %v7159_v10, 51  ;;  %v7177_v19 = vsub.s32 2, %v208_v9 }
  0x50   :  { %185 = vrot.lane.b32.xlu1 %v7039_v2, %s6882_s23  ;;  %181 = vrot.lane.b32.xlu0 %v7041_v3, %s6882_s23  ;;  %v7185_v21 = vsub.s32 0, %v208_v9  ;;  %v7189_v24 = vsub.s32 3, %v208_v9  ;;  %s6890_s29 = smov 34   ;;  %v78_v45 = vld [vmem:[#allocation9 + $0x1] ss:$8 sm:$0xf] }
  0x51   :  { %v7173_v15 = vrot.slane %v76_v12, %v7165_v11  ;;  %v7192_v28 = vrot.slane %v76_v12, %v7177_v19  ;;  %vm259_vm1 = vcmp.lt.s32.totalorder %v7159_v10, 50  ;;  %v7232_v51 = vrot.slane %v78_v45, %v7165_v11  ;;  %s6891_s30 = smov 33   ;;  %s6892_s7 = smov 31  }
  0x52   :  { %12150 = vst [vmem:[#allocation20_spill] sm:$0xff] %v7185_v21  ;;  %v7203_v31 = vrot.slane %v76_v12, %v7185_v21  ;;  %v7206_v32 = vrot.slane %v76_v12, %v7189_v24  ;;  %v7245_v59 = vrot.slane %v78_v45, %v7177_v19  ;;  %v7256_v8 = vrot.slane %v78_v45, %v7185_v21  ;;  %s6893_s8 = smov 30   ;;  %s6894_s9 = smov 29  }
  0x53   :  { %v7259_v9 = vrot.slane %v78_v45, %v7189_v24  ;;  %vm321_vm2 = vcmp.lt.s32.totalorder %v7159_v10, 49  ;;  %vm383_vm3 = vcmp.lt.s32.totalorder %v7159_v10, 48  ;;  %vm445_vm4 = vcmp.lt.s32.totalorder %v7159_v10, 47  ;;  %s6895_s10 = smov 19   ;;  %s6896_s0 = smov 18  }
  0x54   :  { %189 = vrot.lane.b32.xlu1 %v7047_v4, %s6882_s23  ;;  %187 = vrot.lane.b32.xlu0 %v7049_v5, %s6882_s23  ;;  %vm507_vm5 = vcmp.lt.s32.totalorder %v7159_v10, 46  ;;  %vm569_vm6 = vcmp.lt.s32.totalorder %v7159_v10, 45  ;;  %vm631_vm7 = vcmp.lt.s32.totalorder %v7159_v10, 35  ;;  %vm693_vm8 = vcmp.lt.s32.totalorder %v7159_v10, 34  ;;  %s6897_s11 = smov 17   ;;  %s6898_s12 = smov 16  }
  0x55   :  { %vm755_vm9 = vcmp.lt.s32.totalorder %v7159_v10, 33  ;;  %vm817_vm10 = vcmp.lt.s32.totalorder %v7159_v10, 32  ;;  %s6899_s13 = smov 15   ;;  %vm12139_vm11 = vcmp.lt.s32.totalorder %v7159_v10, 31  ;;  %s6900_s14 = smov 14   ;;  %vm12137_vm12 = vcmp.lt.s32.totalorder %v7159_v10, 30 }
  0x56   :  { %s6901_s15 = smov 13   ;;  %vm12135_vm13 = vcmp.lt.s32.totalorder %v7159_v10, 29  ;;  %s6902_s16 = smov 3   ;;  %vm12081_vm14 = vcmp.lt.s32.totalorder %v7159_v10, 19  ;;  %vm11820_vm15 = vcmp.lt.s32.totalorder %v7159_v10, 18 }
  0x57   :  { %s6903_s17 = smov 2   ;;  %s6904_s18 = smov 1  }
  0x58   :  { %193 = vrot.lane.b32.xlu1 %v7055_v6, %s6882_s23  ;;  %191 = vrot.lane.b32.xlu0 %v7057_v7, %s6882_s23  ;;  %s6905_s19 = smov 127   ;;  %s6906_s20 = smov 126  }
  0x59   :  { %s6907_s2 = smov 125   ;;  %s11853_s22 = smov 115  }
  0x5c   :  { %245 = vrot.lane.b32.xlu1 %v7041_v3, %s6883_s3  ;;  %243 = vrot.lane.b32.xlu0 %v7033_v1, %s6883_s3 }
  0x60   :  { %249 = vrot.lane.b32.xlu1 %v7039_v2, %s6883_s3  ;;  %247 = vrot.lane.b32.xlu0 %v7031_v0, %s6883_s3 }
  0x64   :  { %253 = vrot.lane.b32.xlu1 %v7047_v4, %s6883_s3  ;;  %251 = vrot.lane.b32.xlu0 %v7049_v5, %s6883_s3 }
  0x68   :  { %257 = vrot.lane.b32.xlu1 %v7055_v6, %s6883_s3  ;;  %255 = vrot.lane.b32.xlu0 %v7057_v7, %s6883_s3 }
  0x6c   :  { %307 = vrot.lane.b32.xlu1 %v7041_v3, %s6884_s1  ;;  %305 = vrot.lane.b32.xlu0 %v7033_v1, %s6884_s1 }
  0x70   :  { %311 = vrot.lane.b32.xlu1 %v7039_v2, %s6884_s1  ;;  %309 = vrot.lane.b32.xlu0 %v7031_v0, %s6884_s1 }
  0x74   :  { %315 = vrot.lane.b32.xlu1 %v7047_v4, %s6884_s1  ;;  %313 = vrot.lane.b32.xlu0 %v7049_v5, %s6884_s1 }
  0x78   :  { %319 = vrot.lane.b32.xlu1 %v7055_v6, %s6884_s1  ;;  %317 = vrot.lane.b32.xlu0 %v7057_v7, %s6884_s1 }
  0x7c   :  { %369 = vrot.lane.b32.xlu1 %v7041_v3, %s6885_s24  ;;  %367 = vrot.lane.b32.xlu0 %v7033_v1, %s6885_s24 }
  0x80   :  { %373 = vrot.lane.b32.xlu1 %v7039_v2, %s6885_s24  ;;  %371 = vrot.lane.b32.xlu0 %v7031_v0, %s6885_s24 }
  0x84   :  { %377 = vrot.lane.b32.xlu1 %v7047_v4, %s6885_s24  ;;  %375 = vrot.lane.b32.xlu0 %v7049_v5, %s6885_s24 }
  0x88   :  { %381 = vrot.lane.b32.xlu1 %v7055_v6, %s6885_s24  ;;  %379 = vrot.lane.b32.xlu0 %v7057_v7, %s6885_s24 }
  0x8c   :  { %431 = vrot.lane.b32.xlu1 %v7041_v3, %s6886_s25  ;;  %429 = vrot.lane.b32.xlu0 %v7033_v1, %s6886_s25 }
  0x90   :  { %435 = vrot.lane.b32.xlu1 %v7039_v2, %s6886_s25  ;;  %433 = vrot.lane.b32.xlu0 %v7031_v0, %s6886_s25 }
  0x94   :  { %439 = vrot.lane.b32.xlu1 %v7047_v4, %s6886_s25  ;;  %437 = vrot.lane.b32.xlu0 %v7049_v5, %s6886_s25 }
  0x98   :  { %443 = vrot.lane.b32.xlu1 %v7055_v6, %s6886_s25  ;;  %441 = vrot.lane.b32.xlu0 %v7057_v7, %s6886_s25 }
  0x9c   :  { %493 = vrot.lane.b32.xlu1 %v7041_v3, %s6887_s26  ;;  %491 = vrot.lane.b32.xlu0 %v7033_v1, %s6887_s26 }
  0xa0   :  { %497 = vrot.lane.b32.xlu1 %v7039_v2, %s6887_s26  ;;  %495 = vrot.lane.b32.xlu0 %v7031_v0, %s6887_s26 }
  0xa4   :  { %501 = vrot.lane.b32.xlu1 %v7047_v4, %s6887_s26  ;;  %499 = vrot.lane.b32.xlu0 %v7049_v5, %s6887_s26 }
  0xa8   :  { %505 = vrot.lane.b32.xlu1 %v7055_v6, %s6887_s26  ;;  %503 = vrot.lane.b32.xlu0 %v7057_v7, %s6887_s26 }
  0xac   :  { %555 = vrot.lane.b32.xlu1 %v7041_v3, %s6888_s27  ;;  %553 = vrot.lane.b32.xlu0 %v7033_v1, %s6888_s27 }
  0xb0   :  { %559 = vrot.lane.b32.xlu1 %v7039_v2, %s6888_s27  ;;  %557 = vrot.lane.b32.xlu0 %v7031_v0, %s6888_s27 }
  0xb4   :  { %563 = vrot.lane.b32.xlu1 %v7047_v4, %s6888_s27  ;;  %561 = vrot.lane.b32.xlu0 %v7049_v5, %s6888_s27 }
  0xb8   :  { %567 = vrot.lane.b32.xlu1 %v7055_v6, %s6888_s27  ;;  %565 = vrot.lane.b32.xlu0 %v7057_v7, %s6888_s27 }
  0xbc   :  { %617 = vrot.lane.b32.xlu1 %v7041_v3, %s6889_s28  ;;  %615 = vrot.lane.b32.xlu0 %v7033_v1, %s6889_s28 }
  0xbe   :  { %v184_v13 = vpop.permute.xlu1 %183  ;;  %v180_v14 = vpop.permute.xlu0 %179 }
  0xbf   :  { %v202_v16 = vsel %vm197_vm0, %v180_v14, %v184_v13 }
  0xc0   :  { %621 = vrot.lane.b32.xlu1 %v7039_v2, %s6889_s28  ;;  %619 = vrot.lane.b32.xlu0 %v7031_v0, %s6889_s28  ;;  %v228_v22 = vmul.f32 %v7173_v15, %v202_v16 }
  0xc2   :  { %v186_v17 = vpop.permute.xlu1 %185  ;;  %v182_v18 = vpop.permute.xlu0 %181 }
  0xc3   :  { %v203_v20 = vsel %vm197_vm0, %v182_v18, %v186_v17 }
  0xc4   :  { %625 = vrot.lane.b32.xlu1 %v7047_v4, %s6889_s28  ;;  %623 = vrot.lane.b32.xlu0 %v7049_v5, %s6889_s28  ;;  %v232_v23 = vmul.f32 %v7173_v15, %v203_v20 }
  0xc6   :  { %v190_v25 = vpop.permute.xlu1 %189  ;;  %v188_v26 = vpop.permute.xlu0 %187  ;;  %v236_v27 = vpack.c.bf16 %v232_v23, %v228_v22 }
  0xc7   :  { %v201_v29 = vsel %vm197_vm0, %v186_v17, %v190_v25  ;;  %v200_v30 = vsel %vm197_vm0, %v184_v13, %v188_v26 }
  0xc8   :  { %629 = vrot.lane.b32.xlu1 %v7055_v6, %s6889_s28  ;;  %627 = vrot.lane.b32.xlu0 %v7057_v7, %s6889_s28  ;;  %v229_v35 = vmul.f32 %v7192_v28, %v200_v30  ;;  %v233_v36 = vmul.f32 %v7192_v28, %v201_v29  ;;  %v80_v29 = vld [vmem:[#allocation9 + $0x2] ss:$8 sm:$0xf] }
  0xc9   :  { %3408 = vmatprep.subr.bf16.mxu0 %v236_v27  ;;  %v7298_v45 = vrot.slane %v80_v29, %v7177_v19 }
  0xca   :  { %v194_v33 = vpop.permute.xlu1 %193  ;;  %v192_v34 = vpop.permute.xlu0 %191  ;;  %v237_v50 = vpack.c.bf16 %v233_v36, %v229_v35 }
  0xcb   :  { %v205_v37 = vsel %vm197_vm0, %v194_v33, %v182_v18  ;;  %v204_v38 = vsel %vm197_vm0, %v192_v34, %v180_v14  ;;  %v198_v39 = vsel %vm197_vm0, %v188_v26, %v192_v34  ;;  %v199_v40 = vsel %vm197_vm0, %v190_v25, %v194_v33 }
  0xcc   :  { %679 = vrot.lane.b32.xlu1 %v7041_v3, %s6890_s29  ;;  %677 = vrot.lane.b32.xlu0 %v7033_v1, %s6890_s29  ;;  %v227_v41 = vmul.f32 %v7203_v31, %v204_v38  ;;  %v231_v42 = vmul.f32 %v7203_v31, %v205_v37  ;;  %v230_v43 = vmul.f32 %v7206_v32, %v198_v39 }
  0xcd   :  { %v234_v44 = vmul.f32 %v7206_v32, %v199_v40  ;;  %v7283_v37 = vrot.slane %v80_v29, %v7165_v11 }
  0xce   :  { %v246_v46 = vpop.permute.xlu1 %245  ;;  %v244_v47 = vpop.permute.xlu0 %243  ;;  %v235_v48 = vpack.c.bf16 %v231_v42, %v227_v41 }
  0xcf   :  { %v238_v49 = vpack.c.bf16 %v234_v44, %v230_v43 }
  0xd0   :  { %683 = vrot.lane.b32.xlu1 %v7039_v2, %s6890_s29  ;;  %681 = vrot.lane.b32.xlu0 %v7031_v0, %s6890_s29 }
  0xd1   :  { %3409 = vmatpush1.bf16.msra.mxu0 %v235_v48  ;;  %3580 = vmatprep.subr.bf16.mxu1 %v238_v49 }
  0xd2   :  { %3581 = vmatpush1.bf16.msra.mxu1 %v237_v50  ;;  %v250_v52 = vpop.permute.xlu1 %249  ;;  %v248_v53 = vpop.permute.xlu0 %247  ;;  %v7307_v50 = vrot.slane %v80_v29, %v7185_v21 }
  0xd3   :  { %v265_v54 = vsel %vm259_vm1, %v246_v46, %v250_v52  ;;  %v264_v55 = vsel %vm259_vm1, %v244_v47, %v248_v53 }
  0xd4   :  { %v294_v56 = vmul.f32 %v7232_v51, %v265_v54  ;;  %v290_v57 = vmul.f32 %v7232_v51, %v264_v55  ;;  %687 = vrot.lane.b32.xlu1 %v7047_v4, %s6890_s29  ;;  %685 = vrot.lane.b32.xlu0 %v7049_v5, %s6890_s29 }
  0xd6   :  { %v254_v58 = vpop.permute.xlu1 %253  ;;  %v252_v60 = vpop.permute.xlu0 %251  ;;  %v298_v61 = vpack.c.bf16 %v294_v56, %v290_v57 }
  0xd7   :  { %v263_v62 = vsel %vm259_vm1, %v250_v52, %v254_v58  ;;  %v262_v63 = vsel %vm259_vm1, %v248_v53, %v252_v60  ;;  %v7310_v52 = vrot.slane %v80_v29, %v7189_v24 }
  0xd8   :  { %691 = vrot.lane.b32.xlu1 %v7055_v6, %s6890_s29  ;;  %689 = vrot.lane.b32.xlu0 %v7057_v7, %s6890_s29  ;;  %v295_v12 = vmul.f32 %v7245_v59, %v263_v62  ;;  %v291_v13 = vmul.f32 %v7245_v59, %v262_v63 }
  0xd9   :  { %3410 = vmatprep.subr.bf16.mxu0 %v298_v61 }
  0xda   :  { %v258_v14 = vpop.permute.xlu1 %257  ;;  %v256_v16 = vpop.permute.xlu0 %255  ;;  %v299_v36 = vpack.c.bf16 %v295_v12, %v291_v13 }
  0xdb   :  { %v261_v17 = vsel %vm259_vm1, %v254_v58, %v258_v14  ;;  %v267_v18 = vsel %vm259_vm1, %v258_v14, %v246_v46  ;;  %v260_v20 = vsel %vm259_vm1, %v252_v60, %v256_v16  ;;  %v266_v22 = vsel %vm259_vm1, %v256_v16, %v244_v47  ;;  %v82_v14 = vld [vmem:[#allocation9 + $0x3] ss:$8 sm:$0xf] }
  0xdc   :  { %v293_v23 = vmul.f32 %v7256_v8, %v267_v18  ;;  %v296_v25 = vmul.f32 %v7259_v9, %v261_v17  ;;  %v289_v26 = vmul.f32 %v7256_v8, %v266_v22  ;;  %v292_v27 = vmul.f32 %v7259_v9, %v260_v20  ;;  %741 = vrot.lane.b32.xlu1 %v7041_v3, %s6891_s30 }
  0xdd   :  { %739 = vrot.lane.b32.xlu0 %v7033_v1, %s6891_s30 }
  0xde   :  { %v308_v30 = vpop.permute.xlu1 %307  ;;  %v306_v33 = vpop.permute.xlu0 %305  ;;  %v297_v34 = vpack.c.bf16 %v293_v23, %v289_v26  ;;  %v300_v35 = vpack.c.bf16 %v296_v25, %v292_v27  ;;  %v7336_v23 = vrot.slane %v82_v14, %v7165_v11 }
  0xe0   :  { %745 = vrot.lane.b32.xlu1 %v7039_v2, %s6891_s30  ;;  %3411 = vmatpush1.bf16.msra.mxu0 %v297_v34 }
  0xe1   :  { %743 = vrot.lane.b32.xlu0 %v7031_v0, %s6891_s30  ;;  %3582 = vmatprep.subr.bf16.mxu1 %v300_v35  ;;  %v7351_v35 = vrot.slane %v82_v14, %v7177_v19 }
  0xe2   :  { %3583 = vmatpush1.bf16.msra.mxu1 %v299_v36  ;;  %v312_v38 = vpop.permute.xlu1 %311  ;;  %v310_v39 = vpop.permute.xlu0 %309 }
  0xe3   :  { %v327_v40 = vsel %vm321_vm2, %v308_v30, %v312_v38  ;;  %v326_v41 = vsel %vm321_vm2, %v306_v33, %v310_v39 }
  0xe4   :  { %v356_v42 = vmul.f32 %v7283_v37, %v327_v40  ;;  %v352_v43 = vmul.f32 %v7283_v37, %v326_v41  ;;  %749 = vrot.lane.b32.xlu1 %v7047_v4, %s6891_s30  ;;  %v7360_v41 = vrot.slane %v82_v14, %v7185_v21 }
  0xe5   :  { %747 = vrot.lane.b32.xlu0 %v7049_v5, %s6891_s30 }
  0xe6   :  { %v316_v44 = vpop.permute.xlu1 %315  ;;  %v314_v46 = vpop.permute.xlu0 %313  ;;  %v360_v47 = vpack.c.bf16 %v356_v42, %v352_v43  ;;  %v7363_v42 = vrot.slane %v82_v14, %v7189_v24 }
  0xe7   :  { %v325_v48 = vsel %vm321_vm2, %v312_v38, %v316_v44  ;;  %v324_v49 = vsel %vm321_vm2, %v310_v39, %v314_v46 }
  0xe8   :  { %753 = vrot.lane.b32.xlu1 %v7055_v6, %s6891_s30  ;;  %3412 = vmatprep.subr.bf16.mxu0 %v360_v47  ;;  %v357_v53 = vmul.f32 %v7298_v45, %v325_v48  ;;  %v353_v54 = vmul.f32 %v7298_v45, %v324_v49 }
  0xe9   :  { %751 = vrot.lane.b32.xlu0 %v7057_v7, %s6891_s30 }
  0xea   :  { %v320_v55 = vpop.permute.xlu1 %319  ;;  %v318_v56 = vpop.permute.xlu0 %317  ;;  %v361_v22 = vpack.c.bf16 %v357_v53, %v353_v54 }
  0xeb   :  { %v323_v57 = vsel %vm321_vm2, %v316_v44, %v320_v55  ;;  %v329_v58 = vsel %vm321_vm2, %v320_v55, %v308_v30  ;;  %v322_v60 = vsel %vm321_vm2, %v314_v46, %v318_v56  ;;  %v328_v61 = vsel %vm321_vm2, %v318_v56, %v306_v33 }
  0xec   :  { %v355_v62 = vmul.f32 %v7307_v50, %v329_v58  ;;  %v358_v63 = vmul.f32 %v7310_v52, %v323_v57  ;;  %v351_v12 = vmul.f32 %v7307_v50, %v328_v61  ;;  %v354_v13 = vmul.f32 %v7310_v52, %v322_v60  ;;  %803 = vrot.lane.b32.xlu1 %v7041_v3, %s6879_s21  ;;  %v84_v60 = vld [vmem:[#allocation9 + $0x4] ss:$8 sm:$0xf] }
  0xed   :  { %801 = vrot.lane.b32.xlu0 %v7033_v1, %s6879_s21  ;;  %v7389_v14 = vrot.slane %v84_v60, %v7165_v11 }
  0xee   :  { %v370_v16 = vpop.permute.xlu1 %369  ;;  %v368_v17 = vpop.permute.xlu0 %367  ;;  %v359_v18 = vpack.c.bf16 %v355_v62, %v351_v12  ;;  %v362_v20 = vpack.c.bf16 %v358_v63, %v354_v13 }
  0xf0   :  { %807 = vrot.lane.b32.xlu1 %v7039_v2, %s6879_s21  ;;  %3413 = vmatpush1.bf16.msra.mxu0 %v359_v18 }
  0xf1   :  { %805 = vrot.lane.b32.xlu0 %v7031_v0, %s6879_s21  ;;  %3584 = vmatprep.subr.bf16.mxu1 %v362_v20 }
  0xf2   :  { %3585 = vmatpush1.bf16.msra.mxu1 %v361_v22  ;;  %v374_v25 = vpop.permute.xlu1 %373  ;;  %v372_v26 = vpop.permute.xlu0 %371 }
  0xf3   :  { %v389_v27 = vsel %vm383_vm3, %v370_v16, %v374_v25  ;;  %v388_v29 = vsel %vm383_vm3, %v368_v17, %v372_v26 }
  0xf4   :  { %v418_v30 = vmul.f32 %v7336_v23, %v389_v27  ;;  %v414_v33 = vmul.f32 %v7336_v23, %v388_v29  ;;  %811 = vrot.lane.b32.xlu1 %v7047_v4, %s6879_s21  ;;  %v7404_v27 = vrot.slane %v84_v60, %v7177_v19 }
  0xf5   :  { %809 = vrot.lane.b32.xlu0 %v7049_v5, %s6879_s21 }
  0xf6   :  { %v378_v34 = vpop.permute.xlu1 %377  ;;  %v376_v36 = vpop.permute.xlu0 %375  ;;  %v422_v38 = vpack.c.bf16 %v418_v30, %v414_v33 }
  0xf7   :  { %v387_v39 = vsel %vm383_vm3, %v374_v25, %v378_v34  ;;  %v386_v40 = vsel %vm383_vm3, %v372_v26, %v376_v36 }
  0xf8   :  { %815 = vrot.lane.b32.xlu1 %v7055_v6, %s6879_s21  ;;  %3414 = vmatprep.subr.bf16.mxu0 %v422_v38  ;;  %v419_v43 = vmul.f32 %v7351_v35, %v387_v39  ;;  %v415_v44 = vmul.f32 %v7351_v35, %v386_v40  ;;  %v7416_v38 = vrot.slane %v84_v60, %v7189_v24 }
  0xf9   :  { %813 = vrot.lane.b32.xlu0 %v7057_v7, %s6879_s21 }
  0xfa   :  { %v382_v46 = vpop.permute.xlu1 %381  ;;  %v380_v47 = vpop.permute.xlu0 %379  ;;  %v423_v13 = vpack.c.bf16 %v419_v43, %v415_v44 }
  0xfb   :  { %v385_v48 = vsel %vm383_vm3, %v378_v34, %v382_v46  ;;  %v391_v49 = vsel %vm383_vm3, %v382_v46, %v370_v16  ;;  %v384_v53 = vsel %vm383_vm3, %v376_v36, %v380_v47  ;;  %v390_v54 = vsel %vm383_vm3, %v380_v47, %v368_v17 }
  0xfc   :  { %v417_v55 = vmul.f32 %v7360_v41, %v391_v49  ;;  %v420_v56 = vmul.f32 %v7363_v42, %v385_v48  ;;  %v413_v57 = vmul.f32 %v7360_v41, %v390_v54  ;;  %v416_v58 = vmul.f32 %v7363_v42, %v384_v53  ;;  %865 = vrot.lane.b32.xlu1 %v7041_v3, %s6892_s7 }
  0xfd   :  { %863 = vrot.lane.b32.xlu0 %v7033_v1, %s6892_s7  ;;  %v7413_v36 = vrot.slane %v84_v60, %v7185_v21 }
  0xfe   :  { %v432_v61 = vpop.permute.xlu1 %431  ;;  %v430_v62 = vpop.permute.xlu0 %429  ;;  %v421_v63 = vpack.c.bf16 %v417_v55, %v413_v57  ;;  %v424_v12 = vpack.c.bf16 %v420_v56, %v416_v58  ;;  %v86_v57 = vld [vmem:[#allocation9 + $0x5] ss:$8 sm:$0xf] }
 0x100   :  { %869 = vrot.lane.b32.xlu1 %v7039_v2, %s6892_s7  ;;  %3415 = vmatpush1.bf16.msra.mxu0 %v421_v63 }
 0x101   :  { %867 = vrot.lane.b32.xlu0 %v7031_v0, %s6892_s7  ;;  %3586 = vmatprep.subr.bf16.mxu1 %v424_v12  ;;  %v7442_v12 = vrot.slane %v86_v57, %v7165_v11 }
 0x102   :  { %3587 = vmatpush1.bf16.msra.mxu1 %v423_v13  ;;  %v436_v16 = vpop.permute.xlu1 %435  ;;  %v434_v17 = vpop.permute.xlu0 %433 }
 0x103   :  { %v451_v18 = vsel %vm445_vm4, %v432_v61, %v436_v16  ;;  %v450_v20 = vsel %vm445_vm4, %v430_v62, %v434_v17 }
 0x104   :  { %v480_v22 = vmul.f32 %v7389_v14, %v451_v18  ;;  %v476_v25 = vmul.f32 %v7389_v14, %v450_v20  ;;  %873 = vrot.lane.b32.xlu1 %v7047_v4, %s6892_s7 }
 0x105   :  { %871 = vrot.lane.b32.xlu0 %v7049_v5, %s6892_s7 }
 0x106   :  { %v440_v26 = vpop.permute.xlu1 %439  ;;  %v438_v29 = vpop.permute.xlu0 %437  ;;  %v484_v30 = vpack.c.bf16 %v480_v22, %v476_v25 }
 0x107   :  { %v449_v33 = vsel %vm445_vm4, %v436_v16, %v440_v26  ;;  %v448_v34 = vsel %vm445_vm4, %v434_v17, %v438_v29 }
 0x108   :  { %877 = vrot.lane.b32.xlu1 %v7055_v6, %s6892_s7  ;;  %3416 = vmatprep.subr.bf16.mxu0 %v484_v30  ;;  %v481_v39 = vmul.f32 %v7404_v27, %v449_v33  ;;  %v477_v40 = vmul.f32 %v7404_v27, %v448_v34 }
 0x109   :  { %875 = vrot.lane.b32.xlu0 %v7057_v7, %s6892_s7 }
 0x10a   :  { %v444_v43 = vpop.permute.xlu1 %443  ;;  %v442_v44 = vpop.permute.xlu0 %441  ;;  %v485_v63 = vpack.c.bf16 %v481_v39, %v477_v40  ;;  %v7466_v39 = vrot.slane %v86_v57, %v7185_v21  ;;  %v7469_v40 = vrot.slane %v86_v57, %v7189_v24 }
 0x10b   :  { %v447_v46 = vsel %vm445_vm4, %v440_v26, %v444_v43  ;;  %v453_v47 = vsel %vm445_vm4, %v444_v43, %v432_v61  ;;  %v446_v48 = vsel %vm445_vm4, %v438_v29, %v442_v44  ;;  %v452_v49 = vsel %vm445_vm4, %v442_v44, %v430_v62 }
 0x10c   :  { %v479_v53 = vmul.f32 %v7413_v36, %v453_v47  ;;  %v482_v54 = vmul.f32 %v7416_v38, %v447_v46  ;;  %v475_v55 = vmul.f32 %v7413_v36, %v452_v49  ;;  %v478_v56 = vmul.f32 %v7416_v38, %v446_v48  ;;  %927 = vrot.lane.b32.xlu1 %v7041_v3, %s6893_s8 }
 0x10d   :  { %925 = vrot.lane.b32.xlu0 %v7033_v1, %s6893_s8  ;;  %v7457_v26 = vrot.slane %v86_v57, %v7177_v19 }
 0x10e   :  { %v494_v58 = vpop.permute.xlu1 %493  ;;  %v492_v60 = vpop.permute.xlu0 %491  ;;  %v483_v61 = vpack.c.bf16 %v479_v53, %v475_v55  ;;  %v486_v62 = vpack.c.bf16 %v482_v54, %v478_v56 }
 0x110   :  { %931 = vrot.lane.b32.xlu1 %v7039_v2, %s6893_s8  ;;  %3417 = vmatpush1.bf16.msra.mxu0 %v483_v61 }
 0x111   :  { %929 = vrot.lane.b32.xlu0 %v7031_v0, %s6893_s8  ;;  %3588 = vmatprep.subr.bf16.mxu1 %v486_v62 }
 0x112   :  { %3589 = vmatpush1.bf16.msra.mxu1 %v485_v63  ;;  %v498_v13 = vpop.permute.xlu1 %497  ;;  %v496_v16 = vpop.permute.xlu0 %495 }
 0x113   :  { %v513_v17 = vsel %vm507_vm5, %v494_v58, %v498_v13  ;;  %v512_v18 = vsel %vm507_vm5, %v492_v60, %v496_v16 }
 0x114   :  { %v542_v20 = vmul.f32 %v7442_v12, %v513_v17  ;;  %v538_v22 = vmul.f32 %v7442_v12, %v512_v18  ;;  %935 = vrot.lane.b32.xlu1 %v7047_v4, %s6893_s8 }
 0x115   :  { %933 = vrot.lane.b32.xlu0 %v7049_v5, %s6893_s8 }
 0x116   :  { %v502_v25 = vpop.permute.xlu1 %501  ;;  %v500_v29 = vpop.permute.xlu0 %499  ;;  %v546_v30 = vpack.c.bf16 %v542_v20, %v538_v22 }
 0x117   :  { %v511_v33 = vsel %vm507_vm5, %v498_v13, %v502_v25  ;;  %v510_v34 = vsel %vm507_vm5, %v496_v16, %v500_v29 }
 0x118   :  { %939 = vrot.lane.b32.xlu1 %v7055_v6, %s6893_s8  ;;  %3418 = vmatprep.subr.bf16.mxu0 %v546_v30  ;;  %v543_v43 = vmul.f32 %v7457_v26, %v511_v33  ;;  %v539_v44 = vmul.f32 %v7457_v26, %v510_v34 }
 0x119   :  { %937 = vrot.lane.b32.xlu0 %v7057_v7, %s6893_s8 }
 0x11a   :  { %v506_v46 = vpop.permute.xlu1 %505  ;;  %v504_v47 = vpop.permute.xlu0 %503  ;;  %v547_v16 = vpack.c.bf16 %v543_v43, %v539_v44 }
 0x11b   :  { %v509_v48 = vsel %vm507_vm5, %v502_v25, %v506_v46  ;;  %v515_v49 = vsel %vm507_vm5, %v506_v46, %v494_v58  ;;  %v508_v53 = vsel %vm507_vm5, %v500_v29, %v504_v47  ;;  %v514_v54 = vsel %vm507_vm5, %v504_v47, %v492_v60  ;;  %v88_v58 = vld [vmem:[#allocation9 + $0x6] ss:$8 sm:$0xf] }
 0x11c   :  { %v541_v55 = vmul.f32 %v7466_v39, %v515_v49  ;;  %v544_v56 = vmul.f32 %v7469_v40, %v509_v48  ;;  %v537_v57 = vmul.f32 %v7466_v39, %v514_v54  ;;  %v540_v61 = vmul.f32 %v7469_v40, %v508_v53  ;;  %989 = vrot.lane.b32.xlu1 %v7041_v3, %s6894_s9 }
 0x11d   :  { %987 = vrot.lane.b32.xlu0 %v7033_v1, %s6894_s9  ;;  %v7495_v17 = vrot.slane %v88_v58, %v7165_v11  ;;  %v7510_v34 = vrot.slane %v88_v58, %v7177_v19  ;;  %v7519_v48 = vrot.slane %v88_v58, %v7185_v21  ;;  %v7522_v49 = vrot.slane %v88_v58, %v7189_v24 }
 0x11e   :  { %v556_v62 = vpop.permute.xlu1 %555  ;;  %v554_v63 = vpop.permute.xlu0 %553  ;;  %v545_v13 = vpack.c.bf16 %v541_v55, %v537_v57  ;;  %v548_v60 = vpack.c.bf16 %v544_v56, %v540_v61 }
 0x120   :  { %993 = vrot.lane.b32.xlu1 %v7039_v2, %s6894_s9  ;;  %3419 = vmatpush1.bf16.msra.mxu0 %v545_v13 }
 0x121   :  { %991 = vrot.lane.b32.xlu0 %v7031_v0, %s6894_s9  ;;  %3590 = vmatprep.subr.bf16.mxu1 %v548_v60 }
 0x122   :  { %3591 = vmatpush1.bf16.msra.mxu1 %v547_v16  ;;  %v560_v18 = vpop.permute.xlu1 %559  ;;  %v558_v20 = vpop.permute.xlu0 %557 }
 0x123   :  { %v575_v22 = vsel %vm569_vm6, %v556_v62, %v560_v18  ;;  %v574_v25 = vsel %vm569_vm6, %v554_v63, %v558_v20 }
 0x124   :  { %v604_v29 = vmul.f32 %v7495_v17, %v575_v22  ;;  %v600_v30 = vmul.f32 %v7495_v17, %v574_v25  ;;  %997 = vrot.lane.b32.xlu1 %v7047_v4, %s6894_s9 }
 0x125   :  { %995 = vrot.lane.b32.xlu0 %v7049_v5, %s6894_s9 }
 0x126   :  { %v564_v33 = vpop.permute.xlu1 %563  ;;  %v562_v43 = vpop.permute.xlu0 %561  ;;  %v608_v44 = vpack.c.bf16 %v604_v29, %v600_v30 }
 0x127   :  { %v573_v46 = vsel %vm569_vm6, %v560_v18, %v564_v33  ;;  %v572_v47 = vsel %vm569_vm6, %v558_v20, %v562_v43 }
 0x128   :  { %1001 = vrot.lane.b32.xlu1 %v7055_v6, %s6894_s9  ;;  %3420 = vmatprep.subr.bf16.mxu0 %v608_v44  ;;  %v605_v53 = vmul.f32 %v7510_v34, %v573_v46  ;;  %v601_v54 = vmul.f32 %v7510_v34, %v572_v47 }
 0x129   :  { %999 = vrot.lane.b32.xlu0 %v7057_v7, %s6894_s9 }
 0x12a   :  { %v568_v55 = vpop.permute.xlu1 %567  ;;  %v566_v56 = vpop.permute.xlu0 %565  ;;  %v609_v30 = vpack.c.bf16 %v605_v53, %v601_v54 }
 0x12b   :  { %v571_v57 = vsel %vm569_vm6, %v564_v33, %v568_v55  ;;  %v577_v61 = vsel %vm569_vm6, %v568_v55, %v556_v62  ;;  %v570_v13 = vsel %vm569_vm6, %v562_v43, %v566_v56  ;;  %v576_v58 = vsel %vm569_vm6, %v566_v56, %v554_v63  ;;  %v90_v62 = vld [vmem:[#allocation9 + $0x7] ss:$8 sm:$0xf] }
 0x12c   :  { %v603_v60 = vmul.f32 %v7519_v48, %v577_v61  ;;  %v606_v16 = vmul.f32 %v7522_v49, %v571_v57  ;;  %v599_v18 = vmul.f32 %v7519_v48, %v576_v58  ;;  %v602_v20 = vmul.f32 %v7522_v49, %v570_v13  ;;  %1051 = vrot.lane.b32.xlu1 %v7041_v3, %s6895_s10 }
 0x12d   :  { %1049 = vrot.lane.b32.xlu0 %v7033_v1, %s6895_s10  ;;  %v7548_v33 = vrot.slane %v90_v62, %v7165_v11  ;;  %v7563_v56 = vrot.slane %v90_v62, %v7177_v19 }
 0x12e   :  { %v618_v22 = vpop.permute.xlu1 %617  ;;  %v616_v25 = vpop.permute.xlu0 %615  ;;  %v607_v29 = vpack.c.bf16 %v603_v60, %v599_v18  ;;  %v610_v63 = vpack.c.bf16 %v606_v16, %v602_v20  ;;  %v7572_v60 = vrot.slane %v90_v62, %v7185_v21  ;;  %v7575_v16 = vrot.slane %v90_v62, %v7189_v24 }
 0x130   :  { %1055 = vrot.lane.b32.xlu1 %v7039_v2, %s6895_s10  ;;  %3421 = vmatpush1.bf16.msra.mxu0 %v607_v29  ;;  %12151 = vst [vmem:[#allocation21_spill] sm:$0xff] %v7575_v16 }
 0x131   :  { %1053 = vrot.lane.b32.xlu0 %v7031_v0, %s6895_s10  ;;  %3592 = vmatprep.subr.bf16.mxu1 %v610_v63 }
 0x132   :  { %3593 = vmatpush1.bf16.msra.mxu1 %v609_v30  ;;  %v622_v43 = vpop.permute.xlu1 %621  ;;  %v620_v44 = vpop.permute.xlu0 %619 }
 0x133   :  { %v637_v46 = vsel %vm631_vm7, %v618_v22, %v622_v43  ;;  %v636_v47 = vsel %vm631_vm7, %v616_v25, %v620_v44 }
 0x134   :  { %v666_v53 = vmul.f32 %v7548_v33, %v637_v46  ;;  %v662_v54 = vmul.f32 %v7548_v33, %v636_v47  ;;  %1059 = vrot.lane.b32.xlu1 %v7047_v4, %s6895_s10 }
 0x135   :  { %1057 = vrot.lane.b32.xlu0 %v7049_v5, %s6895_s10 }
 0x136   :  { %v626_v55 = vpop.permute.xlu1 %625  ;;  %v624_v57 = vpop.permute.xlu0 %623  ;;  %v670_v61 = vpack.c.bf16 %v666_v53, %v662_v54 }
 0x137   :  { %v635_v13 = vsel %vm631_vm7, %v622_v43, %v626_v55  ;;  %v634_v58 = vsel %vm631_vm7, %v620_v44, %v624_v57 }
 0x138   :  { %1063 = vrot.lane.b32.xlu1 %v7055_v6, %s6895_s10  ;;  %3422 = vmatprep.subr.bf16.mxu0 %v670_v61  ;;  %v667_v18 = vmul.f32 %v7563_v56, %v635_v13  ;;  %v663_v20 = vmul.f32 %v7563_v56, %v634_v58 }
 0x139   :  { %1061 = vrot.lane.b32.xlu0 %v7057_v7, %s6895_s10 }
 0x13a   :  { %v630_v29 = vpop.permute.xlu1 %629  ;;  %v628_v63 = vpop.permute.xlu0 %627  ;;  %v671_v13 = vpack.c.bf16 %v667_v18, %v663_v20 }
 0x13b   :  { %v633_v30 = vsel %vm631_vm7, %v626_v55, %v630_v29  ;;  %v639_v43 = vsel %vm631_vm7, %v630_v29, %v618_v22  ;;  %v632_v44 = vsel %vm631_vm7, %v624_v57, %v628_v63  ;;  %v638_v62 = vsel %vm631_vm7, %v628_v63, %v616_v25  ;;  %v92_v22 = vld [vmem:[#allocation9 + $0x20] ss:$8 sm:$0xf] }
 0x13c   :  { %v665_v46 = vmul.f32 %v7572_v60, %v639_v43  ;;  %v668_v47 = vmul.f32 %v7575_v16, %v633_v30  ;;  %v661_v53 = vmul.f32 %v7572_v60, %v638_v62  ;;  %v664_v54 = vmul.f32 %v7575_v16, %v632_v44  ;;  %1113 = vrot.lane.b32.xlu1 %v7041_v3, %s6896_s0 }
 0x13d   :  { %1111 = vrot.lane.b32.xlu0 %v7033_v1, %s6896_s0  ;;  %v7601_v58 = vrot.slane %v92_v22, %v7165_v11  ;;  %v7616_v44 = vrot.slane %v92_v22, %v7177_v19 }
 0x13e   :  { %v680_v55 = vpop.permute.xlu1 %679  ;;  %v678_v57 = vpop.permute.xlu0 %677  ;;  %v669_v61 = vpack.c.bf16 %v665_v46, %v661_v53  ;;  %v672_v25 = vpack.c.bf16 %v668_v47, %v664_v54  ;;  %v7625_v54 = vrot.slane %v92_v22, %v7185_v21 }
 0x13f   :  { %12152 = vst [vmem:[#allocation22_spill] sm:$0xff] %v7601_v58  ;;  %12153 = vst [vmem:[#allocation23_spill] sm:$0xff] %v7616_v44 }
 0x140   :  { %1117 = vrot.lane.b32.xlu1 %v7039_v2, %s6896_s0  ;;  %3423 = vmatpush1.bf16.msra.mxu0 %v669_v61  ;;  %12154 = vst [vmem:[#allocation24_spill] sm:$0xff] %v7625_v54  ;;  %v7628_v61 = vrot.slane %v92_v22, %v7189_v24 }
 0x141   :  { %1115 = vrot.lane.b32.xlu0 %v7031_v0, %s6896_s0  ;;  %3594 = vmatprep.subr.bf16.mxu1 %v672_v25 }
 0x142   :  { %3595 = vmatpush1.bf16.msra.mxu1 %v671_v13  ;;  %v684_v29 = vpop.permute.xlu1 %683  ;;  %v682_v63 = vpop.permute.xlu0 %681  ;;  %12155 = vst [vmem:[#allocation25_spill] sm:$0xff] %v7628_v61 }
 0x143   :  { %v699_v30 = vsel %vm693_vm8, %v680_v55, %v684_v29  ;;  %v698_v43 = vsel %vm693_vm8, %v678_v57, %v682_v63 }
 0x144   :  { %v728_v18 = vmul.f32 %v7601_v58, %v699_v30  ;;  %v724_v20 = vmul.f32 %v7601_v58, %v698_v43  ;;  %1121 = vrot.lane.b32.xlu1 %v7047_v4, %s6896_s0 }
 0x145   :  { %1119 = vrot.lane.b32.xlu0 %v7049_v5, %s6896_s0 }
 0x146   :  { %v688_v0 = vpop.permute.xlu1 %687  ;;  %v686_v62 = vpop.permute.xlu0 %685  ;;  %v732_v46 = vpack.c.bf16 %v728_v18, %v724_v20 }
 0x147   :  { %v697_v47 = vsel %vm693_vm8, %v684_v29, %v688_v0  ;;  %v696_v53 = vsel %vm693_vm8, %v682_v63, %v686_v62 }
 0x148   :  { %1125 = vrot.lane.b32.xlu1 %v7055_v6, %s6896_s0  ;;  %3424 = vmatprep.subr.bf16.mxu0 %v732_v46  ;;  %v729_v25 = vmul.f32 %v7616_v44, %v697_v47  ;;  %v725_v13 = vmul.f32 %v7616_v44, %v696_v53 }
 0x149   :  { %1123 = vrot.lane.b32.xlu0 %v7057_v7, %s6896_s0 }
 0x14a   :  { %v692_v29 = vpop.permute.xlu1 %691  ;;  %v690_v30 = vpop.permute.xlu0 %689 }
 0x14b   :  { %v695_v63 = vsel %vm693_vm8, %v688_v0, %v692_v29  ;;  %v701_v43 = vsel %vm693_vm8, %v692_v29, %v680_v55  ;;  %v694_v18 = vsel %vm693_vm8, %v686_v62, %v690_v30  ;;  %v700_v22 = vsel %vm693_vm8, %v690_v30, %v678_v57  ;;  %v94_v55 = vld [vmem:[#allocation9 + $0x21] ss:$8 sm:$0xf] }
 0x14c   :  { %v727_v7 = vmul.f32 %v7625_v54, %v701_v43  ;;  %v730_v20 = vmul.f32 %v7628_v61, %v695_v63  ;;  %v723_v46 = vmul.f32 %v7625_v54, %v700_v22  ;;  %v726_v47 = vmul.f32 %v7628_v61, %v694_v18  ;;  %1175 = vrot.lane.b32.xlu1 %v7041_v3, %s6897_s11  ;;  %v6647_v29 = vld [vmem:[#allocation6 + $0x4] ss:$28 sps:$4 sm:$0xff]   ;;  %v7656_v3 = vld [vmem:[#allocation3 + $0x8] sm:$0xff] }
 0x14d   :  { %1173 = vrot.lane.b32.xlu0 %v7033_v1, %s6897_s11  ;;  %v733_v30 = vpack.c.bf16 %v729_v25, %v725_v13  ;;  %v7654_v63 = vrot.slane %v94_v55, %v7165_v11  ;;  %3440 = vmatprep.mubr.bf16.mxu0 %v6647_v29 }
 0x14e   :  { %v742_v0 = vpop.permute.xlu1 %741  ;;  %v731_v62 = vpack.c.bf16 %v727_v7, %v723_v46  ;;  %v734_v53 = vpack.c.bf16 %v730_v20, %v726_v47  ;;  %3612 = vmatprep.mubr.bf16.mxu1 %v6647_v29  ;;  %v7673_v46 = vrot.slane %v94_v55, %v7185_v21  ;;  %v7676_v47 = vrot.slane %v94_v55, %v7189_v24 }
 0x14f   :  { %v740_v57 = vpop.permute.xlu0 %739  ;;  %12156 = vst [vmem:[#allocation26_spill] sm:$0xff] %v7654_v63 }
 0x150   :  { %1179 = vrot.lane.b32.xlu1 %v7039_v2, %s6897_s11  ;;  %3425 = vmatpush1.bf16.msra.mxu0 %v731_v62  ;;  %12157 = vst [vmem:[#allocation27_spill] sm:$0xff] %v7673_v46  ;;  %12158 = vst [vmem:[#allocation28_spill] sm:$0xff] %v7676_v47  ;;  %v7679_v62 = vrot.slane %v94_v55, %v7177_v19 }
 0x151   :  { %1177 = vrot.lane.b32.xlu0 %v7656_v3, %s6897_s11  ;;  %3596 = vmatprep.subr.bf16.mxu1 %v734_v53 }
 0x152   :  { %3597 = vmatpush1.bf16.msra.mxu1 %v733_v30  ;;  %v746_v1 = vpop.permute.xlu1 %745  ;;  %12159 = vst [vmem:[#allocation29_spill] sm:$0xff] %v7679_v62 }
 0x153   :  { %v761_v43 = vsel %vm755_vm9, %v742_v0, %v746_v1  ;;  %v744_v2 = vpop.permute.xlu0 %743 }
 0x154   :  { %v790_v25 = vmul.f32 %v7654_v63, %v761_v43  ;;  %v760_v13 = vsel %vm755_vm9, %v740_v57, %v744_v2  ;;  %1183 = vrot.lane.b32.xlu1 %v7047_v4, %s6897_s11  ;;  %v7681_v4 = vld [vmem:[#allocation3 + $0x18] sm:$0xff] }
 0x155   :  { %v786_v18 = vmul.f32 %v7654_v63, %v760_v13  ;;  %1181 = vrot.lane.b32.xlu0 %v7049_v5, %s6897_s11  ;;  %v7711_v63 = vld [vmem:[#allocation3 + $0x28] sm:$0xff] }
 0x156   :  { %v750_v22 = vpop.permute.xlu1 %749 }
 0x157   :  { %v748_v7 = vpop.permute.xlu0 %747  ;;  %v794_v20 = vpack.c.bf16 %v790_v25, %v786_v18  ;;  %v759_v5 = vsel %vm755_vm9, %v746_v1, %v750_v22  ;;  %v7699_v18 = vld [vmem:[#allocation3 + $0x20] sm:$0xff] }
 0x158   :  { %1187 = vrot.lane.b32.xlu1 %v7055_v6, %s6897_s11  ;;  %v758_v6 = vsel %vm755_vm9, %v744_v2, %v748_v7  ;;  %v791_v2 = vmul.f32 %v7679_v62, %v759_v5 }
 0x159   :  { %1185 = vrot.lane.b32.xlu0 %v7681_v4, %s6897_s11  ;;  %3426 = vmatprep.subr.bf16.mxu0 %v794_v20 }
 0x15a   :  { %v754_v53 = vpop.permute.xlu1 %753 }
 0x15b   :  { %v757_v29 = vsel %vm755_vm9, %v750_v22, %v754_v53  ;;  %v763_v55 = vsel %vm755_vm9, %v754_v53, %v742_v0  ;;  %v752_v30 = vpop.permute.xlu0 %751  ;;  %v787_v0 = vmul.f32 %v7679_v62, %v758_v6  ;;  %v7707_v53 = vld [vmem:[#allocation3] sm:$0xff] }
 0x15c   :  { %v789_v43 = vmul.f32 %v7673_v46, %v763_v55  ;;  %v792_v25 = vmul.f32 %v7676_v47, %v757_v29  ;;  %v756_v13 = vsel %vm755_vm9, %v748_v7, %v752_v30  ;;  %v762_v1 = vsel %vm755_vm9, %v752_v30, %v740_v57  ;;  %1237 = vrot.lane.b32.xlu1 %v7699_v18, %s6898_s12  ;;  %v96_v57 = vld [vmem:[#allocation9 + $0x22] ss:$8 sm:$0xf] }
 0x15d   :  { %v785_v22 = vmul.f32 %v7673_v46, %v762_v1  ;;  %v788_v20 = vmul.f32 %v7676_v47, %v756_v13  ;;  %1235 = vrot.lane.b32.xlu0 %v7707_v53, %s6898_s12  ;;  %v7717_v5 = vrot.slane %v96_v57, %v7165_v11  ;;  %v795_v6 = vpack.c.bf16 %v791_v2, %v787_v0  ;;  %v7731_v2 = vld [vmem:[#allocation3 + $0x10] sm:$0xff]  ;;  %v7735_v47 = vld [vmem:[#allocation3 + $0x38] sm:$0xff] }
 0x15e   :  { %v804_v7 = vpop.permute.xlu1 %803  ;;  %v7743_v46 = vrot.slane %v96_v57, %v7189_v24 }
 0x15f   :  { %v802_v29 = vpop.permute.xlu0 %801  ;;  %v793_v55 = vpack.c.bf16 %v789_v43, %v785_v22  ;;  %v796_v30 = vpack.c.bf16 %v792_v25, %v788_v20  ;;  %12160 = vst [vmem:[#allocation30_spill] sm:$0xff] %v7717_v5  ;;  %v7726_v20 = vld [vmem:[#allocation3 + $0x30] sm:$0xff] }
 0x160   :  { %1241 = vrot.lane.b32.xlu1 %v7711_v63, %s6898_s12  ;;  %12162 = vst [vmem:[#allocation32_spill] sm:$0xff] %v7743_v46 }
 0x161   :  { %1239 = vrot.lane.b32.xlu0 %v7656_v3, %s6898_s12  ;;  %3427 = vmatpush1.bf16.msra.mxu0 %v793_v55 }
 0x162   :  { %3598 = vmatprep.subr.bf16.mxu1 %v796_v30  ;;  %v808_v13 = vpop.permute.xlu1 %807 }
 0x163   :  { %3599 = vmatpush1.bf16.msra.mxu1 %v795_v6  ;;  %v823_v43 = vsel %vm817_vm10, %v804_v7, %v808_v13  ;;  %v806_v25 = vpop.permute.xlu0 %805 }
 0x164   :  { %v852_v1 = vmul.f32 %v7717_v5, %v823_v43  ;;  %v822_v22 = vsel %vm817_vm10, %v802_v29, %v806_v25  ;;  %1245 = vrot.lane.b32.xlu1 %v7726_v20, %s6898_s12  ;;  %v7740_v43 = vrot.slane %v96_v57, %v7185_v21 }
 0x165   :  { %v848_v55 = vmul.f32 %v7717_v5, %v822_v22  ;;  %1243 = vrot.lane.b32.xlu0 %v7731_v2, %s6898_s12  ;;  %v7746_v22 = vrot.slane %v96_v57, %v7177_v19 }
 0x166   :  { %v812_v0 = vpop.permute.xlu1 %811  ;;  %12161 = vst [vmem:[#allocation31_spill] sm:$0xff] %v7740_v43 }
 0x167   :  { %v810_v30 = vpop.permute.xlu0 %809  ;;  %v856_v6 = vpack.c.bf16 %v852_v1, %v848_v55  ;;  %12163 = vst [vmem:[#allocation33_spill] sm:$0xff] %v7746_v22  ;;  %v821_v1 = vsel %vm817_vm10, %v808_v13, %v812_v0 }
 0x168   :  { %1249 = vrot.lane.b32.xlu1 %v7735_v47, %s6898_s12  ;;  %v820_v55 = vsel %vm817_vm10, %v806_v25, %v810_v30  ;;  %v853_v25 = vmul.f32 %v7746_v22, %v821_v1 }
 0x169   :  { %1247 = vrot.lane.b32.xlu0 %v7681_v4, %s6898_s12  ;;  %3428 = vmatprep.subr.bf16.mxu0 %v856_v6 }
 0x16a   :  { %v816_v5 = vpop.permute.xlu1 %815 }
 0x16b   :  { %v819_v62 = vsel %vm817_vm10, %v812_v0, %v816_v5  ;;  %v825_v61 = vsel %vm817_vm10, %v816_v5, %v804_v7  ;;  %v814_v54 = vpop.permute.xlu0 %813  ;;  %v849_v0 = vmul.f32 %v7746_v22, %v820_v55 }
 0x16c   :  { %v851_v57 = vmul.f32 %v7740_v43, %v825_v61  ;;  %v854_v44 = vmul.f32 %v7743_v46, %v819_v62  ;;  %v818_v6 = vsel %vm817_vm10, %v810_v30, %v814_v54  ;;  %v824_v13 = vsel %vm817_vm10, %v814_v54, %v802_v29  ;;  %1299 = vrot.lane.b32.xlu1 %v7699_v18, %s6899_s13  ;;  %v98_v62 = vld [vmem:[#allocation9 + $0x23] ss:$8 sm:$0xf] }
 0x16d   :  { %v847_v7 = vmul.f32 %v7740_v43, %v824_v13  ;;  %v850_v61 = vmul.f32 %v7743_v46, %v818_v6  ;;  %1297 = vrot.lane.b32.xlu0 %v7707_v53, %s6899_s13  ;;  %v7776_v29 = vrot.slane %v98_v62, %v7165_v11  ;;  %v857_v1 = vpack.c.bf16 %v853_v25, %v849_v0 }
 0x16e   :  { %v866_v5 = vpop.permute.xlu1 %865 }
 0x16f   :  { %v864_v30 = vpop.permute.xlu0 %863  ;;  %v855_v58 = vpack.c.bf16 %v851_v57, %v847_v7  ;;  %v858_v54 = vpack.c.bf16 %v854_v44, %v850_v61  ;;  %12164 = vst [vmem:[#allocation34_spill] sm:$0xff] %v7776_v29  ;;  %v7793_v61 = vrot.slane %v98_v62, %v7185_v21 }
 0x170   :  { %1303 = vrot.lane.b32.xlu1 %v7711_v63, %s6899_s13 }
 0x171   :  { %1301 = vrot.lane.b32.xlu0 %v7656_v3, %s6899_s13  ;;  %3429 = vmatpush1.bf16.msra.mxu0 %v855_v58  ;;  %12165 = vst [vmem:[#allocation35_spill] sm:$0xff] %v7793_v61 }
 0x172   :  { %3600 = vmatprep.subr.bf16.mxu1 %v858_v54  ;;  %v870_v55 = vpop.permute.xlu1 %869  ;;  %v7796_v54 = vrot.slane %v98_v62, %v7189_v24 }
 0x173   :  { %3601 = vmatpush1.bf16.msra.mxu1 %v857_v1  ;;  %v885_v57 = vsel %vm12139_vm11, %v866_v5, %v870_v55  ;;  %v868_v44 = vpop.permute.xlu0 %867  ;;  %v7799_v1 = vrot.slane %v98_v62, %v7177_v19 }
 0x174   :  { %v914_v6 = vmul.f32 %v7776_v29, %v885_v57  ;;  %v884_v13 = vsel %vm12139_vm11, %v864_v30, %v868_v44  ;;  %1307 = vrot.lane.b32.xlu1 %v7726_v20, %s6899_s13  ;;  %12166 = vst [vmem:[#allocation36_spill] sm:$0xff] %v7796_v54 }
 0x175   :  { %v910_v7 = vmul.f32 %v7776_v29, %v884_v13  ;;  %1305 = vrot.lane.b32.xlu0 %v7731_v2, %s6899_s13  ;;  %12167 = vst [vmem:[#allocation37_spill] sm:$0xff] %v7799_v1 }
 0x176   :  { %v874_v58 = vpop.permute.xlu1 %873 }
 0x177   :  { %v872_v25 = vpop.permute.xlu0 %871  ;;  %v918_v0 = vpack.c.bf16 %v914_v6, %v910_v7  ;;  %v883_v57 = vsel %vm12139_vm11, %v870_v55, %v874_v58 }
 0x178   :  { %1311 = vrot.lane.b32.xlu1 %v7735_v47, %s6899_s13  ;;  %v882_v6 = vsel %vm12139_vm11, %v868_v44, %v872_v25  ;;  %v915_v44 = vmul.f32 %v7799_v1, %v883_v57 }
 0x179   :  { %1309 = vrot.lane.b32.xlu0 %v7681_v4, %s6899_s13  ;;  %3430 = vmatprep.subr.bf16.mxu0 %v918_v0 }
 0x17a   :  { %v878_v13 = vpop.permute.xlu1 %877 }
 0x17b   :  { %v881_v7 = vsel %vm12139_vm11, %v874_v58, %v878_v13  ;;  %v887_v29 = vsel %vm12139_vm11, %v878_v13, %v866_v5  ;;  %v876_v46 = vpop.permute.xlu0 %875  ;;  %v911_v58 = vmul.f32 %v7799_v1, %v882_v6  ;;  %v100_v13 = vld [vmem:[#allocation9 + $0x24] ss:$8 sm:$0xf] }
 0x17c   :  { %v913_v62 = vmul.f32 %v7793_v61, %v887_v29  ;;  %v916_v43 = vmul.f32 %v7796_v54, %v881_v7  ;;  %v880_v0 = vsel %vm12139_vm11, %v872_v25, %v876_v46  ;;  %v886_v55 = vsel %vm12139_vm11, %v876_v46, %v864_v30  ;;  %1361 = vrot.lane.b32.xlu1 %v7699_v18, %s6900_s14 }
 0x17d   :  { %v909_v5 = vmul.f32 %v7793_v61, %v886_v55  ;;  %v912_v29 = vmul.f32 %v7796_v54, %v880_v0  ;;  %1359 = vrot.lane.b32.xlu0 %v7707_v53, %s6900_s14  ;;  %v7829_v30 = vrot.slane %v100_v13, %v7165_v11  ;;  %v919_v57 = vpack.c.bf16 %v915_v44, %v911_v58 }
 0x17e   :  { %v928_v25 = vpop.permute.xlu1 %927 }
 0x17f   :  { %v926_v7 = vpop.permute.xlu0 %925  ;;  %v917_v22 = vpack.c.bf16 %v913_v62, %v909_v5  ;;  %v920_v46 = vpack.c.bf16 %v916_v43, %v912_v29  ;;  %12168 = vst [vmem:[#allocation38_spill] sm:$0xff] %v7829_v30  ;;  %v7846_v29 = vrot.slane %v100_v13, %v7185_v21 }
 0x180   :  { %1365 = vrot.lane.b32.xlu1 %v7711_v63, %s6900_s14 }
 0x181   :  { %1363 = vrot.lane.b32.xlu0 %v7656_v3, %s6900_s14  ;;  %3431 = vmatpush1.bf16.msra.mxu0 %v917_v22  ;;  %12169 = vst [vmem:[#allocation39_spill] sm:$0xff] %v7846_v29 }
 0x182   :  { %3602 = vmatprep.subr.bf16.mxu1 %v920_v46  ;;  %v932_v6 = vpop.permute.xlu1 %931  ;;  %v7849_v46 = vrot.slane %v100_v13, %v7189_v24 }
 0x183   :  { %3603 = vmatpush1.bf16.msra.mxu1 %v919_v57  ;;  %v947_v62 = vsel %vm12137_vm12, %v928_v25, %v932_v6  ;;  %v930_v43 = vpop.permute.xlu0 %929  ;;  %v7852_v57 = vrot.slane %v100_v13, %v7177_v19 }
 0x184   :  { %v976_v0 = vmul.f32 %v7829_v30, %v947_v62  ;;  %v946_v55 = vsel %vm12137_vm12, %v926_v7, %v930_v43  ;;  %1369 = vrot.lane.b32.xlu1 %v7726_v20, %s6900_s14  ;;  %12170 = vst [vmem:[#allocation40_spill] sm:$0xff] %v7849_v46 }
 0x185   :  { %v972_v5 = vmul.f32 %v7829_v30, %v946_v55  ;;  %1367 = vrot.lane.b32.xlu0 %v7731_v2, %s6900_s14  ;;  %12171 = vst [vmem:[#allocation41_spill] sm:$0xff] %v7852_v57 }
 0x186   :  { %v936_v22 = vpop.permute.xlu1 %935 }
 0x187   :  { %v934_v44 = vpop.permute.xlu0 %933  ;;  %v980_v58 = vpack.c.bf16 %v976_v0, %v972_v5  ;;  %v945_v62 = vsel %vm12137_vm12, %v932_v6, %v936_v22 }
 0x188   :  { %1373 = vrot.lane.b32.xlu1 %v7735_v47, %s6900_s14  ;;  %v944_v0 = vsel %vm12137_vm12, %v930_v43, %v934_v44  ;;  %v977_v43 = vmul.f32 %v7852_v57, %v945_v62 }
 0x189   :  { %1371 = vrot.lane.b32.xlu0 %v7681_v4, %s6900_s14  ;;  %3432 = vmatprep.subr.bf16.mxu0 %v980_v58 }
 0x18a   :  { %v940_v55 = vpop.permute.xlu1 %939 }
 0x18b   :  { %v943_v5 = vsel %vm12137_vm12, %v936_v22, %v940_v55  ;;  %v949_v30 = vsel %vm12137_vm12, %v940_v55, %v928_v25  ;;  %v938_v54 = vpop.permute.xlu0 %937  ;;  %v973_v22 = vmul.f32 %v7852_v57, %v944_v0  ;;  %v102_v55 = vld [vmem:[#allocation9 + $0x25] ss:$8 sm:$0xf] }
 0x18c   :  { %v975_v13 = vmul.f32 %v7846_v29, %v949_v30  ;;  %v978_v61 = vmul.f32 %v7849_v46, %v943_v5  ;;  %v942_v58 = vsel %vm12137_vm12, %v934_v44, %v938_v54  ;;  %v948_v6 = vsel %vm12137_vm12, %v938_v54, %v926_v7  ;;  %1423 = vrot.lane.b32.xlu1 %v7699_v18, %s6901_s15 }
 0x18d   :  { %v971_v25 = vmul.f32 %v7846_v29, %v948_v6  ;;  %v974_v30 = vmul.f32 %v7849_v46, %v942_v58  ;;  %1421 = vrot.lane.b32.xlu0 %v7707_v53, %s6901_s15  ;;  %v7882_v7 = vrot.slane %v102_v55, %v7165_v11  ;;  %v981_v62 = vpack.c.bf16 %v977_v43, %v973_v22 }
 0x18e   :  { %v990_v44 = vpop.permute.xlu1 %989 }
 0x18f   :  { %v988_v5 = vpop.permute.xlu0 %987  ;;  %v979_v1 = vpack.c.bf16 %v975_v13, %v971_v25  ;;  %v982_v54 = vpack.c.bf16 %v978_v61, %v974_v30  ;;  %12172 = vst [vmem:[#allocation42_spill] sm:$0xff] %v7882_v7  ;;  %v7899_v30 = vrot.slane %v102_v55, %v7185_v21 }
 0x190   :  { %1427 = vrot.lane.b32.xlu1 %v7711_v63, %s6901_s15 }
 0x191   :  { %1425 = vrot.lane.b32.xlu0 %v7656_v3, %s6901_s15  ;;  %3433 = vmatpush1.bf16.msra.mxu0 %v979_v1  ;;  %12173 = vst [vmem:[#allocation43_spill] sm:$0xff] %v7899_v30 }
 0x192   :  { %3604 = vmatprep.subr.bf16.mxu1 %v982_v54  ;;  %v994_v0 = vpop.permute.xlu1 %993  ;;  %v7902_v54 = vrot.slane %v102_v55, %v7189_v24 }
 0x193   :  { %3605 = vmatpush1.bf16.msra.mxu1 %v981_v62  ;;  %v1009_v13 = vsel %vm12135_vm13, %v990_v44, %v994_v0  ;;  %v992_v61 = vpop.permute.xlu0 %991  ;;  %v7905_v62 = vrot.slane %v102_v55, %v7177_v19 }
 0x194   :  { %v1038_v58 = vmul.f32 %v7882_v7, %v1009_v13  ;;  %v1008_v6 = vsel %vm12135_vm13, %v988_v5, %v992_v61  ;;  %1431 = vrot.lane.b32.xlu1 %v7726_v20, %s6901_s15  ;;  %12174 = vst [vmem:[#allocation44_spill] sm:$0xff] %v7902_v54 }
 0x195   :  { %v1034_v25 = vmul.f32 %v7882_v7, %v1008_v6  ;;  %1429 = vrot.lane.b32.xlu0 %v7731_v2, %s6901_s15  ;;  %12175 = vst [vmem:[#allocation45_spill] sm:$0xff] %v7905_v62 }
 0x196   :  { %v998_v1 = vpop.permute.xlu1 %997 }
 0x197   :  { %v996_v43 = vpop.permute.xlu0 %995  ;;  %v1042_v22 = vpack.c.bf16 %v1038_v58, %v1034_v25  ;;  %v1007_v13 = vsel %vm12135_vm13, %v994_v0, %v998_v1 }
 0x198   :  { %1435 = vrot.lane.b32.xlu1 %v7735_v47, %s6901_s15  ;;  %v1006_v58 = vsel %vm12135_vm13, %v992_v61, %v996_v43  ;;  %v1039_v61 = vmul.f32 %v7905_v62, %v1007_v13 }
 0x199   :  { %1433 = vrot.lane.b32.xlu0 %v7681_v4, %s6901_s15  ;;  %3434 = vmatprep.subr.bf16.mxu0 %v1042_v22 }
 0x19a   :  { %v1002_v6 = vpop.permute.xlu1 %1001 }
 0x19b   :  { %v1005_v25 = vsel %vm12135_vm13, %v998_v1, %v1002_v6  ;;  %v1011_v7 = vsel %vm12135_vm13, %v1002_v6, %v990_v44  ;;  %v1000_v46 = vpop.permute.xlu0 %999  ;;  %v1035_v1 = vmul.f32 %v7905_v62, %v1006_v58  ;;  %v104_v6 = vld [vmem:[#allocation9 + $0x26] ss:$8 sm:$0xf] }
 0x19c   :  { %v1037_v55 = vmul.f32 %v7899_v30, %v1011_v7  ;;  %v1040_v29 = vmul.f32 %v7902_v54, %v1005_v25  ;;  %v1004_v22 = vsel %vm12135_vm13, %v996_v43, %v1000_v46  ;;  %v1010_v0 = vsel %vm12135_vm13, %v1000_v46, %v988_v5  ;;  %1485 = vrot.lane.b32.xlu1 %v7699_v18, %s6902_s16 }
 0x19d   :  { %v1033_v44 = vmul.f32 %v7899_v30, %v1010_v0  ;;  %v1036_v7 = vmul.f32 %v7902_v54, %v1004_v22  ;;  %1483 = vrot.lane.b32.xlu0 %v7707_v53, %s6902_s16  ;;  %v7935_v5 = vrot.slane %v104_v6, %v7165_v11  ;;  %v1043_v13 = vpack.c.bf16 %v1039_v61, %v1035_v1 }
 0x19e   :  { %v1052_v43 = vpop.permute.xlu1 %1051 }
 0x19f   :  { %v1050_v25 = vpop.permute.xlu0 %1049  ;;  %v1041_v57 = vpack.c.bf16 %v1037_v55, %v1033_v44  ;;  %v1044_v46 = vpack.c.bf16 %v1040_v29, %v1036_v7  ;;  %12176 = vst [vmem:[#allocation46_spill] sm:$0xff] %v7935_v5  ;;  %v7952_v7 = vrot.slane %v104_v6, %v7185_v21 }
 0x1a0   :  { %1489 = vrot.lane.b32.xlu1 %v7711_v63, %s6902_s16 }
 0x1a1   :  { %1487 = vrot.lane.b32.xlu0 %v7656_v3, %s6902_s16  ;;  %3435 = vmatpush1.bf16.msra.mxu0 %v1041_v57  ;;  %12177 = vst [vmem:[#allocation47_spill] sm:$0xff] %v7952_v7 }
 0x1a2   :  { %3606 = vmatprep.subr.bf16.mxu1 %v1044_v46  ;;  %v1056_v58 = vpop.permute.xlu1 %1055  ;;  %v7955_v46 = vrot.slane %v104_v6, %v7189_v24 }
 0x1a3   :  { %3607 = vmatpush1.bf16.msra.mxu1 %v1043_v13  ;;  %v1071_v55 = vsel %vm12081_vm14, %v1052_v43, %v1056_v58  ;;  %v1054_v29 = vpop.permute.xlu0 %1053  ;;  %v7958_v13 = vrot.slane %v104_v6, %v7177_v19 }
 0x1a4   :  { %v1100_v22 = vmul.f32 %v7935_v5, %v1071_v55  ;;  %v1070_v0 = vsel %vm12081_vm14, %v1050_v25, %v1054_v29  ;;  %1493 = vrot.lane.b32.xlu1 %v7726_v20, %s6902_s16  ;;  %12178 = vst [vmem:[#allocation48_spill] sm:$0xff] %v7955_v46 }
 0x1a5   :  { %v1096_v44 = vmul.f32 %v7935_v5, %v1070_v0  ;;  %1491 = vrot.lane.b32.xlu0 %v7731_v2, %s6902_s16  ;;  %12179 = vst [vmem:[#allocation49_spill] sm:$0xff] %v7958_v13 }
 0x1a6   :  { %v1060_v57 = vpop.permute.xlu1 %1059 }
 0x1a7   :  { %v1058_v61 = vpop.permute.xlu0 %1057  ;;  %v1104_v1 = vpack.c.bf16 %v1100_v22, %v1096_v44  ;;  %v1069_v55 = vsel %vm12081_vm14, %v1056_v58, %v1060_v57 }
 0x1a8   :  { %1497 = vrot.lane.b32.xlu1 %v7735_v47, %s6902_s16  ;;  %v1068_v22 = vsel %vm12081_vm14, %v1054_v29, %v1058_v61  ;;  %v1101_v29 = vmul.f32 %v7958_v13, %v1069_v55 }
 0x1a9   :  { %1495 = vrot.lane.b32.xlu0 %v7681_v4, %s6902_s16  ;;  %3436 = vmatprep.subr.bf16.mxu0 %v1104_v1 }
 0x1aa   :  { %v1064_v0 = vpop.permute.xlu1 %1063 }
 0x1ab   :  { %v1067_v44 = vsel %vm12081_vm14, %v1060_v57, %v1064_v0  ;;  %v1073_v5 = vsel %vm12081_vm14, %v1064_v0, %v1052_v43  ;;  %v1062_v54 = vpop.permute.xlu0 %1061  ;;  %v1097_v57 = vmul.f32 %v7958_v13, %v1068_v22  ;;  %v106_v0 = vld [vmem:[#allocation9 + $0x27] ss:$8 sm:$0xf] }
 0x1ac   :  { %v1099_v6 = vmul.f32 %v7952_v7, %v1073_v5  ;;  %v1102_v30 = vmul.f32 %v7955_v46, %v1067_v44  ;;  %v1066_v1 = vsel %vm12081_vm14, %v1058_v61, %v1062_v54  ;;  %v1072_v58 = vsel %vm12081_vm14, %v1062_v54, %v1050_v25  ;;  %1547 = vrot.lane.b32.xlu1 %v7699_v18, %s6903_s17 }
 0x1ad   :  { %v1095_v43 = vmul.f32 %v7952_v7, %v1072_v58  ;;  %v1098_v5 = vmul.f32 %v7955_v46, %v1066_v1  ;;  %1545 = vrot.lane.b32.xlu0 %v7707_v53, %s6903_s17  ;;  %v7988_v25 = vrot.slane %v106_v0, %v7165_v11  ;;  %v1105_v55 = vpack.c.bf16 %v1101_v29, %v1097_v57 }
 0x1ae   :  { %v1114_v61 = vpop.permute.xlu1 %1113  ;;  %vm12091_vm14 = vcmp.lt.s32.totalorder %v7159_v10, 83 }
 0x1af   :  { %v1112_v44 = vpop.permute.xlu0 %1111  ;;  %v1103_v62 = vpack.c.bf16 %v1099_v6, %v1095_v43  ;;  %v1106_v54 = vpack.c.bf16 %v1102_v30, %v1098_v5  ;;  %12180 = vst [vmem:[#allocation50_spill] sm:$0xff] %v7988_v25  ;;  %v8005_v5 = vrot.slane %v106_v0, %v7185_v21 }
 0x1b0   :  { %1551 = vrot.lane.b32.xlu1 %v7711_v63, %s6903_s17 }
 0x1b1   :  { %1549 = vrot.lane.b32.xlu0 %v7656_v3, %s6903_s17  ;;  %3437 = vmatpush1.bf16.msra.mxu0 %v1103_v62  ;;  %12181 = vst [vmem:[#allocation51_spill] sm:$0xff] %v8005_v5 }
 0x1b2   :  { %3608 = vmatprep.subr.bf16.mxu1 %v1106_v54  ;;  %v1118_v22 = vpop.permute.xlu1 %1117  ;;  %v8008_v54 = vrot.slane %v106_v0, %v7189_v24 }
 0x1b3   :  { %3609 = vmatpush1.bf16.msra.mxu1 %v1105_v55  ;;  %v1133_v6 = vsel %vm11820_vm15, %v1114_v61, %v1118_v22  ;;  %v1116_v30 = vpop.permute.xlu0 %1115  ;;  %v8011_v55 = vrot.slane %v106_v0, %v7177_v19 }
 0x1b4   :  { %v1162_v1 = vmul.f32 %v7988_v25, %v1133_v6  ;;  %v1132_v58 = vsel %vm11820_vm15, %v1112_v44, %v1116_v30  ;;  %1555 = vrot.lane.b32.xlu1 %v7726_v20, %s6903_s17  ;;  %12182 = vst [vmem:[#allocation52_spill] sm:$0xff] %v8008_v54 }
 0x1b5   :  { %v1158_v43 = vmul.f32 %v7988_v25, %v1132_v58  ;;  %1553 = vrot.lane.b32.xlu0 %v7731_v2, %s6903_s17  ;;  %12183 = vst [vmem:[#allocation53_spill] sm:$0xff] %v8011_v55 }
 0x1b6   :  { %v1122_v62 = vpop.permute.xlu1 %1121 }
 0x1b7   :  { %v1120_v29 = vpop.permute.xlu0 %1119  ;;  %v1166_v57 = vpack.c.bf16 %v1162_v1, %v1158_v43  ;;  %v1131_v6 = vsel %vm11820_vm15, %v1118_v22, %v1122_v62 }
 0x1b8   :  { %1559 = vrot.lane.b32.xlu1 %v7735_v47, %s6903_s17  ;;  %v1130_v1 = vsel %vm11820_vm15, %v1116_v30, %v1120_v29  ;;  %v1163_v30 = vmul.f32 %v8011_v55, %v1131_v6  ;;  %v6645_v6 = vld [vmem:[#allocation6] ss:$28 sps:$4 sm:$0xff]  }
 0x1b9   :  { %1557 = vrot.lane.b32.xlu0 %v7681_v4, %s6903_s17  ;;  %3438 = vmatprep.subr.bf16.mxu0 %v1166_v57 }
 0x1ba   :  { %v1126_v58 = vpop.permute.xlu1 %1125 }
 0x1bb   :  { %v1129_v43 = vsel %vm11820_vm15, %v1122_v62, %v1126_v58  ;;  %v1135_v25 = vsel %vm11820_vm15, %v1126_v58, %v1114_v61  ;;  %v1124_v46 = vpop.permute.xlu0 %1123  ;;  %v1159_v62 = vmul.f32 %v8011_v55, %v1130_v1  ;;  %v108_v58 = vld [vmem:[#allocation9 + $0x40] ss:$8 sm:$0xf] }
 0x1bc   :  { %v1161_v0 = vmul.f32 %v8005_v5, %v1135_v25  ;;  %v1164_v7 = vmul.f32 %v8008_v54, %v1129_v43  ;;  %v1128_v57 = vsel %vm11820_vm15, %v1120_v29, %v1124_v46  ;;  %v1134_v22 = vsel %vm11820_vm15, %v1124_v46, %v1112_v44  ;;  %1609 = vrot.lane.b32.xlu1 %v7699_v18, %s6904_s18 }
 0x1bd   :  { %v1157_v61 = vmul.f32 %v8005_v5, %v1134_v22  ;;  %v1160_v25 = vmul.f32 %v8008_v54, %v1128_v57  ;;  %1607 = vrot.lane.b32.xlu0 %v7707_v53, %s6904_s18  ;;  %vm11829_vm15 = vcmp.lt.s32.totalorder %v7159_v10, 17  ;;  %v8041_v44 = vrot.slane %v108_v58, %v7165_v11 }
 0x1be   :  { %v1176_v29 = vpop.permute.xlu1 %1175  ;;  %v1167_v1 = vpack.c.bf16 %v1163_v30, %v1159_v62 }
 0x1bf   :  { %v1174_v43 = vpop.permute.xlu0 %1173  ;;  %v1165_v13 = vpack.c.bf16 %v1161_v0, %v1157_v61  ;;  %v1168_v46 = vpack.c.bf16 %v1164_v7, %v1160_v25  ;;  %12184 = vst [vmem:[#allocation54_spill] sm:$0xff] %v8041_v44 }
 0x1c0   :  { %1613 = vrot.lane.b32.xlu1 %v7711_v63, %s6904_s18 }
 0x1c1   :  { %1611 = vrot.lane.b32.xlu0 %v7656_v3, %s6904_s18  ;;  %3439 = vmatpush1.bf16.msra.mxu0 %v1165_v13 }
 0x1c2   :  { %3610 = vmatprep.subr.bf16.mxu1 %v1168_v46  ;;  %v1180_v57 = vpop.permute.xlu1 %1179  ;;  %v8058_v46 = vrot.slane %v108_v58, %v7185_v21 }
 0x1c3   :  { %3611 = vmatpush1.bf16.msra.mxu1 %v1167_v1  ;;  %v1195_v7 = vsel %vm11829_vm15, %v1176_v29, %v1180_v57  ;;  %v1178_v0 = vpop.permute.xlu0 %1177  ;;  %v8061_v1 = vrot.slane %v108_v58, %v7189_v24 }
 0x1c4   :  { %v1224_v22 = vmul.f32 %v8041_v44, %v1195_v7  ;;  %v1194_v61 = vsel %vm11829_vm15, %v1174_v43, %v1178_v0  ;;  %1617 = vrot.lane.b32.xlu1 %v7726_v20, %s6904_s18  ;;  %3441 = vmatmul.mubr.bf16.vlgmr.msra.gmra.mrb[0].mxu0 %v6645_v6  ;;  %12185 = vst [vmem:[#allocation55_spill] sm:$0xff] %v8058_v46 }
 0x1c5   :  { %v1220_v25 = vmul.f32 %v8041_v44, %v1194_v61  ;;  %1615 = vrot.lane.b32.xlu0 %v7731_v2, %s6904_s18  ;;  %12186 = vst [vmem:[#allocation56_spill] sm:$0xff] %v8061_v1  ;;  %v8064_v7 = vrot.slane %v108_v58, %v7177_v19 }
 0x1c6   :  { %v1184_v13 = vpop.permute.xlu1 %1183  ;;  %3613 = vmatmul.mubr.bf16.vlgmr.msra.gmra.mrb[0].mxu1 %v6645_v6 }
 0x1c7   :  { %v1182_v30 = vpop.permute.xlu0 %1181  ;;  %v1228_v62 = vpack.c.bf16 %v1224_v22, %v1220_v25  ;;  %12187 = vst [vmem:[#allocation57_spill] sm:$0xff] %v8064_v7  ;;  %v1193_v6 = vsel %vm11829_vm15, %v1180_v57, %v1184_v13 }
 0x1c8   :  { %1621 = vrot.lane.b32.xlu1 %v7735_v47, %s6904_s18  ;;  %v1192_v22 = vsel %vm11829_vm15, %v1178_v0, %v1182_v30  ;;  %v1225_v0 = vmul.f32 %v8064_v7, %v1193_v6 }
 0x1c9   :  { %1619 = vrot.lane.b32.xlu0 %v7681_v4, %s6904_s18  ;;  %3451 = vmatprep.subr.bf16.mxu0 %v1228_v62 }
 0x1ca   :  { %v1188_v61 = vpop.permute.xlu1 %1187 }
 0x1cb   :  { %v1191_v25 = vsel %vm11829_vm15, %v1184_v13, %v1188_v61  ;;  %v1197_v44 = vsel %vm11829_vm15, %v1188_v61, %v1176_v29  ;;  %v1186_v54 = vpop.permute.xlu0 %1185  ;;  %v1221_v13 = vmul.f32 %v8064_v7, %v1192_v22  ;;  %v110_v61 = vld [vmem:[#allocation9 + $0x41] ss:$8 sm:$0xf] }
 0x1cc   :  { %v1223_v58 = vmul.f32 %v8058_v46, %v1197_v44  ;;  %v1226_v5 = vmul.f32 %v8061_v1, %v1191_v25  ;;  %v1190_v62 = vsel %vm11829_vm15, %v1182_v30, %v1186_v54  ;;  %v1196_v57 = vsel %vm11829_vm15, %v1186_v54, %v1174_v43  ;;  %1679 = vrot.lane.b32.xlu1 %v7699_v18, %s6905_s19 }
 0x1cd   :  { %v1219_v29 = vmul.f32 %v8058_v46, %v1196_v57  ;;  %v1222_v44 = vmul.f32 %v8061_v1, %v1190_v62  ;;  %1677 = vrot.lane.b32.xlu0 %v7707_v53, %s6905_s19  ;;  %vm11838_vm15 = vcmp.lt.s32.totalorder %v7159_v10, 16  ;;  %v8094_v43 = vrot.slane %v110_v61, %v7165_v11 }
 0x1ce   :  { %v1238_v30 = vpop.permute.xlu1 %1237  ;;  %v1229_v6 = vpack.c.bf16 %v1225_v0, %v1221_v13 }
 0x1cf   :  { %v1227_v25 = vpack.c.bf16 %v1223_v58, %v1219_v29  ;;  %v1236_v55 = vpop.permute.xlu0 %1235  ;;  %v1230_v54 = vpack.c.bf16 %v1226_v5, %v1222_v44  ;;  %12188 = vst [vmem:[#allocation58_spill] sm:$0xff] %v8094_v43 }
 0x1d0   :  { %1683 = vrot.lane.b32.xlu1 %v7711_v63, %s6905_s19 }
 0x1d1   :  { %1681 = vrot.lane.b32.xlu0 %v7656_v3, %s6905_s19  ;;  %3452 = vmatpush1.bf16.msra.mxu0 %v1227_v25  ;;  %v8111_v25 = vrot.slane %v110_v61, %v7185_v21 }
 0x1d2   :  { %3623 = vmatprep.subr.bf16.mxu1 %v1230_v54  ;;  %v1242_v22 = vpop.permute.xlu1 %1241  ;;  %v8114_v54 = vrot.slane %v110_v61, %v7189_v24 }
 0x1d3   :  { %3624 = vmatpush1.bf16.msra.mxu1 %v1229_v6  ;;  %v1257_v58 = vsel %vm11838_vm15, %v1238_v30, %v1242_v22  ;;  %v1240_v5 = vpop.permute.xlu0 %1239  ;;  %12189 = vst [vmem:[#allocation59_spill] sm:$0xff] %v8111_v25  ;;  %v8117_v6 = vrot.slane %v110_v61, %v7177_v19 }
 0x1d4   :  { %v1286_v62 = vmul.f32 %v8094_v43, %v1257_v58  ;;  %v1256_v57 = vsel %vm11838_vm15, %v1236_v55, %v1240_v5  ;;  %1687 = vrot.lane.b32.xlu1 %v7726_v20, %s6905_s19  ;;  %12190 = vst [vmem:[#allocation60_spill] sm:$0xff] %v8114_v54 }
 0x1d5   :  { %v1282_v0 = vmul.f32 %v8094_v43, %v1256_v57  ;;  %1685 = vrot.lane.b32.xlu0 %v7731_v2, %s6905_s19  ;;  %12191 = vst [vmem:[#allocation61_spill] sm:$0xff] %v8117_v6 }
 0x1d6   :  { %v1246_v13 = vpop.permute.xlu1 %1245 }
 0x1d7   :  { %v1244_v29 = vpop.permute.xlu0 %1243  ;;  %v1290_v44 = vpack.c.bf16 %v1286_v62, %v1282_v0  ;;  %v1255_v58 = vsel %vm11838_vm15, %v1242_v22, %v1246_v13 }
 0x1d8   :  { %1691 = vrot.lane.b32.xlu1 %v7735_v47, %s6905_s19  ;;  %v1254_v62 = vsel %vm11838_vm15, %v1240_v5, %v1244_v29  ;;  %v1287_v5 = vmul.f32 %v8117_v6, %v1255_v58 }
 0x1d9   :  { %1689 = vrot.lane.b32.xlu0 %v7681_v4, %s6905_s19  ;;  %3453 = vmatprep.subr.bf16.mxu0 %v1290_v44 }
 0x1da   :  { %v1250_v57 = vpop.permute.xlu1 %1249 }
 0x1db   :  { %v1253_v0 = vsel %vm11838_vm15, %v1246_v13, %v1250_v57  ;;  %v1259_v43 = vsel %vm11838_vm15, %v1250_v57, %v1238_v30  ;;  %v1248_v1 = vpop.permute.xlu0 %1247  ;;  %v1283_v13 = vmul.f32 %v8117_v6, %v1254_v62  ;;  %v112_v57 = vld [vmem:[#allocation9 + $0x42] ss:$8 sm:$0xf] }
 0x1dc   :  { %v1285_v61 = vmul.f32 %v8111_v25, %v1259_v43  ;;  %v1288_v46 = vmul.f32 %v8114_v54, %v1253_v0  ;;  %v1252_v44 = vsel %vm11838_vm15, %v1244_v29, %v1248_v1  ;;  %v1258_v22 = vsel %vm11838_vm15, %v1248_v1, %v1236_v55  ;;  %1741 = vrot.lane.b32.xlu1 %v7699_v18, %s6906_s20 }
 0x1dd   :  { %v1281_v30 = vmul.f32 %v8111_v25, %v1258_v22  ;;  %v1284_v43 = vmul.f32 %v8114_v54, %v1252_v44  ;;  %1739 = vrot.lane.b32.xlu0 %v7707_v53, %s6906_s20  ;;  %vm11847_vm15 = vcmp.lt.s32.totalorder %v7159_v10, 15  ;;  %v8147_v1 = vrot.slane %v112_v57, %v7165_v11 }
 0x1de   :  { %v1300_v29 = vpop.permute.xlu1 %1299  ;;  %v1291_v58 = vpack.c.bf16 %v1287_v5, %v1283_v13 }
 0x1df   :  { %v1289_v0 = vpack.c.bf16 %v1285_v61, %v1281_v30  ;;  %v1298_v7 = vpop.permute.xlu0 %1297  ;;  %v1292_v55 = vpack.c.bf16 %v1288_v46, %v1284_v43  ;;  %12192 = vst [vmem:[#allocation62_spill] sm:$0xff] %v8147_v1 }
 0x1e0   :  { %1745 = vrot.lane.b32.xlu1 %v7711_v63, %s6906_s20 }
 0x1e1   :  { %1743 = vrot.lane.b32.xlu0 %v7656_v3, %s6906_s20  ;;  %3454 = vmatpush1.bf16.msra.mxu0 %v1289_v0  ;;  %v8164_v0 = vrot.slane %v112_v57, %v7185_v21 }
 0x1e2   :  { %3625 = vmatprep.subr.bf16.mxu1 %v1292_v55  ;;  %v1304_v62 = vpop.permute.xlu1 %1303  ;;  %v8167_v55 = vrot.slane %v112_v57, %v7189_v24 }
 0x1e3   :  { %3626 = vmatpush1.bf16.msra.mxu1 %v1291_v58  ;;  %v1319_v61 = vsel %vm11847_vm15, %v1300_v29, %v1304_v62  ;;  %v1302_v46 = vpop.permute.xlu0 %1301  ;;  %12193 = vst [vmem:[#allocation63_spill] sm:$0xff] %v8164_v0  ;;  %v8170_v58 = vrot.slane %v112_v57, %v7177_v19 }
 0x1e4   :  { %v1348_v44 = vmul.f32 %v8147_v1, %v1319_v61  ;;  %v1318_v22 = vsel %vm11847_vm15, %v1298_v7, %v1302_v46  ;;  %1749 = vrot.lane.b32.xlu1 %v7726_v20, %s6906_s20  ;;  %12194 = vst [vmem:[#allocation64_spill] sm:$0xff] %v8167_v55 }
 0x1e5   :  { %v1344_v5 = vmul.f32 %v8147_v1, %v1318_v22  ;;  %1747 = vrot.lane.b32.xlu0 %v7731_v2, %s6906_s20  ;;  %12195 = vst [vmem:[#allocation65_spill] sm:$0xff] %v8170_v58 }
 0x1e6   :  { %v1308_v13 = vpop.permute.xlu1 %1307 }
 0x1e7   :  { %v1306_v30 = vpop.permute.xlu0 %1305  ;;  %v1352_v43 = vpack.c.bf16 %v1348_v44, %v1344_v5  ;;  %v1317_v61 = vsel %vm11847_vm15, %v1304_v62, %v1308_v13 }
 0x1e8   :  { %1753 = vrot.lane.b32.xlu1 %v7735_v47, %s6906_s20  ;;  %v1316_v44 = vsel %vm11847_vm15, %v1302_v46, %v1306_v30  ;;  %v1349_v46 = vmul.f32 %v8170_v58, %v1317_v61 }
 0x1e9   :  { %1751 = vrot.lane.b32.xlu0 %v7681_v4, %s6906_s20  ;;  %3455 = vmatprep.subr.bf16.mxu0 %v1352_v43 }
 0x1ea   :  { %v1312_v22 = vpop.permute.xlu1 %1311 }
 0x1eb   :  { %v1315_v5 = vsel %vm11847_vm15, %v1308_v13, %v1312_v22  ;;  %v1321_v1 = vsel %vm11847_vm15, %v1312_v22, %v1300_v29  ;;  %v1310_v54 = vpop.permute.xlu0 %1309  ;;  %v1345_v13 = vmul.f32 %v8170_v58, %v1316_v44  ;;  %v114_v22 = vld [vmem:[#allocation9 + $0x43] ss:$8 sm:$0xf] }
 0x1ec   :  { %v1347_v57 = vmul.f32 %v8164_v0, %v1321_v1  ;;  %v1350_v25 = vmul.f32 %v8167_v55, %v1315_v5  ;;  %v1314_v43 = vsel %vm11847_vm15, %v1306_v30, %v1310_v54  ;;  %v1320_v62 = vsel %vm11847_vm15, %v1310_v54, %v1298_v7  ;;  %1803 = vrot.lane.b32.xlu1 %v7699_v18, %s6907_s2 }
 0x1ed   :  { %v1343_v29 = vmul.f32 %v8164_v0, %v1320_v62  ;;  %v1346_v1 = vmul.f32 %v8167_v55, %v1314_v43  ;;  %1801 = vrot.lane.b32.xlu0 %v7707_v53, %s6907_s2  ;;  %vm11852_vm15 = vcmp.lt.s32.totalorder %v7159_v10, 14  ;;  %v8200_v54 = vrot.slane %v114_v22, %v7165_v11 }
 0x1ee   :  { %v1362_v30 = vpop.permute.xlu1 %1361  ;;  %v1353_v61 = vpack.c.bf16 %v1349_v46, %v1345_v13 }
 0x1ef   :  { %v1351_v5 = vpack.c.bf16 %v1347_v57, %v1343_v29  ;;  %v1360_v6 = vpop.permute.xlu0 %1359  ;;  %v1354_v7 = vpack.c.bf16 %v1350_v25, %v1346_v1  ;;  %12196 = vst [vmem:[#allocation66_spill] sm:$0xff] %v8200_v54  ;;  %v8217_v1 = vrot.slane %v114_v22, %v7185_v21 }
 0x1f0   :  { %1807 = vrot.lane.b32.xlu1 %v7711_v63, %s6907_s2 }
 0x1f1   :  { %1805 = vrot.lane.b32.xlu0 %v7656_v3, %s6907_s2  ;;  %3456 = vmatpush1.bf16.msra.mxu0 %v1351_v5  ;;  %12197 = vst [vmem:[#allocation67_spill] sm:$0xff] %v8217_v1  ;;  %v8220_v5 = vrot.slane %v114_v22, %v7189_v24 }
 0x1f2   :  { %3627 = vmatprep.subr.bf16.mxu1 %v1354_v7  ;;  %v1366_v44 = vpop.permute.xlu1 %1365  ;;  %v8223_v7 = vrot.slane %v114_v22, %v7177_v19 }
 0x1f3   :  { %3628 = vmatpush1.bf16.msra.mxu1 %v1353_v61  ;;  %v1381_v57 = vsel %vm11852_vm15, %v1362_v30, %v1366_v44  ;;  %v1364_v25 = vpop.permute.xlu0 %1363  ;;  %12198 = vst [vmem:[#allocation68_spill] sm:$0xff] %v8220_v5 }
 0x1f4   :  { %v1410_v43 = vmul.f32 %v8200_v54, %v1381_v57  ;;  %v1380_v62 = vsel %vm11852_vm15, %v1360_v6, %v1364_v25  ;;  %1811 = vrot.lane.b32.xlu1 %v7726_v20, %s6907_s2  ;;  %12199 = vst [vmem:[#allocation69_spill] sm:$0xff] %v8223_v7 }
 0x1f5   :  { %v1406_v46 = vmul.f32 %v8200_v54, %v1380_v62  ;;  %1809 = vrot.lane.b32.xlu0 %v7731_v2, %s6907_s2 }
 0x1f6   :  { %v1370_v3 = vpop.permute.xlu1 %1369 }
 0x1f7   :  { %v1368_v13 = vpop.permute.xlu0 %1367  ;;  %v1414_v29 = vpack.c.bf16 %v1410_v43, %v1406_v46  ;;  %v1379_v61 = vsel %vm11852_vm15, %v1366_v44, %v1370_v3 }
 0x1f8   :  { %1815 = vrot.lane.b32.xlu1 %v7735_v47, %s6907_s2  ;;  %v1378_v57 = vsel %vm11852_vm15, %v1364_v25, %v1368_v13  ;;  %v1411_v25 = vmul.f32 %v8223_v7, %v1379_v61  ;;  %v8255_v61 = vld [vmem:[#allocation3 + $0x8] sm:$0xff] }
 0x1f9   :  { %1813 = vrot.lane.b32.xlu0 %v7681_v4, %s6907_s2  ;;  %3457 = vmatprep.subr.bf16.mxu0 %v1414_v29 }
 0x1fa   :  { %v1374_v43 = vpop.permute.xlu1 %1373 }
 0x1fb   :  { %v1377_v62 = vsel %vm11852_vm15, %v1370_v3, %v1374_v43  ;;  %v1383_v46 = vsel %vm11852_vm15, %v1374_v43, %v1362_v30  ;;  %v1372_v54 = vpop.permute.xlu0 %1371  ;;  %v1407_v3 = vmul.f32 %v8223_v7, %v1378_v57  ;;  %v116_v43 = vld [vmem:[#allocation9 + $0x44] ss:$8 sm:$0xf] }
 0x1fc   :  { %v1409_v22 = vmul.f32 %v8217_v1, %v1383_v46  ;;  %v1412_v55 = vmul.f32 %v8220_v5, %v1377_v62  ;;  %v1376_v4 = vsel %vm11852_vm15, %v1368_v13, %v1372_v54  ;;  %v1382_v44 = vsel %vm11852_vm15, %v1372_v54, %v1360_v6  ;;  %1865 = vrot.lane.b32.xlu1 %v7699_v18, %s11853_s22 }
 0x1fd   :  { %v1405_v30 = vmul.f32 %v8217_v1, %v1382_v44  ;;  %v1408_v29 = vmul.f32 %v8220_v5, %v1376_v4  ;;  %1863 = vrot.lane.b32.xlu0 %v7707_v53, %s11853_s22  ;;  %vm11859_vm15 = vcmp.lt.s32.totalorder %v7159_v10, 13  ;;  %v8253_v18 = vrot.slane %v116_v43, %v7165_v11  ;;  %v8310_v5 = vld [vmem:[#allocation3 + $0x28] sm:$0xff] }
 0x1fe   :  { %v1424_v13 = vpop.permute.xlu1 %1423  ;;  %v1415_v54 = vpack.c.bf16 %v1411_v25, %v1407_v3 }
 0x1ff   :  { %v1413_v62 = vpack.c.bf16 %v1409_v22, %v1405_v30  ;;  %v1422_v46 = vpop.permute.xlu0 %1421  ;;  %v1416_v6 = vpack.c.bf16 %v1412_v55, %v1408_v29  ;;  %12200 = vst [vmem:[#allocation70_spill] sm:$0xff] %v8253_v18  ;;  %v8272_v30 = vrot.slane %v116_v43, %v7185_v21  ;;  %v8275_v29 = vrot.slane %v116_v43, %v7189_v24 }
 0x200   :  { %1869 = vrot.lane.b32.xlu1 %v7711_v63, %s11853_s22 }
 0x201   :  { %1867 = vrot.lane.b32.xlu0 %v8255_v61, %s11853_s22  ;;  %3458 = vmatpush1.bf16.msra.mxu0 %v1413_v62  ;;  %12201 = vst [vmem:[#allocation71_spill] sm:$0xff] %v8272_v30  ;;  %12202 = vst [vmem:[#allocation72_spill] sm:$0xff] %v8275_v29  ;;  %v8278_v62 = vrot.slane %v116_v43, %v7177_v19 }
 0x202   :  { %3629 = vmatprep.subr.bf16.mxu1 %v1416_v6  ;;  %v1428_v53 = vpop.permute.xlu1 %1427 }
 0x203   :  { %3630 = vmatpush1.bf16.msra.mxu1 %v1415_v54  ;;  %v1443_v55 = vsel %vm11859_vm15, %v1424_v13, %v1428_v53  ;;  %v1426_v57 = vpop.permute.xlu0 %1425  ;;  %12203 = vst [vmem:[#allocation73_spill] sm:$0xff] %v8278_v62 }
 0x204   :  { %v1472_v63 = vmul.f32 %v8253_v18, %v1443_v55  ;;  %v1442_v22 = vsel %vm11859_vm15, %v1422_v46, %v1426_v57  ;;  %1873 = vrot.lane.b32.xlu1 %v7726_v20, %s11853_s22  ;;  %v8280_v20 = vld [vmem:[#allocation3 + $0x18] sm:$0xff] }
 0x205   :  { %v1468_v4 = vmul.f32 %v8253_v18, %v1442_v22  ;;  %1871 = vrot.lane.b32.xlu0 %v7731_v2, %s11853_s22 }
 0x206   :  { %v1432_v44 = vpop.permute.xlu1 %1431 }
 0x207   :  { %v1430_v25 = vpop.permute.xlu0 %1429  ;;  %v1476_v3 = vpack.c.bf16 %v1472_v63, %v1468_v4  ;;  %v1441_v2 = vsel %vm11859_vm15, %v1428_v53, %v1432_v44 }
 0x208   :  { %1877 = vrot.lane.b32.xlu1 %v7735_v47, %s11853_s22  ;;  %v1440_v47 = vsel %vm11859_vm15, %v1426_v57, %v1430_v25  ;;  %v1473_v57 = vmul.f32 %v8278_v62, %v1441_v2 }
 0x209   :  { %1875 = vrot.lane.b32.xlu0 %v8280_v20, %s11853_s22  ;;  %3459 = vmatprep.subr.bf16.mxu0 %v1476_v3  ;;  %v8298_v3 = vld [vmem:[#allocation3 + $0x20] sm:$0xff]  ;;  %s11874_s22 = smov 114  }
 0x20a   :  { %v1436_v6 = vpop.permute.xlu1 %1435 }
 0x20b   :  { %v1439_v54 = vsel %vm11859_vm15, %v1432_v44, %v1436_v6  ;;  %v1445_v43 = vsel %vm11859_vm15, %v1436_v6, %v1424_v13  ;;  %v1434_v55 = vpop.permute.xlu0 %1433  ;;  %v1469_v13 = vmul.f32 %v8278_v62, %v1440_v47 }
 0x20c   :  { %v1471_v63 = vmul.f32 %v8272_v30, %v1445_v43  ;;  %v1474_v22 = vmul.f32 %v8275_v29, %v1439_v54  ;;  %v1438_v4 = vsel %vm11859_vm15, %v1430_v25, %v1434_v55  ;;  %v1444_v53 = vsel %vm11859_vm15, %v1434_v55, %v1422_v46  ;;  %1927 = vrot.lane.b32.xlu1 %v8298_v3, %s11874_s22  ;;  %v8306_v54 = vld [vmem:[#allocation3] sm:$0xff] }
 0x20d   :  { %v1467_v44 = vmul.f32 %v8272_v30, %v1444_v53  ;;  %v1470_v6 = vmul.f32 %v8275_v29, %v1438_v4  ;;  %1925 = vrot.lane.b32.xlu0 %v8306_v54, %s11874_s22  ;;  %v118_v46 = vld [vmem:[#allocation9 + $0x45] ss:$8 sm:$0xf]  ;;  %vm11878_vm15 = vcmp.lt.s32.totalorder %v7159_v10, 3  ;;  %v1477_v47 = vpack.c.bf16 %v1473_v57, %v1469_v13 }
 0x20e   :  { %v1486_v25 = vpop.permute.xlu1 %1485  ;;  %v8316_v2 = vrot.slane %v118_v46, %v7165_v11  ;;  %v8330_v13 = vld [vmem:[#allocation3 + $0x10] sm:$0xff]  ;;  %v8334_v29 = vld [vmem:[#allocation3 + $0x38] sm:$0xff]  ;;  %v8342_v30 = vrot.slane %v118_v46, %v7189_v24 }
 0x20f   :  { %v1475_v43 = vpack.c.bf16 %v1471_v63, %v1467_v44  ;;  %v1484_v55 = vpop.permute.xlu0 %1483  ;;  %v1478_v18 = vpack.c.bf16 %v1474_v22, %v1470_v6  ;;  %v8325_v6 = vld [vmem:[#allocation3 + $0x30] sm:$0xff] }
 0x210   :  { %1931 = vrot.lane.b32.xlu1 %v8310_v5, %s11874_s22  ;;  %12204 = vst [vmem:[#allocation74_spill] sm:$0xff] %v8316_v2  ;;  %12206 = vst [vmem:[#allocation76_spill] sm:$0xff] %v8342_v30 }
 0x211   :  { %1929 = vrot.lane.b32.xlu0 %v8255_v61, %s11874_s22  ;;  %3460 = vmatpush1.bf16.msra.mxu0 %v1475_v43 }
 0x212   :  { %3631 = vmatprep.subr.bf16.mxu1 %v1478_v18  ;;  %v1490_v4 = vpop.permute.xlu1 %1489 }
 0x213   :  { %3632 = vmatpush1.bf16.msra.mxu1 %v1477_v47  ;;  %v1505_v63 = vsel %vm11878_vm15, %v1486_v25, %v1490_v4  ;;  %v1488_v22 = vpop.permute.xlu0 %1487 }
 0x214   :  { %v1534_v53 = vmul.f32 %v8316_v2, %v1505_v63  ;;  %v1504_v44 = vsel %vm11878_vm15, %v1484_v55, %v1488_v22  ;;  %1935 = vrot.lane.b32.xlu1 %v8325_v6, %s11874_s22  ;;  %v8339_v63 = vrot.slane %v118_v46, %v7185_v21 }
 0x215   :  { %v1530_v57 = vmul.f32 %v8316_v2, %v1504_v44  ;;  %1933 = vrot.lane.b32.xlu0 %v8330_v13, %s11874_s22  ;;  %v8345_v44 = vrot.slane %v118_v46, %v7177_v19 }
 0x216   :  { %v1494_v18 = vpop.permute.xlu1 %1493  ;;  %12205 = vst [vmem:[#allocation75_spill] sm:$0xff] %v8339_v63 }
 0x217   :  { %v1492_v43 = vpop.permute.xlu0 %1491  ;;  %v1538_v47 = vpack.c.bf16 %v1534_v53, %v1530_v57  ;;  %12207 = vst [vmem:[#allocation77_spill] sm:$0xff] %v8345_v44  ;;  %v1503_v53 = vsel %vm11878_vm15, %v1490_v4, %v1494_v18 }
 0x218   :  { %1939 = vrot.lane.b32.xlu1 %v8334_v29, %s11874_s22  ;;  %v1502_v57 = vsel %vm11878_vm15, %v1488_v22, %v1492_v43  ;;  %v1535_v22 = vmul.f32 %v8345_v44, %v1503_v53 }
 0x219   :  { %1937 = vrot.lane.b32.xlu0 %v8280_v20, %s11874_s22  ;;  %3461 = vmatprep.subr.bf16.mxu0 %v1538_v47  ;;  %s11885_s22 = smov 113  }
 0x21a   :  { %v1498_v2 = vpop.permute.xlu1 %1497 }
 0x21b   :  { %v1501_v62 = vsel %vm11878_vm15, %v1494_v18, %v1498_v2  ;;  %v1507_v1 = vsel %vm11878_vm15, %v1498_v2, %v1486_v25  ;;  %v1496_v7 = vpop.permute.xlu0 %1495  ;;  %v1531_v18 = vmul.f32 %v8345_v44, %v1502_v57 }
 0x21c   :  { %v1533_v46 = vmul.f32 %v8339_v63, %v1507_v1  ;;  %v1536_v0 = vmul.f32 %v8342_v30, %v1501_v62  ;;  %v1500_v47 = vsel %vm11878_vm15, %v1492_v43, %v1496_v7  ;;  %v1506_v4 = vsel %vm11878_vm15, %v1496_v7, %v1484_v55  ;;  %1989 = vrot.lane.b32.xlu1 %v8298_v3, %s11885_s22  ;;  %v120_v62 = vld [vmem:[#allocation9 + $0x46] ss:$8 sm:$0xf] }
 0x21d   :  { %v1529_v25 = vmul.f32 %v8339_v63, %v1506_v4  ;;  %v1532_v1 = vmul.f32 %v8342_v30, %v1500_v47  ;;  %1987 = vrot.lane.b32.xlu0 %v8306_v54, %s11885_s22  ;;  %vm11889_vm15 = vcmp.lt.s32.totalorder %v7159_v10, 2  ;;  %v8375_v55 = vrot.slane %v120_v62, %v7165_v11 }
 0x21e   :  { %v1548_v2 = vpop.permute.xlu1 %1547  ;;  %v1539_v53 = vpack.c.bf16 %v1535_v22, %v1531_v18 }
 0x21f   :  { %v1537_v43 = vpack.c.bf16 %v1533_v46, %v1529_v25  ;;  %v1546_v58 = vpop.permute.xlu0 %1545  ;;  %v1540_v7 = vpack.c.bf16 %v1536_v0, %v1532_v1  ;;  %12208 = vst [vmem:[#allocation78_spill] sm:$0xff] %v8375_v55 }
 0x220   :  { %1993 = vrot.lane.b32.xlu1 %v8310_v5, %s11885_s22 }
 0x221   :  { %1991 = vrot.lane.b32.xlu0 %v8255_v61, %s11885_s22  ;;  %3462 = vmatpush1.bf16.msra.mxu0 %v1537_v43  ;;  %v8392_v43 = vrot.slane %v120_v62, %v7185_v21 }
 0x222   :  { %3633 = vmatprep.subr.bf16.mxu1 %v1540_v7  ;;  %v1552_v57 = vpop.permute.xlu1 %1551  ;;  %v8395_v7 = vrot.slane %v120_v62, %v7189_v24 }
 0x223   :  { %3634 = vmatpush1.bf16.msra.mxu1 %v1539_v53  ;;  %v1567_v46 = vsel %vm11889_vm15, %v1548_v2, %v1552_v57  ;;  %v1550_v0 = vpop.permute.xlu0 %1549  ;;  %12209 = vst [vmem:[#allocation79_spill] sm:$0xff] %v8392_v43  ;;  %v8398_v53 = vrot.slane %v120_v62, %v7177_v19 }
 0x224   :  { %v1596_v47 = vmul.f32 %v8375_v55, %v1567_v46  ;;  %v1566_v4 = vsel %vm11889_vm15, %v1546_v58, %v1550_v0  ;;  %1997 = vrot.lane.b32.xlu1 %v8325_v6, %s11885_s22  ;;  %12210 = vst [vmem:[#allocation80_spill] sm:$0xff] %v8395_v7 }
 0x225   :  { %v1592_v22 = vmul.f32 %v8375_v55, %v1566_v4  ;;  %1995 = vrot.lane.b32.xlu0 %v8330_v13, %s11885_s22  ;;  %12211 = vst [vmem:[#allocation81_spill] sm:$0xff] %v8398_v53 }
 0x226   :  { %v1556_v18 = vpop.permute.xlu1 %1555 }
 0x227   :  { %v1554_v25 = vpop.permute.xlu0 %1553  ;;  %v1600_v1 = vpack.c.bf16 %v1596_v47, %v1592_v22  ;;  %v1565_v46 = vsel %vm11889_vm15, %v1552_v57, %v1556_v18 }
 0x228   :  { %2001 = vrot.lane.b32.xlu1 %v8334_v29, %s11885_s22  ;;  %v1564_v47 = vsel %vm11889_vm15, %v1550_v0, %v1554_v25  ;;  %v1597_v0 = vmul.f32 %v8398_v53, %v1565_v46 }
 0x229   :  { %1999 = vrot.lane.b32.xlu0 %v8280_v20, %s11885_s22  ;;  %3463 = vmatprep.subr.bf16.mxu0 %v1600_v1  ;;  %s11896_s22 = smov 112  }
 0x22a   :  { %v1560_v4 = vpop.permute.xlu1 %1559 }
 0x22b   :  { %v1563_v22 = vsel %vm11889_vm15, %v1556_v18, %v1560_v4  ;;  %v1569_v55 = vsel %vm11889_vm15, %v1560_v4, %v1548_v2  ;;  %v1558_v30 = vpop.permute.xlu0 %1557  ;;  %v1593_v18 = vmul.f32 %v8398_v53, %v1564_v47  ;;  %v122_v4 = vld [vmem:[#allocation9 + $0x47] ss:$8 sm:$0xf] }
 0x22c   :  { %v1595_v62 = vmul.f32 %v8392_v43, %v1569_v55  ;;  %v1598_v63 = vmul.f32 %v8395_v7, %v1563_v22  ;;  %v1562_v1 = vsel %vm11889_vm15, %v1554_v25, %v1558_v30  ;;  %v1568_v57 = vsel %vm11889_vm15, %v1558_v30, %v1546_v58  ;;  %2051 = vrot.lane.b32.xlu1 %v8298_v3, %s11896_s22 }
 0x22d   :  { %v1591_v2 = vmul.f32 %v8392_v43, %v1568_v57  ;;  %v1594_v55 = vmul.f32 %v8395_v7, %v1562_v1  ;;  %2049 = vrot.lane.b32.xlu0 %v8306_v54, %s11896_s22  ;;  %vm11900_vm15 = vcmp.lt.s32.totalorder %v7159_v10, 1  ;;  %v8428_v30 = vrot.slane %v122_v4, %v7165_v11 }
 0x22e   :  { %v1610_v25 = vpop.permute.xlu1 %1609  ;;  %v1601_v46 = vpack.c.bf16 %v1597_v0, %v1593_v18 }
 0x22f   :  { %v1599_v22 = vpack.c.bf16 %v1595_v62, %v1591_v2  ;;  %v1608_v44 = vpop.permute.xlu0 %1607  ;;  %v1602_v58 = vpack.c.bf16 %v1598_v63, %v1594_v55  ;;  %12212 = vst [vmem:[#allocation82_spill] sm:$0xff] %v8428_v30 }
 0x230   :  { %2055 = vrot.lane.b32.xlu1 %v8310_v5, %s11896_s22 }
 0x231   :  { %2053 = vrot.lane.b32.xlu0 %v8255_v61, %s11896_s22  ;;  %3464 = vmatpush1.bf16.msra.mxu0 %v1599_v22  ;;  %v8445_v22 = vrot.slane %v122_v4, %v7185_v21 }
 0x232   :  { %3635 = vmatprep.subr.bf16.mxu1 %v1602_v58  ;;  %v1614_v47 = vpop.permute.xlu1 %1613  ;;  %v8448_v58 = vrot.slane %v122_v4, %v7189_v24 }
 0x233   :  { %3636 = vmatpush1.bf16.msra.mxu1 %v1601_v46  ;;  %v1629_v62 = vsel %vm11900_vm15, %v1610_v25, %v1614_v47  ;;  %v1612_v63 = vpop.permute.xlu0 %1611  ;;  %12213 = vst [vmem:[#allocation83_spill] sm:$0xff] %v8445_v22  ;;  %v8451_v46 = vrot.slane %v122_v4, %v7177_v19 }
 0x234   :  { %v1658_v1 = vmul.f32 %v8428_v30, %v1629_v62  ;;  %v1628_v57 = vsel %vm11900_vm15, %v1608_v44, %v1612_v63  ;;  %2059 = vrot.lane.b32.xlu1 %v8325_v6, %s11896_s22  ;;  %12214 = vst [vmem:[#allocation84_spill] sm:$0xff] %v8448_v58 }
 0x235   :  { %v1654_v0 = vmul.f32 %v8428_v30, %v1628_v57  ;;  %2057 = vrot.lane.b32.xlu0 %v8330_v13, %s11896_s22  ;;  %12215 = vst [vmem:[#allocation85_spill] sm:$0xff] %v8451_v46 }
 0x236   :  { %v1618_v18 = vpop.permute.xlu1 %1617 }
 0x237   :  { %v1616_v2 = vpop.permute.xlu0 %1615  ;;  %v1662_v55 = vpack.c.bf16 %v1658_v1, %v1654_v0  ;;  %v1627_v62 = vsel %vm11900_vm15, %v1614_v47, %v1618_v18 }
 0x238   :  { %2063 = vrot.lane.b32.xlu1 %v8334_v29, %s11896_s22  ;;  %v1626_v1 = vsel %vm11900_vm15, %v1612_v63, %v1616_v2  ;;  %v6650_v63 = vld [vmem:[#allocation6 + $0xc] ss:$28 sps:$4 sm:$0xff]  }
 0x239   :  { %2061 = vrot.lane.b32.xlu0 %v8280_v20, %s11896_s22  ;;  %3465 = vmatprep.subr.bf16.mxu0 %v1662_v55  ;;  %s11913_s22 = smov 111  }
 0x23a   :  { %v1622_v57 = vpop.permute.xlu1 %1621  ;;  %3483 = vmatprep.mubr.bf16.mxu0 %v6650_v63  ;;  %3655 = vmatprep.mubr.bf16.mxu1 %v6650_v63 }
 0x23b   :  { %v1625_v0 = vsel %vm11900_vm15, %v1618_v18, %v1622_v57  ;;  %v1631_v30 = vsel %vm11900_vm15, %v1622_v57, %v1610_v25  ;;  %v1620_v7 = vpop.permute.xlu0 %1619  ;;  %v1659_v18 = vmul.f32 %v8451_v46, %v1627_v62  ;;  %v1655_v25 = vmul.f32 %v8451_v46, %v1626_v1  ;;  %v124_v62 = vld [vmem:[#allocation9 + $0x61] ss:$8 sm:$0xf] }
 0x23c   :  { %v1657_v4 = vmul.f32 %v8445_v22, %v1631_v30  ;;  %v1660_v43 = vmul.f32 %v8448_v58, %v1625_v0  ;;  %v1624_v55 = vsel %vm11900_vm15, %v1616_v2, %v1620_v7  ;;  %v1630_v47 = vsel %vm11900_vm15, %v1620_v7, %v1608_v44  ;;  %2113 = vrot.lane.b32.xlu1 %v8298_v3, %s11913_s22 }
 0x23d   :  { %v1653_v57 = vmul.f32 %v8445_v22, %v1630_v47  ;;  %v1656_v30 = vmul.f32 %v8448_v58, %v1624_v55  ;;  %2111 = vrot.lane.b32.xlu0 %v8306_v54, %s11913_s22  ;;  %v1670_v44 = vpack.c.bf16 %v8310_v5, %v8255_v61  ;;  %v1672_v1 = vpack.c.bf16 %v8334_v29, %v8280_v20 }
 0x23e   :  { %v1680_v2 = vpop.permute.xlu1 %1679  ;;  %v1663_v55 = vpack.c.bf16 %v1659_v18, %v1655_v25  ;;  %vm11915_vm15 = vcmp.lt.s32.totalorder %v7159_v10, 127  ;;  %v1669_v47 = vpack.c.bf16 %v8298_v3, %v8306_v54  ;;  %v1671_v18 = vpack.c.bf16 %v8325_v6, %v8330_v13 }
 0x23f   :  { %v1661_v7 = vpack.c.bf16 %v1657_v4, %v1653_v57  ;;  %v1678_v0 = vpop.permute.xlu0 %1677  ;;  %v1664_v53 = vpack.c.bf16 %v1660_v43, %v1656_v30  ;;  %v8489_v43 = vrot.slane %v124_v62, %v7185_v21 }
 0x240   :  { %2117 = vrot.lane.b32.xlu1 %v8310_v5, %s11913_s22 }
 0x241   :  { %2115 = vrot.lane.b32.xlu0 %v8255_v61, %s11913_s22  ;;  %3466 = vmatpush1.bf16.msra.mxu0 %v1661_v7  ;;  %12216 = vst [vmem:[#allocation86_spill] sm:$0xff] %v8489_v43 }
 0x242   :  { %3637 = vmatprep.subr.bf16.mxu1 %v1664_v53  ;;  %v1684_v4 = vpop.permute.xlu1 %1683  ;;  %3467 = vmatprep.subr.bf16.mxu0 %v1670_v44  ;;  %v8500_v53 = vrot.slane %v124_v62, %v7165_v11 }
 0x243   :  { %3638 = vmatpush1.bf16.msra.mxu1 %v1663_v55  ;;  %v1682_v63 = vpop.permute.xlu0 %1681  ;;  %v1699_v25 = vsel %vm11915_vm15, %v1680_v2, %v1684_v4 }
 0x244   :  { %v1698_v57 = vsel %vm11915_vm15, %v1678_v0, %v1682_v63  ;;  %2121 = vrot.lane.b32.xlu1 %v8325_v6, %s11913_s22  ;;  %12217 = vst [vmem:[#allocation87_spill] sm:$0xff] %v8500_v53  ;;  %3639 = vmatprep.subr.bf16.mxu1 %v1672_v1  ;;  %v1727_v44 = vmul.f32 %v8489_v43, %v1699_v25 }
 0x245   :  { %2119 = vrot.lane.b32.xlu0 %v8330_v13, %s11913_s22  ;;  %3468 = vmatpush1.bf16.msra.mxu0 %v1669_v47  ;;  %v1723_v7 = vmul.f32 %v8489_v43, %v1698_v57  ;;  %v8514_v1 = vrot.slane %v124_v62, %v7177_v19  ;;  %v8517_v47 = vrot.slane %v124_v62, %v7189_v24 }
 0x246   :  { %v1688_v30 = vpop.permute.xlu1 %1687 }
 0x247   :  { %v1697_v55 = vsel %vm11915_vm15, %v1684_v4, %v1688_v30  ;;  %v1686_v58 = vpop.permute.xlu0 %1685  ;;  %3640 = vmatpush1.bf16.msra.mxu1 %v1671_v18  ;;  %12218 = vst [vmem:[#allocation88_spill] sm:$0xff] %v8514_v1  ;;  %12219 = vst [vmem:[#allocation89_spill] sm:$0xff] %v8517_v47  ;;  %v1731_v18 = vpack.c.bf16 %v1727_v44, %v1723_v7 }
 0x248   :  { %v1728_v22 = vmul.f32 %v8500_v53, %v1697_v55  ;;  %v1696_v46 = vsel %vm11915_vm15, %v1682_v63, %v1686_v58  ;;  %2125 = vrot.lane.b32.xlu1 %v8334_v29, %s11913_s22 }
 0x249   :  { %v1724_v25 = vmul.f32 %v8500_v53, %v1696_v46  ;;  %2123 = vrot.lane.b32.xlu0 %v8280_v20, %s11913_s22  ;;  %s11924_s22 = smov 110  }
 0x24a   :  { %v1692_v4 = vpop.permute.xlu1 %1691 }
 0x24b   :  { %v1695_v57 = vsel %vm11915_vm15, %v1688_v30, %v1692_v4  ;;  %v1701_v63 = vsel %vm11915_vm15, %v1692_v4, %v1680_v2  ;;  %v1690_v55 = vpop.permute.xlu0 %1689  ;;  %v1732_v43 = vpack.c.bf16 %v1728_v22, %v1724_v25 }
 0x24c   :  { %v1729_v16 = vmul.f32 %v8514_v1, %v1695_v57  ;;  %v1730_v62 = vmul.f32 %v8517_v47, %v1701_v63  ;;  %v1694_v46 = vsel %vm11915_vm15, %v1686_v58, %v1690_v55  ;;  %v1700_v53 = vsel %vm11915_vm15, %v1690_v55, %v1678_v0  ;;  %2175 = vrot.lane.b32.xlu1 %v8298_v3, %s11924_s22  ;;  %v126_v0 = vld [vmem:[#allocation9 + $0x62] ss:$8 sm:$0xf] }
 0x24d   :  { %v1725_v30 = vmul.f32 %v8514_v1, %v1694_v46  ;;  %v1726_v2 = vmul.f32 %v8517_v47, %v1700_v53  ;;  %2173 = vrot.lane.b32.xlu0 %v8306_v54, %s11924_s22  ;;  %3469 = vmatprep.subr.bf16.mxu0 %v1732_v43  ;;  %vm11926_vm15 = vcmp.lt.s32.totalorder %v7159_v10, 126  ;;  %v8544_v25 = vrot.slane %v126_v0, %v7185_v21 }
 0x24e   :  { %3470 = vmatpush1.bf16.msra.mxu0 %v1731_v18  ;;  %v1742_v22 = vpop.permute.xlu1 %1741  ;;  %v8553_v18 = vrot.slane %v126_v0, %v7165_v11 }
 0x24f   :  { %v1733_v44 = vpack.c.bf16 %v1729_v16, %v1725_v30  ;;  %v1740_v7 = vpop.permute.xlu0 %1739  ;;  %v1734_v58 = vpack.c.bf16 %v1730_v62, %v1726_v2  ;;  %12220 = vst [vmem:[#allocation90_spill] sm:$0xff] %v8544_v25 }
 0x250   :  { %2179 = vrot.lane.b32.xlu1 %v8310_v5, %s11924_s22  ;;  %12221 = vst [vmem:[#allocation91_spill] sm:$0xff] %v8553_v18 }
 0x251   :  { %2177 = vrot.lane.b32.xlu0 %v8255_v61, %s11924_s22  ;;  %3641 = vmatprep.subr.bf16.mxu1 %v1734_v58  ;;  %v8570_v58 = vrot.slane %v126_v0, %v7189_v24 }
 0x252   :  { %3642 = vmatpush1.bf16.msra.mxu1 %v1733_v44  ;;  %v1746_v53 = vpop.permute.xlu1 %1745  ;;  %v8567_v44 = vrot.slane %v126_v0, %v7177_v19 }
 0x253   :  { %v1744_v43 = vpop.permute.xlu0 %1743  ;;  %v1761_v16 = vsel %vm11926_vm15, %v1742_v22, %v1746_v53  ;;  %12223 = vst [vmem:[#allocation93_spill] sm:$0xff] %v8570_v58 }
 0x254   :  { %v1760_v4 = vsel %vm11926_vm15, %v1740_v7, %v1744_v43  ;;  %2183 = vrot.lane.b32.xlu1 %v8325_v6, %s11924_s22  ;;  %v1789_v63 = vmul.f32 %v8544_v25, %v1761_v16  ;;  %12222 = vst [vmem:[#allocation92_spill] sm:$0xff] %v8567_v44 }
 0x255   :  { %2181 = vrot.lane.b32.xlu0 %v8330_v13, %s11924_s22  ;;  %v1785_v55 = vmul.f32 %v8544_v25, %v1760_v4 }
 0x256   :  { %v1750_v57 = vpop.permute.xlu1 %1749 }
 0x257   :  { %v1759_v62 = vsel %vm11926_vm15, %v1746_v53, %v1750_v57  ;;  %v1748_v46 = vpop.permute.xlu0 %1747  ;;  %v1793_v4 = vpack.c.bf16 %v1789_v63, %v1785_v55 }
 0x258   :  { %v1790_v30 = vmul.f32 %v8553_v18, %v1759_v62  ;;  %v1758_v2 = vsel %vm11926_vm15, %v1744_v43, %v1748_v46  ;;  %2187 = vrot.lane.b32.xlu1 %v8334_v29, %s11924_s22 }
 0x259   :  { %v1786_v16 = vmul.f32 %v8553_v18, %v1758_v2  ;;  %2185 = vrot.lane.b32.xlu0 %v8280_v20, %s11924_s22  ;;  %s11935_s22 = smov 109  }
 0x25a   :  { %v1754_v53 = vpop.permute.xlu1 %1753 }
 0x25b   :  { %v1757_v62 = vsel %vm11926_vm15, %v1750_v57, %v1754_v53  ;;  %v1763_v43 = vsel %vm11926_vm15, %v1754_v53, %v1742_v22  ;;  %v1752_v25 = vpop.permute.xlu0 %1751  ;;  %v1794_v47 = vpack.c.bf16 %v1790_v30, %v1786_v16 }
 0x25c   :  { %v1791_v1 = vmul.f32 %v8567_v44, %v1757_v62  ;;  %v1792_v0 = vmul.f32 %v8570_v58, %v1763_v43  ;;  %v1756_v2 = vsel %vm11926_vm15, %v1748_v46, %v1752_v25  ;;  %v1762_v18 = vsel %vm11926_vm15, %v1752_v25, %v1740_v7  ;;  %2237 = vrot.lane.b32.xlu1 %v8298_v3, %s11935_s22  ;;  %v128_v7 = vld [vmem:[#allocation9 + $0x63] ss:$8 sm:$0xf] }
 0x25d   :  { %v1787_v57 = vmul.f32 %v8567_v44, %v1756_v2  ;;  %v1788_v22 = vmul.f32 %v8570_v58, %v1762_v18  ;;  %2235 = vrot.lane.b32.xlu0 %v8306_v54, %s11935_s22  ;;  %3471 = vmatprep.subr.bf16.mxu0 %v1794_v47  ;;  %vm11937_vm15 = vcmp.lt.s32.totalorder %v7159_v10, 125  ;;  %v8597_v18 = vrot.slane %v128_v7, %v7185_v21 }
 0x25e   :  { %3472 = vmatpush1.bf16.msra.mxu0 %v1793_v4  ;;  %v1804_v63 = vpop.permute.xlu1 %1803  ;;  %v8606_v53 = vrot.slane %v128_v7, %v7165_v11 }
 0x25f   :  { %v1795_v55 = vpack.c.bf16 %v1791_v1, %v1787_v57  ;;  %v1802_v30 = vpop.permute.xlu0 %1801  ;;  %v1796_v46 = vpack.c.bf16 %v1792_v0, %v1788_v22  ;;  %12224 = vst [vmem:[#allocation94_spill] sm:$0xff] %v8597_v18 }
 0x260   :  { %2241 = vrot.lane.b32.xlu1 %v8310_v5, %s11935_s22  ;;  %12225 = vst [vmem:[#allocation95_spill] sm:$0xff] %v8606_v53 }
 0x261   :  { %2239 = vrot.lane.b32.xlu0 %v8255_v61, %s11935_s22  ;;  %3643 = vmatprep.subr.bf16.mxu1 %v1796_v46  ;;  %v8623_v46 = vrot.slane %v128_v7, %v7189_v24 }
 0x262   :  { %3644 = vmatpush1.bf16.msra.mxu1 %v1795_v55  ;;  %v1808_v25 = vpop.permute.xlu1 %1807  ;;  %v8620_v55 = vrot.slane %v128_v7, %v7177_v19 }
 0x263   :  { %v1806_v47 = vpop.permute.xlu0 %1805  ;;  %v1823_v1 = vsel %vm11937_vm15, %v1804_v63, %v1808_v25  ;;  %12227 = vst [vmem:[#allocation97_spill] sm:$0xff] %v8623_v46 }
 0x264   :  { %v1822_v16 = vsel %vm11937_vm15, %v1802_v30, %v1806_v47  ;;  %2245 = vrot.lane.b32.xlu1 %v8325_v6, %s11935_s22  ;;  %v1851_v62 = vmul.f32 %v8597_v18, %v1823_v1  ;;  %12226 = vst [vmem:[#allocation96_spill] sm:$0xff] %v8620_v55 }
 0x265   :  { %2243 = vrot.lane.b32.xlu0 %v8330_v13, %s11935_s22  ;;  %v1847_v43 = vmul.f32 %v8597_v18, %v1822_v16 }
 0x266   :  { %v1812_v4 = vpop.permute.xlu1 %1811 }
 0x267   :  { %v1821_v0 = vsel %vm11937_vm15, %v1808_v25, %v1812_v4  ;;  %v1810_v2 = vpop.permute.xlu0 %1809  ;;  %v1855_v16 = vpack.c.bf16 %v1851_v62, %v1847_v43 }
 0x268   :  { %v1852_v57 = vmul.f32 %v8606_v53, %v1821_v0  ;;  %v1820_v22 = vsel %vm11937_vm15, %v1806_v47, %v1810_v2  ;;  %2249 = vrot.lane.b32.xlu1 %v8334_v29, %s11935_s22 }
 0x269   :  { %v1848_v1 = vmul.f32 %v8606_v53, %v1820_v22  ;;  %2247 = vrot.lane.b32.xlu0 %v8280_v20, %s11935_s22  ;;  %s11946_s22 = smov 99  }
 0x26a   :  { %v1816_v25 = vpop.permute.xlu1 %1815 }
 0x26b   :  { %v1819_v0 = vsel %vm11937_vm15, %v1812_v4, %v1816_v25  ;;  %v1825_v47 = vsel %vm11937_vm15, %v1816_v25, %v1804_v63  ;;  %v1814_v18 = vpop.permute.xlu0 %1813  ;;  %v1856_v58 = vpack.c.bf16 %v1852_v57, %v1848_v1 }
 0x26c   :  { %v1853_v44 = vmul.f32 %v8620_v55, %v1819_v0  ;;  %v1854_v7 = vmul.f32 %v8623_v46, %v1825_v47  ;;  %v1818_v22 = vsel %vm11937_vm15, %v1810_v2, %v1814_v18  ;;  %v1824_v53 = vsel %vm11937_vm15, %v1814_v18, %v1802_v30  ;;  %2299 = vrot.lane.b32.xlu1 %v8298_v3, %s11946_s22  ;;  %v130_v30 = vld [vmem:[#allocation9 + $0x64] ss:$8 sm:$0xf] }
 0x26d   :  { %v1849_v4 = vmul.f32 %v8620_v55, %v1818_v22  ;;  %v1850_v63 = vmul.f32 %v8623_v46, %v1824_v53  ;;  %2297 = vrot.lane.b32.xlu0 %v8306_v54, %s11946_s22  ;;  %3473 = vmatprep.subr.bf16.mxu0 %v1856_v58  ;;  %vm11948_vm15 = vcmp.lt.s32.totalorder %v7159_v10, 115  ;;  %v8650_v53 = vrot.slane %v130_v30, %v7185_v21 }
 0x26e   :  { %3474 = vmatpush1.bf16.msra.mxu0 %v1855_v16  ;;  %v1866_v62 = vpop.permute.xlu1 %1865  ;;  %v8659_v25 = vrot.slane %v130_v30, %v7165_v11 }
 0x26f   :  { %v1857_v43 = vpack.c.bf16 %v1853_v44, %v1849_v4  ;;  %v1864_v57 = vpop.permute.xlu0 %1863  ;;  %v1858_v2 = vpack.c.bf16 %v1854_v7, %v1850_v63  ;;  %12228 = vst [vmem:[#allocation98_spill] sm:$0xff] %v8650_v53 }
 0x270   :  { %2303 = vrot.lane.b32.xlu1 %v8310_v5, %s11946_s22  ;;  %12229 = vst [vmem:[#allocation99_spill] sm:$0xff] %v8659_v25 }
 0x271   :  { %2301 = vrot.lane.b32.xlu0 %v8255_v61, %s11946_s22  ;;  %3645 = vmatprep.subr.bf16.mxu1 %v1858_v2  ;;  %v8676_v2 = vrot.slane %v130_v30, %v7189_v24 }
 0x272   :  { %3646 = vmatpush1.bf16.msra.mxu1 %v1857_v43  ;;  %v1870_v18 = vpop.permute.xlu1 %1869  ;;  %v8673_v43 = vrot.slane %v130_v30, %v7177_v19 }
 0x273   :  { %v1868_v58 = vpop.permute.xlu0 %1867  ;;  %v1885_v44 = vsel %vm11948_vm15, %v1866_v62, %v1870_v18  ;;  %12231 = vst [vmem:[#allocation101_spill] sm:$0xff] %v8676_v2 }
 0x274   :  { %v1884_v1 = vsel %vm11948_vm15, %v1864_v57, %v1868_v58  ;;  %2307 = vrot.lane.b32.xlu1 %v8325_v6, %s11946_s22  ;;  %v1913_v0 = vmul.f32 %v8650_v53, %v1885_v44  ;;  %12230 = vst [vmem:[#allocation100_spill] sm:$0xff] %v8673_v43 }
 0x275   :  { %2305 = vrot.lane.b32.xlu0 %v8330_v13, %s11946_s22  ;;  %v1909_v47 = vmul.f32 %v8650_v53, %v1884_v1 }
 0x276   :  { %v1874_v16 = vpop.permute.xlu1 %1873 }
 0x277   :  { %v1883_v7 = vsel %vm11948_vm15, %v1870_v18, %v1874_v16  ;;  %v1872_v22 = vpop.permute.xlu0 %1871  ;;  %v1917_v1 = vpack.c.bf16 %v1913_v0, %v1909_v47 }
 0x278   :  { %v1914_v4 = vmul.f32 %v8659_v25, %v1883_v7  ;;  %v1882_v63 = vsel %vm11948_vm15, %v1868_v58, %v1872_v22  ;;  %2311 = vrot.lane.b32.xlu1 %v8334_v29, %s11946_s22 }
 0x279   :  { %v1910_v44 = vmul.f32 %v8659_v25, %v1882_v63  ;;  %2309 = vrot.lane.b32.xlu0 %v8280_v20, %s11946_s22  ;;  %s11957_s22 = smov 98  }
 0x27a   :  { %v1878_v18 = vpop.permute.xlu1 %1877 }
 0x27b   :  { %v1881_v7 = vsel %vm11948_vm15, %v1874_v16, %v1878_v18  ;;  %v1887_v58 = vsel %vm11948_vm15, %v1878_v18, %v1866_v62  ;;  %v1876_v53 = vpop.permute.xlu0 %1875  ;;  %v1918_v46 = vpack.c.bf16 %v1914_v4, %v1910_v44 }
 0x27c   :  { %v1915_v55 = vmul.f32 %v8673_v43, %v1881_v7  ;;  %v1916_v30 = vmul.f32 %v8676_v2, %v1887_v58  ;;  %v1880_v63 = vsel %vm11948_vm15, %v1872_v22, %v1876_v53  ;;  %v1886_v25 = vsel %vm11948_vm15, %v1876_v53, %v1864_v57  ;;  %2361 = vrot.lane.b32.xlu1 %v8298_v3, %s11957_s22  ;;  %v132_v57 = vld [vmem:[#allocation9 + $0x65] ss:$8 sm:$0xf] }
 0x27d   :  { %v1911_v16 = vmul.f32 %v8673_v43, %v1880_v63  ;;  %v1912_v62 = vmul.f32 %v8676_v2, %v1886_v25  ;;  %2359 = vrot.lane.b32.xlu0 %v8306_v54, %s11957_s22  ;;  %3475 = vmatprep.subr.bf16.mxu0 %v1918_v46  ;;  %vm11959_vm15 = vcmp.lt.s32.totalorder %v7159_v10, 114  ;;  %v8703_v25 = vrot.slane %v132_v57, %v7185_v21 }
 0x27e   :  { %3476 = vmatpush1.bf16.msra.mxu0 %v1917_v1  ;;  %v1928_v0 = vpop.permute.xlu1 %1927  ;;  %v8712_v18 = vrot.slane %v132_v57, %v7165_v11 }
 0x27f   :  { %v1919_v47 = vpack.c.bf16 %v1915_v55, %v1911_v16  ;;  %v1926_v4 = vpop.permute.xlu0 %1925  ;;  %v1920_v22 = vpack.c.bf16 %v1916_v30, %v1912_v62  ;;  %12232 = vst [vmem:[#allocation102_spill] sm:$0xff] %v8703_v25 }
 0x280   :  { %2365 = vrot.lane.b32.xlu1 %v8310_v5, %s11957_s22  ;;  %12233 = vst [vmem:[#allocation103_spill] sm:$0xff] %v8712_v18 }
 0x281   :  { %2363 = vrot.lane.b32.xlu0 %v8255_v61, %s11957_s22  ;;  %3647 = vmatprep.subr.bf16.mxu1 %v1920_v22  ;;  %v8729_v22 = vrot.slane %v132_v57, %v7189_v24 }
 0x282   :  { %3648 = vmatpush1.bf16.msra.mxu1 %v1919_v47  ;;  %v1932_v53 = vpop.permute.xlu1 %1931  ;;  %v8726_v47 = vrot.slane %v132_v57, %v7177_v19 }
 0x283   :  { %v1930_v46 = vpop.permute.xlu0 %1929  ;;  %v1947_v55 = vsel %vm11959_vm15, %v1928_v0, %v1932_v53  ;;  %12235 = vst [vmem:[#allocation105_spill] sm:$0xff] %v8729_v22 }
 0x284   :  { %v1946_v44 = vsel %vm11959_vm15, %v1926_v4, %v1930_v46  ;;  %2369 = vrot.lane.b32.xlu1 %v8325_v6, %s11957_s22  ;;  %v1975_v7 = vmul.f32 %v8703_v25, %v1947_v55  ;;  %12234 = vst [vmem:[#allocation104_spill] sm:$0xff] %v8726_v47 }
 0x285   :  { %2367 = vrot.lane.b32.xlu0 %v8330_v13, %s11957_s22  ;;  %v1971_v58 = vmul.f32 %v8703_v25, %v1946_v44 }
 0x286   :  { %v1936_v1 = vpop.permute.xlu1 %1935 }
 0x287   :  { %v1945_v30 = vsel %vm11959_vm15, %v1932_v53, %v1936_v1  ;;  %v1934_v63 = vpop.permute.xlu0 %1933  ;;  %v1979_v44 = vpack.c.bf16 %v1975_v7, %v1971_v58 }
 0x288   :  { %v1976_v16 = vmul.f32 %v8712_v18, %v1945_v30  ;;  %v1944_v62 = vsel %vm11959_vm15, %v1930_v46, %v1934_v63  ;;  %2373 = vrot.lane.b32.xlu1 %v8334_v29, %s11957_s22 }
 0x289   :  { %v1972_v55 = vmul.f32 %v8712_v18, %v1944_v62  ;;  %2371 = vrot.lane.b32.xlu0 %v8280_v20, %s11957_s22  ;;  %s11968_s22 = smov 97  }
 0x28a   :  { %v1940_v53 = vpop.permute.xlu1 %1939 }
 0x28b   :  { %v1943_v30 = vsel %vm11959_vm15, %v1936_v1, %v1940_v53  ;;  %v1949_v46 = vsel %vm11959_vm15, %v1940_v53, %v1928_v0  ;;  %v1938_v25 = vpop.permute.xlu0 %1937  ;;  %v1980_v2 = vpack.c.bf16 %v1976_v16, %v1972_v55 }
 0x28c   :  { %v1977_v43 = vmul.f32 %v8726_v47, %v1943_v30  ;;  %v1978_v57 = vmul.f32 %v8729_v22, %v1949_v46  ;;  %v1942_v62 = vsel %vm11959_vm15, %v1934_v63, %v1938_v25  ;;  %v1948_v18 = vsel %vm11959_vm15, %v1938_v25, %v1926_v4  ;;  %2423 = vrot.lane.b32.xlu1 %v8298_v3, %s11968_s22  ;;  %v134_v4 = vld [vmem:[#allocation9 + $0x66] ss:$8 sm:$0xf] }
 0x28d   :  { %v1973_v1 = vmul.f32 %v8726_v47, %v1942_v62  ;;  %v1974_v0 = vmul.f32 %v8729_v22, %v1948_v18  ;;  %2421 = vrot.lane.b32.xlu0 %v8306_v54, %s11968_s22  ;;  %3477 = vmatprep.subr.bf16.mxu0 %v1980_v2  ;;  %vm11970_vm15 = vcmp.lt.s32.totalorder %v7159_v10, 113  ;;  %v8756_v18 = vrot.slane %v134_v4, %v7185_v21 }
 0x28e   :  { %3478 = vmatpush1.bf16.msra.mxu0 %v1979_v44  ;;  %v1990_v7 = vpop.permute.xlu1 %1989  ;;  %v8765_v53 = vrot.slane %v134_v4, %v7165_v11 }
 0x28f   :  { %v1981_v58 = vpack.c.bf16 %v1977_v43, %v1973_v1  ;;  %v1988_v16 = vpop.permute.xlu0 %1987  ;;  %v1982_v63 = vpack.c.bf16 %v1978_v57, %v1974_v0  ;;  %12236 = vst [vmem:[#allocation106_spill] sm:$0xff] %v8756_v18 }
 0x290   :  { %2427 = vrot.lane.b32.xlu1 %v8310_v5, %s11968_s22  ;;  %12237 = vst [vmem:[#allocation107_spill] sm:$0xff] %v8765_v53 }
 0x291   :  { %2425 = vrot.lane.b32.xlu0 %v8255_v61, %s11968_s22  ;;  %3649 = vmatprep.subr.bf16.mxu1 %v1982_v63  ;;  %v8782_v63 = vrot.slane %v134_v4, %v7189_v24 }
 0x292   :  { %3650 = vmatpush1.bf16.msra.mxu1 %v1981_v58  ;;  %v1994_v25 = vpop.permute.xlu1 %1993  ;;  %v8779_v58 = vrot.slane %v134_v4, %v7177_v19 }
 0x293   :  { %v1992_v2 = vpop.permute.xlu0 %1991  ;;  %v2009_v43 = vsel %vm11970_vm15, %v1990_v7, %v1994_v25  ;;  %12239 = vst [vmem:[#allocation109_spill] sm:$0xff] %v8782_v63 }
 0x294   :  { %v2008_v55 = vsel %vm11970_vm15, %v1988_v16, %v1992_v2  ;;  %2431 = vrot.lane.b32.xlu1 %v8325_v6, %s11968_s22  ;;  %v2037_v30 = vmul.f32 %v8756_v18, %v2009_v43  ;;  %12238 = vst [vmem:[#allocation108_spill] sm:$0xff] %v8779_v58 }
 0x295   :  { %2429 = vrot.lane.b32.xlu0 %v8330_v13, %s11968_s22  ;;  %v2033_v46 = vmul.f32 %v8756_v18, %v2008_v55 }
 0x296   :  { %v1998_v44 = vpop.permute.xlu1 %1997 }
 0x297   :  { %v2007_v57 = vsel %vm11970_vm15, %v1994_v25, %v1998_v44  ;;  %v1996_v62 = vpop.permute.xlu0 %1995  ;;  %v2041_v55 = vpack.c.bf16 %v2037_v30, %v2033_v46 }
 0x298   :  { %v2038_v1 = vmul.f32 %v8765_v53, %v2007_v57  ;;  %v2006_v0 = vsel %vm11970_vm15, %v1992_v2, %v1996_v62  ;;  %2435 = vrot.lane.b32.xlu1 %v8334_v29, %s11968_s22 }
 0x299   :  { %v2034_v43 = vmul.f32 %v8765_v53, %v2006_v0  ;;  %2433 = vrot.lane.b32.xlu0 %v8280_v20, %s11968_s22  ;;  %s11975_s22 = smov 96  }
 0x29a   :  { %v2002_v25 = vpop.permute.xlu1 %2001 }
 0x29b   :  { %v2005_v57 = vsel %vm11970_vm15, %v1998_v44, %v2002_v25  ;;  %v2011_v2 = vsel %vm11970_vm15, %v2002_v25, %v1990_v7  ;;  %v2000_v18 = vpop.permute.xlu0 %1999  ;;  %v2042_v22 = vpack.c.bf16 %v2038_v1, %v2034_v43 }
 0x29c   :  { %v2039_v47 = vmul.f32 %v8779_v58, %v2005_v57  ;;  %v2040_v4 = vmul.f32 %v8782_v63, %v2011_v2  ;;  %v2004_v0 = vsel %vm11970_vm15, %v1996_v62, %v2000_v18  ;;  %v2010_v53 = vsel %vm11970_vm15, %v2000_v18, %v1988_v16  ;;  %2485 = vrot.lane.b32.xlu1 %v8298_v3, %s11975_s22  ;;  %v136_v16 = vld [vmem:[#allocation9 + $0x67] ss:$8 sm:$0xf] }
 0x29d   :  { %v2035_v44 = vmul.f32 %v8779_v58, %v2004_v0  ;;  %v2036_v7 = vmul.f32 %v8782_v63, %v2010_v53  ;;  %2483 = vrot.lane.b32.xlu0 %v8306_v54, %s11975_s22  ;;  %3479 = vmatprep.subr.bf16.mxu0 %v2042_v22  ;;  %vm11977_vm15 = vcmp.lt.s32.totalorder %v7159_v10, 112  ;;  %v8809_v53 = vrot.slane %v136_v16, %v7185_v21 }
 0x29e   :  { %3480 = vmatpush1.bf16.msra.mxu0 %v2041_v55  ;;  %v2052_v30 = vpop.permute.xlu1 %2051 }
 0x29f   :  { %v2043_v46 = vpack.c.bf16 %v2039_v47, %v2035_v44  ;;  %v2050_v1 = vpop.permute.xlu0 %2049  ;;  %v2044_v62 = vpack.c.bf16 %v2040_v4, %v2036_v7  ;;  %12240 = vst [vmem:[#allocation110_spill] sm:$0xff] %v8809_v53  ;;  %v8832_v7 = vrot.slane %v136_v16, %v7177_v19 }
 0x2a0   :  { %2489 = vrot.lane.b32.xlu1 %v8310_v5, %s11975_s22 }
 0x2a1   :  { %2487 = vrot.lane.b32.xlu0 %v8255_v61, %s11975_s22  ;;  %3651 = vmatprep.subr.bf16.mxu1 %v2044_v62  ;;  %v8818_v61 = vrot.slane %v136_v16, %v7165_v11  ;;  %12242 = vst [vmem:[#allocation112_spill] sm:$0xff] %v8832_v7 }
 0x2a2   :  { %3652 = vmatpush1.bf16.msra.mxu1 %v2043_v46  ;;  %v2056_v18 = vpop.permute.xlu1 %2055  ;;  %v8835_v46 = vrot.slane %v136_v16, %v7189_v24 }
 0x2a3   :  { %v2054_v22 = vpop.permute.xlu0 %2053  ;;  %v2071_v47 = vsel %vm11977_vm15, %v2052_v30, %v2056_v18  ;;  %12241 = vst [vmem:[#allocation111_spill] sm:$0xff] %v8818_v61 }
 0x2a4   :  { %v2070_v43 = vsel %vm11977_vm15, %v2050_v1, %v2054_v22  ;;  %2493 = vrot.lane.b32.xlu1 %v8325_v6, %s11975_s22  ;;  %v2099_v55 = vmul.f32 %v8809_v53, %v2071_v47  ;;  %12243 = vst [vmem:[#allocation113_spill] sm:$0xff] %v8835_v46 }
 0x2a5   :  { %2491 = vrot.lane.b32.xlu0 %v8330_v13, %s11975_s22  ;;  %v2095_v57 = vmul.f32 %v8809_v53, %v2070_v43 }
 0x2a6   :  { %v2060_v25 = vpop.permute.xlu1 %2059 }
 0x2a7   :  { %v2069_v2 = vsel %vm11977_vm15, %v2056_v18, %v2060_v25  ;;  %v2058_v4 = vpop.permute.xlu0 %2057  ;;  %v2103_v47 = vpack.c.bf16 %v2099_v55, %v2095_v57  ;;  %v6648_v57 = vld [vmem:[#allocation6 + $0x8] ss:$28 sps:$4 sm:$0xff]  }
 0x2a8   :  { %v2100_v0 = vmul.f32 %v8818_v61, %v2069_v2  ;;  %v2068_v44 = vsel %vm11977_vm15, %v2054_v22, %v2058_v4  ;;  %2497 = vrot.lane.b32.xlu1 %v8334_v29, %s11975_s22 }
 0x2a9   :  { %v2096_v62 = vmul.f32 %v8818_v61, %v2068_v44  ;;  %2495 = vrot.lane.b32.xlu0 %v8280_v20, %s11975_s22  ;;  %s11980_s22 = smov 95  }
 0x2aa   :  { %v2064_v18 = vpop.permute.xlu1 %2063 }
 0x2ab   :  { %v2067_v43 = vsel %vm11977_vm15, %v2060_v25, %v2064_v18  ;;  %v2073_v22 = vsel %vm11977_vm15, %v2064_v18, %v2052_v30  ;;  %v2062_v2 = vpop.permute.xlu0 %2061  ;;  %v2104_v53 = vpack.c.bf16 %v2100_v0, %v2096_v62  ;;  %v8858_v18 = vld [vmem:[#allocation3 + $0x8] sm:$0xff] }
 0x2ac   :  { %v2101_v63 = vmul.f32 %v8832_v7, %v2067_v43  ;;  %v2102_v16 = vmul.f32 %v8835_v46, %v2073_v22  ;;  %v2066_v44 = vsel %vm11977_vm15, %v2058_v4, %v2062_v2  ;;  %v2072_v20 = vsel %vm11977_vm15, %v2062_v2, %v2050_v1  ;;  %2547 = vrot.lane.b32.xlu1 %v8298_v3, %s11980_s22  ;;  %v138_v1 = vld [vmem:[#allocation9 + $0x80] ss:$8 sm:$0xf] }
 0x2ad   :  { %v2097_v25 = vmul.f32 %v8832_v7, %v2066_v44  ;;  %v2098_v30 = vmul.f32 %v8835_v46, %v2072_v20  ;;  %2545 = vrot.lane.b32.xlu0 %v8306_v54, %s11980_s22  ;;  %3481 = vmatprep.subr.bf16.mxu0 %v2104_v53  ;;  %vm11982_vm15 = vcmp.lt.s32.totalorder %v7159_v10, 111  ;;  %v8864_v54 = vrot.slane %v138_v1, %v7185_v21 }
 0x2ae   :  { %3482 = vmatpush1.bf16.msra.mxu0 %v2103_v47  ;;  %v2114_v55 = vpop.permute.xlu1 %2113  ;;  %v8873_v47 = vrot.slane %v138_v1, %v7165_v11 }
 0x2af   :  { %v2105_v0 = vpack.c.bf16 %v2101_v63, %v2097_v25  ;;  %v2112_v4 = vpop.permute.xlu0 %2111  ;;  %v2106_v62 = vpack.c.bf16 %v2102_v16, %v2098_v30  ;;  %12244 = vst [vmem:[#allocation114_spill] sm:$0xff] %v8864_v54  ;;  %v8890_v25 = vrot.slane %v138_v1, %v7189_v24 }
 0x2b0   :  { %2551 = vrot.lane.b32.xlu1 %v8310_v5, %s11980_s22  ;;  %12245 = vst [vmem:[#allocation115_spill] sm:$0xff] %v8873_v47 }
 0x2b1   :  { %2549 = vrot.lane.b32.xlu0 %v8858_v18, %s11980_s22  ;;  %3653 = vmatprep.subr.bf16.mxu1 %v2106_v62  ;;  %12247 = vst [vmem:[#allocation117_spill] sm:$0xff] %v8890_v25 }
 0x2b2   :  { %3654 = vmatpush1.bf16.msra.mxu1 %v2105_v0  ;;  %v2118_v3 = vpop.permute.xlu1 %2117  ;;  %3484 = vmatmul.mubr.bf16.vlgmr.msra.gmra.mrb[0].mxu0 %v6648_v57 }
 0x2b3   :  { %v2116_v63 = vpop.permute.xlu0 %2115  ;;  %v2133_v53 = vsel %vm11982_vm15, %v2114_v55, %v2118_v3 }
 0x2b4   :  { %v2132_v5 = vsel %vm11982_vm15, %v2112_v4, %v2116_v63  ;;  %2555 = vrot.lane.b32.xlu1 %v8325_v6, %s11980_s22  ;;  %v2161_v22 = vmul.f32 %v8864_v54, %v2133_v53 }
 0x2b5   :  { %2553 = vrot.lane.b32.xlu0 %v8330_v13, %s11980_s22  ;;  %3656 = vmatmul.mubr.bf16.vlgmr.msra.gmra.mrb[0].mxu1 %v6648_v57  ;;  %v2157_v2 = vmul.f32 %v8864_v54, %v2132_v5  ;;  %v8887_v13 = vrot.slane %v138_v1, %v7177_v19  ;;  %v8893_v57 = vld [vmem:[#allocation3 + $0x18] sm:$0xff] }
 0x2b6   :  { %v2122_v43 = vpop.permute.xlu1 %2121  ;;  %v8949_v54 = vld [vmem:[#allocation3 + $0x38] sm:$0xff] }
 0x2b7   :  { %v2131_v16 = vsel %vm11982_vm15, %v2118_v3, %v2122_v43  ;;  %v2120_v44 = vpop.permute.xlu0 %2119  ;;  %12246 = vst [vmem:[#allocation116_spill] sm:$0xff] %v8887_v13  ;;  %v2165_v62 = vpack.c.bf16 %v2161_v22, %v2157_v2  ;;  %v8913_v22 = vld [vmem:[#allocation3] sm:$0xff] }
 0x2b8   :  { %v2162_v20 = vmul.f32 %v8873_v47, %v2131_v16  ;;  %v2130_v6 = vsel %vm11982_vm15, %v2116_v63, %v2120_v44  ;;  %2559 = vrot.lane.b32.xlu1 %v8334_v29, %s11980_s22 }
 0x2b9   :  { %v2158_v30 = vmul.f32 %v8873_v47, %v2130_v6  ;;  %2557 = vrot.lane.b32.xlu0 %v8893_v57, %s11980_s22  ;;  %v8907_v47 = vld [vmem:[#allocation3 + $0x20] sm:$0xff]  ;;  %s12001_s22 = smov 94  }
 0x2ba   :  { %v2126_v0 = vpop.permute.xlu1 %2125 }
 0x2bb   :  { %v2129_v3 = vsel %vm11982_vm15, %v2122_v43, %v2126_v0  ;;  %v2135_v29 = vsel %vm11982_vm15, %v2126_v0, %v2114_v55  ;;  %v2124_v63 = vpop.permute.xlu0 %2123  ;;  %v2166_v53 = vpack.c.bf16 %v2162_v20, %v2158_v30  ;;  %v8917_v30 = vld [vmem:[#allocation3 + $0x28] sm:$0xff] }
 0x2bc   :  { %v2163_v1 = vmul.f32 %v8887_v13, %v2129_v3  ;;  %v2164_v5 = vmul.f32 %v8890_v25, %v2135_v29  ;;  %v2128_v16 = vsel %vm11982_vm15, %v2120_v44, %v2124_v63  ;;  %v2134_v6 = vsel %vm11982_vm15, %v2124_v63, %v2112_v4  ;;  %2609 = vrot.lane.b32.xlu1 %v8907_v47, %s12001_s22  ;;  %v140_v0 = vld [vmem:[#allocation9 + $0x81] ss:$8 sm:$0xf] }
 0x2bd   :  { %v2159_v55 = vmul.f32 %v8887_v13, %v2128_v16  ;;  %v2160_v43 = vmul.f32 %v8890_v25, %v2134_v6  ;;  %2607 = vrot.lane.b32.xlu0 %v8913_v22, %s12001_s22  ;;  %3494 = vmatprep.subr.bf16.mxu0 %v2166_v53  ;;  %vm12003_vm15 = vcmp.lt.s32.totalorder %v7159_v10, 110  ;;  %v8938_v16 = vld [vmem:[#allocation3 + $0x10] sm:$0xff]  ;;  %v8954_v46 = vrot.slane %v140_v0, %v7177_v19 }
 0x2be   :  { %3495 = vmatpush1.bf16.msra.mxu0 %v2165_v62  ;;  %v2176_v2 = vpop.permute.xlu1 %2175  ;;  %v8925_v62 = vrot.slane %v140_v0, %v7185_v21 }
 0x2bf   :  { %v2167_v44 = vpack.c.bf16 %v2163_v1, %v2159_v55  ;;  %v2174_v4 = vpop.permute.xlu0 %2173  ;;  %v2168_v20 = vpack.c.bf16 %v2164_v5, %v2160_v43  ;;  %v8931_v1 = vld [vmem:[#allocation3 + $0x30] sm:$0xff]  ;;  %v8936_v5 = vrot.slane %v140_v0, %v7165_v11  ;;  %12250 = vst [vmem:[#allocation120_spill] sm:$0xff] %v8954_v46 }
 0x2c0   :  { %2613 = vrot.lane.b32.xlu1 %v8917_v30, %s12001_s22  ;;  %12248 = vst [vmem:[#allocation118_spill] sm:$0xff] %v8925_v62 }
 0x2c1   :  { %2611 = vrot.lane.b32.xlu0 %v8858_v18, %s12001_s22  ;;  %3666 = vmatprep.subr.bf16.mxu1 %v2168_v20  ;;  %12249 = vst [vmem:[#allocation119_spill] sm:$0xff] %v8936_v5 }
 0x2c2   :  { %3667 = vmatpush1.bf16.msra.mxu1 %v2167_v44  ;;  %v2180_v3 = vpop.permute.xlu1 %2179 }
 0x2c3   :  { %v2178_v29 = vpop.permute.xlu0 %2177  ;;  %v2195_v63 = vsel %vm12003_vm15, %v2176_v2, %v2180_v3 }
 0x2c4   :  { %v2194_v53 = vsel %vm12003_vm15, %v2174_v4, %v2178_v29  ;;  %2617 = vrot.lane.b32.xlu1 %v8931_v1, %s12001_s22  ;;  %v2223_v55 = vmul.f32 %v8925_v62, %v2195_v63  ;;  %v8957_v63 = vrot.slane %v140_v0, %v7189_v24 }
 0x2c5   :  { %2615 = vrot.lane.b32.xlu0 %v8938_v16, %s12001_s22  ;;  %v2219_v43 = vmul.f32 %v8925_v62, %v2194_v53 }
 0x2c6   :  { %v2184_v6 = vpop.permute.xlu1 %2183  ;;  %12251 = vst [vmem:[#allocation121_spill] sm:$0xff] %v8957_v63 }
 0x2c7   :  { %v2193_v44 = vsel %vm12003_vm15, %v2180_v3, %v2184_v6  ;;  %v2182_v20 = vpop.permute.xlu0 %2181 }
 0x2c8   :  { %v2224_v25 = vmul.f32 %v8936_v5, %v2193_v44  ;;  %v2192_v13 = vsel %vm12003_vm15, %v2178_v29, %v2182_v20  ;;  %2621 = vrot.lane.b32.xlu1 %v8949_v54, %s12001_s22  ;;  %v2227_v44 = vpack.c.bf16 %v2223_v55, %v2219_v43 }
 0x2c9   :  { %v2220_v53 = vmul.f32 %v8936_v5, %v2192_v13  ;;  %2619 = vrot.lane.b32.xlu0 %v8893_v57, %s12001_s22  ;;  %s12012_s22 = smov 93  }
 0x2ca   :  { %v2188_v3 = vpop.permute.xlu1 %2187 }
 0x2cb   :  { %v2191_v29 = vsel %vm12003_vm15, %v2184_v6, %v2188_v3  ;;  %v2197_v62 = vsel %vm12003_vm15, %v2188_v3, %v2176_v2  ;;  %v2186_v7 = vpop.permute.xlu0 %2185  ;;  %v2228_v61 = vpack.c.bf16 %v2224_v25, %v2220_v53 }
 0x2cc   :  { %v2225_v58 = vmul.f32 %v8954_v46, %v2191_v29  ;;  %v2226_v0 = vmul.f32 %v8957_v63, %v2197_v62  ;;  %v2190_v13 = vsel %vm12003_vm15, %v2182_v20, %v2186_v7  ;;  %v2196_v5 = vsel %vm12003_vm15, %v2186_v7, %v2174_v4  ;;  %2671 = vrot.lane.b32.xlu1 %v8907_v47, %s12012_s22  ;;  %v142_v7 = vld [vmem:[#allocation9 + $0x82] ss:$8 sm:$0xf] }
 0x2cd   :  { %v2221_v6 = vmul.f32 %v8954_v46, %v2190_v13  ;;  %v2222_v2 = vmul.f32 %v8957_v63, %v2196_v5  ;;  %2669 = vrot.lane.b32.xlu0 %v8913_v22, %s12012_s22  ;;  %3496 = vmatprep.subr.bf16.mxu0 %v2228_v61  ;;  %vm12014_vm15 = vcmp.lt.s32.totalorder %v7159_v10, 109  ;;  %v8984_v5 = vrot.slane %v142_v7, %v7185_v21 }
 0x2ce   :  { %3497 = vmatpush1.bf16.msra.mxu0 %v2227_v44  ;;  %v2238_v25 = vpop.permute.xlu1 %2237  ;;  %v8993_v53 = vrot.slane %v142_v7, %v7165_v11 }
 0x2cf   :  { %v2229_v62 = vpack.c.bf16 %v2225_v58, %v2221_v6  ;;  %v2236_v55 = vpop.permute.xlu0 %2235  ;;  %v2230_v43 = vpack.c.bf16 %v2226_v0, %v2222_v2  ;;  %12252 = vst [vmem:[#allocation122_spill] sm:$0xff] %v8984_v5 }
 0x2d0   :  { %2675 = vrot.lane.b32.xlu1 %v8917_v30, %s12012_s22  ;;  %12253 = vst [vmem:[#allocation123_spill] sm:$0xff] %v8993_v53 }
 0x2d1   :  { %2673 = vrot.lane.b32.xlu0 %v8858_v18, %s12012_s22  ;;  %3668 = vmatprep.subr.bf16.mxu1 %v2230_v43  ;;  %v9010_v43 = vrot.slane %v142_v7, %v7189_v24 }
 0x2d2   :  { %3669 = vmatpush1.bf16.msra.mxu1 %v2229_v62  ;;  %v2242_v4 = vpop.permute.xlu1 %2241  ;;  %v9007_v62 = vrot.slane %v142_v7, %v7177_v19 }
 0x2d3   :  { %v2240_v61 = vpop.permute.xlu0 %2239  ;;  %v2257_v58 = vsel %vm12014_vm15, %v2238_v25, %v2242_v4  ;;  %12255 = vst [vmem:[#allocation125_spill] sm:$0xff] %v9010_v43 }
 0x2d4   :  { %v2256_v20 = vsel %vm12014_vm15, %v2236_v55, %v2240_v61  ;;  %2679 = vrot.lane.b32.xlu1 %v8931_v1, %s12012_s22  ;;  %v2285_v44 = vmul.f32 %v8984_v5, %v2257_v58  ;;  %12254 = vst [vmem:[#allocation124_spill] sm:$0xff] %v9007_v62 }
 0x2d5   :  { %2677 = vrot.lane.b32.xlu0 %v8938_v16, %s12012_s22  ;;  %v2281_v29 = vmul.f32 %v8984_v5, %v2256_v20 }
 0x2d6   :  { %v2246_v3 = vpop.permute.xlu1 %2245 }
 0x2d7   :  { %v2255_v0 = vsel %vm12014_vm15, %v2242_v4, %v2246_v3  ;;  %v2244_v13 = vpop.permute.xlu0 %2243  ;;  %v2289_v20 = vpack.c.bf16 %v2285_v44, %v2281_v29 }
 0x2d8   :  { %v2286_v6 = vmul.f32 %v8993_v53, %v2255_v0  ;;  %v2254_v2 = vsel %vm12014_vm15, %v2240_v61, %v2244_v13  ;;  %2683 = vrot.lane.b32.xlu1 %v8949_v54, %s12012_s22 }
 0x2d9   :  { %v2282_v58 = vmul.f32 %v8993_v53, %v2254_v2  ;;  %2681 = vrot.lane.b32.xlu0 %v8893_v57, %s12012_s22  ;;  %s12023_s22 = smov 83  }
 0x2da   :  { %v2250_v4 = vpop.permute.xlu1 %2249 }
 0x2db   :  { %v2253_v0 = vsel %vm12014_vm15, %v2246_v3, %v2250_v4  ;;  %v2259_v61 = vsel %vm12014_vm15, %v2250_v4, %v2238_v25  ;;  %v2248_v5 = vpop.permute.xlu0 %2247  ;;  %v2290_v63 = vpack.c.bf16 %v2286_v6, %v2282_v58 }
 0x2dc   :  { %v2287_v46 = vmul.f32 %v9007_v62, %v2253_v0  ;;  %v2288_v7 = vmul.f32 %v9010_v43, %v2259_v61  ;;  %v2252_v2 = vsel %vm12014_vm15, %v2244_v13, %v2248_v5  ;;  %v2258_v53 = vsel %vm12014_vm15, %v2248_v5, %v2236_v55  ;;  %2733 = vrot.lane.b32.xlu1 %v8907_v47, %s12023_s22  ;;  %v144_v55 = vld [vmem:[#allocation9 + $0x83] ss:$8 sm:$0xf] }
 0x2dd   :  { %v2283_v3 = vmul.f32 %v9007_v62, %v2252_v2  ;;  %v2284_v25 = vmul.f32 %v9010_v43, %v2258_v53  ;;  %2731 = vrot.lane.b32.xlu0 %v8913_v22, %s12023_s22  ;;  %3498 = vmatprep.subr.bf16.mxu0 %v2290_v63  ;;  %vm12025_vm15 = vcmp.lt.s32.totalorder %v7159_v10, 99  ;;  %v9037_v53 = vrot.slane %v144_v55, %v7185_v21 }
 0x2de   :  { %3499 = vmatpush1.bf16.msra.mxu0 %v2289_v20  ;;  %v2300_v44 = vpop.permute.xlu1 %2299  ;;  %v9046_v4 = vrot.slane %v144_v55, %v7165_v11 }
 0x2df   :  { %v2291_v29 = vpack.c.bf16 %v2287_v46, %v2283_v3  ;;  %v2298_v6 = vpop.permute.xlu0 %2297  ;;  %v2292_v13 = vpack.c.bf16 %v2288_v7, %v2284_v25  ;;  %12256 = vst [vmem:[#allocation126_spill] sm:$0xff] %v9037_v53 }
 0x2e0   :  { %2737 = vrot.lane.b32.xlu1 %v8917_v30, %s12023_s22  ;;  %12257 = vst [vmem:[#allocation127_spill] sm:$0xff] %v9046_v4 }
 0x2e1   :  { %2735 = vrot.lane.b32.xlu0 %v8858_v18, %s12023_s22  ;;  %3670 = vmatprep.subr.bf16.mxu1 %v2292_v13  ;;  %v9063_v13 = vrot.slane %v144_v55, %v7189_v24 }
 0x2e2   :  { %3671 = vmatpush1.bf16.msra.mxu1 %v2291_v29  ;;  %v2304_v5 = vpop.permute.xlu1 %2303  ;;  %v9060_v29 = vrot.slane %v144_v55, %v7177_v19 }
 0x2e3   :  { %v2302_v63 = vpop.permute.xlu0 %2301  ;;  %v2319_v46 = vsel %vm12025_vm15, %v2300_v44, %v2304_v5  ;;  %12259 = vst [vmem:[#allocation129_spill] sm:$0xff] %v9063_v13 }
 0x2e4   :  { %v2318_v58 = vsel %vm12025_vm15, %v2298_v6, %v2302_v63  ;;  %2741 = vrot.lane.b32.xlu1 %v8931_v1, %s12023_s22  ;;  %v2347_v0 = vmul.f32 %v9037_v53, %v2319_v46  ;;  %12258 = vst [vmem:[#allocation128_spill] sm:$0xff] %v9060_v29 }
 0x2e5   :  { %2739 = vrot.lane.b32.xlu0 %v8938_v16, %s12023_s22  ;;  %v2343_v61 = vmul.f32 %v9037_v53, %v2318_v58 }
 0x2e6   :  { %v2308_v20 = vpop.permute.xlu1 %2307 }
 0x2e7   :  { %v2317_v7 = vsel %vm12025_vm15, %v2304_v5, %v2308_v20  ;;  %v2306_v2 = vpop.permute.xlu0 %2305  ;;  %v2351_v58 = vpack.c.bf16 %v2347_v0, %v2343_v61 }
 0x2e8   :  { %v2348_v3 = vmul.f32 %v9046_v4, %v2317_v7  ;;  %v2316_v25 = vsel %vm12025_vm15, %v2302_v63, %v2306_v2  ;;  %2745 = vrot.lane.b32.xlu1 %v8949_v54, %s12023_s22 }
 0x2e9   :  { %v2344_v46 = vmul.f32 %v9046_v4, %v2316_v25  ;;  %2743 = vrot.lane.b32.xlu0 %v8893_v57, %s12023_s22  ;;  %s12034_s22 = smov 82  }
 0x2ea   :  { %v2312_v5 = vpop.permute.xlu1 %2311 }
 0x2eb   :  { %v2315_v7 = vsel %vm12025_vm15, %v2308_v20, %v2312_v5  ;;  %v2321_v63 = vsel %vm12025_vm15, %v2312_v5, %v2300_v44  ;;  %v2310_v53 = vpop.permute.xlu0 %2309  ;;  %v2352_v43 = vpack.c.bf16 %v2348_v3, %v2344_v46 }
 0x2ec   :  { %v2349_v62 = vmul.f32 %v9060_v29, %v2315_v7  ;;  %v2350_v55 = vmul.f32 %v9063_v13, %v2321_v63  ;;  %v2314_v25 = vsel %vm12025_vm15, %v2306_v2, %v2310_v53  ;;  %v2320_v4 = vsel %vm12025_vm15, %v2310_v53, %v2298_v6  ;;  %2795 = vrot.lane.b32.xlu1 %v8907_v47, %s12034_s22  ;;  %v146_v6 = vld [vmem:[#allocation9 + $0x84] ss:$8 sm:$0xf] }
 0x2ed   :  { %v2345_v20 = vmul.f32 %v9060_v29, %v2314_v25  ;;  %v2346_v44 = vmul.f32 %v9063_v13, %v2320_v4  ;;  %2793 = vrot.lane.b32.xlu0 %v8913_v22, %s12034_s22  ;;  %3500 = vmatprep.subr.bf16.mxu0 %v2352_v43  ;;  %vm12036_vm15 = vcmp.lt.s32.totalorder %v7159_v10, 98  ;;  %v9090_v4 = vrot.slane %v146_v6, %v7185_v21 }
 0x2ee   :  { %3501 = vmatpush1.bf16.msra.mxu0 %v2351_v58  ;;  %v2362_v0 = vpop.permute.xlu1 %2361  ;;  %v9099_v5 = vrot.slane %v146_v6, %v7165_v11 }
 0x2ef   :  { %v2353_v61 = vpack.c.bf16 %v2349_v62, %v2345_v20  ;;  %v2360_v3 = vpop.permute.xlu0 %2359  ;;  %v2354_v2 = vpack.c.bf16 %v2350_v55, %v2346_v44  ;;  %12260 = vst [vmem:[#allocation130_spill] sm:$0xff] %v9090_v4 }
 0x2f0   :  { %2799 = vrot.lane.b32.xlu1 %v8917_v30, %s12034_s22  ;;  %12261 = vst [vmem:[#allocation131_spill] sm:$0xff] %v9099_v5 }
 0x2f1   :  { %2797 = vrot.lane.b32.xlu0 %v8858_v18, %s12034_s22  ;;  %3672 = vmatprep.subr.bf16.mxu1 %v2354_v2  ;;  %v9116_v2 = vrot.slane %v146_v6, %v7189_v24 }
 0x2f2   :  { %3673 = vmatpush1.bf16.msra.mxu1 %v2353_v61  ;;  %v2366_v53 = vpop.permute.xlu1 %2365  ;;  %v9113_v61 = vrot.slane %v146_v6, %v7177_v19 }
 0x2f3   :  { %v2364_v43 = vpop.permute.xlu0 %2363  ;;  %v2381_v62 = vsel %vm12036_vm15, %v2362_v0, %v2366_v53  ;;  %12263 = vst [vmem:[#allocation133_spill] sm:$0xff] %v9116_v2 }
 0x2f4   :  { %v2380_v46 = vsel %vm12036_vm15, %v2360_v3, %v2364_v43  ;;  %2803 = vrot.lane.b32.xlu1 %v8931_v1, %s12034_s22  ;;  %v2409_v7 = vmul.f32 %v9090_v4, %v2381_v62  ;;  %12262 = vst [vmem:[#allocation132_spill] sm:$0xff] %v9113_v61 }
 0x2f5   :  { %2801 = vrot.lane.b32.xlu0 %v8938_v16, %s12034_s22  ;;  %v2405_v63 = vmul.f32 %v9090_v4, %v2380_v46 }
 0x2f6   :  { %v2370_v58 = vpop.permute.xlu1 %2369 }
 0x2f7   :  { %v2379_v55 = vsel %vm12036_vm15, %v2366_v53, %v2370_v58  ;;  %v2368_v25 = vpop.permute.xlu0 %2367  ;;  %v2413_v46 = vpack.c.bf16 %v2409_v7, %v2405_v63 }
 0x2f8   :  { %v2410_v20 = vmul.f32 %v9099_v5, %v2379_v55  ;;  %v2378_v44 = vsel %vm12036_vm15, %v2364_v43, %v2368_v25  ;;  %2807 = vrot.lane.b32.xlu1 %v8949_v54, %s12034_s22 }
 0x2f9   :  { %v2406_v62 = vmul.f32 %v9099_v5, %v2378_v44  ;;  %2805 = vrot.lane.b32.xlu0 %v8893_v57, %s12034_s22  ;;  %s12045_s22 = smov 81  }
 0x2fa   :  { %v2374_v53 = vpop.permute.xlu1 %2373 }
 0x2fb   :  { %v2377_v55 = vsel %vm12036_vm15, %v2370_v58, %v2374_v53  ;;  %v2383_v43 = vsel %vm12036_vm15, %v2374_v53, %v2362_v0  ;;  %v2372_v4 = vpop.permute.xlu0 %2371  ;;  %v2414_v13 = vpack.c.bf16 %v2410_v20, %v2406_v62 }
 0x2fc   :  { %v2411_v29 = vmul.f32 %v9113_v61, %v2377_v55  ;;  %v2412_v6 = vmul.f32 %v9116_v2, %v2383_v43  ;;  %v2376_v44 = vsel %vm12036_vm15, %v2368_v25, %v2372_v4  ;;  %v2382_v5 = vsel %vm12036_vm15, %v2372_v4, %v2360_v3  ;;  %2857 = vrot.lane.b32.xlu1 %v8907_v47, %s12045_s22  ;;  %v148_v3 = vld [vmem:[#allocation9 + $0x85] ss:$8 sm:$0xf] }
 0x2fd   :  { %v2407_v58 = vmul.f32 %v9113_v61, %v2376_v44  ;;  %v2408_v0 = vmul.f32 %v9116_v2, %v2382_v5  ;;  %2855 = vrot.lane.b32.xlu0 %v8913_v22, %s12045_s22  ;;  %3502 = vmatprep.subr.bf16.mxu0 %v2414_v13  ;;  %vm12047_vm15 = vcmp.lt.s32.totalorder %v7159_v10, 97  ;;  %v9143_v5 = vrot.slane %v148_v3, %v7185_v21 }
 0x2fe   :  { %3503 = vmatpush1.bf16.msra.mxu0 %v2413_v46  ;;  %v2424_v7 = vpop.permute.xlu1 %2423  ;;  %v9152_v53 = vrot.slane %v148_v3, %v7165_v11 }
 0x2ff   :  { %v2415_v63 = vpack.c.bf16 %v2411_v29, %v2407_v58  ;;  %v2422_v20 = vpop.permute.xlu0 %2421  ;;  %v2416_v25 = vpack.c.bf16 %v2412_v6, %v2408_v0  ;;  %12264 = vst [vmem:[#allocation134_spill] sm:$0xff] %v9143_v5 }
 0x300   :  { %2861 = vrot.lane.b32.xlu1 %v8917_v30, %s12045_s22  ;;  %12265 = vst [vmem:[#allocation135_spill] sm:$0xff] %v9152_v53 }
 0x301   :  { %2859 = vrot.lane.b32.xlu0 %v8858_v18, %s12045_s22  ;;  %3674 = vmatprep.subr.bf16.mxu1 %v2416_v25  ;;  %v9169_v25 = vrot.slane %v148_v3, %v7189_v24 }
 0x302   :  { %3675 = vmatpush1.bf16.msra.mxu1 %v2415_v63  ;;  %v2428_v4 = vpop.permute.xlu1 %2427  ;;  %v9166_v63 = vrot.slane %v148_v3, %v7177_v19 }
 0x303   :  { %v2426_v13 = vpop.permute.xlu0 %2425  ;;  %v2443_v29 = vsel %vm12047_vm15, %v2424_v7, %v2428_v4  ;;  %12267 = vst [vmem:[#allocation137_spill] sm:$0xff] %v9169_v25 }
 0x304   :  { %v2442_v62 = vsel %vm12047_vm15, %v2422_v20, %v2426_v13  ;;  %2865 = vrot.lane.b32.xlu1 %v8931_v1, %s12045_s22  ;;  %v2471_v55 = vmul.f32 %v9143_v5, %v2443_v29  ;;  %12266 = vst [vmem:[#allocation136_spill] sm:$0xff] %v9166_v63 }
 0x305   :  { %2863 = vrot.lane.b32.xlu0 %v8938_v16, %s12045_s22  ;;  %v2467_v43 = vmul.f32 %v9143_v5, %v2442_v62 }
 0x306   :  { %v2432_v46 = vpop.permute.xlu1 %2431 }
 0x307   :  { %v2441_v6 = vsel %vm12047_vm15, %v2428_v4, %v2432_v46  ;;  %v2430_v44 = vpop.permute.xlu0 %2429  ;;  %v2475_v62 = vpack.c.bf16 %v2471_v55, %v2467_v43 }
 0x308   :  { %v2472_v58 = vmul.f32 %v9152_v53, %v2441_v6  ;;  %v2440_v0 = vsel %vm12047_vm15, %v2426_v13, %v2430_v44  ;;  %2869 = vrot.lane.b32.xlu1 %v8949_v54, %s12045_s22 }
 0x309   :  { %v2468_v29 = vmul.f32 %v9152_v53, %v2440_v0  ;;  %2867 = vrot.lane.b32.xlu0 %v8893_v57, %s12045_s22  ;;  %s12056_s22 = smov 80  }
 0x30a   :  { %v2436_v4 = vpop.permute.xlu1 %2435 }
 0x30b   :  { %v2439_v6 = vsel %vm12047_vm15, %v2432_v46, %v2436_v4  ;;  %v2445_v13 = vsel %vm12047_vm15, %v2436_v4, %v2424_v7  ;;  %v2434_v5 = vpop.permute.xlu0 %2433  ;;  %v2476_v2 = vpack.c.bf16 %v2472_v58, %v2468_v29 }
 0x30c   :  { %v2473_v61 = vmul.f32 %v9166_v63, %v2439_v6  ;;  %v2474_v3 = vmul.f32 %v9169_v25, %v2445_v13  ;;  %v2438_v0 = vsel %vm12047_vm15, %v2430_v44, %v2434_v5  ;;  %v2444_v53 = vsel %vm12047_vm15, %v2434_v5, %v2422_v20  ;;  %2919 = vrot.lane.b32.xlu1 %v8907_v47, %s12056_s22  ;;  %v150_v20 = vld [vmem:[#allocation9 + $0x86] ss:$8 sm:$0xf] }
 0x30d   :  { %v2469_v46 = vmul.f32 %v9166_v63, %v2438_v0  ;;  %v2470_v7 = vmul.f32 %v9169_v25, %v2444_v53  ;;  %2917 = vrot.lane.b32.xlu0 %v8913_v22, %s12056_s22  ;;  %3504 = vmatprep.subr.bf16.mxu0 %v2476_v2  ;;  %vm12058_vm15 = vcmp.lt.s32.totalorder %v7159_v10, 96  ;;  %v9196_v53 = vrot.slane %v150_v20, %v7185_v21 }
 0x30e   :  { %3505 = vmatpush1.bf16.msra.mxu0 %v2475_v62  ;;  %v2486_v55 = vpop.permute.xlu1 %2485  ;;  %v9205_v4 = vrot.slane %v150_v20, %v7165_v11 }
 0x30f   :  { %v2477_v43 = vpack.c.bf16 %v2473_v61, %v2469_v46  ;;  %v2484_v58 = vpop.permute.xlu0 %2483  ;;  %v2478_v44 = vpack.c.bf16 %v2474_v3, %v2470_v7  ;;  %12268 = vst [vmem:[#allocation138_spill] sm:$0xff] %v9196_v53 }
 0x310   :  { %2923 = vrot.lane.b32.xlu1 %v8917_v30, %s12056_s22  ;;  %12269 = vst [vmem:[#allocation139_spill] sm:$0xff] %v9205_v4 }
 0x311   :  { %2921 = vrot.lane.b32.xlu0 %v8858_v18, %s12056_s22  ;;  %3676 = vmatprep.subr.bf16.mxu1 %v2478_v44  ;;  %v9222_v44 = vrot.slane %v150_v20, %v7189_v24 }
 0x312   :  { %3677 = vmatpush1.bf16.msra.mxu1 %v2477_v43  ;;  %v2490_v5 = vpop.permute.xlu1 %2489  ;;  %v9219_v43 = vrot.slane %v150_v20, %v7177_v19 }
 0x313   :  { %v2488_v2 = vpop.permute.xlu0 %2487  ;;  %v2505_v61 = vsel %vm12058_vm15, %v2486_v55, %v2490_v5  ;;  %12271 = vst [vmem:[#allocation141_spill] sm:$0xff] %v9222_v44 }
 0x314   :  { %v2504_v29 = vsel %vm12058_vm15, %v2484_v58, %v2488_v2  ;;  %2927 = vrot.lane.b32.xlu1 %v8931_v1, %s12056_s22  ;;  %v2533_v6 = vmul.f32 %v9196_v53, %v2505_v61  ;;  %12270 = vst [vmem:[#allocation140_spill] sm:$0xff] %v9219_v43 }
 0x315   :  { %2925 = vrot.lane.b32.xlu0 %v8938_v16, %s12056_s22  ;;  %v2529_v13 = vmul.f32 %v9196_v53, %v2504_v29 }
 0x316   :  { %v2494_v62 = vpop.permute.xlu1 %2493 }
 0x317   :  { %v2503_v3 = vsel %vm12058_vm15, %v2490_v5, %v2494_v62  ;;  %v2492_v0 = vpop.permute.xlu0 %2491  ;;  %v2537_v29 = vpack.c.bf16 %v2533_v6, %v2529_v13 }
 0x318   :  { %v2534_v46 = vmul.f32 %v9205_v4, %v2503_v3  ;;  %v2502_v7 = vsel %vm12058_vm15, %v2488_v2, %v2492_v0  ;;  %2931 = vrot.lane.b32.xlu1 %v8949_v54, %s12056_s22 }
 0x319   :  { %v2530_v61 = vmul.f32 %v9205_v4, %v2502_v7  ;;  %2929 = vrot.lane.b32.xlu0 %v8893_v57, %s12056_s22  ;;  %s12067_s22 = smov 79  }
 0x31a   :  { %v2498_v5 = vpop.permute.xlu1 %2497 }
 0x31b   :  { %v2501_v3 = vsel %vm12058_vm15, %v2494_v62, %v2498_v5  ;;  %v2507_v2 = vsel %vm12058_vm15, %v2498_v5, %v2486_v55  ;;  %v2496_v53 = vpop.permute.xlu0 %2495  ;;  %v2538_v25 = vpack.c.bf16 %v2534_v46, %v2530_v61 }
 0x31c   :  { %v2535_v63 = vmul.f32 %v9219_v43, %v2501_v3  ;;  %v2536_v20 = vmul.f32 %v9222_v44, %v2507_v2  ;;  %v2500_v7 = vsel %vm12058_vm15, %v2492_v0, %v2496_v53  ;;  %v2506_v4 = vsel %vm12058_vm15, %v2496_v53, %v2484_v58  ;;  %2981 = vrot.lane.b32.xlu1 %v8907_v47, %s12067_s22  ;;  %v152_v58 = vld [vmem:[#allocation9 + $0x87] ss:$8 sm:$0xf] }
 0x31d   :  { %v2531_v62 = vmul.f32 %v9219_v43, %v2500_v7  ;;  %v2532_v55 = vmul.f32 %v9222_v44, %v2506_v4  ;;  %2979 = vrot.lane.b32.xlu0 %v8913_v22, %s12067_s22  ;;  %3506 = vmatprep.subr.bf16.mxu0 %v2538_v25  ;;  %vm12069_vm15 = vcmp.lt.s32.totalorder %v7159_v10, 95  ;;  %v9249_v4 = vrot.slane %v152_v58, %v7185_v21 }
 0x31e   :  { %3507 = vmatpush1.bf16.msra.mxu0 %v2537_v29  ;;  %v2548_v6 = vpop.permute.xlu1 %2547  ;;  %v9258_v5 = vrot.slane %v152_v58, %v7165_v11 }
 0x31f   :  { %v2539_v13 = vpack.c.bf16 %v2535_v63, %v2531_v62  ;;  %v2546_v46 = vpop.permute.xlu0 %2545  ;;  %v2540_v0 = vpack.c.bf16 %v2536_v20, %v2532_v55  ;;  %12272 = vst [vmem:[#allocation142_spill] sm:$0xff] %v9249_v4 }
 0x320   :  { %2985 = vrot.lane.b32.xlu1 %v8917_v30, %s12067_s22  ;;  %12273 = vst [vmem:[#allocation143_spill] sm:$0xff] %v9258_v5 }
 0x321   :  { %2983 = vrot.lane.b32.xlu0 %v8858_v18, %s12067_s22  ;;  %3678 = vmatprep.subr.bf16.mxu1 %v2540_v0  ;;  %v9275_v0 = vrot.slane %v152_v58, %v7189_v24 }
 0x322   :  { %3679 = vmatpush1.bf16.msra.mxu1 %v2539_v13  ;;  %v2552_v53 = vpop.permute.xlu1 %2551  ;;  %v9272_v13 = vrot.slane %v152_v58, %v7177_v19 }
 0x323   :  { %v2550_v25 = vpop.permute.xlu0 %2549  ;;  %v2567_v63 = vsel %vm12069_vm15, %v2548_v6, %v2552_v53  ;;  %12275 = vst [vmem:[#allocation145_spill] sm:$0xff] %v9275_v0 }
 0x324   :  { %v2566_v61 = vsel %vm12069_vm15, %v2546_v46, %v2550_v25  ;;  %2989 = vrot.lane.b32.xlu1 %v8931_v1, %s12067_s22  ;;  %v2595_v3 = vmul.f32 %v9249_v4, %v2567_v63  ;;  %12274 = vst [vmem:[#allocation144_spill] sm:$0xff] %v9272_v13 }
 0x325   :  { %2987 = vrot.lane.b32.xlu0 %v8938_v16, %s12067_s22  ;;  %v2591_v2 = vmul.f32 %v9249_v4, %v2566_v61 }
 0x326   :  { %v2556_v29 = vpop.permute.xlu1 %2555 }
 0x327   :  { %v2565_v20 = vsel %vm12069_vm15, %v2552_v53, %v2556_v29  ;;  %v2554_v7 = vpop.permute.xlu0 %2553  ;;  %v2599_v61 = vpack.c.bf16 %v2595_v3, %v2591_v2 }
 0x328   :  { %v2596_v62 = vmul.f32 %v9258_v5, %v2565_v20  ;;  %v2564_v55 = vsel %vm12069_vm15, %v2550_v25, %v2554_v7  ;;  %2993 = vrot.lane.b32.xlu1 %v8949_v54, %s12067_s22 }
 0x329   :  { %v2592_v63 = vmul.f32 %v9258_v5, %v2564_v55  ;;  %2991 = vrot.lane.b32.xlu0 %v8893_v57, %s12067_s22  ;;  %s12078_s22 = smov 78  }
 0x32a   :  { %v2560_v53 = vpop.permute.xlu1 %2559 }
 0x32b   :  { %v2563_v20 = vsel %vm12069_vm15, %v2556_v29, %v2560_v53  ;;  %v2569_v25 = vsel %vm12069_vm15, %v2560_v53, %v2548_v6  ;;  %v2558_v4 = vpop.permute.xlu0 %2557  ;;  %v2600_v44 = vpack.c.bf16 %v2596_v62, %v2592_v63  ;;  %v6653_v63 = vld [vmem:[#allocation6 + $0x14] ss:$28 sps:$4 sm:$0xff]  }
 0x32c   :  { %v2597_v43 = vmul.f32 %v9272_v13, %v2563_v20  ;;  %v2598_v58 = vmul.f32 %v9275_v0, %v2569_v25  ;;  %v2562_v55 = vsel %vm12069_vm15, %v2554_v7, %v2558_v4  ;;  %v2568_v5 = vsel %vm12069_vm15, %v2558_v4, %v2546_v46  ;;  %3043 = vrot.lane.b32.xlu1 %v8907_v47, %s12078_s22  ;;  %v154_v46 = vld [vmem:[#allocation9 + $0xa0] ss:$8 sm:$0xf] }
 0x32d   :  { %v2593_v29 = vmul.f32 %v9272_v13, %v2562_v55  ;;  %v2594_v6 = vmul.f32 %v9275_v0, %v2568_v5  ;;  %3041 = vrot.lane.b32.xlu0 %v8913_v22, %s12078_s22  ;;  %3508 = vmatprep.subr.bf16.mxu0 %v2600_v44  ;;  %vm12080_vm15 = vcmp.lt.s32.totalorder %v7159_v10, 94  ;;  %v9302_v5 = vrot.slane %v154_v46, %v7185_v21 }
 0x32e   :  { %3509 = vmatpush1.bf16.msra.mxu0 %v2599_v61  ;;  %v2610_v3 = vpop.permute.xlu1 %2609  ;;  %v9311_v61 = vrot.slane %v154_v46, %v7165_v11  ;;  %3526 = vmatprep.mubr.bf16.mxu0 %v6653_v63 }
 0x32f   :  { %v2601_v2 = vpack.c.bf16 %v2597_v43, %v2593_v29  ;;  %v2608_v62 = vpop.permute.xlu0 %2607  ;;  %v2602_v7 = vpack.c.bf16 %v2598_v58, %v2594_v6  ;;  %12276 = vst [vmem:[#allocation146_spill] sm:$0xff] %v9302_v5  ;;  %3698 = vmatprep.mubr.bf16.mxu1 %v6653_v63  ;;  %v9328_v63 = vrot.slane %v154_v46, %v7189_v24 }
 0x330   :  { %3047 = vrot.lane.b32.xlu1 %v8917_v30, %s12078_s22  ;;  %12277 = vst [vmem:[#allocation147_spill] sm:$0xff] %v9311_v61 }
 0x331   :  { %3045 = vrot.lane.b32.xlu0 %v8858_v18, %s12078_s22  ;;  %3680 = vmatprep.subr.bf16.mxu1 %v2602_v7  ;;  %v9325_v7 = vrot.slane %v154_v46, %v7177_v19 }
 0x332   :  { %3681 = vmatpush1.bf16.msra.mxu1 %v2601_v2  ;;  %v2614_v4 = vpop.permute.xlu1 %2613 }
 0x333   :  { %v2612_v44 = vpop.permute.xlu0 %2611  ;;  %v2629_v43 = vsel %vm12080_vm15, %v2610_v3, %v2614_v4 }
 0x334   :  { %v2628_v53 = vsel %vm12080_vm15, %v2608_v62, %v2612_v44  ;;  %3051 = vrot.lane.b32.xlu1 %v8931_v1, %s12078_s22  ;;  %v2657_v25 = vmul.f32 %v9302_v5, %v2629_v43 }
 0x335   :  { %3049 = vrot.lane.b32.xlu0 %v8938_v16, %s12078_s22  ;;  %v2653_v58 = vmul.f32 %v9302_v5, %v2628_v53 }
 0x336   :  { %v2618_v20 = vpop.permute.xlu1 %2617 }
 0x337   :  { %v2627_v55 = vsel %vm12080_vm15, %v2614_v4, %v2618_v20  ;;  %v2616_v29 = vpop.permute.xlu0 %2615  ;;  %v2661_v53 = vpack.c.bf16 %v2657_v25, %v2653_v58 }
 0x338   :  { %v2658_v6 = vmul.f32 %v9311_v61, %v2627_v55  ;;  %v2626_v2 = vsel %vm12080_vm15, %v2612_v44, %v2616_v29  ;;  %3055 = vrot.lane.b32.xlu1 %v8949_v54, %s12078_s22 }
 0x339   :  { %v2654_v43 = vmul.f32 %v9311_v61, %v2626_v2  ;;  %3053 = vrot.lane.b32.xlu0 %v8893_v57, %s12078_s22  ;;  %s6928_s22 = smov 77  }
 0x33a   :  { %v2622_v4 = vpop.permute.xlu1 %2621 }
 0x33b   :  { %v2625_v55 = vsel %vm12080_vm15, %v2618_v20, %v2622_v4  ;;  %v2631_v44 = vsel %vm12080_vm15, %v2622_v4, %v2610_v3  ;;  %v2620_v5 = vpop.permute.xlu0 %2619  ;;  %v2662_v0 = vpack.c.bf16 %v2658_v6, %v2654_v43 }
 0x33c   :  { %v2659_v13 = vmul.f32 %v9325_v7, %v2625_v55  ;;  %v2660_v46 = vmul.f32 %v9328_v63, %v2631_v44  ;;  %v2624_v2 = vsel %vm12080_vm15, %v2616_v29, %v2620_v5  ;;  %v2630_v61 = vsel %vm12080_vm15, %v2620_v5, %v2608_v62  ;;  %3105 = vrot.lane.b32.xlu1 %v8907_v47, %s6928_s22  ;;  %v156_v62 = vld [vmem:[#allocation9 + $0xa1] ss:$8 sm:$0xf] }
 0x33d   :  { %v2655_v20 = vmul.f32 %v9325_v7, %v2624_v2  ;;  %v2656_v3 = vmul.f32 %v9328_v63, %v2630_v61  ;;  %3103 = vrot.lane.b32.xlu0 %v8913_v22, %s6928_s22  ;;  %3510 = vmatprep.subr.bf16.mxu0 %v2662_v0  ;;  %vm12082_vm15 = vcmp.lt.s32.totalorder %v7159_v10, 93  ;;  %v9355_v22 = vrot.slane %v156_v62, %v7185_v21 }
 0x33e   :  { %3511 = vmatpush1.bf16.msra.mxu0 %v2661_v53  ;;  %v2672_v25 = vpop.permute.xlu1 %2671  ;;  %v9378_v44 = vrot.slane %v156_v62, %v7177_v19 }
 0x33f   :  { %v2663_v58 = vpack.c.bf16 %v2659_v13, %v2655_v20  ;;  %v2670_v6 = vpop.permute.xlu0 %2669  ;;  %v2664_v29 = vpack.c.bf16 %v2660_v46, %v2656_v3 }
 0x340   :  { %3109 = vrot.lane.b32.xlu1 %v8917_v30, %s6928_s22 }
 0x341   :  { %3107 = vrot.lane.b32.xlu0 %v8858_v18, %s6928_s22  ;;  %3682 = vmatprep.subr.bf16.mxu1 %v2664_v29  ;;  %v9364_v18 = vrot.slane %v156_v62, %v7165_v11 }
 0x342   :  { %3683 = vmatpush1.bf16.msra.mxu1 %v2663_v58  ;;  %v2676_v47 = vpop.permute.xlu1 %2675 }
 0x343   :  { %v2674_v0 = vpop.permute.xlu0 %2673  ;;  %v2691_v13 = vsel %vm12082_vm15, %v2672_v25, %v2676_v47 }
 0x344   :  { %v2690_v5 = vsel %vm12082_vm15, %v2670_v6, %v2674_v0  ;;  %3113 = vrot.lane.b32.xlu1 %v8931_v1, %s6928_s22  ;;  %v2719_v61 = vmul.f32 %v9355_v22, %v2691_v13 }
 0x345   :  { %3111 = vrot.lane.b32.xlu0 %v8938_v16, %s6928_s22  ;;  %v2715_v43 = vmul.f32 %v9355_v22, %v2690_v5  ;;  %v9381_v16 = vrot.slane %v156_v62, %v7189_v24 }
 0x346   :  { %v2680_v30 = vpop.permute.xlu1 %2679 }
 0x347   :  { %v2689_v4 = vsel %vm12082_vm15, %v2676_v47, %v2680_v30  ;;  %v2678_v53 = vpop.permute.xlu0 %2677  ;;  %v2723_v20 = vpack.c.bf16 %v2719_v61, %v2715_v43 }
 0x348   :  { %v2720_v55 = vmul.f32 %v9364_v18, %v2689_v4  ;;  %v2688_v1 = vsel %vm12082_vm15, %v2674_v0, %v2678_v53  ;;  %3117 = vrot.lane.b32.xlu1 %v8949_v54, %s6928_s22  ;;  %v158_v4 = vld [vmem:[#allocation9 + $0xa2] ss:$8 sm:$0xf] }
 0x349   :  { %v2716_v46 = vmul.f32 %v9364_v18, %v2688_v1  ;;  %3115 = vrot.lane.b32.xlu0 %v8893_v57, %s6928_s22 }
 0x34a   :  { %v2684_v2 = vpop.permute.xlu1 %2683 }
 0x34b   :  { %v2687_v3 = vsel %vm12082_vm15, %v2680_v30, %v2684_v2  ;;  %v2693_v58 = vsel %vm12082_vm15, %v2684_v2, %v2672_v25  ;;  %v2682_v54 = vpop.permute.xlu0 %2681  ;;  %v2724_v29 = vpack.c.bf16 %v2720_v55, %v2716_v46  ;;  %v9407_v2 = vrot.slane %v158_v4, %v7165_v11 }
 0x34c   :  { %v2721_v47 = vmul.f32 %v9378_v44, %v2687_v3  ;;  %v2722_v62 = vmul.f32 %v9381_v16, %v2693_v58  ;;  %v2686_v0 = vsel %vm12082_vm15, %v2678_v53, %v2682_v54  ;;  %v2692_v57 = vsel %vm12082_vm15, %v2682_v54, %v2670_v6 }
 0x34d   :  { %v2717_v13 = vmul.f32 %v9378_v44, %v2686_v0  ;;  %v2718_v5 = vmul.f32 %v9381_v16, %v2692_v57  ;;  %3512 = vmatprep.subr.bf16.mxu0 %v2724_v29  ;;  %v9400_v53 = vrot.slane %v158_v4, %v7185_v21  ;;  %12278 = vst [vmem:[#allocation148_spill] sm:$0xff] %v9407_v2  ;;  %vm12100_vm15 = vcmp.lt.s32.totalorder %v7159_v10, 82 }
 0x34e   :  { %3513 = vmatpush1.bf16.msra.mxu0 %v2723_v20  ;;  %v2734_v30 = vpop.permute.xlu1 %2733  ;;  %v9417_v0 = vrot.slane %v158_v4, %v7177_v19  ;;  %v9420_v57 = vrot.slane %v158_v4, %v7189_v24 }
 0x34f   :  { %v2725_v25 = vpack.c.bf16 %v2721_v47, %v2717_v13  ;;  %v2732_v61 = vpop.permute.xlu0 %2731  ;;  %v2726_v43 = vpack.c.bf16 %v2722_v62, %v2718_v5 }
 0x350   :  { %12279 = vst [vmem:[#allocation149_spill] sm:$0xff] %v9417_v0  ;;  %12280 = vst [vmem:[#allocation150_spill] sm:$0xff] %v9420_v57 }
 0x351   :  { %3684 = vmatprep.subr.bf16.mxu1 %v2726_v43 }
 0x352   :  { %3685 = vmatpush1.bf16.msra.mxu1 %v2725_v25  ;;  %v2738_v55 = vpop.permute.xlu1 %2737 }
 0x353   :  { %v2736_v6 = vpop.permute.xlu0 %2735  ;;  %v2753_v1 = vsel %vm12091_vm14, %v2734_v30, %v2738_v55 }
 0x354   :  { %v2752_v46 = vsel %vm12091_vm14, %v2732_v61, %v2736_v6  ;;  %v2781_v3 = vmul.f32 %v9400_v53, %v2753_v1 }
 0x355   :  { %v2777_v58 = vmul.f32 %v9400_v53, %v2752_v46 }
 0x356   :  { %v2742_v20 = vpop.permute.xlu1 %2741 }
 0x357   :  { %v2751_v54 = vsel %vm12091_vm14, %v2738_v55, %v2742_v20  ;;  %v2740_v29 = vpop.permute.xlu0 %2739  ;;  %v2785_v25 = vpack.c.bf16 %v2781_v3, %v2777_v58 }
 0x358   :  { %v2782_v47 = vmul.f32 %v9407_v2, %v2751_v54  ;;  %v2750_v62 = vsel %vm12091_vm14, %v2736_v6, %v2740_v29 }
 0x359   :  { %v2778_v13 = vmul.f32 %v9407_v2, %v2750_v62 }
 0x35a   :  { %v2746_v5 = vpop.permute.xlu1 %2745 }
 0x35b   :  { %v2749_v43 = vsel %vm12091_vm14, %v2742_v20, %v2746_v5  ;;  %v2755_v55 = vsel %vm12091_vm14, %v2746_v5, %v2734_v30  ;;  %v2744_v1 = vpop.permute.xlu0 %2743  ;;  %v2786_v46 = vpack.c.bf16 %v2782_v47, %v2778_v13  ;;  %v160_v13 = vld [vmem:[#allocation9 + $0xa3] ss:$8 sm:$0xf] }
 0x35c   :  { %v2783_v6 = vmul.f32 %v9417_v0, %v2749_v43  ;;  %v2784_v54 = vmul.f32 %v9420_v57, %v2755_v55  ;;  %v2748_v4 = vsel %vm12091_vm14, %v2740_v29, %v2744_v1  ;;  %v2754_v62 = vsel %vm12091_vm14, %v2744_v1, %v2732_v61 }
 0x35d   :  { %v2779_v3 = vmul.f32 %v9417_v0, %v2748_v4  ;;  %v2780_v58 = vmul.f32 %v9420_v57, %v2754_v62  ;;  %3514 = vmatprep.subr.bf16.mxu0 %v2786_v46  ;;  %v9437_v29 = vrot.slane %v160_v13, %v7185_v21  ;;  %v9444_v1 = vrot.slane %v160_v13, %v7165_v11 }
 0x35e   :  { %3515 = vmatpush1.bf16.msra.mxu0 %v2785_v25  ;;  %v2796_v20 = vpop.permute.xlu1 %2795  ;;  %vm12109_vm14 = vcmp.lt.s32.totalorder %v7159_v10, 81 }
 0x35f   :  { %v2787_v30 = vpack.c.bf16 %v2783_v6, %v2779_v3  ;;  %v2794_v5 = vpop.permute.xlu0 %2793  ;;  %v2788_v47 = vpack.c.bf16 %v2784_v54, %v2780_v58  ;;  %12281 = vst [vmem:[#allocation151_spill] sm:$0xff] %v9437_v29  ;;  %12282 = vst [vmem:[#allocation152_spill] sm:$0xff] %v9444_v1 }
 0x361   :  { %3686 = vmatprep.subr.bf16.mxu1 %v2788_v47  ;;  %v9457_v47 = vrot.slane %v160_v13, %v7189_v24 }
 0x362   :  { %3687 = vmatpush1.bf16.msra.mxu1 %v2787_v30  ;;  %v2800_v43 = vpop.permute.xlu1 %2799  ;;  %v9454_v30 = vrot.slane %v160_v13, %v7177_v19 }
 0x363   :  { %v2798_v61 = vpop.permute.xlu0 %2797  ;;  %v2815_v55 = vsel %vm12100_vm15, %v2796_v20, %v2800_v43  ;;  %12284 = vst [vmem:[#allocation154_spill] sm:$0xff] %v9457_v47 }
 0x364   :  { %v2814_v25 = vsel %vm12100_vm15, %v2794_v5, %v2798_v61  ;;  %v2843_v6 = vmul.f32 %v9437_v29, %v2815_v55  ;;  %12283 = vst [vmem:[#allocation153_spill] sm:$0xff] %v9454_v30 }
 0x365   :  { %v2839_v54 = vmul.f32 %v9437_v29, %v2814_v25 }
 0x366   :  { %v2804_v46 = vpop.permute.xlu1 %2803 }
 0x367   :  { %v2813_v4 = vsel %vm12100_vm15, %v2800_v43, %v2804_v46  ;;  %v2802_v62 = vpop.permute.xlu0 %2801  ;;  %v2847_v0 = vpack.c.bf16 %v2843_v6, %v2839_v54 }
 0x368   :  { %v2844_v3 = vmul.f32 %v9444_v1, %v2813_v4  ;;  %v2812_v58 = vsel %vm12100_vm15, %v2798_v61, %v2802_v62 }
 0x369   :  { %v2840_v57 = vmul.f32 %v9444_v1, %v2812_v58 }
 0x36a   :  { %v2808_v55 = vpop.permute.xlu1 %2807 }
 0x36b   :  { %v2811_v25 = vsel %vm12100_vm15, %v2804_v46, %v2808_v55  ;;  %v2817_v43 = vsel %vm12100_vm15, %v2808_v55, %v2796_v20  ;;  %v2806_v4 = vpop.permute.xlu0 %2805  ;;  %v2848_v29 = vpack.c.bf16 %v2844_v3, %v2840_v57  ;;  %v162_v3 = vld [vmem:[#allocation9 + $0xa4] ss:$8 sm:$0xf] }
 0x36c   :  { %v2845_v61 = vmul.f32 %v9454_v30, %v2811_v25  ;;  %v2846_v2 = vmul.f32 %v9457_v47, %v2817_v43  ;;  %v2810_v13 = vsel %vm12100_vm15, %v2802_v62, %v2806_v4  ;;  %v2816_v58 = vsel %vm12100_vm15, %v2806_v4, %v2794_v5 }
 0x36d   :  { %v2841_v6 = vmul.f32 %v9454_v30, %v2810_v13  ;;  %v2842_v54 = vmul.f32 %v9457_v47, %v2816_v58  ;;  %3516 = vmatprep.subr.bf16.mxu0 %v2848_v29  ;;  %v9474_v62 = vrot.slane %v162_v3, %v7185_v21  ;;  %v9481_v29 = vrot.slane %v162_v3, %v7165_v11 }
 0x36e   :  { %3517 = vmatpush1.bf16.msra.mxu0 %v2847_v0  ;;  %v2858_v46 = vpop.permute.xlu1 %2857  ;;  %vm12118_vm15 = vcmp.lt.s32.totalorder %v7159_v10, 80 }
 0x36f   :  { %v2849_v20 = vpack.c.bf16 %v2845_v61, %v2841_v6  ;;  %v2856_v55 = vpop.permute.xlu0 %2855  ;;  %v2850_v57 = vpack.c.bf16 %v2846_v2, %v2842_v54  ;;  %12285 = vst [vmem:[#allocation155_spill] sm:$0xff] %v9474_v62  ;;  %12286 = vst [vmem:[#allocation156_spill] sm:$0xff] %v9481_v29 }
 0x371   :  { %3688 = vmatprep.subr.bf16.mxu1 %v2850_v57  ;;  %v9494_v57 = vrot.slane %v162_v3, %v7189_v24 }
 0x372   :  { %3689 = vmatpush1.bf16.msra.mxu1 %v2849_v20  ;;  %v2862_v25 = vpop.permute.xlu1 %2861  ;;  %v9491_v20 = vrot.slane %v162_v3, %v7177_v19 }
 0x373   :  { %v2860_v5 = vpop.permute.xlu0 %2859  ;;  %v2877_v43 = vsel %vm12109_vm14, %v2858_v46, %v2862_v25  ;;  %12288 = vst [vmem:[#allocation158_spill] sm:$0xff] %v9494_v57 }
 0x374   :  { %v2876_v0 = vsel %vm12109_vm14, %v2856_v55, %v2860_v5  ;;  %v2905_v4 = vmul.f32 %v9474_v62, %v2877_v43  ;;  %12287 = vst [vmem:[#allocation157_spill] sm:$0xff] %v9491_v20 }
 0x375   :  { %v2901_v61 = vmul.f32 %v9474_v62, %v2876_v0 }
 0x376   :  { %v2866_v2 = vpop.permute.xlu1 %2865 }
 0x377   :  { %v2875_v13 = vsel %vm12109_vm14, %v2862_v25, %v2866_v2  ;;  %v2864_v58 = vpop.permute.xlu0 %2863  ;;  %v2909_v30 = vpack.c.bf16 %v2905_v4, %v2901_v61 }
 0x378   :  { %v2906_v6 = vmul.f32 %v9481_v29, %v2875_v13  ;;  %v2874_v54 = vsel %vm12109_vm14, %v2860_v5, %v2864_v58 }
 0x379   :  { %v2902_v47 = vmul.f32 %v9481_v29, %v2874_v54 }
 0x37a   :  { %v2870_v43 = vpop.permute.xlu1 %2869 }
 0x37b   :  { %v2873_v0 = vsel %vm12109_vm14, %v2866_v2, %v2870_v43  ;;  %v2879_v25 = vsel %vm12109_vm14, %v2870_v43, %v2858_v46  ;;  %v2868_v13 = vpop.permute.xlu0 %2867  ;;  %v2910_v62 = vpack.c.bf16 %v2906_v6, %v2902_v47  ;;  %v164_v6 = vld [vmem:[#allocation9 + $0xa5] ss:$8 sm:$0xf] }
 0x37c   :  { %v2907_v5 = vmul.f32 %v9491_v20, %v2873_v0  ;;  %v2908_v1 = vmul.f32 %v9494_v57, %v2879_v25  ;;  %v2872_v3 = vsel %vm12109_vm14, %v2864_v58, %v2868_v13  ;;  %v2878_v54 = vsel %vm12109_vm14, %v2868_v13, %v2856_v55 }
 0x37d   :  { %v2903_v4 = vmul.f32 %v9491_v20, %v2872_v3  ;;  %v2904_v61 = vmul.f32 %v9494_v57, %v2878_v54  ;;  %3518 = vmatprep.subr.bf16.mxu0 %v2910_v62  ;;  %v9511_v58 = vrot.slane %v164_v6, %v7185_v21  ;;  %v9518_v62 = vrot.slane %v164_v6, %v7165_v11 }
 0x37e   :  { %3519 = vmatpush1.bf16.msra.mxu0 %v2909_v30  ;;  %v2920_v2 = vpop.permute.xlu1 %2919  ;;  %vm12127_vm14 = vcmp.lt.s32.totalorder %v7159_v10, 79 }
 0x37f   :  { %v2911_v46 = vpack.c.bf16 %v2907_v5, %v2903_v4  ;;  %v2918_v43 = vpop.permute.xlu0 %2917  ;;  %v2912_v47 = vpack.c.bf16 %v2908_v1, %v2904_v61  ;;  %12289 = vst [vmem:[#allocation159_spill] sm:$0xff] %v9511_v58  ;;  %12290 = vst [vmem:[#allocation160_spill] sm:$0xff] %v9518_v62 }
 0x381   :  { %3690 = vmatprep.subr.bf16.mxu1 %v2912_v47  ;;  %v9531_v47 = vrot.slane %v164_v6, %v7189_v24 }
 0x382   :  { %3691 = vmatpush1.bf16.msra.mxu1 %v2911_v46  ;;  %v2924_v0 = vpop.permute.xlu1 %2923  ;;  %v9528_v46 = vrot.slane %v164_v6, %v7177_v19 }
 0x383   :  { %v2922_v55 = vpop.permute.xlu0 %2921  ;;  %v2939_v25 = vsel %vm12118_vm15, %v2920_v2, %v2924_v0  ;;  %12292 = vst [vmem:[#allocation162_spill] sm:$0xff] %v9531_v47 }
 0x384   :  { %v2938_v30 = vsel %vm12118_vm15, %v2918_v43, %v2922_v55  ;;  %v2967_v13 = vmul.f32 %v9511_v58, %v2939_v25  ;;  %12291 = vst [vmem:[#allocation161_spill] sm:$0xff] %v9528_v46 }
 0x385   :  { %v2963_v5 = vmul.f32 %v9511_v58, %v2938_v30 }
 0x386   :  { %v2928_v1 = vpop.permute.xlu1 %2927 }
 0x387   :  { %v2937_v3 = vsel %vm12118_vm15, %v2924_v0, %v2928_v1  ;;  %v2926_v54 = vpop.permute.xlu0 %2925  ;;  %v2971_v20 = vpack.c.bf16 %v2967_v13, %v2963_v5 }
 0x388   :  { %v2968_v4 = vmul.f32 %v9518_v62, %v2937_v3  ;;  %v2936_v61 = vsel %vm12118_vm15, %v2922_v55, %v2926_v54 }
 0x389   :  { %v2964_v57 = vmul.f32 %v9518_v62, %v2936_v61 }
 0x38a   :  { %v2932_v25 = vpop.permute.xlu1 %2931 }
 0x38b   :  { %v2935_v30 = vsel %vm12118_vm15, %v2928_v1, %v2932_v25  ;;  %v2941_v0 = vsel %vm12118_vm15, %v2932_v25, %v2920_v2  ;;  %v2930_v3 = vpop.permute.xlu0 %2929  ;;  %v2972_v58 = vpack.c.bf16 %v2968_v4, %v2964_v57  ;;  %v166_v4 = vld [vmem:[#allocation9 + $0xa6] ss:$8 sm:$0xf] }
 0x38c   :  { %v2969_v55 = vmul.f32 %v9528_v46, %v2935_v30  ;;  %v2970_v29 = vmul.f32 %v9531_v47, %v2941_v0  ;;  %v2934_v6 = vsel %vm12118_vm15, %v2926_v54, %v2930_v3  ;;  %v2940_v61 = vsel %vm12118_vm15, %v2930_v3, %v2918_v43 }
 0x38d   :  { %v2965_v13 = vmul.f32 %v9528_v46, %v2934_v6  ;;  %v2966_v5 = vmul.f32 %v9531_v47, %v2940_v61  ;;  %3520 = vmatprep.subr.bf16.mxu0 %v2972_v58  ;;  %v9548_v54 = vrot.slane %v166_v4, %v7185_v21  ;;  %v9555_v58 = vrot.slane %v166_v4, %v7165_v11 }
 0x38e   :  { %3521 = vmatpush1.bf16.msra.mxu0 %v2971_v20  ;;  %v2982_v1 = vpop.permute.xlu1 %2981  ;;  %vm12134_vm15 = vcmp.lt.s32.totalorder %v7159_v10, 78 }
 0x38f   :  { %v2973_v2 = vpack.c.bf16 %v2969_v55, %v2965_v13  ;;  %v2980_v25 = vpop.permute.xlu0 %2979  ;;  %v2974_v57 = vpack.c.bf16 %v2970_v29, %v2966_v5  ;;  %12293 = vst [vmem:[#allocation163_spill] sm:$0xff] %v9548_v54  ;;  %12294 = vst [vmem:[#allocation164_spill] sm:$0xff] %v9555_v58 }
 0x391   :  { %3692 = vmatprep.subr.bf16.mxu1 %v2974_v57  ;;  %v9568_v57 = vrot.slane %v166_v4, %v7189_v24 }
 0x392   :  { %3693 = vmatpush1.bf16.msra.mxu1 %v2973_v2  ;;  %v2986_v30 = vpop.permute.xlu1 %2985  ;;  %v9565_v2 = vrot.slane %v166_v4, %v7177_v19 }
 0x393   :  { %v2984_v43 = vpop.permute.xlu0 %2983  ;;  %v3001_v0 = vsel %vm12127_vm14, %v2982_v1, %v2986_v30  ;;  %12296 = vst [vmem:[#allocation166_spill] sm:$0xff] %v9568_v57 }
 0x394   :  { %v3000_v20 = vsel %vm12127_vm14, %v2980_v25, %v2984_v43  ;;  %v3029_v3 = vmul.f32 %v9548_v54, %v3001_v0  ;;  %12295 = vst [vmem:[#allocation165_spill] sm:$0xff] %v9565_v2 }
 0x395   :  { %v3025_v55 = vmul.f32 %v9548_v54, %v3000_v20 }
 0x396   :  { %v2990_v29 = vpop.permute.xlu1 %2989 }
 0x397   :  { %v2999_v6 = vsel %vm12127_vm14, %v2986_v30, %v2990_v29  ;;  %v2988_v61 = vpop.permute.xlu0 %2987  ;;  %v3033_v46 = vpack.c.bf16 %v3029_v3, %v3025_v55 }
 0x398   :  { %v3030_v13 = vmul.f32 %v9555_v58, %v2999_v6  ;;  %v2998_v5 = vsel %vm12127_vm14, %v2984_v43, %v2988_v61 }
 0x399   :  { %v3026_v47 = vmul.f32 %v9555_v58, %v2998_v5 }
 0x39a   :  { %v2994_v0 = vpop.permute.xlu1 %2993 }
 0x39b   :  { %v2997_v20 = vsel %vm12127_vm14, %v2990_v29, %v2994_v0  ;;  %v3003_v30 = vsel %vm12127_vm14, %v2994_v0, %v2982_v1  ;;  %v2992_v6 = vpop.permute.xlu0 %2991  ;;  %v3034_v54 = vpack.c.bf16 %v3030_v13, %v3026_v47  ;;  %v168_v13 = vld [vmem:[#allocation9 + $0xa7] ss:$8 sm:$0xf] }
 0x39c   :  { %v3031_v43 = vmul.f32 %v9565_v2, %v2997_v20  ;;  %v3032_v62 = vmul.f32 %v9568_v57, %v3003_v30  ;;  %v2996_v4 = vsel %vm12127_vm14, %v2988_v61, %v2992_v6  ;;  %v3002_v5 = vsel %vm12127_vm14, %v2992_v6, %v2980_v25 }
 0x39d   :  { %v3027_v3 = vmul.f32 %v9565_v2, %v2996_v4  ;;  %v3028_v55 = vmul.f32 %v9568_v57, %v3002_v5  ;;  %3522 = vmatprep.subr.bf16.mxu0 %v3034_v54  ;;  %v9585_v61 = vrot.slane %v168_v13, %v7185_v21  ;;  %v9592_v54 = vrot.slane %v168_v13, %v7165_v11 }
 0x39e   :  { %3523 = vmatpush1.bf16.msra.mxu0 %v3033_v46  ;;  %v3044_v29 = vpop.permute.xlu1 %3043  ;;  %vm12136_vm14 = vcmp.lt.s32.totalorder %v7159_v10, 77 }
 0x39f   :  { %v3035_v1 = vpack.c.bf16 %v3031_v43, %v3027_v3  ;;  %v3042_v0 = vpop.permute.xlu0 %3041  ;;  %v3036_v47 = vpack.c.bf16 %v3032_v62, %v3028_v55  ;;  %12297 = vst [vmem:[#allocation167_spill] sm:$0xff] %v9585_v61 }
 0x3a1   :  { %3694 = vmatprep.subr.bf16.mxu1 %v3036_v47  ;;  %v9605_v47 = vrot.slane %v168_v13, %v7189_v24 }
 0x3a2   :  { %3695 = vmatpush1.bf16.msra.mxu1 %v3035_v1  ;;  %v3048_v20 = vpop.permute.xlu1 %3047  ;;  %v9602_v1 = vrot.slane %v168_v13, %v7177_v19 }
 0x3a3   :  { %v3046_v25 = vpop.permute.xlu0 %3045  ;;  %v3063_v30 = vsel %vm12134_vm15, %v3044_v29, %v3048_v20  ;;  %12299 = vst [vmem:[#allocation169_spill] sm:$0xff] %v9605_v47 }
 0x3a4   :  { %v3062_v46 = vsel %vm12134_vm15, %v3042_v0, %v3046_v25  ;;  %v3091_v6 = vmul.f32 %v9585_v61, %v3063_v30  ;;  %12298 = vst [vmem:[#allocation168_spill] sm:$0xff] %v9602_v1 }
 0x3a5   :  { %v3087_v43 = vmul.f32 %v9585_v61, %v3062_v46 }
 0x3a6   :  { %v3052_v62 = vpop.permute.xlu1 %3051 }
 0x3a7   :  { %v3061_v4 = vsel %vm12134_vm15, %v3048_v20, %v3052_v62  ;;  %v3050_v5 = vpop.permute.xlu0 %3049  ;;  %v3095_v2 = vpack.c.bf16 %v3091_v6, %v3087_v43 }
 0x3a8   :  { %v3092_v3 = vmul.f32 %v9592_v54, %v3061_v4  ;;  %v3060_v55 = vsel %vm12134_vm15, %v3046_v25, %v3050_v5 }
 0x3a9   :  { %v3088_v57 = vmul.f32 %v9592_v54, %v3060_v55 }
 0x3aa   :  { %v3056_v30 = vpop.permute.xlu1 %3055 }
 0x3ab   :  { %v3059_v46 = vsel %vm12134_vm15, %v3052_v62, %v3056_v30  ;;  %v3065_v20 = vsel %vm12134_vm15, %v3056_v30, %v3044_v29  ;;  %v3054_v4 = vpop.permute.xlu0 %3053  ;;  %v3096_v61 = vpack.c.bf16 %v3092_v3, %v3088_v57  ;;  %v6651_v62 = vld [vmem:[#allocation6 + $0x10] ss:$28 sps:$4 sm:$0xff]  }
 0x3ac   :  { %v3093_v25 = vmul.f32 %v9602_v1, %v3059_v46  ;;  %v3094_v58 = vmul.f32 %v9605_v47, %v3065_v20  ;;  %v3058_v13 = vsel %vm12134_vm15, %v3050_v5, %v3054_v4  ;;  %v3064_v55 = vsel %vm12134_vm15, %v3054_v4, %v3042_v0  ;;  %v170_v46 = vld [vmem:[#allocation9 + $0xc0] ss:$8 sm:$0xf] }
 0x3ad   :  { %v3089_v6 = vmul.f32 %v9602_v1, %v3058_v13  ;;  %v3090_v43 = vmul.f32 %v9605_v47, %v3064_v55  ;;  %3524 = vmatprep.subr.bf16.mxu0 %v3096_v61  ;;  %v12128_v20 = vmov 0   ;;  %v9623_v0 = vrot.slane %v170_v46, %v7185_v21 }
 0x3ae   :  { %3525 = vmatpush1.bf16.msra.mxu0 %v3095_v2  ;;  %v3106_v29 = vpop.permute.xlu1 %3105  ;;  %v9630_v4 = vrot.slane %v170_v46, %v7165_v11  ;;  %v9641_v11 = vrot.slane %v170_v46, %v7177_v19  ;;  %vm12138_vm15 = vcmask 130048  }
 0x3af   :  { %v3097_v30 = vpack.c.bf16 %v3093_v25, %v3089_v6  ;;  %v3104_v57 = vpop.permute.xlu0 %3103  ;;  %v3098_v3 = vpack.c.bf16 %v3094_v58, %v3090_v43  ;;  %12300 = vst [vmem:[#allocation170_spill] sm:$0xff] %v9623_v0 }
 0x3b0   :  { %12301 = vst [vmem:[#allocation171_spill] sm:$0xff] %v9630_v4  ;;  %12302 = vst [vmem:[#allocation172_spill] sm:$0xff] %v9641_v11 }
 0x3b1   :  { %3696 = vmatprep.subr.bf16.mxu1 %v3098_v3  ;;  %3527 = vmatmul.mubr.bf16.vlgmr.msra.gmra.mrb[0].mxu0 %v6651_v62 }
 0x3b2   :  { %3697 = vmatpush1.bf16.msra.mxu1 %v3097_v30  ;;  %v3110_v5 = vpop.permute.xlu1 %3109  ;;  %3569 = vmatprep.mubr.bf16.mxu0 %v12128_v20 }
 0x3b3   :  { %v3108_v61 = vpop.permute.xlu0 %3107  ;;  %v3125_v2 = vsel %vm12136_vm14, %v3106_v29, %v3110_v5 }
 0x3b4   :  { %v3124_v58 = vsel %vm12136_vm14, %v3104_v57, %v3108_v61  ;;  %v3153_v13 = vmul.f32 %v9623_v0, %v3125_v2 }
 0x3b5   :  { %3699 = vmatmul.mubr.bf16.vlgmr.msra.gmra.mrb[0].mxu1 %v6651_v62  ;;  %v3149_v55 = vmul.f32 %v9623_v0, %v3124_v58  ;;  %v9644_v62 = vrot.slane %v170_v46, %v7189_v24 }
 0x3b6   :  { %v3114_v25 = vpop.permute.xlu1 %3113  ;;  %3741 = vmatprep.mubr.bf16.mxu1 %v12128_v20 }
 0x3b7   :  { %v3123_v6 = vsel %vm12136_vm14, %v3110_v5, %v3114_v25  ;;  %v3112_v43 = vpop.permute.xlu0 %3111  ;;  %12303 = vst [vmem:[#allocation173_spill] sm:$0xff] %v9644_v62  ;;  %v3157_v21 = vpack.c.bf16 %v3153_v13, %v3149_v55 }
 0x3b8   :  { %v3154_v30 = vmul.f32 %v9630_v4, %v3123_v6  ;;  %v3122_v3 = vsel %vm12136_vm14, %v3108_v61, %v3112_v43 }
 0x3b9   :  { %v3150_v20 = vmul.f32 %v9630_v4, %v3122_v3 }
 0x3ba   :  { %v3118_v2 = vpop.permute.xlu1 %3117 }
 0x3bb   :  { %v3121_v58 = vsel %vm12136_vm14, %v3114_v25, %v3118_v2  ;;  %v3127_v5 = vsel %vm12136_vm14, %v3118_v2, %v3106_v29  ;;  %v3116_v6 = vpop.permute.xlu0 %3115  ;;  %v3158_v0 = vpack.c.bf16 %v3154_v30, %v3150_v20  ;;  %v6654_v25 = vld [vmem:[#allocation6 + $0x18] ss:$28 sps:$4 sm:$0xff]  }
 0x3bc   :  { %v3155_v61 = vmul.f32 %v9641_v11, %v3121_v58  ;;  %v3156_v19 = vmul.f32 %v9644_v62, %v3127_v5  ;;  %v3120_v24 = vsel %vm12136_vm14, %v3112_v43, %v3116_v6  ;;  %v3126_v46 = vsel %vm12136_vm14, %v3116_v6, %v3104_v57 }
 0x3bd   :  { %v3151_v13 = vmul.f32 %v9641_v11, %v3120_v24  ;;  %v3152_v55 = vmul.f32 %v9644_v62, %v3126_v46  ;;  %3537 = vmatprep.subr.bf16.mxu0 %v3158_v0 }
 0x3be   :  { %3538 = vmatpush1.bf16.msra.mxu0 %v3157_v21 }
 0x3bf   :  { %v3159_v29 = vpack.c.bf16 %v3155_v61, %v3151_v13  ;;  %v3160_v20 = vpack.c.bf16 %v3156_v19, %v3152_v55 }
 0x3c1   :  { %6513 = vmatmul.mubr.msk.bf16.vlgmr.msra.gmra.mrb[0].mxu0 %vm12138_vm15, %v6654_v25  ;;  %3709 = vmatprep.subr.bf16.mxu1 %v3160_v20 }
 0x3c2   :  { %3710 = vmatpush1.bf16.msra.mxu1 %v3159_v29 }
 0x3c5   :  { %6514 = vmatmul.mubr.msk.bf16.vlgmr.msra.gmra.mrb[0].mxu1 %vm12138_vm15, %v6654_v25 }
 0x494   :  { %v3571_v43 = vpop.f32.mrb[0].mxu0 }
 0x495   :  { %vm3752_vm13 = vcmp.gt.f32.partialorder %v3571_v43, 0.0  ;;  %v3760_v30 = vmul.f32 0.01, %v3571_v43  ;;  %v3573_v57 = vpop.f32.mrb[1].mxu0 }
 0x496   :  { %v3575_v3 = vpop.f32.mrb[2].mxu0  ;;  %v3761_v58 = vmul.f32 0.01, %v3573_v57  ;;  %vm3753_vm12 = vcmp.gt.f32.partialorder %v3573_v57, 0.0 }
 0x497   :  { %v9661_v2 = vsel %vm3752_vm13, %v3571_v43, %v3760_v30  ;;  %vm3756_vm14 = vcmp.gt.f32.partialorder %v3575_v3, 0.0  ;;  %v3764_v0 = vmul.f32 0.01, %v3575_v3  ;;  %v3577_v21 = vpop.f32.mrb[3].mxu0 }
 0x498   :  { %v3743_v5 = vpop.f32.mrb[0].mxu1  ;;  %3776 = vrot.lane.b32.xlu0 %v9661_v2, %s6882_s23  ;;  %v3765_v61 = vmul.f32 0.01, %v3577_v21  ;;  %vm3757_vm15 = vcmp.gt.f32.partialorder %v3577_v21, 0.0  ;;  %v9669_v46 = vsel %vm3753_vm12, %v3573_v57, %v3761_v58 }
 0x499   :  { %v9665_v6 = vsel %vm3756_vm14, %v3575_v3, %v3764_v0  ;;  %v3745_v19 = vpop.f32.mrb[1].mxu1  ;;  %v3762_v13 = vmul.f32 0.01, %v3743_v5  ;;  %vm3754_vm13 = vcmp.gt.f32.partialorder %v3743_v5, 0.0 }
 0x49a   :  { %v3747_v24 = vpop.f32.mrb[2].mxu1  ;;  %3778 = vrot.lane.b32.xlu1 %v9665_v6, %s6882_s23  ;;  %v9673_v25 = vsel %vm3757_vm15, %v3577_v21, %v3765_v61  ;;  %v3763_v43 = vmul.f32 0.01, %v3745_v19  ;;  %vm3755_vm11 = vcmp.gt.f32.partialorder %v3745_v19, 0.0 }
 0x49b   :  { %v3749_v55 = vpop.f32.mrb[3].mxu1  ;;  %v3766_v29 = vmul.f32 0.01, %v3747_v24  ;;  %vm3758_vm14 = vcmp.gt.f32.partialorder %v3747_v24, 0.0  ;;  %v9677_v20 = vsel %vm3754_vm13, %v3743_v5, %v3762_v13 }
 0x49c   :  { %3780 = vrot.lane.b32.xlu0 %v9669_v46, %s6882_s23  ;;  %v3767_v57 = vmul.f32 0.01, %v3749_v55  ;;  %vm3759_vm12 = vcmp.gt.f32.partialorder %v3749_v55, 0.0  ;;  %v9685_v3 = vsel %vm3755_vm11, %v3745_v19, %v3763_v43 }
 0x49d   :  { %v9681_v30 = vsel %vm3758_vm14, %v3747_v24, %v3766_v29 }
 0x49e   :  { %3782 = vrot.lane.b32.xlu1 %v9673_v25, %s6882_s23  ;;  %v9689_v58 = vsel %vm3759_vm12, %v3749_v55, %v3767_v57 }
 0x4a0   :  { %3784 = vrot.lane.b32.xlu0 %v9677_v20, %s6882_s23 }
 0x4a2   :  { %3786 = vrot.lane.b32.xlu1 %v9681_v30, %s6882_s23 }
 0x4a4   :  { %3788 = vrot.lane.b32.xlu0 %v9685_v3, %s6882_s23 }
 0x4a6   :  { %3790 = vrot.lane.b32.xlu1 %v9689_v58, %s6882_s23  ;;  %s12432_s23 = smov 114  }
 0x4a8   :  { %3816 = vrot.lane.b32.xlu0 %v9661_v2, %s6883_s3 }
 0x4aa   :  { %3818 = vrot.lane.b32.xlu1 %v9665_v6, %s6883_s3 }
 0x4ac   :  { %3820 = vrot.lane.b32.xlu0 %v9669_v46, %s6883_s3 }
 0x4ae   :  { %3822 = vrot.lane.b32.xlu1 %v9673_v25, %s6883_s3 }
 0x4b0   :  { %3824 = vrot.lane.b32.xlu0 %v9677_v20, %s6883_s3 }
 0x4b2   :  { %3826 = vrot.lane.b32.xlu1 %v9681_v30, %s6883_s3 }
 0x4b4   :  { %3828 = vrot.lane.b32.xlu0 %v9685_v3, %s6883_s3 }
 0x4b6   :  { %3830 = vrot.lane.b32.xlu1 %v9689_v58, %s6883_s3  ;;  %s12445_s3 = smov 113  }
 0x4b8   :  { %3856 = vrot.lane.b32.xlu0 %v9661_v2, %s6884_s1 }
 0x4ba   :  { %3858 = vrot.lane.b32.xlu1 %v9665_v6, %s6884_s1 }
 0x4bc   :  { %3860 = vrot.lane.b32.xlu0 %v9669_v46, %s6884_s1 }
 0x4be   :  { %3862 = vrot.lane.b32.xlu1 %v9673_v25, %s6884_s1 }
 0x4c0   :  { %3864 = vrot.lane.b32.xlu0 %v9677_v20, %s6884_s1 }
 0x4c2   :  { %3866 = vrot.lane.b32.xlu1 %v9681_v30, %s6884_s1 }
 0x4c4   :  { %3868 = vrot.lane.b32.xlu0 %v9685_v3, %s6884_s1 }
 0x4c6   :  { %3870 = vrot.lane.b32.xlu1 %v9689_v58, %s6884_s1  ;;  %s12458_s1 = smov 112  }
 0x4c8   :  { %3896 = vrot.lane.b32.xlu0 %v9661_v2, %s6885_s24 }
 0x4ca   :  { %3898 = vrot.lane.b32.xlu1 %v9665_v6, %s6885_s24 }
 0x4cc   :  { %3900 = vrot.lane.b32.xlu0 %v9669_v46, %s6885_s24 }
 0x4ce   :  { %3902 = vrot.lane.b32.xlu1 %v9673_v25, %s6885_s24 }
 0x4d0   :  { %3904 = vrot.lane.b32.xlu0 %v9677_v20, %s6885_s24 }
 0x4d2   :  { %3906 = vrot.lane.b32.xlu1 %v9681_v30, %s6885_s24 }
 0x4d4   :  { %3908 = vrot.lane.b32.xlu0 %v9685_v3, %s6885_s24 }
 0x4d6   :  { %3910 = vrot.lane.b32.xlu1 %v9689_v58, %s6885_s24  ;;  %s12472_s24 = smov 111  }
 0x4d8   :  { %3936 = vrot.lane.b32.xlu0 %v9661_v2, %s6886_s25 }
 0x4da   :  { %3938 = vrot.lane.b32.xlu1 %v9665_v6, %s6886_s25 }
 0x4dc   :  { %3940 = vrot.lane.b32.xlu0 %v9669_v46, %s6886_s25 }
 0x4de   :  { %3942 = vrot.lane.b32.xlu1 %v9673_v25, %s6886_s25 }
 0x4e0   :  { %3944 = vrot.lane.b32.xlu0 %v9677_v20, %s6886_s25 }
 0x4e2   :  { %3946 = vrot.lane.b32.xlu1 %v9681_v30, %s6886_s25 }
 0x4e4   :  { %3948 = vrot.lane.b32.xlu0 %v9685_v3, %s6886_s25 }
 0x4e6   :  { %3950 = vrot.lane.b32.xlu1 %v9689_v58, %s6886_s25  ;;  %s12486_s25 = smov 110  }
 0x4e8   :  { %3976 = vrot.lane.b32.xlu0 %v9661_v2, %s6887_s26 }
 0x4ea   :  { %3978 = vrot.lane.b32.xlu1 %v9665_v6, %s6887_s26 }
 0x4ec   :  { %3980 = vrot.lane.b32.xlu0 %v9669_v46, %s6887_s26 }
 0x4ee   :  { %3982 = vrot.lane.b32.xlu1 %v9673_v25, %s6887_s26 }
 0x4f0   :  { %3984 = vrot.lane.b32.xlu0 %v9677_v20, %s6887_s26 }
 0x4f2   :  { %3986 = vrot.lane.b32.xlu1 %v9681_v30, %s6887_s26 }
 0x4f4   :  { %3988 = vrot.lane.b32.xlu0 %v9685_v3, %s6887_s26 }
 0x4f6   :  { %3990 = vrot.lane.b32.xlu1 %v9689_v58, %s6887_s26  ;;  %s12499_s26 = smov 109  }
 0x4f8   :  { %4016 = vrot.lane.b32.xlu0 %v9661_v2, %s6888_s27 }
 0x4fa   :  { %4018 = vrot.lane.b32.xlu1 %v9665_v6, %s6888_s27 }
 0x4fc   :  { %4020 = vrot.lane.b32.xlu0 %v9669_v46, %s6888_s27 }
 0x4fe   :  { %4022 = vrot.lane.b32.xlu1 %v9673_v25, %s6888_s27 }
 0x500   :  { %4024 = vrot.lane.b32.xlu0 %v9677_v20, %s6888_s27 }
 0x502   :  { %4026 = vrot.lane.b32.xlu1 %v9681_v30, %s6888_s27 }
 0x504   :  { %4028 = vrot.lane.b32.xlu0 %v9685_v3, %s6888_s27 }
 0x506   :  { %4030 = vrot.lane.b32.xlu1 %v9689_v58, %s6888_s27  ;;  %s12512_s27 = smov 99  }
 0x508   :  { %4056 = vrot.lane.b32.xlu0 %v9661_v2, %s6889_s28 }
 0x50a   :  { %v3777_v0 = vpop.permute.xlu0 %3776  ;;  %4058 = vrot.lane.b32.xlu1 %v9665_v6, %s6889_s28 }
 0x50c   :  { %4060 = vrot.lane.b32.xlu0 %v9669_v46, %s6889_s28  ;;  %v3779_v21 = vpop.permute.xlu1 %3778 }
 0x50e   :  { %v3781_v5 = vpop.permute.xlu0 %3780  ;;  %4062 = vrot.lane.b32.xlu1 %v9673_v25, %s6889_s28 }
 0x50f   :  { %v3796_v61 = vsel %vm197_vm0, %v3777_v0, %v3781_v5 }
 0x510   :  { %4064 = vrot.lane.b32.xlu0 %v9677_v20, %s6889_s28  ;;  %v3783_v19 = vpop.permute.xlu1 %3782  ;;  %v3801_v13 = vmul.f32 %v3796_v61, %v7173_v15 }
 0x511   :  { %v3797_v24 = vsel %vm197_vm0, %v3779_v21, %v3783_v19 }
 0x512   :  { %v3805_v55 = vmul.f32 %v3797_v24, %v7173_v15  ;;  %v3785_v29 = vpop.permute.xlu0 %3784  ;;  %4066 = vrot.lane.b32.xlu1 %v9681_v30, %s6889_s28 }
 0x514   :  { %4068 = vrot.lane.b32.xlu0 %v9685_v3, %s6889_s28  ;;  %v3787_v43 = vpop.permute.xlu1 %3786  ;;  %v3809_v57 = vpack.c.bf16 %v3805_v55, %v3801_v13  ;;  %v3794_v13 = vsel %vm197_vm0, %v3781_v5, %v3785_v29 }
 0x515   :  { %v3795_v62 = vsel %vm197_vm0, %v3783_v19, %v3787_v43 }
 0x516   :  { %v3789_v11 = vpop.permute.xlu0 %3788  ;;  %4070 = vrot.lane.b32.xlu1 %v9689_v58, %s6889_s28  ;;  %5931 = vmatprep.subr.bf16.mxu0 %v3809_v57  ;;  %v3806_v19 = vmul.f32 %v3795_v62, %v7192_v28  ;;  %v3802_v62 = vmul.f32 %v3794_v13, %v7192_v28  ;;  %s12525_s28 = smov 98  }
 0x517   :  { %v3792_v15 = vsel %vm197_vm0, %v3785_v29, %v3789_v11  ;;  %v3798_v61 = vsel %vm197_vm0, %v3789_v11, %v3777_v0 }
 0x518   :  { %4096 = vrot.lane.b32.xlu0 %v9661_v2, %s6890_s29  ;;  %v3791_v24 = vpop.permute.xlu1 %3790  ;;  %v3800_v4 = vmul.f32 %v3798_v61, %v7203_v31  ;;  %v3803_v47 = vmul.f32 %v3792_v15, %v7206_v32 }
 0x519   :  { %v3793_v55 = vsel %vm197_vm0, %v3787_v43, %v3791_v24  ;;  %v3799_v57 = vsel %vm197_vm0, %v3791_v24, %v3779_v21  ;;  %v3810_v43 = vpack.c.bf16 %v3806_v19, %v3802_v62  ;;  %vm12317_vm0 = vcmp.lt.s32.totalorder %v7159_v10, 31 }
 0x51a   :  { %v3804_v11 = vmul.f32 %v3799_v57, %v7203_v31  ;;  %v3807_v0 = vmul.f32 %v3793_v55, %v7206_v32  ;;  %v3817_v1 = vpop.permute.xlu0 %3816  ;;  %4098 = vrot.lane.b32.xlu1 %v9665_v6, %s6890_s29 }
 0x51c   :  { %v3808_v5 = vpack.c.bf16 %v3804_v11, %v3800_v4  ;;  %4100 = vrot.lane.b32.xlu0 %v9669_v46, %s6890_s29  ;;  %v3819_v29 = vpop.permute.xlu1 %3818  ;;  %v3811_v21 = vpack.c.bf16 %v3807_v0, %v3803_v47 }
 0x51e   :  { %v3821_v61 = vpop.permute.xlu0 %3820  ;;  %4102 = vrot.lane.b32.xlu1 %v9673_v25, %s6890_s29  ;;  %5932 = vmatpush1.bf16.msra.mxu0 %v3808_v5 }
 0x51f   :  { %v3836_v31 = vsel %vm259_vm1, %v3817_v1, %v3821_v61  ;;  %6095 = vmatprep.subr.bf16.mxu1 %v3811_v21 }
 0x520   :  { %6096 = vmatpush1.bf16.msra.mxu1 %v3810_v43  ;;  %4104 = vrot.lane.b32.xlu0 %v9677_v20, %s6890_s29  ;;  %v3823_v28 = vpop.permute.xlu1 %3822  ;;  %v3841_v47 = vmul.f32 %v3836_v31, %v7232_v51 }
 0x521   :  { %v3837_v32 = vsel %vm259_vm1, %v3819_v29, %v3823_v28 }
 0x522   :  { %v3845_v4 = vmul.f32 %v3837_v32, %v7232_v51  ;;  %v3825_v15 = vpop.permute.xlu0 %3824  ;;  %4106 = vrot.lane.b32.xlu1 %v9681_v30, %s6890_s29 }
 0x523   :  { %v3834_v0 = vsel %vm259_vm1, %v3821_v61, %v3825_v15 }
 0x524   :  { %4108 = vrot.lane.b32.xlu0 %v9685_v3, %s6890_s29  ;;  %v3827_v24 = vpop.permute.xlu1 %3826  ;;  %v3849_v13 = vpack.c.bf16 %v3845_v4, %v3841_v47  ;;  %v3842_v61 = vmul.f32 %v3834_v0, %v7245_v59 }
 0x525   :  { %v3835_v19 = vsel %vm259_vm1, %v3823_v28, %v3827_v24 }
 0x526   :  { %v3829_v55 = vpop.permute.xlu0 %3828  ;;  %4110 = vrot.lane.b32.xlu1 %v9689_v58, %s6890_s29  ;;  %5933 = vmatprep.subr.bf16.mxu0 %v3849_v13  ;;  %v3846_v62 = vmul.f32 %v3835_v19, %v7245_v59  ;;  %s12538_s29 = smov 97  }
 0x527   :  { %v3832_v51 = vsel %vm259_vm1, %v3825_v15, %v3829_v55  ;;  %v3838_v57 = vsel %vm259_vm1, %v3829_v55, %v3817_v1 }
 0x528   :  { %4136 = vrot.lane.b32.xlu0 %v9661_v2, %s6891_s30  ;;  %v3831_v11 = vpop.permute.xlu1 %3830  ;;  %v3840_v43 = vmul.f32 %v3838_v57, %v7256_v8  ;;  %v3843_v31 = vmul.f32 %v3832_v51, %v7259_v9  ;;  %v3850_v15 = vpack.c.bf16 %v3846_v62, %v3842_v61 }
 0x529   :  { %v3833_v5 = vsel %vm259_vm1, %v3827_v24, %v3831_v11  ;;  %v3839_v21 = vsel %vm259_vm1, %v3831_v11, %v3819_v29  ;;  %vm12318_vm1 = vmmov %vm12317_vm0 }
 0x52a   :  { %v3844_v1 = vmul.f32 %v3839_v21, %v7256_v8  ;;  %v3847_v28 = vmul.f32 %v3833_v5, %v7259_v9  ;;  %v3857_v32 = vpop.permute.xlu0 %3856  ;;  %4138 = vrot.lane.b32.xlu1 %v9665_v6, %s6891_s30 }
 0x52c   :  { %v3848_v47 = vpack.c.bf16 %v3844_v1, %v3840_v43  ;;  %4140 = vrot.lane.b32.xlu0 %v9669_v46, %s6891_s30  ;;  %v3859_v4 = vpop.permute.xlu1 %3858  ;;  %v3851_v29 = vpack.c.bf16 %v3847_v28, %v3843_v31 }
 0x52e   :  { %v3861_v24 = vpop.permute.xlu0 %3860  ;;  %4142 = vrot.lane.b32.xlu1 %v9673_v25, %s6891_s30  ;;  %5934 = vmatpush1.bf16.msra.mxu0 %v3848_v47 }
 0x52f   :  { %v3876_v8 = vsel %vm321_vm2, %v3857_v32, %v3861_v24  ;;  %6097 = vmatprep.subr.bf16.mxu1 %v3851_v29 }
 0x530   :  { %6098 = vmatpush1.bf16.msra.mxu1 %v3850_v15  ;;  %4144 = vrot.lane.b32.xlu0 %v9677_v20, %s6891_s30  ;;  %v3863_v59 = vpop.permute.xlu1 %3862  ;;  %v3881_v13 = vmul.f32 %v3876_v8, %v7283_v37 }
 0x531   :  { %v3877_v9 = vsel %vm321_vm2, %v3859_v4, %v3863_v59 }
 0x532   :  { %v3885_v19 = vmul.f32 %v3877_v9, %v7283_v37  ;;  %v3865_v55 = vpop.permute.xlu0 %3864  ;;  %4146 = vrot.lane.b32.xlu1 %v9681_v30, %s6891_s30 }
 0x533   :  { %v3874_v21 = vsel %vm321_vm2, %v3861_v24, %v3865_v55 }
 0x534   :  { %4148 = vrot.lane.b32.xlu0 %v9685_v3, %s6891_s30  ;;  %v3867_v51 = vpop.permute.xlu1 %3866  ;;  %v3889_v57 = vpack.c.bf16 %v3885_v19, %v3881_v13  ;;  %v3882_v15 = vmul.f32 %v3874_v21, %v7298_v45 }
 0x535   :  { %v3875_v11 = vsel %vm321_vm2, %v3863_v59, %v3867_v51 }
 0x536   :  { %v3869_v0 = vpop.permute.xlu0 %3868  ;;  %4150 = vrot.lane.b32.xlu1 %v9689_v58, %s6891_s30  ;;  %5935 = vmatprep.subr.bf16.mxu0 %v3889_v57  ;;  %v3886_v43 = vmul.f32 %v3875_v11, %v7298_v45  ;;  %s12551_s30 = smov 96  }
 0x537   :  { %v3872_v37 = vsel %vm321_vm2, %v3865_v55, %v3869_v0  ;;  %v3878_v62 = vsel %vm321_vm2, %v3869_v0, %v3857_v32 }
 0x538   :  { %4176 = vrot.lane.b32.xlu0 %v9661_v2, %s6879_s21  ;;  %v3871_v5 = vpop.permute.xlu1 %3870  ;;  %v3880_v28 = vmul.f32 %v3878_v62, %v7307_v50  ;;  %v3883_v61 = vmul.f32 %v3872_v37, %v7310_v52  ;;  %v3890_v59 = vpack.c.bf16 %v3886_v43, %v3882_v15 }
 0x539   :  { %v3873_v31 = vsel %vm321_vm2, %v3867_v51, %v3871_v5  ;;  %v3879_v1 = vsel %vm321_vm2, %v3871_v5, %v3859_v4  ;;  %vm12320_vm2 = vmmov %vm12317_vm0 }
 0x53a   :  { %v3884_v32 = vmul.f32 %v3879_v1, %v7307_v50  ;;  %v3887_v47 = vmul.f32 %v3873_v31, %v7310_v52  ;;  %v3897_v29 = vpop.permute.xlu0 %3896  ;;  %4178 = vrot.lane.b32.xlu1 %v9665_v6, %s6879_s21 }
 0x53c   :  { %v3888_v24 = vpack.c.bf16 %v3884_v32, %v3880_v28  ;;  %4180 = vrot.lane.b32.xlu0 %v9669_v46, %s6879_s21  ;;  %v3899_v8 = vpop.permute.xlu1 %3898  ;;  %v3891_v4 = vpack.c.bf16 %v3887_v47, %v3883_v61 }
 0x53e   :  { %v3901_v9 = vpop.permute.xlu0 %3900  ;;  %4182 = vrot.lane.b32.xlu1 %v9673_v25, %s6879_s21  ;;  %5936 = vmatpush1.bf16.msra.mxu0 %v3888_v24 }
 0x53f   :  { %v3916_v50 = vsel %vm383_vm3, %v3897_v29, %v3901_v9  ;;  %6099 = vmatprep.subr.bf16.mxu1 %v3891_v4 }
 0x540   :  { %6100 = vmatpush1.bf16.msra.mxu1 %v3890_v59  ;;  %4184 = vrot.lane.b32.xlu0 %v9677_v20, %s6879_s21  ;;  %v3903_v45 = vpop.permute.xlu1 %3902  ;;  %v3921_v13 = vmul.f32 %v3916_v50, %v7336_v23 }
 0x541   :  { %v3917_v52 = vsel %vm383_vm3, %v3899_v8, %v3903_v45 }
 0x542   :  { %v3925_v19 = vmul.f32 %v3917_v52, %v7336_v23  ;;  %v3905_v55 = vpop.permute.xlu0 %3904  ;;  %4186 = vrot.lane.b32.xlu1 %v9681_v30, %s6879_s21 }
 0x543   :  { %v3914_v5 = vsel %vm383_vm3, %v3901_v9, %v3905_v55 }
 0x544   :  { %4188 = vrot.lane.b32.xlu0 %v9685_v3, %s6879_s21  ;;  %v3907_v51 = vpop.permute.xlu1 %3906  ;;  %v3929_v57 = vpack.c.bf16 %v3925_v19, %v3921_v13 }
 0x545   :  { %v3915_v11 = vsel %vm383_vm3, %v3903_v45, %v3907_v51 }
 0x546   :  { %v3909_v0 = vpop.permute.xlu0 %3908  ;;  %4190 = vrot.lane.b32.xlu1 %v9689_v58, %s6879_s21  ;;  %5937 = vmatprep.subr.bf16.mxu0 %v3929_v57  ;;  %v3926_v21 = vmul.f32 %v3915_v11, %v7351_v35  ;;  %s12419_s21 = smov 115  }
 0x547   :  { %v3912_v23 = vsel %vm383_vm3, %v3905_v55, %v3909_v0  ;;  %v3918_v37 = vsel %vm383_vm3, %v3909_v0, %v3897_v29  ;;  %v3922_v29 = vmul.f32 %v3914_v5, %v7351_v35 }
 0x548   :  { %4216 = vrot.lane.b32.xlu0 %v9661_v2, %s6892_s7  ;;  %v3911_v62 = vpop.permute.xlu1 %3910  ;;  %v3920_v1 = vmul.f32 %v3918_v37, %v7360_v41  ;;  %v3923_v28 = vmul.f32 %v3912_v23, %v7363_v42 }
 0x549   :  { %v3913_v43 = vsel %vm383_vm3, %v3907_v51, %v3911_v62  ;;  %v3919_v31 = vsel %vm383_vm3, %v3911_v62, %v3899_v8  ;;  %v3930_v4 = vpack.c.bf16 %v3926_v21, %v3922_v29  ;;  %vm12321_vm3 = vmmov %vm12317_vm0 }
 0x54a   :  { %v3924_v61 = vmul.f32 %v3919_v31, %v7360_v41  ;;  %v3927_v32 = vmul.f32 %v3913_v43, %v7363_v42  ;;  %v3937_v47 = vpop.permute.xlu0 %3936  ;;  %4218 = vrot.lane.b32.xlu1 %v9665_v6, %s6892_s7 }
 0x54c   :  { %v3928_v15 = vpack.c.bf16 %v3924_v61, %v3920_v1  ;;  %4220 = vrot.lane.b32.xlu0 %v9669_v46, %s6892_s7  ;;  %v3939_v24 = vpop.permute.xlu1 %3938  ;;  %v3931_v8 = vpack.c.bf16 %v3927_v32, %v3923_v28 }
 0x54e   :  { %v3941_v59 = vpop.permute.xlu0 %3940  ;;  %4222 = vrot.lane.b32.xlu1 %v9673_v25, %s6892_s7  ;;  %5938 = vmatpush1.bf16.msra.mxu0 %v3928_v15 }
 0x54f   :  { %v3956_v41 = vsel %vm445_vm4, %v3937_v47, %v3941_v59  ;;  %6101 = vmatprep.subr.bf16.mxu1 %v3931_v8 }
 0x550   :  { %6102 = vmatpush1.bf16.msra.mxu1 %v3930_v4  ;;  %4224 = vrot.lane.b32.xlu0 %v9677_v20, %s6892_s7  ;;  %v3943_v35 = vpop.permute.xlu1 %3942  ;;  %v3961_v9 = vmul.f32 %v3956_v41, %v7389_v14 }
 0x551   :  { %v3957_v42 = vsel %vm445_vm4, %v3939_v24, %v3943_v35 }
 0x552   :  { %v3965_v50 = vmul.f32 %v3957_v42, %v7389_v14  ;;  %v3945_v45 = vpop.permute.xlu0 %3944  ;;  %4226 = vrot.lane.b32.xlu1 %v9681_v30, %s6892_s7 }
 0x553   :  { %v3954_v11 = vsel %vm445_vm4, %v3941_v59, %v3945_v45 }
 0x554   :  { %4228 = vrot.lane.b32.xlu0 %v9685_v3, %s6892_s7  ;;  %v3947_v52 = vpop.permute.xlu1 %3946  ;;  %v3969_v13 = vpack.c.bf16 %v3965_v50, %v3961_v9  ;;  %v3962_v1 = vmul.f32 %v3954_v11, %v7404_v27 }
 0x555   :  { %v3955_v19 = vsel %vm445_vm4, %v3943_v35, %v3947_v52 }
 0x556   :  { %v3949_v55 = vpop.permute.xlu0 %3948  ;;  %4230 = vrot.lane.b32.xlu1 %v9689_v58, %s6892_s7  ;;  %5939 = vmatprep.subr.bf16.mxu0 %v3969_v13  ;;  %v3966_v0 = vmul.f32 %v3955_v19, %v7404_v27  ;;  %s12564_s7 = smov 95  }
 0x557   :  { %v3952_v14 = vsel %vm445_vm4, %v3945_v45, %v3949_v55  ;;  %v3958_v51 = vsel %vm445_vm4, %v3949_v55, %v3937_v47 }
 0x558   :  { %4256 = vrot.lane.b32.xlu0 %v9661_v2, %s6893_s8  ;;  %v3951_v57 = vpop.permute.xlu1 %3950  ;;  %v3960_v62 = vmul.f32 %v3958_v51, %v7413_v36  ;;  %v3963_v5 = vmul.f32 %v3952_v14, %v7416_v38  ;;  %v3970_v47 = vpack.c.bf16 %v3966_v0, %v3962_v1 }
 0x559   :  { %v3953_v23 = vsel %vm445_vm4, %v3947_v52, %v3951_v57  ;;  %v3959_v37 = vsel %vm445_vm4, %v3951_v57, %v3939_v24  ;;  %vm12322_vm4 = vmmov %vm12317_vm0 }
 0x55a   :  { %v3964_v21 = vmul.f32 %v3959_v37, %v7413_v36  ;;  %v3967_v43 = vmul.f32 %v3953_v23, %v7416_v38  ;;  %v3977_v31 = vpop.permute.xlu0 %3976  ;;  %4258 = vrot.lane.b32.xlu1 %v9665_v6, %s6893_s8 }
 0x55c   :  { %v3968_v28 = vpack.c.bf16 %v3964_v21, %v3960_v62  ;;  %4260 = vrot.lane.b32.xlu0 %v9669_v46, %s6893_s8  ;;  %v3979_v61 = vpop.permute.xlu1 %3978  ;;  %v3971_v32 = vpack.c.bf16 %v3967_v43, %v3963_v5 }
 0x55e   :  { %v3981_v29 = vpop.permute.xlu0 %3980  ;;  %4262 = vrot.lane.b32.xlu1 %v9673_v25, %s6893_s8  ;;  %5940 = vmatpush1.bf16.msra.mxu0 %v3968_v28 }
 0x55f   :  { %v3996_v36 = vsel %vm507_vm5, %v3977_v31, %v3981_v29  ;;  %6103 = vmatprep.subr.bf16.mxu1 %v3971_v32 }
 0x560   :  { %6104 = vmatpush1.bf16.msra.mxu1 %v3970_v47  ;;  %4264 = vrot.lane.b32.xlu0 %v9677_v20, %s6893_s8  ;;  %v3983_v27 = vpop.permute.xlu1 %3982  ;;  %v4001_v15 = vmul.f32 %v3996_v36, %v7442_v12 }
 0x561   :  { %v3997_v38 = vsel %vm507_vm5, %v3979_v61, %v3983_v27 }
 0x562   :  { %v4005_v24 = vmul.f32 %v3997_v38, %v7442_v12  ;;  %v3985_v8 = vpop.permute.xlu0 %3984  ;;  %4266 = vrot.lane.b32.xlu1 %v9681_v30, %s6893_s8 }
 0x563   :  { %v3994_v50 = vsel %vm507_vm5, %v3981_v29, %v3985_v8 }
 0x564   :  { %4268 = vrot.lane.b32.xlu0 %v9685_v3, %s6893_s8  ;;  %v3987_v4 = vpop.permute.xlu1 %3986  ;;  %v4009_v59 = vpack.c.bf16 %v4005_v24, %v4001_v15  ;;  %v4002_v11 = vmul.f32 %v3994_v50, %v7457_v26 }
 0x565   :  { %v3995_v41 = vsel %vm507_vm5, %v3983_v27, %v3987_v4 }
 0x566   :  { %v3989_v35 = vpop.permute.xlu0 %3988  ;;  %4270 = vrot.lane.b32.xlu1 %v9689_v58, %s6893_s8  ;;  %5941 = vmatprep.subr.bf16.mxu0 %v4009_v59  ;;  %v4006_v45 = vmul.f32 %v3995_v41, %v7457_v26  ;;  %s12577_s8 = smov 94  }
 0x567   :  { %v3992_v12 = vsel %vm507_vm5, %v3985_v8, %v3989_v35  ;;  %v3998_v42 = vsel %vm507_vm5, %v3989_v35, %v3977_v31 }
 0x568   :  { %4296 = vrot.lane.b32.xlu0 %v9661_v2, %s6894_s9  ;;  %v3991_v9 = vpop.permute.xlu1 %3990  ;;  %v4000_v19 = vmul.f32 %v3998_v42, %v7466_v39  ;;  %v4003_v55 = vmul.f32 %v3992_v12, %v7469_v40  ;;  %v4010_v62 = vpack.c.bf16 %v4006_v45, %v4002_v11 }
 0x569   :  { %v3993_v52 = vsel %vm507_vm5, %v3987_v4, %v3991_v9  ;;  %v3999_v13 = vsel %vm507_vm5, %v3991_v9, %v3979_v61  ;;  %vm12323_vm5 = vmmov %vm12317_vm0 }
 0x56a   :  { %v4004_v14 = vmul.f32 %v3999_v13, %v7466_v39  ;;  %v4007_v51 = vmul.f32 %v3993_v52, %v7469_v40  ;;  %v4017_v57 = vpop.permute.xlu0 %4016  ;;  %4298 = vrot.lane.b32.xlu1 %v9665_v6, %s6894_s9 }
 0x56c   :  { %v4008_v0 = vpack.c.bf16 %v4004_v14, %v4000_v19  ;;  %4300 = vrot.lane.b32.xlu0 %v9669_v46, %s6894_s9  ;;  %v4019_v23 = vpop.permute.xlu1 %4018  ;;  %v4011_v37 = vpack.c.bf16 %v4007_v51, %v4003_v55 }
 0x56e   :  { %v4021_v5 = vpop.permute.xlu0 %4020  ;;  %4302 = vrot.lane.b32.xlu1 %v9673_v25, %s6894_s9  ;;  %5942 = vmatpush1.bf16.msra.mxu0 %v4008_v0 }
 0x56f   :  { %v4036_v39 = vsel %vm569_vm6, %v4017_v57, %v4021_v5  ;;  %6105 = vmatprep.subr.bf16.mxu1 %v4011_v37 }
 0x570   :  { %6106 = vmatpush1.bf16.msra.mxu1 %v4010_v62  ;;  %4304 = vrot.lane.b32.xlu0 %v9677_v20, %s6894_s9  ;;  %v4023_v26 = vpop.permute.xlu1 %4022  ;;  %v4041_v21 = vmul.f32 %v4036_v39, %v7495_v17 }
 0x571   :  { %v4037_v40 = vsel %vm569_vm6, %v4019_v23, %v4023_v26 }
 0x572   :  { %v4045_v43 = vmul.f32 %v4037_v40, %v7495_v17  ;;  %v4025_v31 = vpop.permute.xlu0 %4024  ;;  %4306 = vrot.lane.b32.xlu1 %v9681_v30, %s6894_s9 }
 0x573   :  { %v4034_v36 = vsel %vm569_vm6, %v4021_v5, %v4025_v31 }
 0x574   :  { %4308 = vrot.lane.b32.xlu0 %v9685_v3, %s6894_s9  ;;  %v4027_v1 = vpop.permute.xlu1 %4026  ;;  %v4049_v28 = vpack.c.bf16 %v4045_v43, %v4041_v21  ;;  %v4042_v35 = vmul.f32 %v4034_v36, %v7510_v34  ;;  %v12305_v36 = vld [vmem:[#allocation22_spill] sm:$0xff] }
 0x575   :  { %v4035_v61 = vsel %vm569_vm6, %v4023_v26, %v4027_v1  ;;  %v12304_v26 = vld [vmem:[#allocation21_spill] sm:$0xff] }
 0x576   :  { %v4029_v32 = vpop.permute.xlu0 %4028  ;;  %4310 = vrot.lane.b32.xlu1 %v9689_v58, %s6894_s9  ;;  %5943 = vmatprep.subr.bf16.mxu0 %v4049_v28  ;;  %v4046_v27 = vmul.f32 %v4035_v61, %v7510_v34  ;;  %s12590_s9 = smov 93  }
 0x577   :  { %v4032_v17 = vsel %vm569_vm6, %v4025_v31, %v4029_v32  ;;  %v4038_v47 = vsel %vm569_vm6, %v4029_v32, %v4017_v57 }
 0x578   :  { %4336 = vrot.lane.b32.xlu0 %v9661_v2, %s6895_s10  ;;  %v4031_v29 = vpop.permute.xlu1 %4030  ;;  %v4040_v24 = vmul.f32 %v4038_v47, %v7519_v48  ;;  %v4043_v8 = vmul.f32 %v4032_v17, %v7522_v49  ;;  %v4050_v50 = vpack.c.bf16 %v4046_v27, %v4042_v35 }
 0x579   :  { %v4033_v38 = vsel %vm569_vm6, %v4027_v1, %v4031_v29  ;;  %v4039_v15 = vsel %vm569_vm6, %v4031_v29, %v4019_v23  ;;  %vm12325_vm6 = vmmov %vm12317_vm0 }
 0x57a   :  { %v4044_v4 = vmul.f32 %v4039_v15, %v7519_v48  ;;  %v4047_v59 = vmul.f32 %v4033_v38, %v7522_v49  ;;  %v4057_v41 = vpop.permute.xlu0 %4056  ;;  %4338 = vrot.lane.b32.xlu1 %v9665_v6, %s6895_s10 }
 0x57c   :  { %v4048_v12 = vpack.c.bf16 %v4044_v4, %v4040_v24  ;;  %4340 = vrot.lane.b32.xlu0 %v9669_v46, %s6895_s10  ;;  %v4059_v42 = vpop.permute.xlu1 %4058  ;;  %v4051_v9 = vpack.c.bf16 %v4047_v59, %v4043_v8 }
 0x57e   :  { %v4061_v45 = vpop.permute.xlu0 %4060  ;;  %4342 = vrot.lane.b32.xlu1 %v9673_v25, %s6895_s10  ;;  %5944 = vmatpush1.bf16.msra.mxu0 %v4048_v12 }
 0x57f   :  { %v4076_v48 = vsel %vm631_vm7, %v4057_v41, %v4061_v45  ;;  %6107 = vmatprep.subr.bf16.mxu1 %v4051_v9  ;;  %v12306_v9 = vld [vmem:[#allocation23_spill] sm:$0xff] }
 0x580   :  { %6108 = vmatpush1.bf16.msra.mxu1 %v4050_v50  ;;  %4344 = vrot.lane.b32.xlu0 %v9677_v20, %s6895_s10  ;;  %v4063_v34 = vpop.permute.xlu1 %4062  ;;  %v4081_v52 = vmul.f32 %v4076_v48, %v7548_v33 }
 0x581   :  { %v4077_v49 = vsel %vm631_vm7, %v4059_v42, %v4063_v34 }
 0x582   :  { %v4085_v13 = vmul.f32 %v4077_v49, %v7548_v33  ;;  %v4065_v19 = vpop.permute.xlu0 %4064  ;;  %4346 = vrot.lane.b32.xlu1 %v9681_v30, %s6895_s10 }
 0x583   :  { %v4074_v23 = vsel %vm631_vm7, %v4061_v45, %v4065_v19 }
 0x584   :  { %4348 = vrot.lane.b32.xlu0 %v9685_v3, %s6895_s10  ;;  %v4067_v55 = vpop.permute.xlu1 %4066  ;;  %v4089_v14 = vpack.c.bf16 %v4085_v13, %v4081_v52  ;;  %v4082_v1 = vmul.f32 %v4074_v23, %v7563_v56  ;;  %v12308_v52 = vld [vmem:[#allocation25_spill] sm:$0xff] }
 0x585   :  { %v4075_v51 = vsel %vm631_vm7, %v4063_v34, %v4067_v55  ;;  %v12307_v34 = vld [vmem:[#allocation24_spill] sm:$0xff] }
 0x586   :  { %v4069_v57 = vpop.permute.xlu0 %4068  ;;  %4350 = vrot.lane.b32.xlu1 %v9689_v58, %s6895_s10  ;;  %5945 = vmatprep.subr.bf16.mxu0 %v4089_v14  ;;  %v4086_v37 = vmul.f32 %v4075_v51, %v7563_v56  ;;  %v10152_v51 = vld [vmem:[#allocation8] sm:$0xff]  ;;  %s12603_s10 = smov 83  }
 0x587   :  { %v4072_v33 = vsel %vm631_vm7, %v4065_v19, %v4069_v57  ;;  %v4078_v11 = vsel %vm631_vm7, %v4069_v57, %v4057_v41  ;;  %v6516_v23 = vcombine.high %v10152_v51, %v10152_v51 }
 0x588   :  { %4376 = vrot.lane.b32.xlu0 %v9661_v2, %s6896_s0  ;;  %v4071_v0 = vpop.permute.xlu1 %4070  ;;  %v4080_v39 = vmul.f32 %v4078_v11, %v7572_v60  ;;  %v4083_v40 = vmul.f32 %v4072_v33, %v12304_v26  ;;  %v4090_v17 = vpack.c.bf16 %v4086_v37, %v4082_v1 }
 0x589   :  { %v4073_v62 = vsel %vm631_vm7, %v4067_v55, %v4071_v0  ;;  %v4079_v5 = vsel %vm631_vm7, %v4071_v0, %v4059_v42  ;;  %5963 = vmatprep.mubr.bf16.mxu0 %v6516_v23  ;;  %6127 = vmatprep.mubr.bf16.mxu1 %v6516_v23  ;;  %vm12326_vm7 = vmmov %vm12317_vm0 }
 0x58a   :  { %v4084_v21 = vmul.f32 %v4079_v5, %v7572_v60  ;;  %v4087_v43 = vmul.f32 %v4073_v62, %v12304_v26  ;;  %v4097_v31 = vpop.permute.xlu0 %4096  ;;  %4378 = vrot.lane.b32.xlu1 %v9665_v6, %s6896_s0 }
 0x58c   :  { %v4088_v28 = vpack.c.bf16 %v4084_v21, %v4080_v39  ;;  %4380 = vrot.lane.b32.xlu0 %v9669_v46, %s6896_s0  ;;  %v4099_v61 = vpop.permute.xlu1 %4098  ;;  %v4091_v32 = vpack.c.bf16 %v4087_v43, %v4083_v40  ;;  %v12309_v40 = vld [vmem:[#allocation26_spill] sm:$0xff] }
 0x58e   :  { %v4101_v47 = vpop.permute.xlu0 %4100  ;;  %4382 = vrot.lane.b32.xlu1 %v9673_v25, %s6896_s0  ;;  %5946 = vmatpush1.bf16.msra.mxu0 %v4088_v28 }
 0x58f   :  { %v4116_v60 = vsel %vm693_vm8, %v4097_v31, %v4101_v47  ;;  %6109 = vmatprep.subr.bf16.mxu1 %v4091_v32 }
 0x590   :  { %6110 = vmatpush1.bf16.msra.mxu1 %v4090_v17  ;;  %4384 = vrot.lane.b32.xlu0 %v9677_v20, %s6896_s0  ;;  %v4103_v56 = vpop.permute.xlu1 %4102  ;;  %v4121_v27 = vmul.f32 %v4116_v60, %v12305_v36 }
 0x591   :  { %v4117_v29 = vsel %vm693_vm8, %v4099_v61, %v4103_v56 }
 0x592   :  { %v4125_v38 = vmul.f32 %v4117_v29, %v12305_v36  ;;  %v4105_v15 = vpop.permute.xlu0 %4104  ;;  %4386 = vrot.lane.b32.xlu1 %v9681_v30, %s6896_s0  ;;  %v12310_v29 = vld [vmem:[#allocation29_spill] sm:$0xff] }
 0x593   :  { %v4114_v42 = vsel %vm693_vm8, %v4101_v47, %v4105_v15 }
 0x594   :  { %4388 = vrot.lane.b32.xlu0 %v9685_v3, %s6896_s0  ;;  %v4107_v24 = vpop.permute.xlu1 %4106  ;;  %v4129_v8 = vpack.c.bf16 %v4125_v38, %v4121_v27  ;;  %v4122_v57 = vmul.f32 %v4114_v42, %v12306_v9 }
 0x595   :  { %v4115_v4 = vsel %vm693_vm8, %v4103_v56, %v4107_v24 }
 0x596   :  { %v4109_v59 = vpop.permute.xlu0 %4108  ;;  %4390 = vrot.lane.b32.xlu1 %v9689_v58, %s6896_s0  ;;  %5947 = vmatprep.subr.bf16.mxu0 %v4129_v8  ;;  %v4126_v50 = vmul.f32 %v4115_v4, %v12306_v9  ;;  %v12312_v8 = vld [vmem:[#allocation28_spill] sm:$0xff]  ;;  %s12616_s0 = smov 82  }
 0x597   :  { %v4112_v41 = vsel %vm693_vm8, %v4105_v15, %v4109_v59  ;;  %v4118_v35 = vsel %vm693_vm8, %v4109_v59, %v4097_v31  ;;  %v12311_v15 = vld [vmem:[#allocation27_spill] sm:$0xff] }
 0x598   :  { %4416 = vrot.lane.b32.xlu0 %v9661_v2, %s6897_s11  ;;  %v4111_v12 = vpop.permute.xlu1 %4110  ;;  %v4120_v49 = vmul.f32 %v4118_v35, %v12307_v34  ;;  %v4123_v13 = vmul.f32 %v4112_v41, %v12308_v52  ;;  %v4130_v37 = vpack.c.bf16 %v4126_v50, %v4122_v57 }
 0x599   :  { %v4113_v45 = vsel %vm693_vm8, %v4107_v24, %v4111_v12  ;;  %v4119_v48 = vsel %vm693_vm8, %v4111_v12, %v4099_v61  ;;  %vm12329_vm8 = vcmp.lt.s32.totalorder %v7159_v10, 30 }
 0x59a   :  { %v4124_v19 = vmul.f32 %v4119_v48, %v12307_v34  ;;  %v4127_v55 = vmul.f32 %v4113_v45, %v12308_v52  ;;  %v4137_v14 = vpop.permute.xlu0 %4136  ;;  %4418 = vrot.lane.b32.xlu1 %v9665_v6, %s6897_s11  ;;  %vm12333_vm11 = vmmov %vm12329_vm8 }
 0x59b   :  { %vm12334_vm15 = vmmov %vm12329_vm8 }
 0x59c   :  { %v4128_v33 = vpack.c.bf16 %v4124_v19, %v4120_v49  ;;  %4420 = vrot.lane.b32.xlu0 %v9669_v46, %s6897_s11  ;;  %v4139_v11 = vpop.permute.xlu1 %4138  ;;  %v4131_v0 = vpack.c.bf16 %v4127_v55, %v4123_v13  ;;  %v12313_v13 = vld [vmem:[#allocation30_spill] sm:$0xff]  ;;  %vm12335_vm13 = vmmov %vm12329_vm8 }
 0x59d   :  { %vm12337_vm14 = vmmov %vm12329_vm8 }
 0x59e   :  { %v4141_v62 = vpop.permute.xlu0 %4140  ;;  %4422 = vrot.lane.b32.xlu1 %v9673_v25, %s6897_s11  ;;  %5948 = vmatpush1.bf16.msra.mxu0 %v4128_v33  ;;  %vm12338_vm12 = vmmov %vm12329_vm8 }
 0x59f   :  { %v4156_v5 = vsel %vm755_vm9, %v4137_v14, %v4141_v62  ;;  %6111 = vmatprep.subr.bf16.mxu1 %v4131_v0 }
 0x5a0   :  { %6112 = vmatpush1.bf16.msra.mxu1 %v4130_v37  ;;  %4424 = vrot.lane.b32.xlu0 %v9677_v20, %s6897_s11  ;;  %v4143_v39 = vpop.permute.xlu1 %4142  ;;  %v4161_v21 = vmul.f32 %v4156_v5, %v12309_v40 }
 0x5a1   :  { %v4157_v26 = vsel %vm755_vm9, %v4139_v11, %v4143_v39 }
 0x5a2   :  { %v4165_v43 = vmul.f32 %v4157_v26, %v12309_v40  ;;  %v4145_v31 = vpop.permute.xlu0 %4144  ;;  %4426 = vrot.lane.b32.xlu1 %v9681_v30, %s6897_s11 }
 0x5a3   :  { %v4154_v56 = vsel %vm755_vm9, %v4141_v62, %v4145_v31 }
 0x5a4   :  { %4428 = vrot.lane.b32.xlu0 %v9685_v3, %s6897_s11  ;;  %v4147_v1 = vpop.permute.xlu1 %4146  ;;  %v4169_v28 = vpack.c.bf16 %v4165_v43, %v4161_v21  ;;  %v4162_v12 = vmul.f32 %v4154_v56, %v12310_v29  ;;  %v12315_v43 = vld [vmem:[#allocation31_spill] sm:$0xff] }
 0x5a5   :  { %v4155_v61 = vsel %vm755_vm9, %v4143_v39, %v4147_v1  ;;  %v12314_v39 = vld [vmem:[#allocation33_spill] sm:$0xff] }
 0x5a6   :  { %v4149_v32 = vpop.permute.xlu0 %4148  ;;  %4430 = vrot.lane.b32.xlu1 %v9689_v58, %s6897_s11  ;;  %5949 = vmatprep.subr.bf16.mxu0 %v4169_v28  ;;  %v4166_v36 = vmul.f32 %v4155_v61, %v12310_v29  ;;  %s12629_s11 = smov 81  }
 0x5a7   :  { %v4152_v17 = vsel %vm755_vm9, %v4145_v31, %v4149_v32  ;;  %v4158_v47 = vsel %vm755_vm9, %v4149_v32, %v4137_v14 }
 0x5a8   :  { %4456 = vrot.lane.b32.xlu0 %v9661_v2, %s6898_s12  ;;  %v4151_v60 = vpop.permute.xlu1 %4150  ;;  %v4160_v24 = vmul.f32 %v4158_v47, %v12311_v15  ;;  %v4163_v4 = vmul.f32 %v4152_v17, %v12312_v8  ;;  %v4170_v45 = vpack.c.bf16 %v4166_v36, %v4162_v12 }
 0x5a9   :  { %v4153_v27 = vsel %vm755_vm9, %v4147_v1, %v4151_v60  ;;  %v4159_v38 = vsel %vm755_vm9, %v4151_v60, %v4139_v11  ;;  %v12316_v1 = vld [vmem:[#allocation32_spill] sm:$0xff]  ;;  %vm12330_vm9 = vmmov %vm12329_vm8 }
 0x5aa   :  { %v4164_v59 = vmul.f32 %v4159_v38, %v12311_v15  ;;  %v4167_v41 = vmul.f32 %v4153_v27, %v12312_v8  ;;  %v4177_v35 = vpop.permute.xlu0 %4176  ;;  %4458 = vrot.lane.b32.xlu1 %v9665_v6, %s6898_s12  ;;  %v12319_v8 = vld [vmem:[#allocation34_spill] sm:$0xff] }
 0x5ac   :  { %v4168_v42 = vpack.c.bf16 %v4164_v59, %v4160_v24  ;;  %4460 = vrot.lane.b32.xlu0 %v9669_v46, %s6898_s12  ;;  %v4179_v9 = vpop.permute.xlu1 %4178  ;;  %v4171_v50 = vpack.c.bf16 %v4167_v41, %v4163_v4 }
 0x5ae   :  { %v4181_v48 = vpop.permute.xlu0 %4180  ;;  %4462 = vrot.lane.b32.xlu1 %v9673_v25, %s6898_s12  ;;  %5950 = vmatpush1.bf16.msra.mxu0 %v4168_v42 }
 0x5af   :  { %v4196_v34 = vsel %vm817_vm10, %v4177_v35, %v4181_v48  ;;  %6113 = vmatprep.subr.bf16.mxu1 %v4171_v50 }
 0x5b0   :  { %6114 = vmatpush1.bf16.msra.mxu1 %v4170_v45  ;;  %4464 = vrot.lane.b32.xlu0 %v9677_v20, %s6898_s12  ;;  %v4183_v49 = vpop.permute.xlu1 %4182  ;;  %v4201_v19 = vmul.f32 %v4196_v34, %v12313_v13 }
 0x5b1   :  { %v4197_v52 = vsel %vm817_vm10, %v4179_v9, %v4183_v49 }
 0x5b2   :  { %v4205_v55 = vmul.f32 %v4197_v52, %v12313_v13  ;;  %v4185_v14 = vpop.permute.xlu0 %4184  ;;  %4466 = vrot.lane.b32.xlu1 %v9681_v30, %s6898_s12 }
 0x5b3   :  { %v4194_v5 = vsel %vm817_vm10, %v4181_v48, %v4185_v14 }
 0x5b4   :  { %4468 = vrot.lane.b32.xlu0 %v9685_v3, %s6898_s12  ;;  %v4187_v57 = vpop.permute.xlu1 %4186  ;;  %v4209_v33 = vpack.c.bf16 %v4205_v55, %v4201_v19  ;;  %v4202_v47 = vmul.f32 %v4194_v5, %v12314_v39  ;;  %v12327_v55 = vld [vmem:[#allocation35_spill] sm:$0xff] }
 0x5b5   :  { %v4195_v11 = vsel %vm817_vm10, %v4183_v49, %v4187_v57  ;;  %v12324_v49 = vld [vmem:[#allocation37_spill] sm:$0xff] }
 0x5b6   :  { %v4189_v0 = vpop.permute.xlu0 %4188  ;;  %4470 = vrot.lane.b32.xlu1 %v9689_v58, %s6898_s12  ;;  %5951 = vmatprep.subr.bf16.mxu0 %v4209_v33  ;;  %v4206_v26 = vmul.f32 %v4195_v11, %v12314_v39  ;;  %s12642_s12 = smov 80  }
 0x5b7   :  { %v4192_v23 = vsel %vm817_vm10, %v4185_v14, %v4189_v0  ;;  %v4198_v37 = vsel %vm817_vm10, %v4189_v0, %v4177_v35 }
 0x5b8   :  { %4496 = vrot.lane.b32.xlu0 %v9661_v2, %s6899_s13  ;;  %v4191_v62 = vpop.permute.xlu1 %4190  ;;  %v4200_v31 = vmul.f32 %v4198_v37, %v12315_v43  ;;  %v4203_v28 = vmul.f32 %v4192_v23, %v12316_v1  ;;  %v4210_v36 = vpack.c.bf16 %v4206_v26, %v4202_v47 }
 0x5b9   :  { %v4193_v40 = vsel %vm817_vm10, %v4187_v57, %v4191_v62  ;;  %v4199_v21 = vsel %vm817_vm10, %v4191_v62, %v4179_v9  ;;  %v12328_v57 = vld [vmem:[#allocation36_spill] sm:$0xff]  ;;  %vm12332_vm10 = vmmov %vm12329_vm8 }
 0x5ba   :  { %v4204_v61 = vmul.f32 %v4199_v21, %v12315_v43  ;;  %v4207_v32 = vmul.f32 %v4193_v40, %v12316_v1  ;;  %v4217_v17 = vpop.permute.xlu0 %4216  ;;  %4498 = vrot.lane.b32.xlu1 %v9665_v6, %s6899_s13  ;;  %v12331_v1 = vld [vmem:[#allocation38_spill] sm:$0xff] }
 0x5bc   :  { %v4208_v60 = vpack.c.bf16 %v4204_v61, %v4200_v31  ;;  %4500 = vrot.lane.b32.xlu0 %v9669_v46, %s6899_s13  ;;  %v4219_v56 = vpop.permute.xlu1 %4218  ;;  %v4211_v29 = vpack.c.bf16 %v4207_v32, %v4203_v28 }
 0x5be   :  { %v4221_v27 = vpop.permute.xlu0 %4220  ;;  %4502 = vrot.lane.b32.xlu1 %v9673_v25, %s6899_s13  ;;  %5952 = vmatpush1.bf16.msra.mxu0 %v4208_v60 }
 0x5bf   :  { %v4236_v38 = vsel %vm12317_vm0, %v4217_v17, %v4221_v27  ;;  %6115 = vmatprep.subr.bf16.mxu1 %v4211_v29  ;;  %vm12341_vm0 = vcmp.lt.s32.totalorder %v7159_v10, 29 }
 0x5c0   :  { %6116 = vmatpush1.bf16.msra.mxu1 %v4210_v36  ;;  %4504 = vrot.lane.b32.xlu0 %v9677_v20, %s6899_s13  ;;  %v4223_v15 = vpop.permute.xlu1 %4222  ;;  %v4241_v4 = vmul.f32 %v4236_v38, %v12319_v8 }
 0x5c1   :  { %v4237_v24 = vsel %vm12318_vm1, %v4219_v56, %v4223_v15  ;;  %vm12342_vm1 = vmmov %vm12341_vm0 }
 0x5c2   :  { %v4245_v59 = vmul.f32 %v4237_v24, %v12319_v8  ;;  %v4225_v41 = vpop.permute.xlu0 %4224  ;;  %4506 = vrot.lane.b32.xlu1 %v9681_v30, %s6899_s13 }
 0x5c3   :  { %v4234_v34 = vsel %vm12323_vm5, %v4221_v27, %v4225_v41  ;;  %vm12347_vm5 = vmmov %vm12341_vm0 }
 0x5c4   :  { %4508 = vrot.lane.b32.xlu0 %v9685_v3, %s6899_s13  ;;  %v4227_v35 = vpop.permute.xlu1 %4226  ;;  %v4249_v12 = vpack.c.bf16 %v4245_v59, %v4241_v4  ;;  %v4242_v37 = vmul.f32 %v4234_v34, %v12324_v49  ;;  %v12339_v59 = vld [vmem:[#allocation39_spill] sm:$0xff] }
 0x5c5   :  { %v4235_v42 = vsel %vm12320_vm2, %v4223_v15, %v4227_v35  ;;  %v12336_v15 = vld [vmem:[#allocation41_spill] sm:$0xff]  ;;  %vm12344_vm2 = vmmov %vm12341_vm0 }
 0x5c6   :  { %v4229_v9 = vpop.permute.xlu0 %4228  ;;  %4510 = vrot.lane.b32.xlu1 %v9689_v58, %s6899_s13  ;;  %5953 = vmatprep.subr.bf16.mxu0 %v4249_v12  ;;  %v4246_v52 = vmul.f32 %v4235_v42, %v12324_v49  ;;  %s12655_s13 = smov 79  }
 0x5c7   :  { %v4232_v50 = vsel %vm12321_vm3, %v4225_v41, %v4229_v9  ;;  %v4238_v45 = vsel %vm12322_vm4, %v4229_v9, %v4217_v17  ;;  %vm12345_vm3 = vmmov %vm12341_vm0 }
 0x5c8   :  { %4536 = vrot.lane.b32.xlu0 %v9661_v2, %s6900_s14  ;;  %v4231_v48 = vpop.permute.xlu1 %4230  ;;  %v4240_v14 = vmul.f32 %v4238_v45, %v12327_v55  ;;  %v4243_v33 = vmul.f32 %v4232_v50, %v12328_v57  ;;  %v4250_v26 = vpack.c.bf16 %v4246_v52, %v4242_v37  ;;  %vm12346_vm4 = vmmov %vm12341_vm0 }
 0x5c9   :  { %v4233_v13 = vsel %vm12325_vm6, %v4227_v35, %v4231_v48  ;;  %v4239_v19 = vsel %vm12326_vm7, %v4231_v48, %v4219_v56  ;;  %v12340_v35 = vld [vmem:[#allocation40_spill] sm:$0xff]  ;;  %vm12349_vm6 = vmmov %vm12341_vm0 }
 0x5ca   :  { %v4244_v11 = vmul.f32 %v4239_v19, %v12327_v55  ;;  %v4247_v0 = vmul.f32 %v4233_v13, %v12328_v57  ;;  %v4257_v23 = vpop.permute.xlu0 %4256  ;;  %4538 = vrot.lane.b32.xlu1 %v9665_v6, %s6900_s14  ;;  %v12343_v57 = vld [vmem:[#allocation42_spill] sm:$0xff]  ;;  %vm12350_vm7 = vmmov %vm12341_vm0 }
 0x5cc   :  { %v4248_v62 = vpack.c.bf16 %v4244_v11, %v4240_v14  ;;  %4540 = vrot.lane.b32.xlu0 %v9669_v46, %s6900_s14  ;;  %v4259_v5 = vpop.permute.xlu1 %4258  ;;  %v4251_v39 = vpack.c.bf16 %v4247_v0, %v4243_v33 }
 0x5ce   :  { %v4261_v40 = vpop.permute.xlu0 %4260  ;;  %4542 = vrot.lane.b32.xlu1 %v9673_v25, %s6900_s14  ;;  %5954 = vmatpush1.bf16.msra.mxu0 %v4248_v62 }
 0x5cf   :  { %v4276_v21 = vsel %vm12329_vm8, %v4257_v23, %v4261_v40  ;;  %6117 = vmatprep.subr.bf16.mxu1 %v4251_v39  ;;  %vm12353_vm8 = vcmp.lt.s32.totalorder %v7159_v10, 19 }
 0x5d0   :  { %6118 = vmatpush1.bf16.msra.mxu1 %v4250_v26  ;;  %4544 = vrot.lane.b32.xlu0 %v9677_v20, %s6900_s14  ;;  %v4263_v43 = vpop.permute.xlu1 %4262  ;;  %v4281_v28 = vmul.f32 %v4276_v21, %v12331_v1 }
 0x5d1   :  { %v4277_v31 = vsel %vm12330_vm9, %v4259_v5, %v4263_v43  ;;  %vm12354_vm9 = vmmov %vm12353_vm8 }
 0x5d2   :  { %v4285_v61 = vmul.f32 %v4277_v31, %v12331_v1  ;;  %v4265_v32 = vpop.permute.xlu0 %4264  ;;  %4546 = vrot.lane.b32.xlu1 %v9681_v30, %s6900_s14 }
 0x5d3   :  { %v4274_v38 = vsel %vm12335_vm13, %v4261_v40, %v4265_v32  ;;  %vm12359_vm13 = vmmov %vm12353_vm8 }
 0x5d4   :  { %4548 = vrot.lane.b32.xlu0 %v9685_v3, %s6900_s14  ;;  %v4267_v17 = vpop.permute.xlu1 %4266  ;;  %v4289_v47 = vpack.c.bf16 %v4285_v61, %v4281_v28  ;;  %v4282_v45 = vmul.f32 %v4274_v38, %v12336_v15  ;;  %v12351_v61 = vld [vmem:[#allocation43_spill] sm:$0xff] }
 0x5d5   :  { %v4275_v60 = vsel %vm12332_vm10, %v4263_v43, %v4267_v17  ;;  %v12348_v43 = vld [vmem:[#allocation45_spill] sm:$0xff]  ;;  %vm12356_vm10 = vmmov %vm12353_vm8 }
 0x5d6   :  { %v4269_v56 = vpop.permute.xlu0 %4268  ;;  %4550 = vrot.lane.b32.xlu1 %v9689_v58, %s6900_s14  ;;  %5955 = vmatprep.subr.bf16.mxu0 %v4289_v47  ;;  %v4286_v24 = vmul.f32 %v4275_v60, %v12336_v15  ;;  %s12668_s14 = smov 78  }
 0x5d7   :  { %v4272_v29 = vsel %vm12333_vm11, %v4265_v32, %v4269_v56  ;;  %v4278_v36 = vsel %vm12334_vm15, %v4269_v56, %v4257_v23  ;;  %vm12357_vm11 = vmmov %vm12353_vm8 }
 0x5d8   :  { %4576 = vrot.lane.b32.xlu0 %v9661_v2, %s6901_s15  ;;  %v4271_v27 = vpop.permute.xlu1 %4270  ;;  %v4280_v41 = vmul.f32 %v4278_v36, %v12339_v59  ;;  %v4283_v12 = vmul.f32 %v4272_v29, %v12340_v35  ;;  %v4290_v52 = vpack.c.bf16 %v4286_v24, %v4282_v45  ;;  %vm12358_vm15 = vmmov %vm12353_vm8 }
 0x5d9   :  { %v4273_v8 = vsel %vm12337_vm14, %v4267_v17, %v4271_v27  ;;  %v4279_v4 = vsel %vm12338_vm12, %v4271_v27, %v4259_v5  ;;  %v12352_v17 = vld [vmem:[#allocation44_spill] sm:$0xff]  ;;  %vm12361_vm14 = vmmov %vm12353_vm8 }
 0x5da   :  { %v4284_v42 = vmul.f32 %v4279_v4, %v12339_v59  ;;  %v4287_v9 = vmul.f32 %v4273_v8, %v12340_v35  ;;  %v4297_v50 = vpop.permute.xlu0 %4296  ;;  %4578 = vrot.lane.b32.xlu1 %v9665_v6, %s6901_s15  ;;  %v12355_v35 = vld [vmem:[#allocation46_spill] sm:$0xff]  ;;  %vm12362_vm12 = vmmov %vm12353_vm8 }
 0x5dc   :  { %v4288_v48 = vpack.c.bf16 %v4284_v42, %v4280_v41  ;;  %4580 = vrot.lane.b32.xlu0 %v9669_v46, %s6901_s15  ;;  %v4299_v34 = vpop.permute.xlu1 %4298  ;;  %v4291_v49 = vpack.c.bf16 %v4287_v9, %v4283_v12 }
 0x5de   :  { %v4301_v13 = vpop.permute.xlu0 %4300  ;;  %4582 = vrot.lane.b32.xlu1 %v9673_v25, %s6901_s15  ;;  %5956 = vmatpush1.bf16.msra.mxu0 %v4288_v48 }
 0x5df   :  { %v4316_v19 = vsel %vm12341_vm0, %v4297_v50, %v4301_v13  ;;  %6119 = vmatprep.subr.bf16.mxu1 %v4291_v49  ;;  %vm12365_vm0 = vcmp.lt.s32.totalorder %v7159_v10, 18 }
 0x5e0   :  { %6120 = vmatpush1.bf16.msra.mxu1 %v4290_v52  ;;  %4584 = vrot.lane.b32.xlu0 %v9677_v20, %s6901_s15  ;;  %v4303_v55 = vpop.permute.xlu1 %4302  ;;  %v4321_v33 = vmul.f32 %v4316_v19, %v12343_v57 }
 0x5e1   :  { %v4317_v14 = vsel %vm12342_vm1, %v4299_v34, %v4303_v55  ;;  %vm12366_vm1 = vmmov %vm12365_vm0 }
 0x5e2   :  { %v4325_v11 = vmul.f32 %v4317_v14, %v12343_v57  ;;  %v4305_v0 = vpop.permute.xlu0 %4304  ;;  %4586 = vrot.lane.b32.xlu1 %v9681_v30, %s6901_s15 }
 0x5e3   :  { %v4314_v21 = vsel %vm12347_vm5, %v4301_v13, %v4305_v0  ;;  %vm12371_vm5 = vmmov %vm12365_vm0 }
 0x5e4   :  { %4588 = vrot.lane.b32.xlu0 %v9685_v3, %s6901_s15  ;;  %v4307_v23 = vpop.permute.xlu1 %4306  ;;  %v4329_v37 = vpack.c.bf16 %v4325_v11, %v4321_v33  ;;  %v4322_v36 = vmul.f32 %v4314_v21, %v12348_v43  ;;  %v12363_v11 = vld [vmem:[#allocation47_spill] sm:$0xff] }
 0x5e5   :  { %v4315_v62 = vsel %vm12344_vm2, %v4303_v55, %v4307_v23  ;;  %v12360_v55 = vld [vmem:[#allocation49_spill] sm:$0xff]  ;;  %vm12368_vm2 = vmmov %vm12365_vm0 }
 0x5e6   :  { %v4309_v5 = vpop.permute.xlu0 %4308  ;;  %4590 = vrot.lane.b32.xlu1 %v9689_v58, %s6901_s15  ;;  %5957 = vmatprep.subr.bf16.mxu0 %v4329_v37  ;;  %v4326_v31 = vmul.f32 %v4315_v62, %v12348_v43  ;;  %s6930_s15 = smov [#allocation12]  }
 0x5e7   :  { %v4312_v39 = vsel %vm12345_vm3, %v4305_v0, %v4309_v5  ;;  %v4318_v26 = vsel %vm12346_vm4, %v4309_v5, %v4297_v50  ;;  %vm12369_vm3 = vmmov %vm12365_vm0 }
 0x5e8   :  { %4616 = vrot.lane.b32.xlu0 %v9661_v2, %s6902_s16  ;;  %v4311_v40 = vpop.permute.xlu1 %4310  ;;  %v4320_v32 = vmul.f32 %v4318_v26, %v12351_v61  ;;  %v4323_v47 = vmul.f32 %v4312_v39, %v12352_v17  ;;  %v4330_v24 = vpack.c.bf16 %v4326_v31, %v4322_v36  ;;  %vm12370_vm4 = vmmov %vm12365_vm0 }
 0x5e9   :  { %v4313_v1 = vsel %vm12349_vm6, %v4307_v23, %v4311_v40  ;;  %v4319_v28 = vsel %vm12350_vm7, %v4311_v40, %v4299_v34  ;;  %v12364_v23 = vld [vmem:[#allocation48_spill] sm:$0xff]  ;;  %vm12373_vm6 = vmmov %vm12365_vm0 }
 0x5ea   :  { %v4324_v60 = vmul.f32 %v4319_v28, %v12351_v61  ;;  %v4327_v56 = vmul.f32 %v4313_v1, %v12352_v17  ;;  %v4337_v29 = vpop.permute.xlu0 %4336  ;;  %4618 = vrot.lane.b32.xlu1 %v9665_v6, %s6902_s16  ;;  %v12367_v17 = vld [vmem:[#allocation50_spill] sm:$0xff]  ;;  %vm12374_vm7 = vmmov %vm12365_vm0 }
 0x5ec   :  { %v4328_v27 = vpack.c.bf16 %v4324_v60, %v4320_v32  ;;  %4620 = vrot.lane.b32.xlu0 %v9669_v46, %s6902_s16  ;;  %v4339_v38 = vpop.permute.xlu1 %4338  ;;  %v4331_v15 = vpack.c.bf16 %v4327_v56, %v4323_v47 }
 0x5ee   :  { %v4341_v8 = vpop.permute.xlu0 %4340  ;;  %4622 = vrot.lane.b32.xlu1 %v9673_v25, %s6902_s16  ;;  %5958 = vmatpush1.bf16.msra.mxu0 %v4328_v27 }
 0x5ef   :  { %v4356_v4 = vsel %vm12353_vm8, %v4337_v29, %v4341_v8  ;;  %6121 = vmatprep.subr.bf16.mxu1 %v4331_v15  ;;  %vm12377_vm8 = vcmp.lt.s32.totalorder %v7159_v10, 17 }
 0x5f0   :  { %6122 = vmatpush1.bf16.msra.mxu1 %v4330_v24  ;;  %4624 = vrot.lane.b32.xlu0 %v9677_v20, %s6902_s16  ;;  %v4343_v59 = vpop.permute.xlu1 %4342  ;;  %v4361_v12 = vmul.f32 %v4356_v4, %v12355_v35 }
 0x5f1   :  { %v4357_v41 = vsel %vm12354_vm9, %v4339_v38, %v4343_v59  ;;  %vm12378_vm9 = vmmov %vm12377_vm8 }
 0x5f2   :  { %v4365_v42 = vmul.f32 %v4357_v41, %v12355_v35  ;;  %v4345_v9 = vpop.permute.xlu0 %4344  ;;  %4626 = vrot.lane.b32.xlu1 %v9681_v30, %s6902_s16 }
 0x5f3   :  { %v4354_v19 = vsel %vm12359_vm13, %v4341_v8, %v4345_v9  ;;  %vm12383_vm13 = vmmov %vm12377_vm8 }
 0x5f4   :  { %4628 = vrot.lane.b32.xlu0 %v9685_v3, %s6902_s16  ;;  %v4347_v50 = vpop.permute.xlu1 %4346  ;;  %v4369_v45 = vpack.c.bf16 %v4365_v42, %v4361_v12  ;;  %v4362_v26 = vmul.f32 %v4354_v19, %v12360_v55  ;;  %v12375_v42 = vld [vmem:[#allocation51_spill] sm:$0xff] }
 0x5f5   :  { %v4355_v48 = vsel %vm12356_vm10, %v4343_v59, %v4347_v50  ;;  %v12372_v59 = vld [vmem:[#allocation53_spill] sm:$0xff]  ;;  %vm12380_vm10 = vmmov %vm12377_vm8 }
 0x5f6   :  { %v4349_v34 = vpop.permute.xlu0 %4348  ;;  %4630 = vrot.lane.b32.xlu1 %v9689_v58, %s6902_s16  ;;  %5959 = vmatprep.subr.bf16.mxu0 %v4369_v45  ;;  %v4366_v14 = vmul.f32 %v4355_v48, %v12360_v55  ;;  %s6478_s16 = sshll.u32 %s6930_s15, 4  ;;  %s6479_s16 = int_to_ptr.vmem [resolvable:$true] %s6478_s16 }
 0x5f7   :  { %v4352_v49 = vsel %vm12357_vm11, %v4345_v9, %v4349_v34  ;;  %v4358_v52 = vsel %vm12358_vm15, %v4349_v34, %v4337_v29  ;;  %vm12381_vm11 = vmmov %vm12377_vm8  ;;  %p6803_p5 = scmp.lt.s32.totalorder %s6479_s16, %s6479_s16 }
 0x5f8   :  { %4656 = vrot.lane.b32.xlu0 %v9661_v2, %s6903_s17  ;;  %v4351_v13 = vpop.permute.xlu1 %4350  ;;  %v4360_v0 = vmul.f32 %v4358_v52, %v12363_v11  ;;  %v4363_v37 = vmul.f32 %v4352_v49, %v12364_v23  ;;  %v4370_v31 = vpack.c.bf16 %v4366_v14, %v4362_v26  ;;  %v6515_v14 = vcombine.low %v10152_v51, %v10152_v51  ;;  %v12379_v51 = vld [vmem:[#allocation54_spill] sm:$0xff]  ;;  %vm12382_vm15 = vmmov %vm12377_vm8 }
 0x5f9   :  { %v4353_v57 = vsel %vm12361_vm14, %v4347_v50, %v4351_v13  ;;  %v4359_v33 = vsel %vm12362_vm12, %v4351_v13, %v4339_v38  ;;  %v12376_v50 = vld [vmem:[#allocation52_spill] sm:$0xff]  ;;  %vm12385_vm14 = vmmov %vm12377_vm8 }
 0x5fa   :  { %v4364_v62 = vmul.f32 %v4359_v33, %v12363_v11  ;;  %v4367_v5 = vmul.f32 %v4353_v57, %v12364_v23  ;;  %v4377_v39 = vpop.permute.xlu0 %4376  ;;  %4658 = vrot.lane.b32.xlu1 %v9665_v6, %s6903_s17  ;;  %vm12386_vm12 = vmmov %vm12377_vm8 }
 0x5fc   :  { %v4368_v40 = vpack.c.bf16 %v4364_v62, %v4360_v0  ;;  %4660 = vrot.lane.b32.xlu0 %v9669_v46, %s6903_s17  ;;  %v4379_v21 = vpop.permute.xlu1 %4378  ;;  %v4371_v43 = vpack.c.bf16 %v4367_v5, %v4363_v37 }
 0x5fe   :  { %v4381_v1 = vpop.permute.xlu0 %4380  ;;  %4662 = vrot.lane.b32.xlu1 %v9673_v25, %s6903_s17  ;;  %5960 = vmatpush1.bf16.msra.mxu0 %v4368_v40 }
 0x5ff   :  { %v4396_v28 = vsel %vm12365_vm0, %v4377_v39, %v4381_v1  ;;  %6123 = vmatprep.subr.bf16.mxu1 %v4371_v43  ;;  %vm12389_vm0 = vcmp.lt.s32.totalorder %v7159_v10, 16 }
 0x600   :  { %6124 = vmatpush1.bf16.msra.mxu1 %v4370_v31  ;;  %4664 = vrot.lane.b32.xlu0 %v9677_v20, %s6903_s17  ;;  %v4383_v61 = vpop.permute.xlu1 %4382  ;;  %v4401_v47 = vmul.f32 %v4396_v28, %v12367_v17 }
 0x601   :  { %v4397_v32 = vsel %vm12366_vm1, %v4379_v21, %v4383_v61  ;;  %vm12390_vm1 = vmmov %vm12389_vm0 }
 0x602   :  { %v4405_v60 = vmul.f32 %v4397_v32, %v12367_v17  ;;  %v4385_v56 = vpop.permute.xlu0 %4384  ;;  %4666 = vrot.lane.b32.xlu1 %v9681_v30, %s6903_s17 }
 0x603   :  { %v4394_v4 = vsel %vm12371_vm5, %v4381_v1, %v4385_v56  ;;  %vm12395_vm5 = vmmov %vm12389_vm0 }
 0x604   :  { %4668 = vrot.lane.b32.xlu0 %v9685_v3, %s6903_s17  ;;  %v4387_v29 = vpop.permute.xlu1 %4386  ;;  %v4409_v36 = vpack.c.bf16 %v4405_v60, %v4401_v47  ;;  %v4402_v52 = vmul.f32 %v4394_v4, %v12372_v59  ;;  %v12387_v60 = vld [vmem:[#allocation55_spill] sm:$0xff] }
 0x605   :  { %v4395_v27 = vsel %vm12368_vm2, %v4383_v61, %v4387_v29  ;;  %v12384_v61 = vld [vmem:[#allocation57_spill] sm:$0xff]  ;;  %vm12392_vm2 = vmmov %vm12389_vm0 }
 0x606   :  { %v4389_v38 = vpop.permute.xlu0 %4388  ;;  %4670 = vrot.lane.b32.xlu1 %v9689_v58, %s6903_s17  ;;  %5961 = vmatprep.subr.bf16.mxu0 %v4409_v36  ;;  %v4406_v41 = vmul.f32 %v4395_v27, %v12372_v59  ;;  %s6798_s17 = scalar_lea.vmem %s6479_s16, 256 }
 0x607   :  { %v4392_v15 = vsel %vm12369_vm3, %v4385_v56, %v4389_v38  ;;  %v4398_v24 = vsel %vm12370_vm4, %v4389_v38, %v4377_v39  ;;  %vm12393_vm3 = vmmov %vm12389_vm0  ;;  %p6799_p4 = scmp.ne.s32.totalorder %s6479_s16, %s6798_s17  ;;  %p6804_p6 = scmp.lt.s32.totalorder %s6798_s17, %s6798_s17 }
 0x608   :  { %4696 = vrot.lane.b32.xlu0 %v9661_v2, %s6904_s18  ;;  %v4391_v8 = vpop.permute.xlu1 %4390  ;;  %v4400_v9 = vmul.f32 %v4398_v24, %v12375_v42  ;;  %v4403_v45 = vmul.f32 %v4392_v15, %v12376_v50  ;;  %v4410_v57 = vpack.c.bf16 %v4406_v41, %v4402_v52  ;;  %vm12394_vm4 = vmmov %vm12389_vm0 }
 0x609   :  { %v4393_v35 = vsel %vm12373_vm6, %v4387_v29, %v4391_v8  ;;  %v4399_v12 = vsel %vm12374_vm7, %v4391_v8, %v4379_v21  ;;  %v12388_v29 = vld [vmem:[#allocation56_spill] sm:$0xff]  ;;  %vm12397_vm6 = vmmov %vm12389_vm0  ;;  %p6805_p7 = por %p6804_p6, %p6803_p5 }
 0x60a   :  { %v4404_v48 = vmul.f32 %v4399_v12, %v12375_v42  ;;  %v4407_v34 = vmul.f32 %v4393_v35, %v12376_v50  ;;  %v4417_v49 = vpop.permute.xlu0 %4416  ;;  %4698 = vrot.lane.b32.xlu1 %v9665_v6, %s6904_s18  ;;  %v12391_v50 = vld [vmem:[#allocation58_spill] sm:$0xff]  ;;  %vm12398_vm7 = vmmov %vm12389_vm0 }
 0x60b   :  { %p6806_p8 = pnand %p6805_p7, %p6799_p4 }
 0x60c   :  { %v4408_v13 = vpack.c.bf16 %v4404_v48, %v4400_v9  ;;  %4700 = vrot.lane.b32.xlu0 %v9669_v46, %s6904_s18  ;;  %v4419_v19 = vpop.permute.xlu1 %4418  ;;  %v4411_v55 = vpack.c.bf16 %v4407_v34, %v4403_v45 }
 0x60e   :  { %v4421_v33 = vpop.permute.xlu0 %4420  ;;  %4702 = vrot.lane.b32.xlu1 %v9673_v25, %s6904_s18  ;;  %5962 = vmatpush1.bf16.msra.mxu0 %v4408_v13 }
 0x60f   :  { %v4436_v11 = vsel %vm12377_vm8, %v4417_v49, %v4421_v33  ;;  %6125 = vmatprep.subr.bf16.mxu1 %v4411_v55  ;;  %vm12401_vm8 = vcmp.lt.s32.totalorder %v7159_v10, 15 }
 0x610   :  { %6126 = vmatpush1.bf16.msra.mxu1 %v4410_v57  ;;  %4704 = vrot.lane.b32.xlu0 %v9677_v20, %s6904_s18  ;;  %v4423_v0 = vpop.permute.xlu1 %4422  ;;  %v4441_v37 = vmul.f32 %v4436_v11, %v12379_v51  ;;  %v12396_v11 = vld [vmem:[#allocation61_spill] sm:$0xff] }
 0x611   :  { %v4437_v23 = vsel %vm12378_vm9, %v4419_v19, %v4423_v0  ;;  %5964 = vmatmul.mubr.bf16.vlgmr.msra.gmra.mrb[4].mxu0 %v6515_v14  ;;  %vm12402_vm9 = vmmov %vm12401_vm8 }
 0x612   :  { %v4445_v62 = vmul.f32 %v4437_v23, %v12379_v51  ;;  %v4425_v5 = vpop.permute.xlu0 %4424  ;;  %4706 = vrot.lane.b32.xlu1 %v9681_v30, %s6904_s18 }
 0x613   :  { %6128 = vmatmul.mubr.bf16.vlgmr.msra.gmra.mrb[4].mxu1 %v6515_v14  ;;  %v4434_v28 = vsel %vm12383_vm13, %v4421_v33, %v4425_v5  ;;  %vm12407_vm13 = vmmov %vm12401_vm8 }
 0x614   :  { %4708 = vrot.lane.b32.xlu0 %v9685_v3, %s6904_s18  ;;  %v4427_v39 = vpop.permute.xlu1 %4426  ;;  %v4449_v26 = vpack.c.bf16 %v4445_v62, %v4441_v37  ;;  %v4442_v24 = vmul.f32 %v4434_v28, %v12384_v61  ;;  %v12399_v37 = vld [vmem:[#allocation59_spill] sm:$0xff] }
 0x615   :  { %v4435_v40 = vsel %vm12380_vm10, %v4423_v0, %v4427_v39  ;;  %vm12404_vm10 = vmmov %vm12401_vm8 }
 0x616   :  { %v4429_v21 = vpop.permute.xlu0 %4428  ;;  %4710 = vrot.lane.b32.xlu1 %v9689_v58, %s6904_s18  ;;  %5972 = vmatprep.subr.bf16.mxu0 %v4449_v26  ;;  %v4446_v32 = vmul.f32 %v4435_v40, %v12384_v61 }
 0x617   :  { %v4432_v43 = vsel %vm12381_vm11, %v4425_v5, %v4429_v21  ;;  %v4438_v31 = vsel %vm12382_vm15, %v4429_v21, %v4417_v49  ;;  %v12400_v5 = vld [vmem:[#allocation60_spill] sm:$0xff]  ;;  %vm12405_vm11 = vmmov %vm12401_vm8 }
 0x618   :  { %4744 = vrot.lane.b32.xlu0 %v9661_v2, %s6905_s19  ;;  %v4431_v1 = vpop.permute.xlu1 %4430  ;;  %v4440_v56 = vmul.f32 %v4438_v31, %v12387_v60  ;;  %v4443_v36 = vmul.f32 %v4432_v43, %v12388_v29  ;;  %v4450_v41 = vpack.c.bf16 %v4446_v32, %v4442_v24  ;;  %vm12406_vm15 = vmmov %vm12401_vm8 }
 0x619   :  { %v4433_v17 = vsel %vm12385_vm14, %v4427_v39, %v4431_v1  ;;  %v4439_v47 = vsel %vm12386_vm12, %v4431_v1, %v4419_v19  ;;  %vm12409_vm14 = vmmov %vm12401_vm8 }
 0x61a   :  { %v4444_v27 = vmul.f32 %v4439_v47, %v12387_v60  ;;  %v4447_v38 = vmul.f32 %v4433_v17, %v12388_v29  ;;  %v4457_v15 = vpop.permute.xlu0 %4456  ;;  %4746 = vrot.lane.b32.xlu1 %v9665_v6, %s6905_s19  ;;  %vm12410_vm12 = vmmov %vm12401_vm8 }
 0x61c   :  { %v4448_v8 = vpack.c.bf16 %v4444_v27, %v4440_v56  ;;  %4748 = vrot.lane.b32.xlu0 %v9669_v46, %s6905_s19  ;;  %v4459_v4 = vpop.permute.xlu1 %4458  ;;  %v4451_v59 = vpack.c.bf16 %v4447_v38, %v4443_v36  ;;  %v12403_v56 = vld [vmem:[#allocation62_spill] sm:$0xff] }
 0x61e   :  { %v4461_v35 = vpop.permute.xlu0 %4460  ;;  %4750 = vrot.lane.b32.xlu1 %v9673_v25, %s6905_s19  ;;  %5973 = vmatpush1.bf16.msra.mxu0 %v4448_v8 }
 0x61f   :  { %v4476_v12 = vsel %vm12389_vm0, %v4457_v15, %v4461_v35  ;;  %6136 = vmatprep.subr.bf16.mxu1 %v4451_v59  ;;  %vm12413_vm0 = vcmp.lt.s32.totalorder %v7159_v10, 14 }
 0x620   :  { %6137 = vmatpush1.bf16.msra.mxu1 %v4450_v41  ;;  %4752 = vrot.lane.b32.xlu0 %v9677_v20, %s6905_s19  ;;  %v4463_v42 = vpop.permute.xlu1 %4462  ;;  %v4481_v45 = vmul.f32 %v4476_v12, %v12391_v50  ;;  %v12408_v12 = vld [vmem:[#allocation65_spill] sm:$0xff] }
 0x621   :  { %v4477_v9 = vsel %vm12390_vm1, %v4459_v4, %v4463_v42  ;;  %vm12414_vm1 = vmmov %vm12413_vm0 }
 0x622   :  { %v4485_v48 = vmul.f32 %v4477_v9, %v12391_v50  ;;  %v4465_v34 = vpop.permute.xlu0 %4464  ;;  %4754 = vrot.lane.b32.xlu1 %v9681_v30, %s6905_s19 }
 0x623   :  { %v4474_v33 = vsel %vm12395_vm5, %v4461_v35, %v4465_v34  ;;  %vm12420_vm5 = vmmov %vm12413_vm0 }
 0x624   :  { %4756 = vrot.lane.b32.xlu0 %v9685_v3, %s6905_s19  ;;  %v4467_v49 = vpop.permute.xlu1 %4466  ;;  %v4489_v52 = vpack.c.bf16 %v4485_v48, %v4481_v45  ;;  %v4482_v43 = vmul.f32 %v4474_v33, %v12396_v11  ;;  %v12411_v45 = vld [vmem:[#allocation63_spill] sm:$0xff] }
 0x625   :  { %v4475_v13 = vsel %vm12392_vm2, %v4463_v42, %v4467_v49  ;;  %vm12416_vm2 = vmmov %vm12413_vm0 }
 0x626   :  { %v4469_v19 = vpop.permute.xlu0 %4468  ;;  %4758 = vrot.lane.b32.xlu1 %v9689_v58, %s6905_s19  ;;  %5974 = vmatprep.subr.bf16.mxu0 %v4489_v52  ;;  %v4486_v0 = vmul.f32 %v4475_v13, %v12396_v11 }
 0x627   :  { %v4472_v55 = vsel %vm12393_vm3, %v4465_v34, %v4469_v19  ;;  %v4478_v14 = vsel %vm12394_vm4, %v4469_v19, %v4457_v15  ;;  %v12412_v34 = vld [vmem:[#allocation64_spill] sm:$0xff]  ;;  %vm12417_vm3 = vmmov %vm12413_vm0 }
 0x628   :  { %4784 = vrot.lane.b32.xlu0 %v9661_v2, %s6906_s20  ;;  %v4471_v57 = vpop.permute.xlu1 %4470  ;;  %v4480_v62 = vmul.f32 %v4478_v14, %v12399_v37  ;;  %v4483_v39 = vmul.f32 %v4472_v55, %v12400_v5  ;;  %v4490_v61 = vpack.c.bf16 %v4486_v0, %v4482_v43  ;;  %vm12418_vm4 = vmmov %vm12413_vm0 }
 0x629   :  { %v4473_v23 = vsel %vm12397_vm6, %v4467_v49, %v4471_v57  ;;  %v4479_v51 = vsel %vm12398_vm7, %v4471_v57, %v4459_v4  ;;  %vm12422_vm6 = vmmov %vm12413_vm0 }
 0x62a   :  { %v4484_v26 = vmul.f32 %v4479_v51, %v12399_v37  ;;  %v4487_v40 = vmul.f32 %v4473_v23, %v12400_v5  ;;  %v4497_v21 = vpop.permute.xlu0 %4496  ;;  %4786 = vrot.lane.b32.xlu1 %v9665_v6, %s6906_s20  ;;  %vm12423_vm7 = vmmov %vm12413_vm0 }
 0x62c   :  { %v4488_v31 = vpack.c.bf16 %v4484_v26, %v4480_v62  ;;  %4788 = vrot.lane.b32.xlu0 %v9669_v46, %s6906_s20  ;;  %v4499_v1 = vpop.permute.xlu1 %4498  ;;  %v4491_v28 = vpack.c.bf16 %v4487_v40, %v4483_v39  ;;  %v12415_v62 = vld [vmem:[#allocation66_spill] sm:$0xff] }
 0x62e   :  { %v4501_v32 = vpop.permute.xlu0 %4500  ;;  %4790 = vrot.lane.b32.xlu1 %v9673_v25, %s6906_s20  ;;  %5975 = vmatpush1.bf16.msra.mxu0 %v4488_v31 }
 0x62f   :  { %v4516_v17 = vsel %vm12401_vm8, %v4497_v21, %v4501_v32  ;;  %6138 = vmatprep.subr.bf16.mxu1 %v4491_v28  ;;  %vm12426_vm8 = vcmp.lt.s32.totalorder %v7159_v10, 13 }
 0x630   :  { %6139 = vmatpush1.bf16.msra.mxu1 %v4490_v61  ;;  %4792 = vrot.lane.b32.xlu0 %v9677_v20, %s6906_s20  ;;  %v4503_v47 = vpop.permute.xlu1 %4502  ;;  %v4521_v29 = vmul.f32 %v4516_v17, %v12403_v56  ;;  %v12421_v17 = vld [vmem:[#allocation69_spill] sm:$0xff] }
 0x631   :  { %v4517_v60 = vsel %vm12402_vm9, %v4499_v1, %v4503_v47  ;;  %vm12427_vm9 = vmmov %vm12426_vm8 }
 0x632   :  { %v4525_v36 = vmul.f32 %v4517_v60, %v12403_v56  ;;  %v4505_v27 = vpop.permute.xlu0 %4504  ;;  %4794 = vrot.lane.b32.xlu1 %v9681_v30, %s6906_s20 }
 0x633   :  { %v4514_v35 = vsel %vm12407_vm13, %v4501_v32, %v4505_v27  ;;  %vm12433_vm13 = vmmov %vm12426_vm8 }
 0x634   :  { %4796 = vrot.lane.b32.xlu0 %v9685_v3, %s6906_s20  ;;  %v4507_v38 = vpop.permute.xlu1 %4506  ;;  %v4529_v15 = vpack.c.bf16 %v4525_v36, %v4521_v29  ;;  %v4522_v55 = vmul.f32 %v4514_v35, %v12408_v12  ;;  %v12424_v29 = vld [vmem:[#allocation67_spill] sm:$0xff] }
 0x635   :  { %v4515_v24 = vsel %vm12404_vm10, %v4503_v47, %v4507_v38  ;;  %vm12429_vm10 = vmmov %vm12426_vm8 }
 0x636   :  { %v4509_v8 = vpop.permute.xlu0 %4508  ;;  %4798 = vrot.lane.b32.xlu1 %v9689_v58, %s6906_s20  ;;  %5976 = vmatprep.subr.bf16.mxu0 %v4529_v15  ;;  %v4526_v42 = vmul.f32 %v4515_v24, %v12408_v12 }
 0x637   :  { %v4512_v4 = vsel %vm12405_vm11, %v4505_v27, %v4509_v8  ;;  %v4518_v59 = vsel %vm12406_vm15, %v4509_v8, %v4497_v21  ;;  %v12425_v27 = vld [vmem:[#allocation68_spill] sm:$0xff]  ;;  %vm12430_vm11 = vmmov %vm12426_vm8 }
 0x638   :  { %4824 = vrot.lane.b32.xlu0 %v9661_v2, %s6907_s2  ;;  %v4511_v41 = vpop.permute.xlu1 %4510  ;;  %v4520_v48 = vmul.f32 %v4518_v59, %v12411_v45  ;;  %v4523_v49 = vmul.f32 %v4512_v4, %v12412_v34  ;;  %v4530_v11 = vpack.c.bf16 %v4526_v42, %v4522_v55  ;;  %vm12431_vm15 = vmmov %vm12426_vm8 }
 0x639   :  { %v4513_v9 = vsel %vm12409_vm14, %v4507_v38, %v4511_v41  ;;  %v4519_v50 = vsel %vm12410_vm12, %v4511_v41, %v4499_v1  ;;  %vm12435_vm14 = vmmov %vm12426_vm8 }
 0x63a   :  { %v4524_v52 = vmul.f32 %v4519_v50, %v12411_v45  ;;  %v4527_v13 = vmul.f32 %v4513_v9, %v12412_v34  ;;  %v4537_v19 = vpop.permute.xlu0 %4536  ;;  %4826 = vrot.lane.b32.xlu1 %v9665_v6, %s6907_s2  ;;  %vm12436_vm12 = vmmov %vm12426_vm8 }
 0x63c   :  { %v4528_v14 = vpack.c.bf16 %v4524_v52, %v4520_v48  ;;  %4828 = vrot.lane.b32.xlu0 %v9669_v46, %s6907_s2  ;;  %v4539_v57 = vpop.permute.xlu1 %4538  ;;  %v4531_v33 = vpack.c.bf16 %v4527_v13, %v4523_v49  ;;  %v12428_v48 = vld [vmem:[#allocation70_spill] sm:$0xff] }
 0x63e   :  { %v4541_v0 = vpop.permute.xlu0 %4540  ;;  %4830 = vrot.lane.b32.xlu1 %v9673_v25, %s6907_s2  ;;  %5977 = vmatpush1.bf16.msra.mxu0 %v4528_v14 }
 0x63f   :  { %v4556_v23 = vsel %vm12413_vm0, %v4537_v19, %v4541_v0  ;;  %6140 = vmatprep.subr.bf16.mxu1 %v4531_v33  ;;  %vm12439_vm0 = vcmp.lt.s32.totalorder %v7159_v10, 3 }
 0x640   :  { %6141 = vmatpush1.bf16.msra.mxu1 %v4530_v11  ;;  %4832 = vrot.lane.b32.xlu0 %v9677_v20, %s6907_s2  ;;  %v4543_v51 = vpop.permute.xlu1 %4542  ;;  %v4561_v5 = vmul.f32 %v4556_v23, %v12415_v62  ;;  %v12434_v23 = vld [vmem:[#allocation73_spill] sm:$0xff] }
 0x641   :  { %v4557_v37 = vsel %vm12414_vm1, %v4539_v57, %v4543_v51  ;;  %vm12440_vm1 = vmmov %vm12439_vm0 }
 0x642   :  { %v4565_v39 = vmul.f32 %v4557_v37, %v12415_v62  ;;  %v4545_v26 = vpop.permute.xlu0 %4544  ;;  %4834 = vrot.lane.b32.xlu1 %v9681_v30, %s6907_s2 }
 0x643   :  { %v4554_v32 = vsel %vm12420_vm5, %v4541_v0, %v4545_v26  ;;  %vm12446_vm5 = vmmov %vm12439_vm0 }
 0x644   :  { %4836 = vrot.lane.b32.xlu0 %v9685_v3, %s6907_s2  ;;  %v4547_v40 = vpop.permute.xlu1 %4546  ;;  %v4569_v21 = vpack.c.bf16 %v4565_v39, %v4561_v5  ;;  %v4562_v4 = vmul.f32 %v4554_v32, %v12421_v17  ;;  %v12437_v5 = vld [vmem:[#allocation71_spill] sm:$0xff] }
 0x645   :  { %v4555_v43 = vsel %vm12416_vm2, %v4543_v51, %v4547_v40  ;;  %vm12442_vm2 = vmmov %vm12439_vm0 }
 0x646   :  { %v4549_v31 = vpop.permute.xlu0 %4548  ;;  %4838 = vrot.lane.b32.xlu1 %v9689_v58, %s6907_s2  ;;  %5978 = vmatprep.subr.bf16.mxu0 %v4569_v21  ;;  %v4566_v47 = vmul.f32 %v4555_v43, %v12421_v17 }
 0x647   :  { %v4552_v1 = vsel %vm12417_vm3, %v4545_v26, %v4549_v31  ;;  %v4558_v28 = vsel %vm12418_vm4, %v4549_v31, %v4537_v19  ;;  %v12438_v26 = vld [vmem:[#allocation72_spill] sm:$0xff]  ;;  %vm12443_vm3 = vmmov %vm12439_vm0 }
 0x648   :  { %4864 = vrot.lane.b32.xlu0 %v9661_v2, %s12419_s21  ;;  %v4551_v61 = vpop.permute.xlu1 %4550  ;;  %v4560_v36 = vmul.f32 %v4558_v28, %v12424_v29  ;;  %v4563_v38 = vmul.f32 %v4552_v1, %v12425_v27  ;;  %v4570_v12 = vpack.c.bf16 %v4566_v47, %v4562_v4  ;;  %vm12444_vm4 = vmmov %vm12439_vm0 }
 0x649   :  { %v4553_v60 = vsel %vm12422_vm6, %v4547_v40, %v4551_v61  ;;  %v4559_v56 = vsel %vm12423_vm7, %v4551_v61, %v4539_v57  ;;  %vm12448_vm6 = vmmov %vm12439_vm0 }
 0x64a   :  { %v4564_v15 = vmul.f32 %v4559_v56, %v12424_v29  ;;  %v4567_v24 = vmul.f32 %v4553_v60, %v12425_v27  ;;  %v4577_v8 = vpop.permute.xlu0 %4576  ;;  %4866 = vrot.lane.b32.xlu1 %v9665_v6, %s12419_s21  ;;  %vm12449_vm7 = vmmov %vm12439_vm0 }
 0x64c   :  { %v4568_v59 = vpack.c.bf16 %v4564_v15, %v4560_v36  ;;  %4868 = vrot.lane.b32.xlu0 %v9669_v46, %s12419_s21  ;;  %v4579_v41 = vpop.permute.xlu1 %4578  ;;  %v4571_v35 = vpack.c.bf16 %v4567_v24, %v4563_v38  ;;  %v12441_v36 = vld [vmem:[#allocation74_spill] sm:$0xff] }
 0x64e   :  { %v4581_v42 = vpop.permute.xlu0 %4580  ;;  %4870 = vrot.lane.b32.xlu1 %v9673_v25, %s12419_s21  ;;  %5979 = vmatpush1.bf16.msra.mxu0 %v4568_v59 }
 0x64f   :  { %v4596_v9 = vsel %vm12426_vm8, %v4577_v8, %v4581_v42  ;;  %6142 = vmatprep.subr.bf16.mxu1 %v4571_v35  ;;  %vm12452_vm8 = vcmp.lt.s32.totalorder %v7159_v10, 2 }
 0x650   :  { %6143 = vmatpush1.bf16.msra.mxu1 %v4570_v12  ;;  %4872 = vrot.lane.b32.xlu0 %v9677_v20, %s12419_s21  ;;  %v4583_v50 = vpop.permute.xlu1 %4582  ;;  %v4601_v34 = vmul.f32 %v4596_v9, %v12428_v48  ;;  %v12447_v9 = vld [vmem:[#allocation77_spill] sm:$0xff] }
 0x651   :  { %v4597_v45 = vsel %vm12427_vm9, %v4579_v41, %v4583_v50  ;;  %vm12453_vm9 = vmmov %vm12452_vm8 }
 0x652   :  { %v4605_v49 = vmul.f32 %v4597_v45, %v12428_v48  ;;  %v4585_v52 = vpop.permute.xlu0 %4584  ;;  %4874 = vrot.lane.b32.xlu1 %v9681_v30, %s12419_s21 }
 0x653   :  { %v4594_v0 = vsel %vm12433_vm13, %v4581_v42, %v4585_v52  ;;  %vm12459_vm13 = vmmov %vm12452_vm8 }
 0x654   :  { %4876 = vrot.lane.b32.xlu0 %v9685_v3, %s12419_s21  ;;  %v4587_v13 = vpop.permute.xlu1 %4586  ;;  %v4609_v19 = vpack.c.bf16 %v4605_v49, %v4601_v34  ;;  %v4602_v1 = vmul.f32 %v4594_v0, %v12434_v23  ;;  %v12450_v34 = vld [vmem:[#allocation75_spill] sm:$0xff] }
 0x655   :  { %v4595_v55 = vsel %vm12429_vm10, %v4583_v50, %v4587_v13  ;;  %vm12455_vm10 = vmmov %vm12452_vm8 }
 0x656   :  { %v4589_v14 = vpop.permute.xlu0 %4588  ;;  %4878 = vrot.lane.b32.xlu1 %v9689_v58, %s12419_s21  ;;  %5980 = vmatprep.subr.bf16.mxu0 %v4609_v19  ;;  %v4606_v51 = vmul.f32 %v4595_v55, %v12434_v23 }
 0x657   :  { %v4592_v57 = vsel %vm12430_vm11, %v4585_v52, %v4589_v14  ;;  %v4598_v33 = vsel %vm12431_vm15, %v4589_v14, %v4577_v8  ;;  %v12451_v52 = vld [vmem:[#allocation76_spill] sm:$0xff]  ;;  %vm12456_vm11 = vmmov %vm12452_vm8 }
 0x658   :  { %4904 = vrot.lane.b32.xlu0 %v9661_v2, %s12432_s23  ;;  %v4591_v11 = vpop.permute.xlu1 %4590  ;;  %v4600_v39 = vmul.f32 %v4598_v33, %v12437_v5  ;;  %v4603_v40 = vmul.f32 %v4592_v57, %v12438_v26  ;;  %v4610_v17 = vpack.c.bf16 %v4606_v51, %v4602_v1  ;;  %vm12457_vm15 = vmmov %vm12452_vm8 }
 0x659   :  { %v4593_v37 = vsel %vm12435_vm14, %v4587_v13, %v4591_v11  ;;  %v4599_v62 = vsel %vm12436_vm12, %v4591_v11, %v4579_v41  ;;  %vm12461_vm14 = vmmov %vm12452_vm8 }
 0x65a   :  { %v4604_v21 = vmul.f32 %v4599_v62, %v12437_v5  ;;  %v4607_v43 = vmul.f32 %v4593_v37, %v12438_v26  ;;  %v4617_v31 = vpop.permute.xlu0 %4616  ;;  %4906 = vrot.lane.b32.xlu1 %v9665_v6, %s12432_s23  ;;  %vm12462_vm12 = vmmov %vm12452_vm8 }
 0x65c   :  { %v4608_v28 = vpack.c.bf16 %v4604_v21, %v4600_v39  ;;  %4908 = vrot.lane.b32.xlu0 %v9669_v46, %s12432_s23  ;;  %v4619_v61 = vpop.permute.xlu1 %4618  ;;  %v4611_v32 = vpack.c.bf16 %v4607_v43, %v4603_v40  ;;  %v12454_v39 = vld [vmem:[#allocation78_spill] sm:$0xff] }
 0x65e   :  { %v4621_v47 = vpop.permute.xlu0 %4620  ;;  %4910 = vrot.lane.b32.xlu1 %v9673_v25, %s12432_s23  ;;  %5981 = vmatpush1.bf16.msra.mxu0 %v4608_v28 }
 0x65f   :  { %v4636_v60 = vsel %vm12439_vm0, %v4617_v31, %v4621_v47  ;;  %6144 = vmatprep.subr.bf16.mxu1 %v4611_v32  ;;  %vm12465_vm0 = vcmp.lt.s32.totalorder %v7159_v10, 1 }
 0x660   :  { %6145 = vmatpush1.bf16.msra.mxu1 %v4610_v17  ;;  %4912 = vrot.lane.b32.xlu0 %v9677_v20, %s12432_s23  ;;  %v4623_v56 = vpop.permute.xlu1 %4622  ;;  %v4641_v27 = vmul.f32 %v4636_v60, %v12441_v36  ;;  %v12460_v60 = vld [vmem:[#allocation81_spill] sm:$0xff] }
 0x661   :  { %v4637_v29 = vsel %vm12440_vm1, %v4619_v61, %v4623_v56  ;;  %vm12466_vm1 = vmmov %vm12465_vm0 }
 0x662   :  { %v4645_v38 = vmul.f32 %v4637_v29, %v12441_v36  ;;  %v4625_v15 = vpop.permute.xlu0 %4624  ;;  %4914 = vrot.lane.b32.xlu1 %v9681_v30, %s12432_s23 }
 0x663   :  { %v4634_v42 = vsel %vm12446_vm5, %v4621_v47, %v4625_v15  ;;  %vm12471_vm5 = vmmov %vm12465_vm0 }
 0x664   :  { %4916 = vrot.lane.b32.xlu0 %v9685_v3, %s12432_s23  ;;  %v4627_v24 = vpop.permute.xlu1 %4626  ;;  %v4649_v8 = vpack.c.bf16 %v4645_v38, %v4641_v27  ;;  %v4642_v57 = vmul.f32 %v4634_v42, %v12447_v9  ;;  %v12463_v27 = vld [vmem:[#allocation79_spill] sm:$0xff] }
 0x665   :  { %v4635_v4 = vsel %vm12442_vm2, %v4623_v56, %v4627_v24  ;;  %vm12468_vm2 = vmmov %vm12465_vm0 }
 0x666   :  { %v4629_v59 = vpop.permute.xlu0 %4628  ;;  %4918 = vrot.lane.b32.xlu1 %v9689_v58, %s12432_s23  ;;  %5982 = vmatprep.subr.bf16.mxu0 %v4649_v8  ;;  %v4646_v50 = vmul.f32 %v4635_v4, %v12447_v9 }
 0x667   :  { %v4632_v41 = vsel %vm12443_vm3, %v4625_v15, %v4629_v59  ;;  %v4638_v35 = vsel %vm12444_vm4, %v4629_v59, %v4617_v31  ;;  %v12464_v15 = vld [vmem:[#allocation80_spill] sm:$0xff]  ;;  %vm12469_vm3 = vmmov %vm12465_vm0 }
 0x668   :  { %4944 = vrot.lane.b32.xlu0 %v9661_v2, %s12445_s3  ;;  %v4631_v12 = vpop.permute.xlu1 %4630  ;;  %v4640_v49 = vmul.f32 %v4638_v35, %v12450_v34  ;;  %v4643_v13 = vmul.f32 %v4632_v41, %v12451_v52  ;;  %v4650_v23 = vpack.c.bf16 %v4646_v50, %v4642_v57  ;;  %vm12470_vm4 = vmmov %vm12465_vm0 }
 0x669   :  { %v4633_v45 = vsel %vm12448_vm6, %v4627_v24, %v4631_v12  ;;  %v4639_v48 = vsel %vm12449_vm7, %v4631_v12, %v4619_v61  ;;  %vm12474_vm6 = vmmov %vm12465_vm0 }
 0x66a   :  { %v4644_v19 = vmul.f32 %v4639_v48, %v12450_v34  ;;  %v4647_v55 = vmul.f32 %v4633_v45, %v12451_v52  ;;  %v4657_v14 = vpop.permute.xlu0 %4656  ;;  %4946 = vrot.lane.b32.xlu1 %v9665_v6, %s12445_s3  ;;  %vm12475_vm7 = vmmov %vm12465_vm0 }
 0x66c   :  { %v4648_v33 = vpack.c.bf16 %v4644_v19, %v4640_v49  ;;  %4948 = vrot.lane.b32.xlu0 %v9669_v46, %s12445_s3  ;;  %v4659_v11 = vpop.permute.xlu1 %4658  ;;  %v4651_v0 = vpack.c.bf16 %v4647_v55, %v4643_v13  ;;  %v12467_v49 = vld [vmem:[#allocation82_spill] sm:$0xff] }
 0x66e   :  { %v4661_v51 = vpop.permute.xlu0 %4660  ;;  %4950 = vrot.lane.b32.xlu1 %v9673_v25, %s12445_s3  ;;  %5983 = vmatpush1.bf16.msra.mxu0 %v4648_v33 }
 0x66f   :  { %v4676_v37 = vsel %vm12452_vm8, %v4657_v14, %v4661_v51  ;;  %6146 = vmatprep.subr.bf16.mxu1 %v4651_v0  ;;  %vm12478_vm8 = vcmp.lt.s32.totalorder %v7159_v10, 127 }
 0x670   :  { %6147 = vmatpush1.bf16.msra.mxu1 %v4650_v23  ;;  %4952 = vrot.lane.b32.xlu0 %v9677_v20, %s12445_s3  ;;  %v4663_v62 = vpop.permute.xlu1 %4662  ;;  %v4681_v26 = vmul.f32 %v4676_v37, %v12454_v39  ;;  %v10747_v37 = vld [vmem:[#allocation8 + $0x8] sm:$0xff] }
 0x671   :  { %v4677_v5 = vsel %vm12453_vm9, %v4659_v11, %v4663_v62  ;;  %vm12479_vm9 = vmmov %vm12478_vm8 }
 0x672   :  { %v4685_v40 = vmul.f32 %v4677_v5, %v12454_v39  ;;  %v4665_v21 = vpop.permute.xlu0 %4664  ;;  %4954 = vrot.lane.b32.xlu1 %v9681_v30, %s12445_s3 }
 0x673   :  { %v4674_v47 = vsel %vm12459_vm13, %v4661_v51, %v4665_v21  ;;  %vm12485_vm13 = vmmov %vm12478_vm8 }
 0x674   :  { %4956 = vrot.lane.b32.xlu0 %v9685_v3, %s12445_s3  ;;  %v4667_v43 = vpop.permute.xlu1 %4666  ;;  %v4689_v31 = vpack.c.bf16 %v4685_v40, %v4681_v26  ;;  %v4682_v41 = vmul.f32 %v4674_v47, %v12460_v60  ;;  %v6518_v40 = vcombine.high %v10747_v37, %v10747_v37 }
 0x675   :  { %v4675_v1 = vsel %vm12455_vm10, %v4663_v62, %v4667_v43  ;;  %v12473_v62 = vld [vmem:[#allocation85_spill] sm:$0xff]  ;;  %vm12480_vm10 = vmmov %vm12478_vm8 }
 0x676   :  { %v4669_v28 = vpop.permute.xlu0 %4668  ;;  %4958 = vrot.lane.b32.xlu1 %v9689_v58, %s12445_s3  ;;  %5984 = vmatprep.subr.bf16.mxu0 %v4689_v31  ;;  %v4686_v56 = vmul.f32 %v4675_v1, %v12460_v60  ;;  %v12477_v31 = vld [vmem:[#allocation84_spill] sm:$0xff] }
 0x677   :  { %v4672_v61 = vsel %vm12456_vm11, %v4665_v21, %v4669_v28  ;;  %v4678_v32 = vsel %vm12457_vm15, %v4669_v28, %v4657_v14  ;;  %v12476_v21 = vld [vmem:[#allocation83_spill] sm:$0xff]  ;;  %6004 = vmatprep.mubr.bf16.mxu0 %v6518_v40  ;;  %6168 = vmatprep.mubr.bf16.mxu1 %v6518_v40  ;;  %vm12482_vm11 = vmmov %vm12478_vm8 }
 0x678   :  { %4984 = vrot.lane.b32.xlu0 %v9661_v2, %s12458_s1  ;;  %v4671_v17 = vpop.permute.xlu1 %4670  ;;  %v4680_v38 = vmul.f32 %v4678_v32, %v12463_v27  ;;  %v4683_v24 = vmul.f32 %v4672_v61, %v12464_v15  ;;  %v4690_v9 = vpack.c.bf16 %v4686_v56, %v4682_v41  ;;  %vm12484_vm15 = vmmov %vm12478_vm8 }
 0x679   :  { %v4673_v29 = vsel %vm12461_vm14, %v4667_v43, %v4671_v17  ;;  %v4679_v36 = vsel %vm12462_vm12, %v4671_v17, %v4659_v11  ;;  %vm12488_vm14 = vmmov %vm12478_vm8 }
 0x67a   :  { %v4684_v8 = vmul.f32 %v4679_v36, %v12463_v27  ;;  %v4687_v4 = vmul.f32 %v4673_v29, %v12464_v15  ;;  %v4697_v59 = vpop.permute.xlu0 %4696  ;;  %4986 = vrot.lane.b32.xlu1 %v9665_v6, %s12458_s1  ;;  %v4737_v29 = vpack.c.bf16 %v9673_v25, %v9669_v46  ;;  %vm12489_vm12 = vmmov %vm12478_vm8 }
 0x67c   :  { %v4688_v35 = vpack.c.bf16 %v4684_v8, %v4680_v38  ;;  %4988 = vrot.lane.b32.xlu0 %v9669_v46, %s12458_s1  ;;  %v4699_v12 = vpop.permute.xlu1 %4698  ;;  %v4691_v42 = vpack.c.bf16 %v4687_v4, %v4683_v24  ;;  %v4739_v38 = vpack.c.bf16 %v9689_v58, %v9685_v3  ;;  %v4736_v24 = vpack.c.bf16 %v9665_v6, %v9661_v2 }
 0x67e   :  { %v4701_v50 = vpop.permute.xlu0 %4700  ;;  %4990 = vrot.lane.b32.xlu1 %v9673_v25, %s12458_s1  ;;  %5985 = vmatpush1.bf16.msra.mxu0 %v4688_v35 }
 0x67f   :  { %v4716_v45 = vsel %vm12465_vm0, %v4697_v59, %v4701_v50  ;;  %6148 = vmatprep.subr.bf16.mxu1 %v4691_v42  ;;  %v12481_v42 = vld [vmem:[#allocation86_spill] sm:$0xff]  ;;  %vm12491_vm0 = vcmp.lt.s32.totalorder %v7159_v10, 126 }
 0x680   :  { %6149 = vmatpush1.bf16.msra.mxu1 %v4690_v9  ;;  %4992 = vrot.lane.b32.xlu0 %v9677_v20, %s12458_s1  ;;  %v4703_v48 = vpop.permute.xlu1 %4702  ;;  %v4721_v52 = vmul.f32 %v4716_v45, %v12467_v49  ;;  %v12483_v45 = vld [vmem:[#allocation87_spill] sm:$0xff] }
 0x681   :  { %v4717_v34 = vsel %vm12466_vm1, %v4699_v12, %v4703_v48  ;;  %vm12492_vm1 = vmmov %vm12491_vm0 }
 0x682   :  { %v4725_v13 = vmul.f32 %v4717_v34, %v12467_v49  ;;  %v4705_v19 = vpop.permute.xlu0 %4704  ;;  %4994 = vrot.lane.b32.xlu1 %v9681_v30, %s12458_s1 }
 0x683   :  { %v4714_v23 = vsel %vm12471_vm5, %v4701_v50, %v4705_v19  ;;  %vm12498_vm5 = vmmov %vm12491_vm0 }
 0x684   :  { %4996 = vrot.lane.b32.xlu0 %v9685_v3, %s12458_s1  ;;  %v4707_v55 = vpop.permute.xlu1 %4706  ;;  %v4729_v14 = vpack.c.bf16 %v4725_v13, %v4721_v52  ;;  %v4722_v17 = vmul.f32 %v4714_v23, %v12473_v62 }
 0x685   :  { %v4715_v57 = vsel %vm12468_vm2, %v4703_v48, %v4707_v55  ;;  %vm12493_vm2 = vmmov %vm12491_vm0 }
 0x686   :  { %v4709_v33 = vpop.permute.xlu0 %4708  ;;  %4998 = vrot.lane.b32.xlu1 %v9689_v58, %s12458_s1  ;;  %5986 = vmatprep.subr.bf16.mxu0 %v4729_v14  ;;  %v4726_v5 = vmul.f32 %v4715_v57, %v12473_v62 }
 0x687   :  { %v4712_v11 = vsel %vm12469_vm3, %v4705_v19, %v4709_v33  ;;  %v4718_v0 = vsel %vm12470_vm4, %v4709_v33, %v4697_v59  ;;  %v4738_v59 = vpack.c.bf16 %v9681_v30, %v9677_v20  ;;  %v12487_v33 = vld [vmem:[#allocation88_spill] sm:$0xff]  ;;  %vm12495_vm3 = vmmov %vm12491_vm0 }
 0x688   :  { %5024 = vrot.lane.b32.xlu0 %v9661_v2, %s12472_s24  ;;  %v4711_v51 = vpop.permute.xlu1 %4710  ;;  %v4720_v43 = vmul.f32 %v4718_v0, %v12476_v21  ;;  %v4723_v1 = vmul.f32 %v4712_v11, %v12477_v31  ;;  %v4730_v36 = vpack.c.bf16 %v4726_v5, %v4722_v17  ;;  %vm12497_vm4 = vmmov %vm12491_vm0 }
 0x689   :  { %v4713_v39 = vsel %vm12474_vm6, %v4707_v55, %v4711_v51  ;;  %v4719_v26 = vsel %vm12475_vm7, %v4711_v51, %v4699_v12  ;;  %v12490_v51 = vld [vmem:[#allocation89_spill] sm:$0xff]  ;;  %vm12501_vm6 = vmmov %vm12491_vm0 }
 0x68a   :  { %v4724_v28 = vmul.f32 %v4719_v26, %v12476_v21  ;;  %v4727_v61 = vmul.f32 %v4713_v39, %v12477_v31  ;;  %v4745_v32 = vpop.permute.xlu0 %4744  ;;  %5026 = vrot.lane.b32.xlu1 %v9665_v6, %s12472_s24  ;;  %vm12502_vm7 = vmmov %vm12491_vm0 }
 0x68c   :  { %v4728_v47 = vpack.c.bf16 %v4724_v28, %v4720_v43  ;;  %5028 = vrot.lane.b32.xlu0 %v9669_v46, %s12472_s24  ;;  %v4747_v60 = vpop.permute.xlu1 %4746  ;;  %v4731_v56 = vpack.c.bf16 %v4727_v61, %v4723_v1 }
 0x68e   :  { %v4749_v27 = vpop.permute.xlu0 %4748  ;;  %5030 = vrot.lane.b32.xlu1 %v9673_v25, %s12472_s24  ;;  %5987 = vmatpush1.bf16.msra.mxu0 %v4728_v47 }
 0x68f   :  { %6150 = vmatprep.subr.bf16.mxu1 %v4731_v56  ;;  %5988 = vmatprep.subr.bf16.mxu0 %v4737_v29  ;;  %v4764_v35 = vsel %vm12480_vm10, %v4745_v32, %v4749_v27 }
 0x690   :  { %6151 = vmatpush1.bf16.msra.mxu1 %v4730_v36  ;;  %5032 = vrot.lane.b32.xlu0 %v9677_v20, %s12472_s24  ;;  %v4751_v15 = vpop.permute.xlu1 %4750  ;;  %v4768_v52 = vmul.f32 %v4764_v35, %v12481_v42  ;;  %v12496_v36 = vld [vmem:[#allocation91_spill] sm:$0xff] }
 0x691   :  { %6152 = vmatprep.subr.bf16.mxu1 %v4739_v38  ;;  %v4765_v8 = vsel %vm12478_vm8, %v4747_v60, %v4751_v15  ;;  %vm12504_vm8 = vcmp.lt.s32.totalorder %v7159_v10, 125 }
 0x692   :  { %v4753_v4 = vpop.permute.xlu0 %4752  ;;  %5034 = vrot.lane.b32.xlu1 %v9681_v30, %s12472_s24  ;;  %5989 = vmatpush1.bf16.msra.mxu0 %v4736_v24  ;;  %v4772_v9 = vmul.f32 %v4765_v8, %v12481_v42  ;;  %vm12506_vm10 = vmmov %vm12504_vm8 }
 0x693   :  { %v4762_v41 = vsel %vm12479_vm9, %v4749_v27, %v4753_v4  ;;  %vm12505_vm9 = vmmov %vm12504_vm8 }
 0x694   :  { %6153 = vmatpush1.bf16.msra.mxu1 %v4738_v59  ;;  %5036 = vrot.lane.b32.xlu0 %v9685_v3, %s12472_s24  ;;  %v4755_v12 = vpop.permute.xlu1 %4754  ;;  %v4769_v48 = vmul.f32 %v4762_v41, %v12483_v45  ;;  %v4776_v57 = vpack.c.bf16 %v4772_v9, %v4768_v52 }
 0x695   :  { %v4763_v50 = vsel %vm12482_vm11, %v4751_v15, %v4755_v12  ;;  %vm12508_vm11 = vmmov %vm12504_vm8 }
 0x696   :  { %v4773_v34 = vmul.f32 %v4763_v50, %v12483_v45  ;;  %v4757_v49 = vpop.permute.xlu0 %4756  ;;  %5038 = vrot.lane.b32.xlu1 %v9689_v58, %s12472_s24  ;;  %v12503_v45 = vld [vmem:[#allocation93_spill] sm:$0xff] }
 0x697   :  { %v4760_v13 = vsel %vm12484_vm15, %v4753_v4, %v4757_v49  ;;  %v4766_v19 = vsel %vm12485_vm13, %v4757_v49, %v4745_v32  ;;  %vm12510_vm15 = vmmov %vm12504_vm8 }
 0x698   :  { %5064 = vrot.lane.b32.xlu0 %v9661_v2, %s12486_s25  ;;  %v4759_v55 = vpop.permute.xlu1 %4758  ;;  %v4777_v14 = vpack.c.bf16 %v4773_v34, %v4769_v48  ;;  %v4770_v11 = vmul.f32 %v4760_v13, %v12487_v33  ;;  %v4771_v62 = vmul.f32 %v4766_v19, %v12490_v51  ;;  %vm12511_vm13 = vmmov %vm12504_vm8 }
 0x699   :  { %v4761_v0 = vsel %vm12488_vm14, %v4755_v12, %v4759_v55  ;;  %v4767_v23 = vsel %vm12489_vm12, %v4759_v55, %v4747_v60  ;;  %v12494_v60 = vld [vmem:[#allocation90_spill] sm:$0xff]  ;;  %v12500_v12 = vld [vmem:[#allocation92_spill] sm:$0xff]  ;;  %vm12514_vm14 = vmmov %vm12504_vm8 }
 0x69a   :  { %v4774_v5 = vmul.f32 %v4761_v0, %v12487_v33  ;;  %v4775_v39 = vmul.f32 %v4767_v23, %v12490_v51  ;;  %v4785_v26 = vpop.permute.xlu0 %4784  ;;  %5066 = vrot.lane.b32.xlu1 %v9665_v6, %s12486_s25  ;;  %5990 = vmatprep.subr.bf16.mxu0 %v4777_v14  ;;  %vm12515_vm12 = vmmov %vm12504_vm8 }
 0x69b   :  { %5991 = vmatpush1.bf16.msra.mxu0 %v4776_v57 }
 0x69c   :  { %v4778_v40 = vpack.c.bf16 %v4774_v5, %v4770_v11  ;;  %5068 = vrot.lane.b32.xlu0 %v9669_v46, %s12486_s25  ;;  %v4787_v21 = vpop.permute.xlu1 %4786  ;;  %v4779_v43 = vpack.c.bf16 %v4775_v39, %v4771_v62  ;;  %v12507_v62 = vld [vmem:[#allocation94_spill] sm:$0xff] }
 0x69e   :  { %v4789_v31 = vpop.permute.xlu0 %4788  ;;  %5070 = vrot.lane.b32.xlu1 %v9673_v25, %s12486_s25  ;;  %6154 = vmatprep.subr.bf16.mxu1 %v4779_v43 }
 0x69f   :  { %6155 = vmatpush1.bf16.msra.mxu1 %v4778_v40  ;;  %v4804_v17 = vsel %vm12493_vm2, %v4785_v26, %v4789_v31 }
 0x6a0   :  { %5072 = vrot.lane.b32.xlu0 %v9677_v20, %s12486_s25  ;;  %v4791_v1 = vpop.permute.xlu1 %4790  ;;  %v4808_v24 = vmul.f32 %v4804_v17, %v12494_v60 }
 0x6a1   :  { %v4805_v28 = vsel %vm12491_vm0, %v4787_v21, %v4791_v1  ;;  %vm12517_vm0 = vcmp.lt.s32.totalorder %v7159_v10, 115 }
 0x6a2   :  { %v4793_v61 = vpop.permute.xlu0 %4792  ;;  %5074 = vrot.lane.b32.xlu1 %v9681_v30, %s12486_s25  ;;  %v4812_v56 = vmul.f32 %v4805_v28, %v12494_v60  ;;  %vm12519_vm2 = vmmov %vm12517_vm0 }
 0x6a3   :  { %v4802_v32 = vsel %vm12492_vm1, %v4789_v31, %v4793_v61  ;;  %vm12518_vm1 = vmmov %vm12517_vm0 }
 0x6a4   :  { %5076 = vrot.lane.b32.xlu0 %v9685_v3, %s12486_s25  ;;  %v4795_v47 = vpop.permute.xlu1 %4794  ;;  %v4809_v27 = vmul.f32 %v4802_v32, %v12496_v36  ;;  %v4816_v35 = vpack.c.bf16 %v4812_v56, %v4808_v24 }
 0x6a5   :  { %v4803_v29 = vsel %vm12495_vm3, %v4791_v1, %v4795_v47  ;;  %vm12521_vm3 = vmmov %vm12517_vm0 }
 0x6a6   :  { %v4813_v38 = vmul.f32 %v4803_v29, %v12496_v36  ;;  %v4797_v15 = vpop.permute.xlu0 %4796  ;;  %5078 = vrot.lane.b32.xlu1 %v9689_v58, %s12486_s25  ;;  %v12516_v36 = vld [vmem:[#allocation97_spill] sm:$0xff] }
 0x6a7   :  { %v4800_v8 = vsel %vm12497_vm4, %v4793_v61, %v4797_v15  ;;  %v4806_v4 = vsel %vm12498_vm5, %v4797_v15, %v4785_v26  ;;  %v12509_v26 = vld [vmem:[#allocation95_spill] sm:$0xff]  ;;  %vm12523_vm4 = vmmov %vm12517_vm0 }
 0x6a8   :  { %5104 = vrot.lane.b32.xlu0 %v9661_v2, %s12499_s26  ;;  %v4799_v59 = vpop.permute.xlu1 %4798  ;;  %v4817_v41 = vpack.c.bf16 %v4813_v38, %v4809_v27  ;;  %v4810_v42 = vmul.f32 %v4800_v8, %v12500_v12  ;;  %v4811_v48 = vmul.f32 %v4806_v4, %v12503_v45  ;;  %vm12524_vm5 = vmmov %vm12517_vm0 }
 0x6a9   :  { %v4801_v9 = vsel %vm12501_vm6, %v4795_v47, %v4799_v59  ;;  %v4807_v50 = vsel %vm12502_vm7, %v4799_v59, %v4787_v21  ;;  %v12513_v47 = vld [vmem:[#allocation96_spill] sm:$0xff]  ;;  %vm12527_vm6 = vmmov %vm12517_vm0 }
 0x6aa   :  { %v4814_v34 = vmul.f32 %v4801_v9, %v12500_v12  ;;  %v4815_v49 = vmul.f32 %v4807_v50, %v12503_v45  ;;  %v4825_v52 = vpop.permute.xlu0 %4824  ;;  %5106 = vrot.lane.b32.xlu1 %v9665_v6, %s12499_s26  ;;  %5992 = vmatprep.subr.bf16.mxu0 %v4817_v41  ;;  %vm12528_vm7 = vmmov %vm12517_vm0 }
 0x6ab   :  { %5993 = vmatpush1.bf16.msra.mxu0 %v4816_v35 }
 0x6ac   :  { %v4818_v13 = vpack.c.bf16 %v4814_v34, %v4810_v42  ;;  %5108 = vrot.lane.b32.xlu0 %v9669_v46, %s12499_s26  ;;  %v4827_v19 = vpop.permute.xlu1 %4826  ;;  %v4819_v55 = vpack.c.bf16 %v4815_v49, %v4811_v48  ;;  %v12520_v48 = vld [vmem:[#allocation98_spill] sm:$0xff] }
 0x6ae   :  { %v4829_v14 = vpop.permute.xlu0 %4828  ;;  %5110 = vrot.lane.b32.xlu1 %v9673_v25, %s12499_s26  ;;  %6156 = vmatprep.subr.bf16.mxu1 %v4819_v55 }
 0x6af   :  { %6157 = vmatpush1.bf16.msra.mxu1 %v4818_v13  ;;  %v4844_v23 = vsel %vm12506_vm10, %v4825_v52, %v4829_v14 }
 0x6b0   :  { %5112 = vrot.lane.b32.xlu0 %v9677_v20, %s12499_s26  ;;  %v4831_v57 = vpop.permute.xlu1 %4830  ;;  %v4848_v31 = vmul.f32 %v4844_v23, %v12507_v62 }
 0x6b1   :  { %v4845_v33 = vsel %vm12504_vm8, %v4827_v19, %v4831_v57  ;;  %vm12530_vm8 = vcmp.lt.s32.totalorder %v7159_v10, 114 }
 0x6b2   :  { %v4833_v11 = vpop.permute.xlu0 %4832  ;;  %5114 = vrot.lane.b32.xlu1 %v9681_v30, %s12499_s26  ;;  %v4852_v5 = vmul.f32 %v4845_v33, %v12507_v62  ;;  %vm12532_vm10 = vmmov %vm12530_vm8 }
 0x6b3   :  { %v4842_v0 = vsel %vm12505_vm9, %v4829_v14, %v4833_v11  ;;  %vm12531_vm9 = vmmov %vm12530_vm8 }
 0x6b4   :  { %5116 = vrot.lane.b32.xlu0 %v9685_v3, %s12499_s26  ;;  %v4835_v51 = vpop.permute.xlu1 %4834  ;;  %v4849_v40 = vmul.f32 %v4842_v0, %v12509_v26  ;;  %v4856_v17 = vpack.c.bf16 %v4852_v5, %v4848_v31 }
 0x6b5   :  { %v4843_v39 = vsel %vm12508_vm11, %v4831_v57, %v4835_v51  ;;  %vm12534_vm11 = vmmov %vm12530_vm8 }
 0x6b6   :  { %v4853_v21 = vmul.f32 %v4843_v39, %v12509_v26  ;;  %v4837_v43 = vpop.permute.xlu0 %4836  ;;  %5118 = vrot.lane.b32.xlu1 %v9689_v58, %s12499_s26  ;;  %v12529_v26 = vld [vmem:[#allocation101_spill] sm:$0xff] }
 0x6b7   :  { %v4840_v1 = vsel %vm12510_vm15, %v4833_v11, %v4837_v43  ;;  %v4846_v28 = vsel %vm12511_vm13, %v4837_v43, %v4825_v52  ;;  %v12522_v52 = vld [vmem:[#allocation99_spill] sm:$0xff]  ;;  %vm12536_vm15 = vmmov %vm12530_vm8 }
 0x6b8   :  { %5144 = vrot.lane.b32.xlu0 %v9661_v2, %s12512_s27  ;;  %v4839_v61 = vpop.permute.xlu1 %4838  ;;  %v4857_v32 = vpack.c.bf16 %v4853_v21, %v4849_v40  ;;  %v4850_v60 = vmul.f32 %v4840_v1, %v12513_v47  ;;  %v4851_v27 = vmul.f32 %v4846_v28, %v12516_v36  ;;  %vm12537_vm13 = vmmov %vm12530_vm8 }
 0x6b9   :  { %v4841_v56 = vsel %vm12514_vm14, %v4835_v51, %v4839_v61  ;;  %v4847_v29 = vsel %vm12515_vm12, %v4839_v61, %v4827_v19  ;;  %v12526_v51 = vld [vmem:[#allocation100_spill] sm:$0xff]  ;;  %vm12540_vm14 = vmmov %vm12530_vm8 }
 0x6ba   :  { %v4854_v38 = vmul.f32 %v4841_v56, %v12513_v47  ;;  %v4855_v15 = vmul.f32 %v4847_v29, %v12516_v36  ;;  %v4865_v24 = vpop.permute.xlu0 %4864  ;;  %5146 = vrot.lane.b32.xlu1 %v9665_v6, %s12512_s27  ;;  %5994 = vmatprep.subr.bf16.mxu0 %v4857_v32  ;;  %vm12541_vm12 = vmmov %vm12530_vm8 }
 0x6bb   :  { %5995 = vmatpush1.bf16.msra.mxu0 %v4856_v17 }
 0x6bc   :  { %v4858_v8 = vpack.c.bf16 %v4854_v38, %v4850_v60  ;;  %5148 = vrot.lane.b32.xlu0 %v9669_v46, %s12512_s27  ;;  %v4867_v4 = vpop.permute.xlu1 %4866  ;;  %v4859_v59 = vpack.c.bf16 %v4855_v15, %v4851_v27  ;;  %v12533_v27 = vld [vmem:[#allocation102_spill] sm:$0xff] }
 0x6be   :  { %v4869_v41 = vpop.permute.xlu0 %4868  ;;  %5150 = vrot.lane.b32.xlu1 %v9673_v25, %s12512_s27  ;;  %6158 = vmatprep.subr.bf16.mxu1 %v4859_v59 }
 0x6bf   :  { %6159 = vmatpush1.bf16.msra.mxu1 %v4858_v8  ;;  %v4884_v50 = vsel %vm12519_vm2, %v4865_v24, %v4869_v41 }
 0x6c0   :  { %5152 = vrot.lane.b32.xlu0 %v9677_v20, %s12512_s27  ;;  %v4871_v35 = vpop.permute.xlu1 %4870  ;;  %v4888_v14 = vmul.f32 %v4884_v50, %v12520_v48 }
 0x6c1   :  { %v4885_v12 = vsel %vm12517_vm0, %v4867_v4, %v4871_v35  ;;  %vm12543_vm0 = vcmp.lt.s32.totalorder %v7159_v10, 113 }
 0x6c2   :  { %v4873_v42 = vpop.permute.xlu0 %4872  ;;  %5154 = vrot.lane.b32.xlu1 %v9681_v30, %s12512_s27  ;;  %v4892_v34 = vmul.f32 %v4885_v12, %v12520_v48  ;;  %vm12545_vm2 = vmmov %vm12543_vm0 }
 0x6c3   :  { %v4882_v9 = vsel %vm12518_vm1, %v4869_v41, %v4873_v42  ;;  %vm12544_vm1 = vmmov %vm12543_vm0 }
 0x6c4   :  { %5156 = vrot.lane.b32.xlu0 %v9685_v3, %s12512_s27  ;;  %v4875_v45 = vpop.permute.xlu1 %4874  ;;  %v4889_v13 = vmul.f32 %v4882_v9, %v12522_v52  ;;  %v4896_v23 = vpack.c.bf16 %v4892_v34, %v4888_v14 }
 0x6c5   :  { %v4883_v49 = vsel %vm12521_vm3, %v4871_v35, %v4875_v45  ;;  %vm12547_vm3 = vmmov %vm12543_vm0 }
 0x6c6   :  { %v4893_v19 = vmul.f32 %v4883_v49, %v12522_v52  ;;  %v4877_v55 = vpop.permute.xlu0 %4876  ;;  %5158 = vrot.lane.b32.xlu1 %v9689_v58, %s12512_s27  ;;  %v12542_v52 = vld [vmem:[#allocation105_spill] sm:$0xff] }
 0x6c7   :  { %v4880_v57 = vsel %vm12523_vm4, %v4873_v42, %v4877_v55  ;;  %v4886_v33 = vsel %vm12524_vm5, %v4877_v55, %v4865_v24  ;;  %v12535_v24 = vld [vmem:[#allocation103_spill] sm:$0xff]  ;;  %vm12549_vm4 = vmmov %vm12543_vm0 }
 0x6c8   :  { %5184 = vrot.lane.b32.xlu0 %v9661_v2, %s12525_s28  ;;  %v4879_v11 = vpop.permute.xlu1 %4878  ;;  %v4897_v0 = vpack.c.bf16 %v4893_v19, %v4889_v13  ;;  %v4890_v62 = vmul.f32 %v4880_v57, %v12526_v51  ;;  %v4891_v40 = vmul.f32 %v4886_v33, %v12529_v26  ;;  %vm12550_vm5 = vmmov %vm12543_vm0 }
 0x6c9   :  { %v4881_v5 = vsel %vm12527_vm6, %v4875_v45, %v4879_v11  ;;  %v4887_v39 = vsel %vm12528_vm7, %v4879_v11, %v4867_v4  ;;  %v12539_v45 = vld [vmem:[#allocation104_spill] sm:$0xff]  ;;  %vm12553_vm6 = vmmov %vm12543_vm0 }
 0x6ca   :  { %v4894_v21 = vmul.f32 %v4881_v5, %v12526_v51  ;;  %v4895_v43 = vmul.f32 %v4887_v39, %v12529_v26  ;;  %v4905_v31 = vpop.permute.xlu0 %4904  ;;  %5186 = vrot.lane.b32.xlu1 %v9665_v6, %s12525_s28  ;;  %5996 = vmatprep.subr.bf16.mxu0 %v4897_v0  ;;  %vm12554_vm7 = vmmov %vm12543_vm0 }
 0x6cb   :  { %5997 = vmatpush1.bf16.msra.mxu0 %v4896_v23 }
 0x6cc   :  { %v4898_v1 = vpack.c.bf16 %v4894_v21, %v4890_v62  ;;  %5188 = vrot.lane.b32.xlu0 %v9669_v46, %s12525_s28  ;;  %v4907_v28 = vpop.permute.xlu1 %4906  ;;  %v4899_v61 = vpack.c.bf16 %v4895_v43, %v4891_v40  ;;  %v12546_v40 = vld [vmem:[#allocation106_spill] sm:$0xff] }
 0x6ce   :  { %v4909_v32 = vpop.permute.xlu0 %4908  ;;  %5190 = vrot.lane.b32.xlu1 %v9673_v25, %s12525_s28  ;;  %6160 = vmatprep.subr.bf16.mxu1 %v4899_v61 }
 0x6cf   :  { %6161 = vmatpush1.bf16.msra.mxu1 %v4898_v1  ;;  %v4924_v29 = vsel %vm12532_vm10, %v4905_v31, %v4909_v32 }
 0x6d0   :  { %5192 = vrot.lane.b32.xlu0 %v9677_v20, %s12525_s28  ;;  %v4911_v17 = vpop.permute.xlu1 %4910  ;;  %v4928_v41 = vmul.f32 %v4924_v29, %v12533_v27 }
 0x6d1   :  { %v4925_v47 = vsel %vm12530_vm8, %v4907_v28, %v4911_v17  ;;  %vm12556_vm8 = vcmp.lt.s32.totalorder %v7159_v10, 112 }
 0x6d2   :  { %v4913_v60 = vpop.permute.xlu0 %4912  ;;  %5194 = vrot.lane.b32.xlu1 %v9681_v30, %s12525_s28  ;;  %v4932_v38 = vmul.f32 %v4925_v47, %v12533_v27  ;;  %vm12558_vm10 = vmmov %vm12556_vm8 }
 0x6d3   :  { %v4922_v56 = vsel %vm12531_vm9, %v4909_v32, %v4913_v60  ;;  %vm12557_vm9 = vmmov %vm12556_vm8 }
 0x6d4   :  { %5196 = vrot.lane.b32.xlu0 %v9685_v3, %s12525_s28  ;;  %v4915_v36 = vpop.permute.xlu1 %4914  ;;  %v4929_v8 = vmul.f32 %v4922_v56, %v12535_v24  ;;  %v4936_v50 = vpack.c.bf16 %v4932_v38, %v4928_v41 }
 0x6d5   :  { %v4923_v15 = vsel %vm12534_vm11, %v4911_v17, %v4915_v36  ;;  %vm12560_vm11 = vmmov %vm12556_vm8 }
 0x6d6   :  { %v4933_v4 = vmul.f32 %v4923_v15, %v12535_v24  ;;  %v4917_v59 = vpop.permute.xlu0 %4916  ;;  %5198 = vrot.lane.b32.xlu1 %v9689_v58, %s12525_s28  ;;  %v12555_v24 = vld [vmem:[#allocation109_spill] sm:$0xff] }
 0x6d7   :  { %v4920_v35 = vsel %vm12536_vm15, %v4913_v60, %v4917_v59  ;;  %v4926_v12 = vsel %vm12537_vm13, %v4917_v59, %v4905_v31  ;;  %v12548_v31 = vld [vmem:[#allocation107_spill] sm:$0xff]  ;;  %vm12562_vm15 = vmmov %vm12556_vm8 }
 0x6d8   :  { %5224 = vrot.lane.b32.xlu0 %v9661_v2, %s12538_s29  ;;  %v4919_v42 = vpop.permute.xlu1 %4918  ;;  %v4937_v9 = vpack.c.bf16 %v4933_v4, %v4929_v8  ;;  %v4930_v48 = vmul.f32 %v4920_v35, %v12539_v45  ;;  %v4931_v13 = vmul.f32 %v4926_v12, %v12542_v52  ;;  %vm12563_vm13 = vmmov %vm12556_vm8 }
 0x6d9   :  { %v4921_v34 = vsel %vm12540_vm14, %v4915_v36, %v4919_v42  ;;  %v4927_v49 = vsel %vm12541_vm12, %v4919_v42, %v4907_v28  ;;  %v12552_v36 = vld [vmem:[#allocation108_spill] sm:$0xff]  ;;  %vm12566_vm14 = vmmov %vm12556_vm8 }
 0x6da   :  { %v4934_v19 = vmul.f32 %v4921_v34, %v12539_v45  ;;  %v4935_v55 = vmul.f32 %v4927_v49, %v12542_v52  ;;  %v4945_v14 = vpop.permute.xlu0 %4944  ;;  %5226 = vrot.lane.b32.xlu1 %v9665_v6, %s12538_s29  ;;  %5998 = vmatprep.subr.bf16.mxu0 %v4937_v9  ;;  %vm12567_vm12 = vmmov %vm12556_vm8 }
 0x6db   :  { %5999 = vmatpush1.bf16.msra.mxu0 %v4936_v50 }
 0x6dc   :  { %v4938_v57 = vpack.c.bf16 %v4934_v19, %v4930_v48  ;;  %5228 = vrot.lane.b32.xlu0 %v9669_v46, %s12538_s29  ;;  %v4947_v33 = vpop.permute.xlu1 %4946  ;;  %v4939_v11 = vpack.c.bf16 %v4935_v55, %v4931_v13  ;;  %v12559_v13 = vld [vmem:[#allocation110_spill] sm:$0xff] }
 0x6de   :  { %v4949_v0 = vpop.permute.xlu0 %4948  ;;  %5230 = vrot.lane.b32.xlu1 %v9673_v25, %s12538_s29  ;;  %6162 = vmatprep.subr.bf16.mxu1 %v4939_v11 }
 0x6df   :  { %6163 = vmatpush1.bf16.msra.mxu1 %v4938_v57  ;;  %v4964_v39 = vsel %vm12545_vm2, %v4945_v14, %v4949_v0 }
 0x6e0   :  { %5232 = vrot.lane.b32.xlu0 %v9677_v20, %s12538_s29  ;;  %v4951_v23 = vpop.permute.xlu1 %4950  ;;  %v4968_v32 = vmul.f32 %v4964_v39, %v12546_v40 }
 0x6e1   :  { %v4965_v51 = vsel %vm12543_vm0, %v4947_v33, %v4951_v23  ;;  %vm12569_vm0 = vcmp.lt.s32.totalorder %v7159_v10, 111 }
 0x6e2   :  { %v4953_v62 = vpop.permute.xlu0 %4952  ;;  %5234 = vrot.lane.b32.xlu1 %v9681_v30, %s12538_s29  ;;  %v4972_v21 = vmul.f32 %v4965_v51, %v12546_v40  ;;  %vm12571_vm2 = vmmov %vm12569_vm0 }
 0x6e3   :  { %v4962_v5 = vsel %vm12544_vm1, %v4949_v0, %v4953_v62  ;;  %vm12570_vm1 = vmmov %vm12569_vm0 }
 0x6e4   :  { %5236 = vrot.lane.b32.xlu0 %v9685_v3, %s12538_s29  ;;  %v4955_v26 = vpop.permute.xlu1 %4954  ;;  %v4969_v1 = vmul.f32 %v4962_v5, %v12548_v31  ;;  %v4976_v29 = vpack.c.bf16 %v4972_v21, %v4968_v32 }
 0x6e5   :  { %v4963_v43 = vsel %vm12547_vm3, %v4951_v23, %v4955_v26  ;;  %vm12573_vm3 = vmmov %vm12569_vm0 }
 0x6e6   :  { %v4973_v28 = vmul.f32 %v4963_v43, %v12548_v31  ;;  %v4957_v61 = vpop.permute.xlu0 %4956  ;;  %5238 = vrot.lane.b32.xlu1 %v9689_v58, %s12538_s29  ;;  %v12568_v31 = vld [vmem:[#allocation113_spill] sm:$0xff] }
 0x6e7   :  { %v4960_v17 = vsel %vm12549_vm4, %v4953_v62, %v4957_v61  ;;  %v4966_v47 = vsel %vm12550_vm5, %v4957_v61, %v4945_v14  ;;  %v12561_v14 = vld [vmem:[#allocation111_spill] sm:$0xff]  ;;  %vm12575_vm4 = vmmov %vm12569_vm0 }
 0x6e8   :  { %5264 = vrot.lane.b32.xlu0 %v9661_v2, %s12551_s30  ;;  %v4959_v60 = vpop.permute.xlu1 %4958  ;;  %v4977_v56 = vpack.c.bf16 %v4973_v28, %v4969_v1  ;;  %v4970_v27 = vmul.f32 %v4960_v17, %v12552_v36  ;;  %v4971_v8 = vmul.f32 %v4966_v47, %v12555_v24  ;;  %v6517_v17 = vcombine.low %v10747_v37, %v10747_v37  ;;  %vm12576_vm5 = vmmov %vm12569_vm0 }
 0x6e9   :  { %v4961_v38 = vsel %vm12553_vm6, %v4955_v26, %v4959_v60  ;;  %v4967_v15 = vsel %vm12554_vm7, %v4959_v60, %v4947_v33  ;;  %v12565_v26 = vld [vmem:[#allocation112_spill] sm:$0xff]  ;;  %vm12579_vm6 = vmmov %vm12569_vm0 }
 0x6ea   :  { %v4974_v4 = vmul.f32 %v4961_v38, %v12552_v36  ;;  %v4975_v59 = vmul.f32 %v4967_v15, %v12555_v24  ;;  %v4985_v41 = vpop.permute.xlu0 %4984  ;;  %5266 = vrot.lane.b32.xlu1 %v9665_v6, %s12551_s30  ;;  %6000 = vmatprep.subr.bf16.mxu0 %v4977_v56  ;;  %vm12580_vm7 = vmmov %vm12569_vm0 }
 0x6eb   :  { %6001 = vmatpush1.bf16.msra.mxu0 %v4976_v29 }
 0x6ec   :  { %v4978_v35 = vpack.c.bf16 %v4974_v4, %v4970_v27  ;;  %5268 = vrot.lane.b32.xlu0 %v9669_v46, %s12551_s30  ;;  %v4987_v12 = vpop.permute.xlu1 %4986  ;;  %v4979_v42 = vpack.c.bf16 %v4975_v59, %v4971_v8  ;;  %v12572_v8 = vld [vmem:[#allocation114_spill] sm:$0xff] }
 0x6ee   :  { %v4989_v9 = vpop.permute.xlu0 %4988  ;;  %5270 = vrot.lane.b32.xlu1 %v9673_v25, %s12551_s30  ;;  %6164 = vmatprep.subr.bf16.mxu1 %v4979_v42 }
 0x6ef   :  { %6165 = vmatpush1.bf16.msra.mxu1 %v4978_v35  ;;  %v5004_v49 = vsel %vm12558_vm10, %v4985_v41, %v4989_v9 }
 0x6f0   :  { %5272 = vrot.lane.b32.xlu0 %v9677_v20, %s12551_s30  ;;  %v4991_v50 = vpop.permute.xlu1 %4990  ;;  %v5008_v0 = vmul.f32 %v5004_v49, %v12559_v13 }
 0x6f1   :  { %v5005_v45 = vsel %vm12556_vm8, %v4987_v12, %v4991_v50  ;;  %vm12582_vm8 = vcmp.lt.s32.totalorder %v7159_v10, 110 }
 0x6f2   :  { %v4993_v48 = vpop.permute.xlu0 %4992  ;;  %5274 = vrot.lane.b32.xlu1 %v9681_v30, %s12551_s30  ;;  %v5012_v19 = vmul.f32 %v5005_v45, %v12559_v13  ;;  %vm12584_vm10 = vmmov %vm12582_vm8 }
 0x6f3   :  { %v5002_v34 = vsel %vm12557_vm9, %v4989_v9, %v4993_v48  ;;  %vm12583_vm9 = vmmov %vm12582_vm8 }
 0x6f4   :  { %5276 = vrot.lane.b32.xlu0 %v9685_v3, %s12551_s30  ;;  %v4995_v52 = vpop.permute.xlu1 %4994  ;;  %v5009_v57 = vmul.f32 %v5002_v34, %v12561_v14  ;;  %v5016_v39 = vpack.c.bf16 %v5012_v19, %v5008_v0 }
 0x6f5   :  { %v5003_v55 = vsel %vm12560_vm11, %v4991_v50, %v4995_v52  ;;  %vm12586_vm11 = vmmov %vm12582_vm8 }
 0x6f6   :  { %v5013_v33 = vmul.f32 %v5003_v55, %v12561_v14  ;;  %v4997_v11 = vpop.permute.xlu0 %4996  ;;  %5278 = vrot.lane.b32.xlu1 %v9689_v58, %s12551_s30  ;;  %v12581_v14 = vld [vmem:[#allocation117_spill] sm:$0xff] }
 0x6f7   :  { %v5000_v23 = vsel %vm12562_vm15, %v4993_v48, %v4997_v11  ;;  %v5006_v51 = vsel %vm12563_vm13, %v4997_v11, %v4985_v41  ;;  %v12574_v41 = vld [vmem:[#allocation115_spill] sm:$0xff]  ;;  %vm12588_vm15 = vmmov %vm12582_vm8 }
 0x6f8   :  { %5304 = vrot.lane.b32.xlu0 %v9661_v2, %s12564_s7  ;;  %v4999_v62 = vpop.permute.xlu1 %4998  ;;  %v5017_v5 = vpack.c.bf16 %v5013_v33, %v5009_v57  ;;  %v5010_v40 = vmul.f32 %v5000_v23, %v12565_v26  ;;  %v5011_v1 = vmul.f32 %v5006_v51, %v12568_v31  ;;  %vm12589_vm13 = vmmov %vm12582_vm8 }
 0x6f9   :  { %v5001_v21 = vsel %vm12566_vm14, %v4995_v52, %v4999_v62  ;;  %v5007_v43 = vsel %vm12567_vm12, %v4999_v62, %v4987_v12  ;;  %v12578_v52 = vld [vmem:[#allocation116_spill] sm:$0xff]  ;;  %vm12592_vm14 = vmmov %vm12582_vm8 }
 0x6fa   :  { %v5014_v28 = vmul.f32 %v5001_v21, %v12565_v26  ;;  %v5015_v61 = vmul.f32 %v5007_v43, %v12568_v31  ;;  %v5025_v32 = vpop.permute.xlu0 %5024  ;;  %5306 = vrot.lane.b32.xlu1 %v9665_v6, %s12564_s7  ;;  %6002 = vmatprep.subr.bf16.mxu0 %v5017_v5  ;;  %vm12593_vm12 = vmmov %vm12582_vm8 }
 0x6fb   :  { %6003 = vmatpush1.bf16.msra.mxu0 %v5016_v39 }
 0x6fc   :  { %v5018_v47 = vpack.c.bf16 %v5014_v28, %v5010_v40  ;;  %5308 = vrot.lane.b32.xlu0 %v9669_v46, %s12564_s7  ;;  %v5027_v60 = vpop.permute.xlu1 %5026  ;;  %v5019_v56 = vpack.c.bf16 %v5015_v61, %v5011_v1  ;;  %v12585_v1 = vld [vmem:[#allocation118_spill] sm:$0xff] }
 0x6fe   :  { %v5029_v29 = vpop.permute.xlu0 %5028  ;;  %5310 = vrot.lane.b32.xlu1 %v9673_v25, %s12564_s7  ;;  %6166 = vmatprep.subr.bf16.mxu1 %v5019_v56 }
 0x6ff   :  { %6167 = vmatpush1.bf16.msra.mxu1 %v5018_v47  ;;  %6005 = vmatmul.mubr.bf16.vlgmr.msra.gmra.mrb[4].mxu0 %v6517_v17  ;;  %v5044_v15 = vsel %vm12571_vm2, %v5025_v32, %v5029_v29 }
 0x700   :  { %5312 = vrot.lane.b32.xlu0 %v9677_v20, %s12564_s7  ;;  %v5031_v36 = vpop.permute.xlu1 %5030  ;;  %v5048_v9 = vmul.f32 %v5044_v15, %v12572_v8  ;;  %v12591_v15 = vld [vmem:[#allocation120_spill] sm:$0xff] }
 0x701   :  { %v5045_v37 = vsel %vm12569_vm0, %v5027_v60, %v5031_v36  ;;  %vm12595_vm0 = vcmp.lt.s32.totalorder %v7159_v10, 109 }
 0x702   :  { %v5033_v27 = vpop.permute.xlu0 %5032  ;;  %5314 = vrot.lane.b32.xlu1 %v9681_v30, %s12564_s7  ;;  %6169 = vmatmul.mubr.bf16.vlgmr.msra.gmra.mrb[4].mxu1 %v6517_v17  ;;  %v5052_v4 = vmul.f32 %v5045_v37, %v12572_v8  ;;  %vm12597_vm2 = vmmov %vm12595_vm0 }
 0x703   :  { %v5042_v38 = vsel %vm12570_vm1, %v5029_v29, %v5033_v27  ;;  %vm12596_vm1 = vmmov %vm12595_vm0 }
 0x704   :  { %5316 = vrot.lane.b32.xlu0 %v9685_v3, %s12564_s7  ;;  %v5035_v24 = vpop.permute.xlu1 %5034  ;;  %v5049_v35 = vmul.f32 %v5042_v38, %v12574_v41  ;;  %v5056_v49 = vpack.c.bf16 %v5052_v4, %v5048_v9 }
 0x705   :  { %v5043_v59 = vsel %vm12573_vm3, %v5031_v36, %v5035_v24  ;;  %vm12599_vm3 = vmmov %vm12595_vm0 }
 0x706   :  { %v5053_v12 = vmul.f32 %v5043_v59, %v12574_v41  ;;  %v5037_v42 = vpop.permute.xlu0 %5036  ;;  %5318 = vrot.lane.b32.xlu1 %v9689_v58, %s12564_s7  ;;  %v12594_v59 = vld [vmem:[#allocation121_spill] sm:$0xff] }
 0x707   :  { %v5040_v50 = vsel %vm12575_vm4, %v5033_v27, %v5037_v42  ;;  %v5046_v45 = vsel %vm12576_vm5, %v5037_v42, %v5025_v32  ;;  %v12587_v32 = vld [vmem:[#allocation119_spill] sm:$0xff]  ;;  %vm12601_vm4 = vmmov %vm12595_vm0 }
 0x708   :  { %5344 = vrot.lane.b32.xlu0 %v9661_v2, %s12577_s8  ;;  %v5039_v48 = vpop.permute.xlu1 %5038  ;;  %v5057_v34 = vpack.c.bf16 %v5053_v12, %v5049_v35  ;;  %v5050_v13 = vmul.f32 %v5040_v50, %v12578_v52  ;;  %v5051_v57 = vmul.f32 %v5046_v45, %v12581_v14  ;;  %vm12602_vm5 = vmmov %vm12595_vm0 }
 0x709   :  { %v5041_v19 = vsel %vm12579_vm6, %v5035_v24, %v5039_v48  ;;  %v5047_v55 = vsel %vm12580_vm7, %v5039_v48, %v5027_v60  ;;  %vm12605_vm6 = vmmov %vm12595_vm0 }
 0x70a   :  { %v5054_v33 = vmul.f32 %v5041_v19, %v12578_v52  ;;  %v5055_v11 = vmul.f32 %v5047_v55, %v12581_v14  ;;  %v5065_v0 = vpop.permute.xlu0 %5064  ;;  %5346 = vrot.lane.b32.xlu1 %v9665_v6, %s12577_s8  ;;  %6013 = vmatprep.subr.bf16.mxu0 %v5057_v34  ;;  %v12598_v14 = vld [vmem:[#allocation122_spill] sm:$0xff]  ;;  %vm12606_vm7 = vmmov %vm12595_vm0 }
 0x70b   :  { %6014 = vmatpush1.bf16.msra.mxu0 %v5056_v49 }
 0x70c   :  { %v5058_v23 = vpack.c.bf16 %v5054_v33, %v5050_v13  ;;  %5348 = vrot.lane.b32.xlu0 %v9669_v46, %s12577_s8  ;;  %v5067_v51 = vpop.permute.xlu1 %5066  ;;  %v5059_v62 = vpack.c.bf16 %v5055_v11, %v5051_v57  ;;  %v12600_v11 = vld [vmem:[#allocation123_spill] sm:$0xff] }
 0x70e   :  { %v5069_v5 = vpop.permute.xlu0 %5068  ;;  %5350 = vrot.lane.b32.xlu1 %v9673_v25, %s12577_s8  ;;  %6177 = vmatprep.subr.bf16.mxu1 %v5059_v62 }
 0x70f   :  { %6178 = vmatpush1.bf16.msra.mxu1 %v5058_v23  ;;  %v5084_v43 = vsel %vm12584_vm10, %v5065_v0, %v5069_v5 }
 0x710   :  { %5352 = vrot.lane.b32.xlu0 %v9677_v20, %s12577_s8  ;;  %v5071_v39 = vpop.permute.xlu1 %5070  ;;  %v5088_v56 = vmul.f32 %v5084_v43, %v12585_v1  ;;  %v12604_v43 = vld [vmem:[#allocation124_spill] sm:$0xff] }
 0x711   :  { %v5085_v26 = vsel %vm12582_vm8, %v5067_v51, %v5071_v39  ;;  %vm12608_vm8 = vcmp.lt.s32.totalorder %v7159_v10, 99 }
 0x712   :  { %v5073_v40 = vpop.permute.xlu0 %5072  ;;  %5354 = vrot.lane.b32.xlu1 %v9681_v30, %s12577_s8  ;;  %v5092_v28 = vmul.f32 %v5085_v26, %v12585_v1  ;;  %vm12610_vm10 = vmmov %vm12608_vm8 }
 0x713   :  { %v5082_v21 = vsel %vm12583_vm9, %v5069_v5, %v5073_v40  ;;  %vm12609_vm9 = vmmov %vm12608_vm8 }
 0x714   :  { %5356 = vrot.lane.b32.xlu0 %v9685_v3, %s12577_s8  ;;  %v5075_v31 = vpop.permute.xlu1 %5074  ;;  %v5089_v17 = vmul.f32 %v5082_v21, %v12587_v32  ;;  %v5096_v38 = vpack.c.bf16 %v5092_v28, %v5088_v56 }
 0x715   :  { %v5083_v61 = vsel %vm12586_vm11, %v5071_v39, %v5075_v31  ;;  %vm12612_vm11 = vmmov %vm12608_vm8 }
 0x716   :  { %v5093_v47 = vmul.f32 %v5083_v61, %v12587_v32  ;;  %v5077_v60 = vpop.permute.xlu0 %5076  ;;  %5358 = vrot.lane.b32.xlu1 %v9689_v58, %s12577_s8  ;;  %v12607_v61 = vld [vmem:[#allocation125_spill] sm:$0xff] }
 0x717   :  { %v5080_v29 = vsel %vm12588_vm15, %v5073_v40, %v5077_v60  ;;  %v5086_v36 = vsel %vm12589_vm13, %v5077_v60, %v5065_v0  ;;  %vm12614_vm15 = vmmov %vm12608_vm8 }
 0x718   :  { %5384 = vrot.lane.b32.xlu0 %v9661_v2, %s12590_s9  ;;  %v5079_v37 = vpop.permute.xlu1 %5078  ;;  %v5097_v27 = vpack.c.bf16 %v5093_v47, %v5089_v17  ;;  %v5090_v24 = vmul.f32 %v5080_v29, %v12591_v15  ;;  %v5091_v41 = vmul.f32 %v5086_v36, %v12594_v59  ;;  %vm12615_vm13 = vmmov %vm12608_vm8 }
 0x719   :  { %v5081_v8 = vsel %vm12592_vm14, %v5075_v31, %v5079_v37  ;;  %v5087_v4 = vsel %vm12593_vm12, %v5079_v37, %v5067_v51  ;;  %vm12618_vm14 = vmmov %vm12608_vm8 }
 0x71a   :  { %v5094_v35 = vmul.f32 %v5081_v8, %v12591_v15  ;;  %v5095_v12 = vmul.f32 %v5087_v4, %v12594_v59  ;;  %v5105_v42 = vpop.permute.xlu0 %5104  ;;  %5386 = vrot.lane.b32.xlu1 %v9665_v6, %s12590_s9  ;;  %6015 = vmatprep.subr.bf16.mxu0 %v5097_v27  ;;  %v12611_v59 = vld [vmem:[#allocation126_spill] sm:$0xff]  ;;  %vm12619_vm12 = vmmov %vm12608_vm8 }
 0x71b   :  { %6016 = vmatpush1.bf16.msra.mxu0 %v5096_v38 }
 0x71c   :  { %v5098_v9 = vpack.c.bf16 %v5094_v35, %v5090_v24  ;;  %5388 = vrot.lane.b32.xlu0 %v9669_v46, %s12590_s9  ;;  %v5107_v50 = vpop.permute.xlu1 %5106  ;;  %v5099_v45 = vpack.c.bf16 %v5095_v12, %v5091_v41  ;;  %v12613_v12 = vld [vmem:[#allocation127_spill] sm:$0xff] }
 0x71e   :  { %v5109_v48 = vpop.permute.xlu0 %5108  ;;  %5390 = vrot.lane.b32.xlu1 %v9673_v25, %s12590_s9  ;;  %6179 = vmatprep.subr.bf16.mxu1 %v5099_v45 }
 0x71f   :  { %6180 = vmatpush1.bf16.msra.mxu1 %v5098_v9  ;;  %v5124_v19 = vsel %vm12597_vm2, %v5105_v42, %v5109_v48 }
 0x720   :  { %5392 = vrot.lane.b32.xlu0 %v9677_v20, %s12590_s9  ;;  %v5111_v34 = vpop.permute.xlu1 %5110  ;;  %v5128_v62 = vmul.f32 %v5124_v19, %v12598_v14  ;;  %v12617_v19 = vld [vmem:[#allocation128_spill] sm:$0xff] }
 0x721   :  { %v5125_v49 = vsel %vm12595_vm0, %v5107_v50, %v5111_v34  ;;  %vm12621_vm0 = vcmp.lt.s32.totalorder %v7159_v10, 98 }
 0x722   :  { %v5113_v52 = vpop.permute.xlu0 %5112  ;;  %5394 = vrot.lane.b32.xlu1 %v9681_v30, %s12590_s9  ;;  %v5132_v57 = vmul.f32 %v5125_v49, %v12598_v14  ;;  %vm12623_vm2 = vmmov %vm12621_vm0 }
 0x723   :  { %v5122_v13 = vsel %vm12596_vm1, %v5109_v48, %v5113_v52  ;;  %vm12622_vm1 = vmmov %vm12621_vm0 }
 0x724   :  { %5396 = vrot.lane.b32.xlu0 %v9685_v3, %s12590_s9  ;;  %v5115_v55 = vpop.permute.xlu1 %5114  ;;  %v5129_v0 = vmul.f32 %v5122_v13, %v12600_v11  ;;  %v5136_v21 = vpack.c.bf16 %v5132_v57, %v5128_v62 }
 0x725   :  { %v5123_v33 = vsel %vm12599_vm3, %v5111_v34, %v5115_v55  ;;  %vm12625_vm3 = vmmov %vm12621_vm0 }
 0x726   :  { %v5133_v23 = vmul.f32 %v5123_v33, %v12600_v11  ;;  %v5117_v51 = vpop.permute.xlu0 %5116  ;;  %5398 = vrot.lane.b32.xlu1 %v9689_v58, %s12590_s9  ;;  %v12620_v33 = vld [vmem:[#allocation129_spill] sm:$0xff] }
 0x727   :  { %v5120_v5 = vsel %vm12601_vm4, %v5113_v52, %v5117_v51  ;;  %v5126_v39 = vsel %vm12602_vm5, %v5117_v51, %v5105_v42  ;;  %vm12627_vm4 = vmmov %vm12621_vm0 }
 0x728   :  { %5424 = vrot.lane.b32.xlu0 %v9661_v2, %s12603_s10  ;;  %v5119_v26 = vpop.permute.xlu1 %5118  ;;  %v5137_v40 = vpack.c.bf16 %v5133_v23, %v5129_v0  ;;  %v5130_v31 = vmul.f32 %v5120_v5, %v12604_v43  ;;  %v5131_v32 = vmul.f32 %v5126_v39, %v12607_v61  ;;  %vm12628_vm5 = vmmov %vm12621_vm0 }
 0x729   :  { %v5121_v1 = vsel %vm12605_vm6, %v5115_v55, %v5119_v26  ;;  %v5127_v28 = vsel %vm12606_vm7, %v5119_v26, %v5107_v50  ;;  %vm12631_vm6 = vmmov %vm12621_vm0 }
 0x72a   :  { %v5134_v17 = vmul.f32 %v5121_v1, %v12604_v43  ;;  %v5135_v47 = vmul.f32 %v5127_v28, %v12607_v61  ;;  %v5145_v60 = vpop.permute.xlu0 %5144  ;;  %5426 = vrot.lane.b32.xlu1 %v9665_v6, %s12603_s10  ;;  %6017 = vmatprep.subr.bf16.mxu0 %v5137_v40  ;;  %v12624_v61 = vld [vmem:[#allocation130_spill] sm:$0xff]  ;;  %vm12632_vm7 = vmmov %vm12621_vm0 }
 0x72b   :  { %6018 = vmatpush1.bf16.msra.mxu0 %v5136_v21 }
 0x72c   :  { %v5138_v56 = vpack.c.bf16 %v5134_v17, %v5130_v31  ;;  %5428 = vrot.lane.b32.xlu0 %v9669_v46, %s12603_s10  ;;  %v5147_v29 = vpop.permute.xlu1 %5146  ;;  %v5139_v36 = vpack.c.bf16 %v5135_v47, %v5131_v32  ;;  %v12626_v47 = vld [vmem:[#allocation131_spill] sm:$0xff] }
 0x72e   :  { %v5149_v37 = vpop.permute.xlu0 %5148  ;;  %5430 = vrot.lane.b32.xlu1 %v9673_v25, %s12603_s10  ;;  %6181 = vmatprep.subr.bf16.mxu1 %v5139_v36 }
 0x72f   :  { %6182 = vmatpush1.bf16.msra.mxu1 %v5138_v56  ;;  %v5164_v8 = vsel %vm12610_vm10, %v5145_v60, %v5149_v37 }
 0x730   :  { %5432 = vrot.lane.b32.xlu0 %v9677_v20, %s12603_s10  ;;  %v5151_v27 = vpop.permute.xlu1 %5150  ;;  %v5168_v45 = vmul.f32 %v5164_v8, %v12611_v59  ;;  %v12630_v8 = vld [vmem:[#allocation132_spill] sm:$0xff] }
 0x731   :  { %v5165_v38 = vsel %vm12608_vm8, %v5147_v29, %v5151_v27  ;;  %vm12634_vm8 = vcmp.lt.s32.totalorder %v7159_v10, 97 }
 0x732   :  { %v5153_v15 = vpop.permute.xlu0 %5152  ;;  %5434 = vrot.lane.b32.xlu1 %v9681_v30, %s12603_s10  ;;  %v5172_v41 = vmul.f32 %v5165_v38, %v12611_v59  ;;  %vm12636_vm10 = vmmov %vm12634_vm8 }
 0x733   :  { %v5162_v24 = vsel %vm12609_vm9, %v5149_v37, %v5153_v15  ;;  %vm12635_vm9 = vmmov %vm12634_vm8 }
 0x734   :  { %5436 = vrot.lane.b32.xlu0 %v9685_v3, %s12603_s10  ;;  %v5155_v4 = vpop.permute.xlu1 %5154  ;;  %v5169_v42 = vmul.f32 %v5162_v24, %v12613_v12  ;;  %v5176_v13 = vpack.c.bf16 %v5172_v41, %v5168_v45 }
 0x735   :  { %v5163_v35 = vsel %vm12612_vm11, %v5151_v27, %v5155_v4  ;;  %vm12638_vm11 = vmmov %vm12634_vm8 }
 0x736   :  { %v5173_v9 = vmul.f32 %v5163_v35, %v12613_v12  ;;  %v5157_v50 = vpop.permute.xlu0 %5156  ;;  %5438 = vrot.lane.b32.xlu1 %v9689_v58, %s12603_s10  ;;  %v12633_v35 = vld [vmem:[#allocation133_spill] sm:$0xff] }
 0x737   :  { %v5160_v48 = vsel %vm12614_vm15, %v5153_v15, %v5157_v50  ;;  %v5166_v34 = vsel %vm12615_vm13, %v5157_v50, %v5145_v60  ;;  %vm12640_vm15 = vmmov %vm12634_vm8 }
 0x738   :  { %5464 = vrot.lane.b32.xlu0 %v9661_v2, %s12616_s0  ;;  %v5159_v49 = vpop.permute.xlu1 %5158  ;;  %v5177_v52 = vpack.c.bf16 %v5173_v9, %v5169_v42  ;;  %v5170_v55 = vmul.f32 %v5160_v48, %v12617_v19  ;;  %v5171_v11 = vmul.f32 %v5166_v34, %v12620_v33  ;;  %vm12641_vm13 = vmmov %vm12634_vm8 }
 0x739   :  { %v5161_v14 = vsel %vm12618_vm14, %v5155_v4, %v5159_v49  ;;  %v5167_v57 = vsel %vm12619_vm12, %v5159_v49, %v5147_v29  ;;  %vm12644_vm14 = vmmov %vm12634_vm8 }
 0x73a   :  { %v5174_v0 = vmul.f32 %v5161_v14, %v12617_v19  ;;  %v5175_v23 = vmul.f32 %v5167_v57, %v12620_v33  ;;  %v5185_v51 = vpop.permute.xlu0 %5184  ;;  %5466 = vrot.lane.b32.xlu1 %v9665_v6, %s12616_s0  ;;  %6019 = vmatprep.subr.bf16.mxu0 %v5177_v52  ;;  %v12637_v33 = vld [vmem:[#allocation134_spill] sm:$0xff]  ;;  %vm12645_vm12 = vmmov %vm12634_vm8 }
 0x73b   :  { %6020 = vmatpush1.bf16.msra.mxu0 %v5176_v13 }
 0x73c   :  { %v5178_v62 = vpack.c.bf16 %v5174_v0, %v5170_v55  ;;  %5468 = vrot.lane.b32.xlu0 %v9669_v46, %s12616_s0  ;;  %v5187_v5 = vpop.permute.xlu1 %5186  ;;  %v5179_v39 = vpack.c.bf16 %v5175_v23, %v5171_v11  ;;  %v12639_v23 = vld [vmem:[#allocation135_spill] sm:$0xff] }
 0x73e   :  { %v5189_v26 = vpop.permute.xlu0 %5188  ;;  %5470 = vrot.lane.b32.xlu1 %v9673_v25, %s12616_s0  ;;  %6183 = vmatprep.subr.bf16.mxu1 %v5179_v39 }
 0x73f   :  { %6184 = vmatpush1.bf16.msra.mxu1 %v5178_v62  ;;  %v5204_v1 = vsel %vm12623_vm2, %v5185_v51, %v5189_v26 }
 0x740   :  { %5472 = vrot.lane.b32.xlu0 %v9677_v20, %s12616_s0  ;;  %v5191_v40 = vpop.permute.xlu1 %5190  ;;  %v5208_v36 = vmul.f32 %v5204_v1, %v12624_v61  ;;  %v12643_v1 = vld [vmem:[#allocation136_spill] sm:$0xff] }
 0x741   :  { %v5205_v21 = vsel %vm12621_vm0, %v5187_v5, %v5191_v40  ;;  %vm12647_vm0 = vcmp.lt.s32.totalorder %v7159_v10, 96 }
 0x742   :  { %v5193_v43 = vpop.permute.xlu0 %5192  ;;  %5474 = vrot.lane.b32.xlu1 %v9681_v30, %s12616_s0  ;;  %v5212_v32 = vmul.f32 %v5205_v21, %v12624_v61  ;;  %vm12649_vm2 = vmmov %vm12647_vm0 }
 0x743   :  { %v5202_v31 = vsel %vm12622_vm1, %v5189_v26, %v5193_v43  ;;  %vm12648_vm1 = vmmov %vm12647_vm0 }
 0x744   :  { %5476 = vrot.lane.b32.xlu0 %v9685_v3, %s12616_s0  ;;  %v5195_v28 = vpop.permute.xlu1 %5194  ;;  %v5209_v60 = vmul.f32 %v5202_v31, %v12626_v47  ;;  %v5216_v24 = vpack.c.bf16 %v5212_v32, %v5208_v36 }
 0x745   :  { %v5203_v17 = vsel %vm12625_vm3, %v5191_v40, %v5195_v28  ;;  %vm12651_vm3 = vmmov %vm12647_vm0 }
 0x746   :  { %v5213_v56 = vmul.f32 %v5203_v17, %v12626_v47  ;;  %v5197_v29 = vpop.permute.xlu0 %5196  ;;  %5478 = vrot.lane.b32.xlu1 %v9689_v58, %s12616_s0  ;;  %v12646_v17 = vld [vmem:[#allocation137_spill] sm:$0xff] }
 0x747   :  { %v5200_v37 = vsel %vm12627_vm4, %v5193_v43, %v5197_v29  ;;  %v5206_v27 = vsel %vm12628_vm5, %v5197_v29, %v5185_v51  ;;  %vm12653_vm4 = vmmov %vm12647_vm0 }
 0x748   :  { %5504 = vrot.lane.b32.xlu0 %v9661_v2, %s12629_s11  ;;  %v5199_v38 = vpop.permute.xlu1 %5198  ;;  %v5217_v15 = vpack.c.bf16 %v5213_v56, %v5209_v60  ;;  %v5210_v4 = vmul.f32 %v5200_v37, %v12630_v8  ;;  %v5211_v12 = vmul.f32 %v5206_v27, %v12633_v35  ;;  %vm12654_vm5 = vmmov %vm12647_vm0 }
 0x749   :  { %v5201_v59 = vsel %vm12631_vm6, %v5195_v28, %v5199_v38  ;;  %v5207_v41 = vsel %vm12632_vm7, %v5199_v38, %v5187_v5  ;;  %vm12657_vm6 = vmmov %vm12647_vm0 }
 0x74a   :  { %v5214_v42 = vmul.f32 %v5201_v59, %v12630_v8  ;;  %v5215_v9 = vmul.f32 %v5207_v41, %v12633_v35  ;;  %v5225_v50 = vpop.permute.xlu0 %5224  ;;  %5506 = vrot.lane.b32.xlu1 %v9665_v6, %s12629_s11  ;;  %6021 = vmatprep.subr.bf16.mxu0 %v5217_v15  ;;  %v12650_v35 = vld [vmem:[#allocation138_spill] sm:$0xff]  ;;  %vm12658_vm7 = vmmov %vm12647_vm0 }
 0x74b   :  { %6022 = vmatpush1.bf16.msra.mxu0 %v5216_v24 }
 0x74c   :  { %v5218_v45 = vpack.c.bf16 %v5214_v42, %v5210_v4  ;;  %5508 = vrot.lane.b32.xlu0 %v9669_v46, %s12629_s11  ;;  %v5227_v48 = vpop.permute.xlu1 %5226  ;;  %v5219_v34 = vpack.c.bf16 %v5215_v9, %v5211_v12  ;;  %v12652_v9 = vld [vmem:[#allocation139_spill] sm:$0xff] }
 0x74e   :  { %v5229_v49 = vpop.permute.xlu0 %5228  ;;  %5510 = vrot.lane.b32.xlu1 %v9673_v25, %s12629_s11  ;;  %6185 = vmatprep.subr.bf16.mxu1 %v5219_v34 }
 0x74f   :  { %6186 = vmatpush1.bf16.msra.mxu1 %v5218_v45  ;;  %v5244_v14 = vsel %vm12636_vm10, %v5225_v50, %v5229_v49 }
 0x750   :  { %5512 = vrot.lane.b32.xlu0 %v9677_v20, %s12629_s11  ;;  %v5231_v52 = vpop.permute.xlu1 %5230  ;;  %v5248_v39 = vmul.f32 %v5244_v14, %v12637_v33  ;;  %v12656_v14 = vld [vmem:[#allocation140_spill] sm:$0xff] }
 0x751   :  { %v5245_v13 = vsel %vm12634_vm8, %v5227_v48, %v5231_v52  ;;  %vm12660_vm8 = vcmp.lt.s32.totalorder %v7159_v10, 95 }
 0x752   :  { %v5233_v19 = vpop.permute.xlu0 %5232  ;;  %5514 = vrot.lane.b32.xlu1 %v9681_v30, %s12629_s11  ;;  %v5252_v11 = vmul.f32 %v5245_v13, %v12637_v33  ;;  %vm12662_vm10 = vmmov %vm12660_vm8 }
 0x753   :  { %v5242_v55 = vsel %vm12635_vm9, %v5229_v49, %v5233_v19  ;;  %vm12661_vm9 = vmmov %vm12660_vm8 }
 0x754   :  { %5516 = vrot.lane.b32.xlu0 %v9685_v3, %s12629_s11  ;;  %v5235_v57 = vpop.permute.xlu1 %5234  ;;  %v5249_v51 = vmul.f32 %v5242_v55, %v12639_v23  ;;  %v5256_v31 = vpack.c.bf16 %v5252_v11, %v5248_v39 }
 0x755   :  { %v5243_v0 = vsel %vm12638_vm11, %v5231_v52, %v5235_v57  ;;  %vm12664_vm11 = vmmov %vm12660_vm8 }
 0x756   :  { %v5253_v62 = vmul.f32 %v5243_v0, %v12639_v23  ;;  %v5237_v5 = vpop.permute.xlu0 %5236  ;;  %5518 = vrot.lane.b32.xlu1 %v9689_v58, %s12629_s11  ;;  %v12659_v0 = vld [vmem:[#allocation141_spill] sm:$0xff] }
 0x757   :  { %v5240_v26 = vsel %vm12640_vm15, %v5233_v19, %v5237_v5  ;;  %v5246_v40 = vsel %vm12641_vm13, %v5237_v5, %v5225_v50  ;;  %vm12666_vm15 = vmmov %vm12660_vm8 }
 0x758   :  { %5544 = vrot.lane.b32.xlu0 %v9661_v2, %s12642_s12  ;;  %v5239_v21 = vpop.permute.xlu1 %5238  ;;  %v5257_v43 = vpack.c.bf16 %v5253_v62, %v5249_v51  ;;  %v5250_v28 = vmul.f32 %v5240_v26, %v12643_v1  ;;  %v5251_v47 = vmul.f32 %v5246_v40, %v12646_v17  ;;  %vm12667_vm13 = vmmov %vm12660_vm8 }
 0x759   :  { %v5241_v61 = vsel %vm12644_vm14, %v5235_v57, %v5239_v21  ;;  %v5247_v32 = vsel %vm12645_vm12, %v5239_v21, %v5227_v48  ;;  %vm12670_vm14 = vmmov %vm12660_vm8 }
 0x75a   :  { %v5254_v60 = vmul.f32 %v5241_v61, %v12643_v1  ;;  %v5255_v56 = vmul.f32 %v5247_v32, %v12646_v17  ;;  %v5265_v29 = vpop.permute.xlu0 %5264  ;;  %5546 = vrot.lane.b32.xlu1 %v9665_v6, %s12642_s12  ;;  %6023 = vmatprep.subr.bf16.mxu0 %v5257_v43  ;;  %v12663_v17 = vld [vmem:[#allocation142_spill] sm:$0xff]  ;;  %vm12671_vm12 = vmmov %vm12660_vm8 }
 0x75b   :  { %6024 = vmatpush1.bf16.msra.mxu0 %v5256_v31 }
 0x75c   :  { %v5258_v36 = vpack.c.bf16 %v5254_v60, %v5250_v28  ;;  %5548 = vrot.lane.b32.xlu0 %v9669_v46, %s12642_s12  ;;  %v5267_v37 = vpop.permute.xlu1 %5266  ;;  %v5259_v27 = vpack.c.bf16 %v5255_v56, %v5251_v47  ;;  %v12665_v56 = vld [vmem:[#allocation143_spill] sm:$0xff] }
 0x75e   :  { %v5269_v38 = vpop.permute.xlu0 %5268  ;;  %5550 = vrot.lane.b32.xlu1 %v9673_v25, %s12642_s12  ;;  %6187 = vmatprep.subr.bf16.mxu1 %v5259_v27 }
 0x75f   :  { %6188 = vmatpush1.bf16.msra.mxu1 %v5258_v36  ;;  %v5284_v59 = vsel %vm12649_vm2, %v5265_v29, %v5269_v38 }
 0x760   :  { %5552 = vrot.lane.b32.xlu0 %v9677_v20, %s12642_s12  ;;  %v5271_v15 = vpop.permute.xlu1 %5270  ;;  %v5288_v34 = vmul.f32 %v5284_v59, %v12650_v35  ;;  %v12669_v59 = vld [vmem:[#allocation144_spill] sm:$0xff] }
 0x761   :  { %v5285_v24 = vsel %vm12647_vm0, %v5267_v37, %v5271_v15  ;;  %vm12673_vm0 = vcmp.lt.s32.totalorder %v7159_v10, 94 }
 0x762   :  { %v5273_v8 = vpop.permute.xlu0 %5272  ;;  %5554 = vrot.lane.b32.xlu1 %v9681_v30, %s12642_s12  ;;  %v5292_v12 = vmul.f32 %v5285_v24, %v12650_v35  ;;  %vm12675_vm2 = vmmov %vm12673_vm0 }
 0x763   :  { %v5282_v4 = vsel %vm12648_vm1, %v5269_v38, %v5273_v8  ;;  %vm12674_vm1 = vmmov %vm12673_vm0 }
 0x764   :  { %5556 = vrot.lane.b32.xlu0 %v9685_v3, %s12642_s12  ;;  %v5275_v41 = vpop.permute.xlu1 %5274  ;;  %v5289_v50 = vmul.f32 %v5282_v4, %v12652_v9  ;;  %v5296_v55 = vpack.c.bf16 %v5292_v12, %v5288_v34 }
 0x765   :  { %v5283_v42 = vsel %vm12651_vm3, %v5271_v15, %v5275_v41  ;;  %vm12677_vm3 = vmmov %vm12673_vm0 }
 0x766   :  { %v5293_v45 = vmul.f32 %v5283_v42, %v12652_v9  ;;  %v5277_v48 = vpop.permute.xlu0 %5276  ;;  %5558 = vrot.lane.b32.xlu1 %v9689_v58, %s12642_s12  ;;  %v12672_v42 = vld [vmem:[#allocation145_spill] sm:$0xff] }
 0x767   :  { %v5280_v49 = vsel %vm12653_vm4, %v5273_v8, %v5277_v48  ;;  %v5286_v52 = vsel %vm12654_vm5, %v5277_v48, %v5265_v29  ;;  %vm12679_vm4 = vmmov %vm12673_vm0 }
 0x768   :  { %5584 = vrot.lane.b32.xlu0 %v9661_v2, %s12655_s13  ;;  %v5279_v13 = vpop.permute.xlu1 %5278  ;;  %v5297_v19 = vpack.c.bf16 %v5293_v45, %v5289_v50  ;;  %v5290_v57 = vmul.f32 %v5280_v49, %v12656_v14  ;;  %v5291_v23 = vmul.f32 %v5286_v52, %v12659_v0  ;;  %vm12680_vm5 = vmmov %vm12673_vm0 }
 0x769   :  { %v5281_v33 = vsel %vm12657_vm6, %v5275_v41, %v5279_v13  ;;  %v5287_v11 = vsel %vm12658_vm7, %v5279_v13, %v5267_v37  ;;  %vm12681_vm6 = vmmov %vm12673_vm0 }
 0x76a   :  { %v5294_v51 = vmul.f32 %v5281_v33, %v12656_v14  ;;  %v5295_v62 = vmul.f32 %v5287_v11, %v12659_v0  ;;  %v5305_v5 = vpop.permute.xlu0 %5304  ;;  %5586 = vrot.lane.b32.xlu1 %v9665_v6, %s12655_s13  ;;  %6025 = vmatprep.subr.bf16.mxu0 %v5297_v19  ;;  %v11377_v19 = vld [vmem:[#allocation8 + $0x10] sm:$0xff]  ;;  %vm12682_vm7 = vmmov %vm12673_vm0 }
 0x76b   :  { %6026 = vmatpush1.bf16.msra.mxu0 %v5296_v55  ;;  %v6520_v14 = vcombine.high %v11377_v19, %v11377_v19 }
 0x76c   :  { %v5298_v39 = vpack.c.bf16 %v5294_v51, %v5290_v57  ;;  %5588 = vrot.lane.b32.xlu0 %v9669_v46, %s12655_s13  ;;  %v5307_v26 = vpop.permute.xlu1 %5306  ;;  %v5299_v40 = vpack.c.bf16 %v5295_v62, %v5291_v23  ;;  %v12676_v51 = vld [vmem:[#allocation146_spill] sm:$0xff] }
 0x76d   :  { %6045 = vmatprep.mubr.bf16.mxu0 %v6520_v14  ;;  %6209 = vmatprep.mubr.bf16.mxu1 %v6520_v14 }
 0x76e   :  { %v5309_v21 = vpop.permute.xlu0 %5308  ;;  %5590 = vrot.lane.b32.xlu1 %v9673_v25, %s12655_s13  ;;  %6189 = vmatprep.subr.bf16.mxu1 %v5299_v40 }
 0x76f   :  { %6190 = vmatpush1.bf16.msra.mxu1 %v5298_v39  ;;  %v5324_v61 = vsel %vm12662_vm10, %v5305_v5, %v5309_v21  ;;  %v12678_v39 = vld [vmem:[#allocation147_spill] sm:$0xff] }
 0x770   :  { %5592 = vrot.lane.b32.xlu0 %v9677_v20, %s12655_s13  ;;  %v5311_v43 = vpop.permute.xlu1 %5310  ;;  %v5328_v27 = vmul.f32 %v5324_v61, %v12663_v17 }
 0x771   :  { %v5325_v31 = vsel %vm12660_vm8, %v5307_v26, %v5311_v43  ;;  %vm12683_vm8 = vcmp.lt.s32.totalorder %v7159_v10, 93 }
 0x772   :  { %v5313_v1 = vpop.permute.xlu0 %5312  ;;  %5594 = vrot.lane.b32.xlu1 %v9681_v30, %s12655_s13  ;;  %v5332_v47 = vmul.f32 %v5325_v31, %v12663_v17  ;;  %vm12685_vm10 = vmmov %vm12683_vm8 }
 0x773   :  { %v5322_v28 = vsel %vm12661_vm9, %v5309_v21, %v5313_v1  ;;  %vm12684_vm9 = vmmov %vm12683_vm8 }
 0x774   :  { %5596 = vrot.lane.b32.xlu0 %v9685_v3, %s12655_s13  ;;  %v5315_v32 = vpop.permute.xlu1 %5314  ;;  %v5329_v29 = vmul.f32 %v5322_v28, %v12665_v56  ;;  %v5336_v4 = vpack.c.bf16 %v5332_v47, %v5328_v27 }
 0x775   :  { %v5323_v60 = vsel %vm12664_vm11, %v5311_v43, %v5315_v32  ;;  %vm12686_vm11 = vmmov %vm12683_vm8 }
 0x776   :  { %v5333_v36 = vmul.f32 %v5323_v60, %v12665_v56  ;;  %v5317_v37 = vpop.permute.xlu0 %5316  ;;  %5598 = vrot.lane.b32.xlu1 %v9689_v58, %s12655_s13 }
 0x777   :  { %v5320_v38 = vsel %vm12666_vm15, %v5313_v1, %v5317_v37  ;;  %v5326_v15 = vsel %vm12667_vm13, %v5317_v37, %v5305_v5  ;;  %vm12687_vm15 = vmmov %vm12683_vm8 }
 0x778   :  { %5624 = vrot.lane.b32.xlu0 %v9661_v2, %s12668_s14  ;;  %v5319_v24 = vpop.permute.xlu1 %5318  ;;  %v5337_v8 = vpack.c.bf16 %v5333_v36, %v5329_v29  ;;  %v5330_v41 = vmul.f32 %v5320_v38, %v12669_v59  ;;  %v5331_v9 = vmul.f32 %v5326_v15, %v12672_v42  ;;  %vm12688_vm13 = vmmov %vm12683_vm8 }
 0x779   :  { %v5321_v35 = vsel %vm12670_vm14, %v5315_v32, %v5319_v24  ;;  %v5327_v12 = vsel %vm12671_vm12, %v5319_v24, %v5307_v26  ;;  %vm12689_vm14 = vmmov %vm12683_vm8 }
 0x77a   :  { %v5334_v50 = vmul.f32 %v5321_v35, %v12669_v59  ;;  %v5335_v45 = vmul.f32 %v5327_v12, %v12672_v42  ;;  %v5345_v48 = vpop.permute.xlu0 %5344  ;;  %5626 = vrot.lane.b32.xlu1 %v9665_v6, %s12668_s14  ;;  %6027 = vmatprep.subr.bf16.mxu0 %v5337_v8  ;;  %vm12690_vm12 = vmmov %vm12683_vm8 }
 0x77b   :  { %6028 = vmatpush1.bf16.msra.mxu0 %v5336_v4 }
 0x77c   :  { %v5338_v34 = vpack.c.bf16 %v5334_v50, %v5330_v41  ;;  %5628 = vrot.lane.b32.xlu0 %v9669_v46, %s12668_s14  ;;  %v5347_v49 = vpop.permute.xlu1 %5346  ;;  %v5339_v52 = vpack.c.bf16 %v5335_v45, %v5331_v9 }
 0x77e   :  { %v5349_v13 = vpop.permute.xlu0 %5348  ;;  %5630 = vrot.lane.b32.xlu1 %v9673_v25, %s12668_s14  ;;  %6191 = vmatprep.subr.bf16.mxu1 %v5339_v52 }
 0x77f   :  { %6192 = vmatpush1.bf16.msra.mxu1 %v5338_v34  ;;  %v5364_v0 = vsel %vm12675_vm2, %v5345_v48, %v5349_v13 }
 0x780   :  { %5632 = vrot.lane.b32.xlu0 %v9677_v20, %s12668_s14  ;;  %v5351_v55 = vpop.permute.xlu1 %5350  ;;  %v5368_v43 = vmul.f32 %v5364_v0, %v12676_v51 }
 0x781   :  { %v5365_v57 = vsel %vm12673_vm0, %v5347_v49, %v5351_v55  ;;  %vm12691_vm0 = vcmp.lt.s32.totalorder %v7159_v10, 83 }
 0x782   :  { %v5353_v33 = vpop.permute.xlu0 %5352  ;;  %5634 = vrot.lane.b32.xlu1 %v9681_v30, %s12668_s14  ;;  %v5372_v62 = vmul.f32 %v5365_v57, %v12676_v51  ;;  %vm12693_vm2 = vmmov %vm12691_vm0  ;;  %v12695_v51 = vld [vmem:[#allocation148_spill] sm:$0xff] }
 0x783   :  { %v5362_v11 = vsel %vm12674_vm1, %v5349_v13, %v5353_v33  ;;  %vm12692_vm1 = vmmov %vm12691_vm0 }
 0x784   :  { %5636 = vrot.lane.b32.xlu0 %v9685_v3, %s12668_s14  ;;  %v5355_v23 = vpop.permute.xlu1 %5354  ;;  %v5369_v26 = vmul.f32 %v5362_v11, %v12678_v39  ;;  %v5376_v32 = vpack.c.bf16 %v5372_v62, %v5368_v43 }
 0x785   :  { %v5363_v5 = vsel %vm12677_vm3, %v5351_v55, %v5355_v23  ;;  %vm12694_vm3 = vmmov %vm12691_vm0 }
 0x786   :  { %v5373_v40 = vmul.f32 %v5363_v5, %v12678_v39  ;;  %v5357_v21 = vpop.permute.xlu0 %5356  ;;  %5638 = vrot.lane.b32.xlu1 %v9689_v58, %s12668_s14 }
 0x787   :  { %v5360_v31 = vsel %vm12679_vm4, %v5353_v33, %v5357_v21  ;;  %v5366_v1 = vsel %vm12680_vm5, %v5357_v21, %v5345_v48  ;;  %vm12696_vm4 = vmmov %vm12691_vm0 }
 0x788   :  { %5664 = vrot.lane.b32.xlu0 %v9661_v2, %s6928_s22  ;;  %v5359_v28 = vpop.permute.xlu1 %5358  ;;  %v5377_v61 = vpack.c.bf16 %v5373_v40, %v5369_v26  ;;  %v5370_v17 = vmul.f32 %v5360_v31, %v9325_v7  ;;  %v5371_v56 = vmul.f32 %v5366_v1, %v9328_v63  ;;  %vm12697_vm5 = vmmov %vm12691_vm0 }
 0x789   :  { %v5361_v47 = vsel %vm12681_vm6, %v5355_v23, %v5359_v28  ;;  %v5367_v60 = vsel %vm12682_vm7, %v5359_v28, %v5347_v49  ;;  %vm12698_vm6 = vmmov %vm12691_vm0 }
 0x78a   :  { %v5374_v29 = vmul.f32 %v5361_v47, %v9325_v7  ;;  %v5375_v36 = vmul.f32 %v5367_v60, %v9328_v63  ;;  %v5385_v37 = vpop.permute.xlu0 %5384  ;;  %5666 = vrot.lane.b32.xlu1 %v9665_v6, %s6928_s22  ;;  %6029 = vmatprep.subr.bf16.mxu0 %v5377_v61  ;;  %vm12699_vm7 = vmmov %vm12691_vm0  ;;  %v12701_v47 = vld [vmem:[#allocation150_spill] sm:$0xff] }
 0x78b   :  { %6030 = vmatpush1.bf16.msra.mxu0 %v5376_v32  ;;  %v12700_v32 = vld [vmem:[#allocation149_spill] sm:$0xff] }
 0x78c   :  { %v5378_v2 = vpack.c.bf16 %v5374_v29, %v5370_v17  ;;  %5668 = vrot.lane.b32.xlu0 %v9669_v46, %s6928_s22  ;;  %v5387_v27 = vpop.permute.xlu1 %5386  ;;  %v5379_v38 = vpack.c.bf16 %v5375_v36, %v5371_v56 }
 0x78e   :  { %v5389_v15 = vpop.permute.xlu0 %5388  ;;  %5670 = vrot.lane.b32.xlu1 %v9673_v25, %s6928_s22  ;;  %6193 = vmatprep.subr.bf16.mxu1 %v5379_v38 }
 0x78f   :  { %6194 = vmatpush1.bf16.msra.mxu1 %v5378_v2  ;;  %v5404_v24 = vsel %vm12685_vm10, %v5385_v37, %v5389_v15 }
 0x790   :  { %5672 = vrot.lane.b32.xlu0 %v9677_v20, %s6928_s22  ;;  %v5391_v7 = vpop.permute.xlu1 %5390  ;;  %v5408_v41 = vmul.f32 %v5404_v24, %v9355_v22  ;;  %v12705_v24 = vld [vmem:[#allocation151_spill] sm:$0xff] }
 0x791   :  { %v5405_v63 = vsel %vm12683_vm8, %v5387_v27, %v5391_v7  ;;  %vm12702_vm8 = vcmp.lt.s32.totalorder %v7159_v10, 82 }
 0x792   :  { %v5393_v6 = vpop.permute.xlu0 %5392  ;;  %5674 = vrot.lane.b32.xlu1 %v9681_v30, %s6928_s22  ;;  %v5412_v20 = vmul.f32 %v5405_v63, %v9355_v22  ;;  %vm12704_vm10 = vmmov %vm12702_vm8 }
 0x793   :  { %v5402_v46 = vsel %vm12684_vm9, %v5389_v15, %v5393_v6  ;;  %vm12703_vm9 = vmmov %vm12702_vm8 }
 0x794   :  { %5676 = vrot.lane.b32.xlu0 %v9685_v3, %s6928_s22  ;;  %v5395_v25 = vpop.permute.xlu1 %5394  ;;  %v5409_v4 = vmul.f32 %v5402_v46, %v9364_v18  ;;  %v5416_v9 = vpack.c.bf16 %v5412_v20, %v5408_v41 }
 0x795   :  { %v5403_v8 = vsel %vm12686_vm11, %v5391_v7, %v5395_v25  ;;  %vm12706_vm11 = vmmov %vm12702_vm8 }
 0x796   :  { %v5413_v59 = vmul.f32 %v5403_v8, %v9364_v18  ;;  %v5397_v30 = vpop.permute.xlu0 %5396  ;;  %5678 = vrot.lane.b32.xlu1 %v9689_v58, %s6928_s22  ;;  %v12707_v8 = vld [vmem:[#allocation152_spill] sm:$0xff] }
 0x797   :  { %v5400_v35 = vsel %vm12687_vm15, %v5393_v6, %v5397_v30  ;;  %v5406_v3 = vsel %vm12688_vm13, %v5397_v30, %v5385_v37  ;;  %vm12708_vm15 = vmmov %vm12702_vm8 }
 0x798   :  { %v5399_v12 = vpop.permute.xlu1 %5398  ;;  %v5417_v42 = vpack.c.bf16 %v5413_v59, %v5409_v4  ;;  %v5410_v45 = vmul.f32 %v5400_v35, %v9378_v44  ;;  %v5411_v58 = vmul.f32 %v5406_v3, %v9381_v16  ;;  %vm12709_vm13 = vmmov %vm12702_vm8 }
 0x799   :  { %v5401_v50 = vsel %vm12689_vm14, %v5395_v25, %v5399_v12  ;;  %v5407_v18 = vsel %vm12690_vm12, %v5399_v12, %v5387_v27  ;;  %vm12710_vm14 = vmmov %vm12702_vm8 }
 0x79a   :  { %v5414_v22 = vmul.f32 %v5401_v50, %v9378_v44  ;;  %v5415_v48 = vmul.f32 %v5407_v18, %v9381_v16  ;;  %v5425_v34 = vpop.permute.xlu0 %5424  ;;  %6031 = vmatprep.subr.bf16.mxu0 %v5417_v42  ;;  %vm12711_vm12 = vmmov %vm12702_vm8 }
 0x79b   :  { %6032 = vmatpush1.bf16.msra.mxu0 %v5416_v9 }
 0x79c   :  { %v5418_v49 = vpack.c.bf16 %v5414_v22, %v5410_v45  ;;  %v5427_v52 = vpop.permute.xlu1 %5426  ;;  %v5419_v13 = vpack.c.bf16 %v5415_v48, %v5411_v58  ;;  %v12712_v45 = vld [vmem:[#allocation153_spill] sm:$0xff]  ;;  %v12713_v22 = vld [vmem:[#allocation154_spill] sm:$0xff] }
 0x79e   :  { %v5429_v55 = vpop.permute.xlu0 %5428  ;;  %6195 = vmatprep.subr.bf16.mxu1 %v5419_v13 }
 0x79f   :  { %6196 = vmatpush1.bf16.msra.mxu1 %v5418_v49  ;;  %v5444_v44 = vsel %vm12693_vm2, %v5425_v34, %v5429_v55 }
 0x7a0   :  { %v5431_v14 = vpop.permute.xlu1 %5430  ;;  %v5448_v26 = vmul.f32 %v5444_v44, %v9400_v53 }
 0x7a1   :  { %v5445_v57 = vsel %vm12691_vm0, %v5427_v52, %v5431_v14  ;;  %vm12714_vm0 = vcmp.lt.s32.totalorder %v7159_v10, 81 }
 0x7a2   :  { %v5433_v33 = vpop.permute.xlu0 %5432  ;;  %v5452_v0 = vmul.f32 %v5445_v57, %v9400_v53  ;;  %vm12716_vm2 = vmmov %vm12714_vm0 }
 0x7a3   :  { %v5442_v11 = vsel %vm12692_vm1, %v5429_v55, %v5433_v33  ;;  %vm12715_vm1 = vmmov %vm12714_vm0 }
 0x7a4   :  { %v5435_v16 = vpop.permute.xlu1 %5434  ;;  %v5449_v62 = vmul.f32 %v5442_v11, %v12695_v51  ;;  %v5456_v1 = vpack.c.bf16 %v5452_v0, %v5448_v26 }
 0x7a5   :  { %v5443_v23 = vsel %vm12694_vm3, %v5431_v14, %v5435_v16  ;;  %vm12718_vm3 = vmmov %vm12714_vm0 }
 0x7a6   :  { %v5453_v5 = vmul.f32 %v5443_v23, %v12695_v51  ;;  %v5437_v39 = vpop.permute.xlu0 %5436  ;;  %v12717_v51 = vld [vmem:[#allocation155_spill] sm:$0xff] }
 0x7a7   :  { %v5440_v40 = vsel %vm12696_vm4, %v5433_v33, %v5437_v39  ;;  %v5446_v21 = vsel %vm12697_vm5, %v5437_v39, %v5425_v34  ;;  %v12719_v39 = vld [vmem:[#allocation156_spill] sm:$0xff]  ;;  %vm12720_vm4 = vmmov %vm12714_vm0 }
 0x7a8   :  { %v5439_v43 = vpop.permute.xlu1 %5438  ;;  %v5457_v31 = vpack.c.bf16 %v5453_v5, %v5449_v62  ;;  %v5450_v17 = vmul.f32 %v5440_v40, %v12700_v32  ;;  %v5451_v60 = vmul.f32 %v5446_v21, %v12701_v47  ;;  %vm12721_vm5 = vmmov %vm12714_vm0 }
 0x7a9   :  { %v5441_v28 = vsel %vm12698_vm6, %v5435_v16, %v5439_v43  ;;  %v5447_v61 = vsel %vm12699_vm7, %v5439_v43, %v5427_v52  ;;  %vm12722_vm6 = vmmov %vm12714_vm0 }
 0x7aa   :  { %v5454_v53 = vmul.f32 %v5441_v28, %v12700_v32  ;;  %v5455_v56 = vmul.f32 %v5447_v61, %v12701_v47  ;;  %v5465_v29 = vpop.permute.xlu0 %5464  ;;  %6033 = vmatprep.subr.bf16.mxu0 %v5457_v31  ;;  %vm12723_vm7 = vmmov %vm12714_vm0 }
 0x7ab   :  { %6034 = vmatpush1.bf16.msra.mxu0 %v5456_v1 }
 0x7ac   :  { %v5458_v36 = vpack.c.bf16 %v5454_v53, %v5450_v17  ;;  %v5467_v37 = vpop.permute.xlu1 %5466  ;;  %v5459_v2 = vpack.c.bf16 %v5455_v56, %v5451_v60  ;;  %v12724_v60 = vld [vmem:[#allocation157_spill] sm:$0xff]  ;;  %v12725_v56 = vld [vmem:[#allocation158_spill] sm:$0xff] }
 0x7ae   :  { %v5469_v27 = vpop.permute.xlu0 %5468  ;;  %6197 = vmatprep.subr.bf16.mxu1 %v5459_v2 }
 0x7af   :  { %6198 = vmatpush1.bf16.msra.mxu1 %v5458_v36  ;;  %v5484_v6 = vsel %vm12704_vm10, %v5465_v29, %v5469_v27 }
 0x7b0   :  { %v5471_v38 = vpop.permute.xlu1 %5470  ;;  %v5488_v41 = vmul.f32 %v5484_v6, %v12705_v24 }
 0x7b1   :  { %v5485_v15 = vsel %vm12702_vm8, %v5467_v37, %v5471_v38  ;;  %vm12726_vm8 = vcmp.lt.s32.totalorder %v7159_v10, 80 }
 0x7b2   :  { %v5473_v7 = vpop.permute.xlu0 %5472  ;;  %v5492_v25 = vmul.f32 %v5485_v15, %v12705_v24  ;;  %vm12728_vm10 = vmmov %vm12726_vm8 }
 0x7b3   :  { %v5482_v63 = vsel %vm12703_vm9, %v5469_v27, %v5473_v7  ;;  %vm12727_vm9 = vmmov %vm12726_vm8 }
 0x7b4   :  { %v5475_v46 = vpop.permute.xlu1 %5474  ;;  %v5489_v4 = vmul.f32 %v5482_v63, %v12707_v8  ;;  %v5496_v9 = vpack.c.bf16 %v5492_v25, %v5488_v41 }
 0x7b5   :  { %v5483_v20 = vsel %vm12706_vm11, %v5471_v38, %v5475_v46  ;;  %vm12730_vm11 = vmmov %vm12726_vm8 }
 0x7b6   :  { %v5493_v59 = vmul.f32 %v5483_v20, %v12707_v8  ;;  %v5477_v30 = vpop.permute.xlu0 %5476  ;;  %v12729_v8 = vld [vmem:[#allocation159_spill] sm:$0xff] }
 0x7b7   :  { %v5480_v35 = vsel %vm12708_vm15, %v5473_v7, %v5477_v30  ;;  %v5486_v3 = vsel %vm12709_vm13, %v5477_v30, %v5465_v29  ;;  %v12731_v30 = vld [vmem:[#allocation160_spill] sm:$0xff]  ;;  %vm12732_vm15 = vmmov %vm12726_vm8 }
 0x7b8   :  { %v5479_v12 = vpop.permute.xlu1 %5478  ;;  %v5497_v42 = vpack.c.bf16 %v5493_v59, %v5489_v4  ;;  %v5490_v58 = vmul.f32 %v5480_v35, %v12712_v45  ;;  %v5491_v48 = vmul.f32 %v5486_v3, %v12713_v22  ;;  %vm12733_vm13 = vmmov %vm12726_vm8 }
 0x7b9   :  { %v5481_v50 = vsel %vm12710_vm14, %v5475_v46, %v5479_v12  ;;  %v5487_v18 = vsel %vm12711_vm12, %v5479_v12, %v5467_v37  ;;  %vm12734_vm14 = vmmov %vm12726_vm8 }
 0x7ba   :  { %v5494_v34 = vmul.f32 %v5481_v50, %v12712_v45  ;;  %v5495_v49 = vmul.f32 %v5487_v18, %v12713_v22  ;;  %v5505_v52 = vpop.permute.xlu0 %5504  ;;  %6035 = vmatprep.subr.bf16.mxu0 %v5497_v42  ;;  %vm12735_vm12 = vmmov %vm12726_vm8 }
 0x7bb   :  { %6036 = vmatpush1.bf16.msra.mxu0 %v5496_v9 }
 0x7bc   :  { %v5498_v13 = vpack.c.bf16 %v5494_v34, %v5490_v58  ;;  %v5507_v55 = vpop.permute.xlu1 %5506  ;;  %v5499_v14 = vpack.c.bf16 %v5495_v49, %v5491_v48  ;;  %v12736_v48 = vld [vmem:[#allocation161_spill] sm:$0xff]  ;;  %v12737_v49 = vld [vmem:[#allocation162_spill] sm:$0xff] }
 0x7be   :  { %v5509_v57 = vpop.permute.xlu0 %5508  ;;  %6199 = vmatprep.subr.bf16.mxu1 %v5499_v14 }
 0x7bf   :  { %6200 = vmatpush1.bf16.msra.mxu1 %v5498_v13  ;;  %v5524_v0 = vsel %vm12716_vm2, %v5505_v52, %v5509_v57 }
 0x7c0   :  { %v5511_v33 = vpop.permute.xlu1 %5510  ;;  %v5528_v43 = vmul.f32 %v5524_v0, %v12717_v51 }
 0x7c1   :  { %v5525_v11 = vsel %vm12714_vm0, %v5507_v55, %v5511_v33  ;;  %vm12738_vm0 = vcmp.lt.s32.totalorder %v7159_v10, 79 }
 0x7c2   :  { %v5513_v44 = vpop.permute.xlu0 %5512  ;;  %v5532_v62 = vmul.f32 %v5525_v11, %v12717_v51  ;;  %vm12740_vm2 = vmmov %vm12738_vm0 }
 0x7c3   :  { %v5522_v16 = vsel %vm12715_vm1, %v5509_v57, %v5513_v44  ;;  %vm12739_vm1 = vmmov %vm12738_vm0 }
 0x7c4   :  { %v5515_v23 = vpop.permute.xlu1 %5514  ;;  %v5529_v26 = vmul.f32 %v5522_v16, %v12719_v39  ;;  %v5536_v32 = vpack.c.bf16 %v5532_v62, %v5528_v43 }
 0x7c5   :  { %v5523_v5 = vsel %vm12718_vm3, %v5511_v33, %v5515_v23  ;;  %vm12742_vm3 = vmmov %vm12738_vm0 }
 0x7c6   :  { %v5533_v40 = vmul.f32 %v5523_v5, %v12719_v39  ;;  %v5517_v21 = vpop.permute.xlu0 %5516  ;;  %v12741_v39 = vld [vmem:[#allocation163_spill] sm:$0xff] }
 0x7c7   :  { %v5520_v31 = vsel %vm12720_vm4, %v5513_v44, %v5517_v21  ;;  %v5526_v1 = vsel %vm12721_vm5, %v5517_v21, %v5505_v52  ;;  %v12743_v21 = vld [vmem:[#allocation164_spill] sm:$0xff]  ;;  %vm12744_vm4 = vmmov %vm12738_vm0 }
 0x7c8   :  { %v5519_v28 = vpop.permute.xlu1 %5518  ;;  %v5537_v61 = vpack.c.bf16 %v5533_v40, %v5529_v26  ;;  %v5530_v53 = vmul.f32 %v5520_v31, %v12724_v60  ;;  %v5531_v29 = vmul.f32 %v5526_v1, %v12725_v56  ;;  %vm12745_vm5 = vmmov %vm12738_vm0 }
 0x7c9   :  { %v5521_v17 = vsel %vm12722_vm6, %v5515_v23, %v5519_v28  ;;  %v5527_v47 = vsel %vm12723_vm7, %v5519_v28, %v5507_v55  ;;  %vm12746_vm6 = vmmov %vm12738_vm0 }
 0x7ca   :  { %v5534_v36 = vmul.f32 %v5521_v17, %v12724_v60  ;;  %v5535_v37 = vmul.f32 %v5527_v47, %v12725_v56  ;;  %v5545_v2 = vpop.permute.xlu0 %5544  ;;  %6037 = vmatprep.subr.bf16.mxu0 %v5537_v61  ;;  %vm12747_vm7 = vmmov %vm12738_vm0 }
 0x7cb   :  { %6038 = vmatpush1.bf16.msra.mxu0 %v5536_v32 }
 0x7cc   :  { %v5538_v27 = vpack.c.bf16 %v5534_v36, %v5530_v53  ;;  %v5547_v38 = vpop.permute.xlu1 %5546  ;;  %v5539_v15 = vpack.c.bf16 %v5535_v37, %v5531_v29  ;;  %v12748_v29 = vld [vmem:[#allocation165_spill] sm:$0xff]  ;;  %v12749_v37 = vld [vmem:[#allocation166_spill] sm:$0xff] }
 0x7ce   :  { %v5549_v7 = vpop.permute.xlu0 %5548  ;;  %6201 = vmatprep.subr.bf16.mxu1 %v5539_v15 }
 0x7cf   :  { %6202 = vmatpush1.bf16.msra.mxu1 %v5538_v27  ;;  %v5564_v25 = vsel %vm12728_vm10, %v5545_v2, %v5549_v7 }
 0x7d0   :  { %v5551_v63 = vpop.permute.xlu1 %5550  ;;  %v5568_v12 = vmul.f32 %v5564_v25, %v12729_v8 }
 0x7d1   :  { %v5565_v6 = vsel %vm12726_vm8, %v5547_v38, %v5551_v63  ;;  %vm12750_vm8 = vcmp.lt.s32.totalorder %v7159_v10, 78 }
 0x7d2   :  { %v5553_v46 = vpop.permute.xlu0 %5552  ;;  %v5572_v4 = vmul.f32 %v5565_v6, %v12729_v8  ;;  %vm12752_vm10 = vmmov %vm12750_vm8 }
 0x7d3   :  { %v5562_v24 = vsel %vm12727_vm9, %v5549_v7, %v5553_v46  ;;  %vm12751_vm9 = vmmov %vm12750_vm8 }
 0x7d4   :  { %v5555_v20 = vpop.permute.xlu1 %5554  ;;  %v5569_v41 = vmul.f32 %v5562_v24, %v12731_v30  ;;  %v5576_v45 = vpack.c.bf16 %v5572_v4, %v5568_v12 }
 0x7d5   :  { %v5563_v59 = vsel %vm12730_vm11, %v5551_v63, %v5555_v20  ;;  %vm12754_vm11 = vmmov %vm12750_vm8 }
 0x7d6   :  { %v5573_v35 = vmul.f32 %v5563_v59, %v12731_v30  ;;  %v5557_v3 = vpop.permute.xlu0 %5556  ;;  %v12753_v30 = vld [vmem:[#allocation167_spill] sm:$0xff] }
 0x7d7   :  { %v5560_v42 = vsel %vm12732_vm15, %v5553_v46, %v5557_v3  ;;  %v5566_v9 = vsel %vm12733_vm13, %v5557_v3, %v5545_v2  ;;  %vm12755_vm15 = vmmov %vm12750_vm8 }
 0x7d8   :  { %v5559_v50 = vpop.permute.xlu1 %5558  ;;  %v5577_v18 = vpack.c.bf16 %v5573_v35, %v5569_v41  ;;  %v5570_v34 = vmul.f32 %v5560_v42, %v12736_v48  ;;  %v5571_v52 = vmul.f32 %v5566_v9, %v12737_v49  ;;  %vm12756_vm13 = vmmov %vm12750_vm8 }
 0x7d9   :  { %v5561_v58 = vsel %vm12734_vm14, %v5555_v20, %v5559_v50  ;;  %v5567_v22 = vsel %vm12735_vm12, %v5559_v50, %v5547_v38  ;;  %vm12757_vm14 = vmmov %vm12750_vm8 }
 0x7da   :  { %v5574_v13 = vmul.f32 %v5561_v58, %v12736_v48  ;;  %v5575_v55 = vmul.f32 %v5567_v22, %v12737_v49  ;;  %v5585_v14 = vpop.permute.xlu0 %5584  ;;  %6039 = vmatprep.subr.bf16.mxu0 %v5577_v18  ;;  %vm12758_vm12 = vmmov %vm12750_vm8  ;;  %v12759_v49 = vld [vmem:[#allocation168_spill] sm:$0xff] }
 0x7db   :  { %6040 = vmatpush1.bf16.msra.mxu0 %v5576_v45 }
 0x7dc   :  { %v5578_v57 = vpack.c.bf16 %v5574_v13, %v5570_v34  ;;  %v5587_v33 = vpop.permute.xlu1 %5586  ;;  %v5579_v11 = vpack.c.bf16 %v5575_v55, %v5571_v52  ;;  %v12760_v13 = vld [vmem:[#allocation169_spill] sm:$0xff] }
 0x7de   :  { %v5589_v44 = vpop.permute.xlu0 %5588  ;;  %6203 = vmatprep.subr.bf16.mxu1 %v5579_v11 }
 0x7df   :  { %6204 = vmatpush1.bf16.msra.mxu1 %v5578_v57  ;;  %v5604_v62 = vsel %vm12740_vm2, %v5585_v14, %v5589_v44 }
 0x7e0   :  { %v5591_v16 = vpop.permute.xlu1 %5590  ;;  %v5608_v28 = vmul.f32 %v5604_v62, %v12741_v39 }
 0x7e1   :  { %v5605_v0 = vsel %vm12738_vm0, %v5587_v33, %v5591_v16  ;;  %vm12762_vm0 = vcmp.lt.s32.totalorder %v7159_v10, 77 }
 0x7e2   :  { %v5593_v23 = vpop.permute.xlu0 %5592  ;;  %v5612_v26 = vmul.f32 %v5605_v0, %v12741_v39  ;;  %vm12764_vm2 = vmmov %vm12762_vm0 }
 0x7e3   :  { %v5602_v51 = vsel %vm12739_vm1, %v5589_v44, %v5593_v23  ;;  %vm12763_vm1 = vmmov %vm12762_vm0 }
 0x7e4   :  { %v5595_v5 = vpop.permute.xlu1 %5594  ;;  %v5609_v43 = vmul.f32 %v5602_v51, %v12743_v21  ;;  %v5616_v60 = vpack.c.bf16 %v5612_v26, %v5608_v28 }
 0x7e5   :  { %v5603_v40 = vsel %vm12742_vm3, %v5591_v16, %v5595_v5  ;;  %vm12766_vm3 = vmmov %vm12762_vm0 }
 0x7e6   :  { %v5613_v31 = vmul.f32 %v5603_v40, %v12743_v21  ;;  %v5597_v1 = vpop.permute.xlu0 %5596  ;;  %v12765_v40 = vld [vmem:[#allocation170_spill] sm:$0xff] }
 0x7e7   :  { %v5600_v61 = vsel %vm12744_vm4, %v5593_v23, %v5597_v1  ;;  %v5606_v32 = vsel %vm12745_vm5, %v5597_v1, %v5585_v14  ;;  %v12761_v23 = vmov 0   ;;  %vm12768_vm4 = vmmov %vm12762_vm0 }
 0x7e8   :  { %v5599_v17 = vpop.permute.xlu1 %5598  ;;  %v5617_v47 = vpack.c.bf16 %v5613_v31, %v5609_v43  ;;  %v5610_v36 = vmul.f32 %v5600_v61, %v12748_v29  ;;  %v5611_v2 = vmul.f32 %v5606_v32, %v12749_v37  ;;  %v12767_v31 = vld [vmem:[#allocation171_spill] sm:$0xff]  ;;  %vm12769_vm5 = vmmov %vm12762_vm0 }
 0x7e9   :  { %v5601_v53 = vsel %vm12746_vm6, %v5595_v5, %v5599_v17  ;;  %v5607_v56 = vsel %vm12747_vm7, %v5599_v17, %v5587_v33  ;;  %vm12770_vm6 = vmmov %vm12762_vm0 }
 0x7ea   :  { %v5614_v27 = vmul.f32 %v5601_v53, %v12748_v29  ;;  %v5615_v38 = vmul.f32 %v5607_v56, %v12749_v37  ;;  %v5625_v15 = vpop.permute.xlu0 %5624  ;;  %6041 = vmatprep.subr.bf16.mxu0 %v5617_v47  ;;  %vm12771_vm7 = vmmov %vm12762_vm0  ;;  %v12772_v37 = vld [vmem:[#allocation172_spill] sm:$0xff] }
 0x7eb   :  { %6042 = vmatpush1.bf16.msra.mxu0 %v5616_v60 }
 0x7ec   :  { %v5618_v7 = vpack.c.bf16 %v5614_v27, %v5610_v36  ;;  %v5627_v63 = vpop.permute.xlu1 %5626  ;;  %v5619_v6 = vpack.c.bf16 %v5615_v38, %v5611_v2  ;;  %v12773_v27 = vld [vmem:[#allocation173_spill] sm:$0xff] }
 0x7ee   :  { %v5629_v46 = vpop.permute.xlu0 %5628  ;;  %6205 = vmatprep.subr.bf16.mxu1 %v5619_v6 }
 0x7ef   :  { %6206 = vmatpush1.bf16.msra.mxu1 %v5618_v7  ;;  %v5644_v4 = vsel %vm12752_vm10, %v5625_v15, %v5629_v46 }
 0x7f0   :  { %v5631_v24 = vpop.permute.xlu1 %5630  ;;  %v5648_v9 = vmul.f32 %v5644_v4, %v12753_v30 }
 0x7f1   :  { %v5645_v25 = vsel %vm12750_vm8, %v5627_v63, %v5631_v24  ;;  %vm12774_vm8 = vcmask 130048  }
 0x7f2   :  { %v5633_v20 = vpop.permute.xlu0 %5632  ;;  %v5652_v41 = vmul.f32 %v5645_v25, %v12753_v30 }
 0x7f3   :  { %v5642_v8 = vsel %vm12751_vm9, %v5629_v46, %v5633_v20  ;;  %vm12775_vm9 = vmmov %vm12774_vm8 }
 0x7f4   :  { %v5635_v59 = vpop.permute.xlu1 %5634  ;;  %v5649_v3 = vmul.f32 %v5642_v8, %v9592_v54  ;;  %v5656_v22 = vpack.c.bf16 %v5652_v41, %v5648_v9 }
 0x7f5   :  { %v5643_v35 = vsel %vm12754_vm11, %v5631_v24, %v5635_v59 }
 0x7f6   :  { %v5653_v12 = vmul.f32 %v5643_v35, %v9592_v54  ;;  %v5637_v42 = vpop.permute.xlu0 %5636  ;;  %v6519_v54 = vcombine.low %v11377_v19, %v11377_v19 }
 0x7f7   :  { %v5640_v50 = vsel %vm12755_vm15, %v5633_v20, %v5637_v42  ;;  %v5646_v18 = vsel %vm12756_vm13, %v5637_v42, %v5625_v15 }
 0x7f8   :  { %v5639_v45 = vpop.permute.xlu1 %5638  ;;  %v5657_v58 = vpack.c.bf16 %v5653_v12, %v5649_v3  ;;  %v5650_v52 = vmul.f32 %v5640_v50, %v12759_v49  ;;  %v5651_v55 = vmul.f32 %v5646_v18, %v12760_v13 }
 0x7f9   :  { %v5641_v48 = vsel %vm12757_vm14, %v5635_v59, %v5639_v45  ;;  %v5647_v34 = vsel %vm12758_vm12, %v5639_v45, %v5627_v63  ;;  %v6661_v63 = vld [vmem:[#allocation8 + $0x18] ss:$0 sps:$4 sm:$0xff]  }
 0x7fa   :  { %v5654_v14 = vmul.f32 %v5641_v48, %v12759_v49  ;;  %v5655_v57 = vmul.f32 %v5647_v34, %v12760_v13  ;;  %v5665_v33 = vpop.permute.xlu0 %5664  ;;  %6043 = vmatprep.subr.bf16.mxu0 %v5657_v58 }
 0x7fb   :  { %6044 = vmatpush1.bf16.msra.mxu0 %v5656_v22 }
 0x7fc   :  { %v5658_v11 = vpack.c.bf16 %v5654_v14, %v5650_v52  ;;  %v5667_v44 = vpop.permute.xlu1 %5666  ;;  %v5659_v16 = vpack.c.bf16 %v5655_v57, %v5651_v55 }
 0x7fe   :  { %v5669_v0 = vpop.permute.xlu0 %5668  ;;  %6207 = vmatprep.subr.bf16.mxu1 %v5659_v16  ;;  %6046 = vmatmul.mubr.bf16.vlgmr.msra.gmra.mrb[4].mxu0 %v6519_v54 }
 0x7ff   :  { %6208 = vmatpush1.bf16.msra.mxu1 %v5658_v11  ;;  %6086 = vmatprep.mubr.bf16.mxu0 %v12761_v23  ;;  %v5684_v39 = vsel %vm12764_vm2, %v5665_v33, %v5669_v0 }
 0x800   :  { %v5671_v19 = vpop.permute.xlu1 %5670  ;;  %v5688_v32 = vmul.f32 %v5684_v39, %v12765_v40 }
 0x801   :  { %v5685_v51 = vsel %vm12762_vm0, %v5667_v44, %v5671_v19 }
 0x802   :  { %v5673_v62 = vpop.permute.xlu0 %5672  ;;  %6210 = vmatmul.mubr.bf16.vlgmr.msra.gmra.mrb[4].mxu1 %v6519_v54  ;;  %v5692_v21 = vmul.f32 %v5685_v51, %v12765_v40 }
 0x803   :  { %v5682_v5 = vsel %vm12763_vm1, %v5669_v0, %v5673_v62  ;;  %6250 = vmatprep.mubr.bf16.mxu1 %v12761_v23 }
 0x804   :  { %v5675_v26 = vpop.permute.xlu1 %5674  ;;  %v5689_v1 = vmul.f32 %v5682_v5, %v12767_v31  ;;  %v5696_v56 = vpack.c.bf16 %v5692_v21, %v5688_v32 }
 0x805   :  { %v5683_v43 = vsel %vm12766_vm3, %v5671_v19, %v5675_v26 }
 0x806   :  { %v5693_v28 = vmul.f32 %v5683_v43, %v12767_v31  ;;  %v5677_v61 = vpop.permute.xlu0 %5676 }
 0x807   :  { %v5680_v17 = vsel %vm12768_vm4, %v5673_v62, %v5677_v61  ;;  %v5686_v47 = vsel %vm12769_vm5, %v5677_v61, %v5665_v33 }
 0x808   :  { %v5679_v60 = vpop.permute.xlu1 %5678  ;;  %v5697_v53 = vpack.c.bf16 %v5693_v28, %v5689_v1  ;;  %v5690_v2 = vmul.f32 %v5680_v17, %v12772_v37  ;;  %v5691_v38 = vmul.f32 %v5686_v47, %v12773_v27 }
 0x809   :  { %v5681_v29 = vsel %vm12770_vm6, %v5675_v26, %v5679_v60  ;;  %v5687_v36 = vsel %vm12771_vm7, %v5679_v60, %v5667_v44 }
 0x80a   :  { %v5694_v15 = vmul.f32 %v5681_v29, %v12772_v37  ;;  %v5695_v7 = vmul.f32 %v5687_v36, %v12773_v27  ;;  %6054 = vmatprep.subr.bf16.mxu0 %v5697_v53 }
 0x80b   :  { %6055 = vmatpush1.bf16.msra.mxu0 %v5696_v56 }
 0x80c   :  { %v5698_v6 = vpack.c.bf16 %v5694_v15, %v5690_v2  ;;  %v5699_v46 = vpack.c.bf16 %v5695_v7, %v5691_v38 }
 0x80e   :  { %6522 = vmatmul.mubr.msk.bf16.vlgmr.msra.gmra.mrb[4].mxu0 %vm12774_vm8, %v6661_v63  ;;  %6218 = vmatprep.subr.bf16.mxu1 %v5699_v46 }
 0x80f   :  { %6219 = vmatpush1.bf16.msra.mxu1 %v5698_v6 }
 0x812   :  { %6523 = vmatmul.mubr.msk.bf16.vlgmr.msra.gmra.mrb[4].mxu1 %vm12775_vm9, %v6661_v63 }
 0x8e1   :  { %v6088_v10 = vpop.f32.mrb[4].mxu0 }
 0x8e2   :  { %v11627_v24 = vmul.f32 0.5, %v6088_v10  ;;  %v6090_v25 = vpop.f32.mrb[5].mxu0 }
 0x8e3   :  { %v11629_v20 = vmul.f32 0.5, %v6090_v25  ;;  %v6438_v8 = vcombine.high %v6088_v10, %v6090_v25  ;;  %v6092_v4 = vpop.f32.mrb[6].mxu0 }
 0x8e4   :  { %v11632_v59 = vand.u32 2147483647, %v11627_v24  ;;  %v6093_v30 = vpop.f32.mrb[7].mxu0 }
 0x8e5   :  { %v11635_v41 = vand.u32 2147483647, %v11629_v20  ;;  %6442 = vst [vmem:[#allocation12] sm:$0xff] %v6438_v8  ;;  %v6252_v35 = vpop.f32.mrb[4].mxu1 }
 0x8e6   :  { %v6283_v3 = vmax.f32 %v11632_v59, 1e-30  ;;  %v6299_v12 = vadd.f32 1.0, %v11632_v59  ;;  %v6254_v42 = vpop.f32.mrb[5].mxu1  ;;  %v11641_v45 = vmul.f32 0.5, %v6252_v35 }
 0x8e7   :  { %v6284_v9 = vmax.f32 %v11635_v41, 1e-30  ;;  %v6300_v50 = vadd.f32 1.0, %v11635_v41  ;;  %v6256_v18 = vpop.f32.mrb[6].mxu1  ;;  %v11643_v58 = vmul.f32 0.5, %v6254_v42  ;;  %v6439_v22 = vcombine.high %v6252_v35, %v6254_v42 }
 0x8e8   :  { %6662 = vrcp.f32 %v6283_v3  ;;  %v6257_v48 = vpop.f32.mrb[7].mxu1  ;;  %v11646_v34 = vand.u32 2147483647, %v11641_v45 }
 0x8e9   :  { %6664 = vrcp.f32 %v6299_v12  ;;  %6443 = vst [vmem:[#allocation12 + $0x8] sm:$0xff] %v6439_v22  ;;  %v11649_v54 = vand.u32 2147483647, %v11643_v58 }
 0x8ea   :  { %6666 = vrcp.f32 %v6284_v9 }
 0x8eb   :  { %6668 = vrcp.f32 %v6300_v50 }
 0x8ec   :  { %6809 = shalt.err (!%p6806_p8)
}
 0x8ed   :  { %s6810_s20 = scalar_lea.hbm %s11760_s5, 256 }
 0x8ee   :  { %p6811_p9 = scmp.ne.s32.totalorder %s11760_s5, %s6810_s20  ;;  %p6814_p10 = scmp.lt.u32.totalorder %s6810_s20, %s11760_s5 }
 0x8f0   :  { %p6816_p11 = pnand %p6814_p10, %p6811_p9 }
 0x8f2   :  { %6819 = shalt.err (!%p6816_p11)
}
 0x8f3   :  { %6481 = dma.vmem_to_hbm [thread:$0]  %s6479_s16, 256, %s11760_s5, [#allocation13]   ;;  %v6285_v49 = vmax.f32 %v11646_v34, 1e-30  ;;  %v6301_v52 = vadd.f32 1.0, %v11646_v34  ;;  %v6302_v55 = vadd.f32 1.0, %v11649_v54  ;;  %v6663_v14 = vpop.eup %6662 }
 0x8f4   :  { %v6286_v13 = vmax.f32 %v11649_v54, 1e-30  ;;  %v6524_v57 = vadd.f32 -1.0, %v11632_v59  ;;  %v6665_v33 = vpop.eup %6664  ;;  %v6288_v11 = vmul.f32 -1.0, %v6663_v14  ;;  %vm6279_vm10 = vcmp.gt.f32.partialorder %v11632_v59, 0.41421357 }
 0x8f5   :  { %6670 = vrcp.f32 %v6285_v49  ;;  %v6667_v16 = vpop.eup %6666  ;;  %v6525_v0 = vadd.f32 -1.0, %v11635_v41  ;;  %vm6275_vm11 = vcmp.gt.f32.partialorder %v11632_v59, 2.4142137  ;;  %vm6280_vm15 = vcmp.gt.f32.partialorder %v11635_v41, 0.41421357  ;;  %s6933_s5 = smov [#allocation14]  }
 0x8f6   :  { %6672 = vrcp.f32 %v6301_v52  ;;  %v6304_v44 = vmul.f32 %v6665_v33, %v6524_v57  ;;  %v6669_v23 = vpop.eup %6668  ;;  %v6290_v51 = vmul.f32 -1.0, %v6667_v16  ;;  %vm6276_vm13 = vcmp.gt.f32.partialorder %v11635_v41, 2.4142137  ;;  %s6488_s24 = sshll.u32 %s6933_s5, 4  ;;  %s6489_s24 = int_to_ptr.vmem [resolvable:$true] %s6488_s24 }
 0x8f7   :  { %6674 = vrcp.f32 %v6286_v13  ;;  %v6306_v5 = vmul.f32 %v6669_v23, %v6525_v0  ;;  %v6526_v31 = vadd.f32 -1.0, %v11646_v34  ;;  %v6527_v60 = vadd.f32 -1.0, %v11649_v54  ;;  %s6820_s25 = scalar_lea.vmem %s6489_s24, 256  ;;  %p6825_p13 = scmp.lt.s32.totalorder %s6489_s24, %s6489_s24 }
 0x8f8   :  { %6676 = vrcp.f32 %v6302_v55  ;;  %v6311_v19 = vsel %vm6279_vm10, %v6304_v44, %v11632_v59  ;;  %vm6281_vm14 = vcmp.gt.f32.partialorder %v11646_v34, 0.41421357  ;;  %vm6277_vm12 = vcmp.gt.f32.partialorder %v11646_v34, 2.4142137  ;;  %p6821_p12 = scmp.ne.s32.totalorder %s6489_s24, %s6820_s25  ;;  %p6826_p0 = scmp.lt.s32.totalorder %s6820_s25, %s6820_s25 }
 0x8f9   :  { %v6315_v62 = vsel %vm6275_vm11, %v6288_v11, %v6311_v19  ;;  %v6312_v26 = vsel %vm6280_vm15, %v6306_v5, %v11635_v41  ;;  %vm6282_vm0 = vcmp.gt.f32.partialorder %v11649_v54, 0.41421357  ;;  %vm6278_vm1 = vcmp.gt.f32.partialorder %v11649_v54, 2.4142137 }
 0x8fa   :  { %v6327_v39 = vmul.f32 %v6315_v62, %v6315_v62  ;;  %v11683_v43 = vsel %vm6276_vm13, %v6290_v51, %v6312_v26  ;;  %v6931_v42 = vmov 0.0   ;;  %vm6263_vm2 = vcmp.lt.f32.partialorder %v11627_v24, 0.0  ;;  %p6827_p1 = por %p6826_p0, %p6825_p13 }
 0x8fb   :  { %v6328_v28 = vmul.f32 %v11683_v43, %v11683_v43  ;;  %v6319_v9 = vsel %vm6279_vm10, 0.7853982, %v6931_v42  ;;  %v6320_v14 = vsel %vm6280_vm15, 0.7853982, %v6931_v42  ;;  %vm6264_vm3 = vcmp.lt.f32.partialorder %v11629_v20, 0.0 }
 0x8fc   :  { %v6331_v21 = vmul.f32 0.080537446, %v6327_v39  ;;  %v6323_v55 = vsel %vm6275_vm11, 1.5707964, %v6319_v9  ;;  %v6324_v23 = vsel %vm6276_vm13, 1.5707964, %v6320_v14  ;;  %p6828_p2 = pnand %p6827_p1, %p6821_p12 }
 0x8fd   :  { %v6332_v56 = vmul.f32 0.080537446, %v6328_v28  ;;  %v6932_v51 = vmov 1.0   ;;  %v6321_v24 = vsel %vm6281_vm14, 0.7853982, %v6931_v42  ;;  %vm6379_vm4 = vcmask 1043456  }
 0x8fe   :  { %v6528_v17 = vadd.f32 -0.13877685, %v6331_v21  ;;  %v6267_v5 = vsel %vm6263_vm2, -1.0, %v6932_v51  ;;  %v6322_v41 = vsel %vm6282_vm0, 0.7853982, %v6931_v42  ;;  %vm6265_vm5 = vcmp.lt.f32.partialorder %v11641_v45, 0.0 }
 0x8ff   :  { %v6671_v40 = vpop.eup %6670  ;;  %v6529_v27 = vadd.f32 -0.13877685, %v6332_v56  ;;  %vm6266_vm6 = vcmp.lt.f32.partialorder %v11643_v58, 0.0 }
 0x900   :  { %v6673_v1 = vpop.eup %6672  ;;  %v6292_v61 = vmul.f32 -1.0, %v6671_v40  ;;  %v6339_v36 = vmul.f32 %v6528_v17, %v6327_v39 }
 0x901   :  { %v6675_v32 = vpop.eup %6674  ;;  %v6308_v47 = vmul.f32 %v6673_v1, %v6526_v31  ;;  %v6340_v6 = vmul.f32 %v6529_v27, %v6328_v28  ;;  %v6268_v31 = vsel %vm6264_vm3, -1.0, %v6932_v51 }
 0x902   :  { %v6677_v53 = vpop.eup %6676  ;;  %v6294_v29 = vmul.f32 -1.0, %v6675_v32  ;;  %v6343_v15 = vadd.f32 0.19977711, %v6339_v36  ;;  %v6325_v32 = vsel %vm6277_vm12, 1.5707964, %v6321_v24 }
 0x903   :  { %v6313_v37 = vsel %vm6281_vm14, %v6308_v47, %v11646_v34  ;;  %v6310_v2 = vmul.f32 %v6677_v53, %v6527_v60  ;;  %v6344_v4 = vadd.f32 0.19977711, %v6340_v6  ;;  %v6269_v34 = vsel %vm6265_vm5, -1.0, %v6932_v51 }
 0x904   :  { %v6317_v38 = vsel %vm6277_vm12, %v6292_v61, %v6313_v37  ;;  %v6347_v10 = vmul.f32 %v6343_v15, %v6327_v39 }
 0x905   :  { %v6329_v7 = vmul.f32 %v6317_v38, %v6317_v38  ;;  %v6314_v63 = vsel %vm6282_vm0, %v6310_v2, %v11649_v54  ;;  %v6348_v12 = vmul.f32 %v6344_v4, %v6328_v28 }
 0x906   :  { %v6318_v46 = vsel %vm6278_vm1, %v6294_v29, %v6314_v63  ;;  %v6532_v30 = vadd.f32 -0.3333295, %v6347_v10  ;;  %v6270_v63 = vsel %vm6266_vm6, -1.0, %v6932_v51 }
 0x907   :  { %v6333_v25 = vmul.f32 0.080537446, %v6329_v7  ;;  %v6330_v8 = vmul.f32 %v6318_v46, %v6318_v46  ;;  %v6533_v48 = vadd.f32 -0.3333295, %v6348_v12 }
 0x908   :  { %v6355_v50 = vmul.f32 %v6532_v30, %v6327_v39 }
 0x909   :  { %v6530_v35 = vadd.f32 -0.13877685, %v6333_v25  ;;  %v6334_v3 = vmul.f32 0.080537446, %v6330_v8  ;;  %v6356_v57 = vmul.f32 %v6533_v48, %v6328_v28 }
 0x90a   :  { %v6359_v49 = vmul.f32 %v6355_v50, %v6315_v62 }
 0x90b   :  { %v6341_v18 = vmul.f32 %v6530_v35, %v6329_v7  ;;  %v6531_v22 = vadd.f32 -0.13877685, %v6334_v3  ;;  %v6360_v16 = vmul.f32 %v6356_v57, %v11683_v43 }
 0x90c   :  { %v6363_v33 = vadd.f32 %v6359_v49, %v6323_v55 }
 0x90d   :  { %v6345_v52 = vadd.f32 0.19977711, %v6341_v18  ;;  %v6342_v13 = vmul.f32 %v6531_v22, %v6330_v8  ;;  %v6364_v39 = vadd.f32 %v6360_v16, %v6324_v23  ;;  %v12776_v16 = vld [vmem:[#allocation20_spill] sm:$0xff] }
 0x90e   :  { %v6367_v0 = vadd.f32 %v6363_v33, %v6315_v62 }
 0x90f   :  { %v6349_v11 = vmul.f32 %v6345_v52, %v6329_v7  ;;  %v6346_v44 = vadd.f32 0.19977711, %v6342_v13  ;;  %v6368_v20 = vadd.f32 %v6364_v39, %v11683_v43  ;;  %v6326_v43 = vsel %vm6278_vm1, 1.5707964, %v6322_v41 }
 0x910   :  { %v6371_v26 = vmul.f32 %v6367_v0, %v6267_v5 }
 0x911   :  { %v6534_v19 = vadd.f32 -0.3333295, %v6349_v11  ;;  %v6350_v59 = vmul.f32 %v6346_v44, %v6330_v8  ;;  %v6372_v61 = vmul.f32 %v6368_v20, %v6268_v31 }
 0x912   :  { %v6375_v1 = vmul.f32 1.272, %v6371_v26 }
 0x913   :  { %v6357_v40 = vmul.f32 %v6534_v19, %v6329_v7  ;;  %v6535_v21 = vadd.f32 -0.3333295, %v6350_v59  ;;  %v6376_v56 = vmul.f32 1.272, %v6372_v61 }
 0x914   :  { %v6380_v17 = vsel %vm6379_vm4, %v6375_v1, 0.0 }
 0x915   :  { %v6361_v62 = vmul.f32 %v6357_v40, %v6317_v38  ;;  %v6358_v28 = vmul.f32 %v6535_v21, %v6330_v8  ;;  %v6381_v53 = vrot.slane %v6380_v17, 4  ;;  %v6387_v2 = vsel %vm6379_vm4, %v6376_v56, 0.0 }
 0x916   :  { %v6388_v27 = vrot.slane %v6387_v2, 4 }
 0x917   :  { %v6365_v47 = vadd.f32 %v6361_v62, %v6325_v32  ;;  %v6362_v60 = vmul.f32 %v6358_v28, %v6318_v46  ;;  %v6382_v37 = vadd.f32 %v6381_v53, %v6380_v17 }
 0x918   :  { %v6389_v45 = vadd.f32 %v6388_v27, %v6387_v2 }
 0x919   :  { %v6369_v29 = vadd.f32 %v6365_v47, %v6317_v38  ;;  %v6366_v36 = vadd.f32 %v6362_v60, %v6326_v43  ;;  %v6383_v25 = vrot.slane %v6382_v37, 2 }
 0x91a   :  { %v6390_v4 = vrot.slane %v6389_v45, 2 }
 0x91b   :  { %v6373_v15 = vmul.f32 %v6369_v29, %v6269_v34  ;;  %v6370_v7 = vadd.f32 %v6366_v36, %v6318_v46  ;;  %v6384_v30 = vadd.f32 %v6383_v25, %v6382_v37 }
 0x91c   :  { %v6391_v12 = vadd.f32 %v6390_v4, %v6389_v45 }
 0x91d   :  { %v6377_v6 = vmul.f32 1.272, %v6373_v15  ;;  %v6374_v10 = vmul.f32 %v6370_v7, %v6270_v63  ;;  %v6385_v50 = vrot.slane %v6384_v30, 1 }
 0x91e   :  { %v6392_v22 = vrot.slane %v6391_v12, 1 }
 0x91f   :  { %v6394_v8 = vsel %vm6379_vm4, %v6377_v6, 0.0  ;;  %v6378_v54 = vmul.f32 1.272, %v6374_v10  ;;  %v6386_v52 = vadd.f32 %v6385_v50, %v6384_v30 }
 0x920   :  { %v6395_v38 = vrot.slane %v6394_v8, 4  ;;  %v6393_v14 = vadd.f32 %v6392_v22, %v6391_v12 }
 0x921   :  { %v6401_v58 = vsel %vm6379_vm4, %v6378_v54, 0.0 }
 0x922   :  { %v6396_v35 = vadd.f32 %v6395_v38, %v6394_v8  ;;  %v6402_v3 = vrot.slane %v6401_v58, 4 }
 0x924   :  { %v6397_v42 = vrot.slane %v6396_v35, 2  ;;  %v6403_v9 = vadd.f32 %v6402_v3, %v6401_v58 }
 0x926   :  { %v6398_v46 = vadd.f32 %v6397_v42, %v6396_v35  ;;  %v6404_v18 = vrot.slane %v6403_v9, 2 }
 0x928   :  { %v6399_v48 = vrot.slane %v6398_v46, 1  ;;  %v6405_v49 = vadd.f32 %v6404_v18, %v6403_v9 }
 0x92a   :  { %v6400_v13 = vadd.f32 %v6399_v48, %v6398_v46  ;;  %v6406_v55 = vrot.slane %v6405_v49, 1 }
 0x92c   :  { %v6408_v57 = vadd.f32 %v6400_v13, %v6386_v52  ;;  %v6407_v33 = vadd.f32 %v6406_v55, %v6405_v49 }
 0x92e   :  { %v6410_v11 = vmul.f32 0.125, %v6408_v57  ;;  %v6409_v44 = vadd.f32 %v6407_v33, %v6393_v14 }
 0x930   :  { %v6415_v0 = vrot.slane %v6410_v11, %v12776_v16  ;;  %v6411_v23 = vmul.f32 0.125, %v6409_v44 }
 0x932   :  { %v6420_v19 = vsub.f32 %v6375_v1, %v6415_v0  ;;  %v6422_v59 = vsub.f32 %v6377_v6, %v6415_v0  ;;  %v6419_v51 = vrot.slane %v6411_v23, %v12776_v16 }
 0x934   :  { %v6444_v5 = vmul.f32 1.442695, %v6420_v19  ;;  %v6448_v39 = vmul.f32 1.442695, %v6422_v59  ;;  %v6421_v26 = vsub.f32 %v6376_v56, %v6419_v51  ;;  %v6423_v24 = vsub.f32 %v6378_v54, %v6419_v51 }
 0x936   :  { %6678 = vpow2.f32 %v6444_v5  ;;  %v6446_v40 = vmul.f32 1.442695, %v6421_v26  ;;  %v6450_v21 = vmul.f32 1.442695, %v6423_v24  ;;  %v6428_v31 = vcombine.low %v6420_v19, %v6421_v26 }
 0x937   :  { %6680 = vpow2.f32 %v6448_v39  ;;  %v6429_v20 = vcombine.low %v6422_v59, %v6423_v24 }
 0x938   :  { %6682 = vpow2.f32 %v6446_v40  ;;  %6432 = vst [vmem:[#allocation14] sm:$0xff] %v6428_v31 }
 0x939   :  { %6684 = vpow2.f32 %v6450_v21  ;;  %6433 = vst [vmem:[#allocation14 + $0x8] sm:$0xff] %v6429_v20 }
 0x93a   :  { %6831 = shalt.err (!%p6828_p2)
}
 0x93b   :  { %s6832_s28 = scalar_lea.hbm %s11761_s6, 256 }
 0x93c   :  { %p6833_p3 = scmp.ne.s32.totalorder %s11761_s6, %s6832_s28  ;;  %p6836_p4 = scmp.lt.u32.totalorder %s6832_s28, %s11761_s6 }
 0x93e   :  { %p6838_p5 = pnand %p6836_p4, %p6833_p3 }
 0x940   :  { %6841 = shalt.err (!%p6838_p5)
}
 0x941   :  { %6491 = dma.vmem_to_hbm [thread:$0]  %s6489_s24, 256, %s11761_s6, [#allocation13]   ;;  %v6679_v1 = vpop.eup %6678 }
 0x942   :  { %v6681_v62 = vpop.eup %6680  ;;  %s6934_s0 = smov [#allocation11]  }
 0x943   :  { %s6468_s11 = sshll.u32 %s6934_s0, 4  ;;  %v6683_v41 = vpop.eup %6682  ;;  %s6469_s11 = int_to_ptr.vmem [resolvable:$true] %s6468_s11 }
 0x944   :  { %v6685_v28 = vpop.eup %6684  ;;  %v6456_v61 = vcombine.low %v6679_v1, %v6683_v41  ;;  %s6842_s12 = scalar_lea.vmem %s6469_s11, 256  ;;  %p6847_p7 = scmp.lt.s32.totalorder %s6469_s11, %s6469_s11 }
 0x945   :  { %v6457_v32 = vcombine.low %v6681_v62, %v6685_v28  ;;  %p6843_p6 = scmp.ne.s32.totalorder %s6469_s11, %s6842_s12  ;;  %p6848_p8 = scmp.lt.s32.totalorder %s6842_s12, %s6842_s12 }
 0x946   :  { %6460 = vst [vmem:[#allocation11] sm:$0xff] %v6456_v61 }
 0x947   :  { %6461 = vst [vmem:[#allocation11 + $0x8] sm:$0xff] %v6457_v32  ;;  %p6849_p9 = por %p6848_p8, %p6847_p7 }
 0x949   :  { %p6850_p10 = pnand %p6849_p9, %p6843_p6 }
 0x94b   :  { %6853 = shalt.err (!%p6850_p10)
}
 0x94c   :  { %s6854_s14 = scalar_lea.hbm %s11759_s4, 256 }
 0x94d   :  { %p6855_p11 = scmp.ne.s32.totalorder %s11759_s4, %s6854_s14  ;;  %p6858_p12 = scmp.lt.u32.totalorder %s6854_s14, %s11759_s4 }
 0x94f   :  { %p6860_p13 = pnand %p6858_p12, %p6855_p11 }
 0x951   :  { %6863 = shalt.err (!%p6860_p13)
}
 0x952   :  { %6471 = dma.vmem_to_hbm [thread:$0]  %s6469_s11, 256, %s11759_s4, [#allocation5]  }
 0x953   :  { %6870 = dma.done.wait [#allocation5], 256  }
 0x954   :  { %6871 = vsyncadd [#allocation5], 4294967040 }
 0x955   :  { %6872 = dma.done.wait [#allocation13], 512  }
 0x956   :  { %6873 = vsyncadd [#allocation13], 4294966784 }
 0x957   :  { %6501 = vsyncpa [#allocation4], 1 }
 0x958   :  { %6502 = vsyncpa [#allocation7], 1 }
 0x959   :  { %6503 = vsyncpa [#allocation10], 1 }
 0x95a   :  { %6504 = vsyncpa [#allocation5], 1 }
 0x95b   :  { %6505 = vsyncpa [#allocation13], 1 }

</bundles_post_ra>
